<compile_context>
chip_gen: v7x
topology: tpu7x:2x2x1
jax: 0.10.0
libtpu: 0.0.40
codegen_flags: <defaults>
</compile_context>

<pallas_src>
import functools

import jax
import jax.numpy as jnp
import numpy as np
from jax.experimental import pallas as pl
from jax.experimental.pallas import tpu as pltpu

_BN_EPS = 1e-5


def _pick_block(dim, target, align):
    """Largest tile <= target that divides dim and is a multiple of align,
    falling back to the full dim (always legal)."""
    if dim <= target or dim % align:
        return dim
    t = (target // align) * align
    while t >= align:
        if dim % t == 0:
            return t
        t -= align
    return dim


# ----------------------------------------------------------------------------
# Tiled matmul (+bias, optional pre-ReLU on A, post-activation, residual add)
# ----------------------------------------------------------------------------
def _mm_kernel(a_ref, w_ref, b_ref, *rest, act, pre_relu, has_res):
    if has_res:
        r_ref, o_ref, acc_ref = rest
    else:
        o_ref, acc_ref = rest

    @pl.when(pl.program_id(2) == 0)
    def _():
        acc_ref[...] = jnp.zeros_like(acc_ref)

    a = a_ref[...]
    if pre_relu:                      # fused ReLU on the matmul input (BN-folded)
        a = jnp.maximum(a, 0.0)
    acc_ref[...] += jnp.dot(a.astype(jnp.bfloat16),
                            w_ref[...].astype(jnp.bfloat16),
                            preferred_element_type=jnp.float32)

    @pl.when(pl.program_id(2) == pl.num_programs(2) - 1)
    def _():
        y = acc_ref[...] + b_ref[...]
        if act == "relu":
            y = jnp.maximum(y, 0.0)
        elif act == "sigmoid":
            y = jax.nn.sigmoid(y)
        if has_res:
            y = y + r_ref[...]
        o_ref[...] = y.astype(o_ref.dtype)


def pallas_matmul(a, w, b, act="none", pre_relu=False, residual=None):
    """(M,K)@(K,N)+b with fused pre-ReLU / activation / residual add."""
    M, K = a.shape
    K2, N = w.shape
    assert K == K2
    tm = _pick_block(M, 512, 8)
    tn = _pick_block(N, 512, 128)
    tk = _pick_block(K, 512, 128)
    grid = (M // tm, N // tn, K // tk)
    has_res = residual is not None
    kernel = functools.partial(_mm_kernel, act=act, pre_relu=pre_relu,
                               has_res=has_res)
    in_specs = [
        pl.BlockSpec((tm, tk), lambda i, j, k: (i, k)),
        pl.BlockSpec((tk, tn), lambda i, j, k: (k, j)),
        pl.BlockSpec((1, tn), lambda i, j, k: (0, j)),
    ]
    args = [a, w, b.reshape(1, N)]
    if has_res:
        in_specs.append(pl.BlockSpec((tm, tn), lambda i, j, k: (i, j)))
        args.append(residual)
    return pl.pallas_call(
        kernel,
        out_shape=jax.ShapeDtypeStruct((M, N), jnp.float32),
        grid=grid,
        in_specs=in_specs,
        out_specs=pl.BlockSpec((tm, tn), lambda i, j, k: (i, j)),
        scratch_shapes=[pltpu.VMEM((tm, tn), jnp.float32)],
        compiler_params=pltpu.CompilerParams(
            dimension_semantics=("parallel", "parallel", "arbitrary")),
    )(*args)


# ----------------------------------------------------------------------------
# kxk conv: per-batch tap-loop over a haloed VMEM tile (no im2col in HBM)
# ----------------------------------------------------------------------------
def _conv_kxk_kernel(xp_ref, w_ref, b_ref, o_ref, *, ksize, H, W, act, pre_relu):
    Cin = xp_ref.shape[3]
    Cout = o_ref.shape[2]
    xp = xp_ref[0]                                   # (H+2p, W+2p, Cin) f32
    if pre_relu:                                     # relu(pad(x)) == pad(relu(x))
        xp = jnp.maximum(xp, 0.0)
    acc = jnp.zeros((H * W, Cout), jnp.float32)
    for di in range(ksize):
        for dj in range(ksize):
            patch = xp[di:di + H, dj:dj + W, :].reshape(H * W, Cin)
            acc = acc + jnp.dot(patch.astype(jnp.bfloat16),
                                w_ref[di * ksize + dj].astype(jnp.bfloat16),
                                preferred_element_type=jnp.float32)
    y = acc + b_ref[...]
    if act == "relu":
        y = jnp.maximum(y, 0.0)
    o_ref[0] = y.astype(o_ref.dtype)


def conv_kxk(x_nhwc, w_taps, b, ksize, act="none", pre_relu=False):
    """kxk 'same' conv.  x:(B,H,W,Cin)  w:(k*k,Cin,Cout) -> (B,H*W,Cout)."""
    B, H, W, Cin = x_nhwc.shape
    Cout = w_taps.shape[-1]
    p = (ksize - 1) // 2
    xp = jnp.pad(x_nhwc, ((0, 0), (p, p), (p, p), (0, 0)))
    kernel = functools.partial(_conv_kxk_kernel, ksize=ksize, H=H, W=W,
                               act=act, pre_relu=pre_relu)
    return pl.pallas_call(
        kernel,
        out_shape=jax.ShapeDtypeStruct((B, H * W, Cout), jnp.float32),
        grid=(B,),
        in_specs=[
            pl.BlockSpec((1, H + 2 * p, W + 2 * p, Cin), lambda b: (b, 0, 0, 0)),
            pl.BlockSpec((ksize * ksize, Cin, Cout), lambda b: (0, 0, 0)),
            pl.BlockSpec((1, Cout), lambda b: (0, 0)),
        ],
        out_specs=pl.BlockSpec((1, H * W, Cout), lambda b: (b, 0, 0)),
        compiler_params=pltpu.CompilerParams(dimension_semantics=("parallel",)),
    )(xp, w_taps, b.reshape(1, Cout))


# ----------------------------------------------------------------------------
# CAM (channel attention) per batch, channels-last, spatial gate fused
# ----------------------------------------------------------------------------
def _cam_kernel(gamma_ref, x_ref, sp_ref, o_ref):
    x = x_ref[0]                                     # (N, C) f32
    xtb = x.T.astype(jnp.bfloat16)                   # (C, N), in-VMEM transpose
    energy = jax.lax.dot_general(                    # (C, C) = x_cn @ x_cn^T
        xtb, xtb, (((1,), (1,)), ((), ())), preferred_element_type=jnp.float32)
    energy_new = jnp.max(energy, axis=-1, keepdims=True) - energy
    e = jnp.exp(energy_new - jnp.max(energy_new, axis=-1, keepdims=True))
    attn = e * pl.reciprocal(jnp.sum(e, axis=-1, keepdims=True), approx=True)
    out = jax.lax.dot_general(                       # (N, C): contract C dims
        x.astype(jnp.bfloat16), attn.astype(jnp.bfloat16),
        (((1,), (1,)), ((), ())), preferred_element_type=jnp.float32)
    # fused spatial sigmoid gate:  sigmoid(spatial) * (gamma*out + x)
    o_ref[0] = jax.nn.sigmoid(sp_ref[0]) * (gamma_ref[0] * out + x)


def pallas_cam(x_bnc, sp_bn1, gamma):
    B, N, C = x_bnc.shape
    return pl.pallas_call(
        _cam_kernel,
        out_shape=jax.ShapeDtypeStruct((B, N, C), jnp.float32),
        grid=(B,),
        in_specs=[
            pl.BlockSpec(memory_space=pltpu.MemorySpace.SMEM),   # gamma (1,)
            pl.BlockSpec((1, N, C), lambda b: (b, 0, 0)),
            pl.BlockSpec((1, N, 1), lambda b: (b, 0, 0)),
        ],
        out_specs=pl.BlockSpec((1, N, C), lambda b: (b, 0, 0)),
        compiler_params=pltpu.CompilerParams(dimension_semantics=("parallel",)),
    )(gamma, x_bnc, sp_bn1)


# ----------------------------------------------------------------------------
# PAM (position attention) per batch, KV-tiled online softmax, SE gate fused
# ----------------------------------------------------------------------------
def _pam_kernel(gamma_ref, q_ref, k_ref, v_ref, x_ref, gate_ref, o_ref,
                m_sc, l_sc, acc_sc):
    kv = pl.program_id(1)

    @pl.when(kv == 0)
    def _():
        m_sc[...] = jnp.full_like(m_sc, -jnp.inf)
        l_sc[...] = jnp.zeros_like(l_sc)
        acc_sc[...] = jnp.zeros_like(acc_sc)

    q = q_ref[0].astype(jnp.bfloat16)                # (N, Cq)
    k = k_ref[0].astype(jnp.bfloat16)                # (tkv, Cq)
    s = jax.lax.dot_general(                         # (N, tkv) = q @ k^T
        q, k, (((1,), (1,)), ((), ())), preferred_element_type=jnp.float32)
    m_prev = m_sc[...]
    m_new = jnp.maximum(m_prev, jnp.max(s, axis=-1, keepdims=True))
    alpha = jnp.exp(m_prev - m_new)
    p = jnp.exp(s - m_new)
    l_sc[...] = alpha * l_sc[...] + jnp.sum(p, axis=-1, keepdims=True)
    acc_sc[...] = alpha * acc_sc[...] + jnp.dot(
        p.astype(jnp.bfloat16), v_ref[0].astype(jnp.bfloat16),
        preferred_element_type=jnp.float32)
    m_sc[...] = m_new

    @pl.when(kv == pl.num_programs(1) - 1)
    def _():
        out = acc_sc[...] * pl.reciprocal(l_sc[...], approx=True)   # (N, C)
        # fused SE channel gate:  gate * (gamma*out + x)
        o_ref[0] = gate_ref[0] * (gamma_ref[0] * out + x_ref[0])


def pallas_pam(q_bnc, k_bnc, v_bnc, x_bnc, gate_b1c, gamma):
    B, N, Cq = q_bnc.shape
    _, _, C = v_bnc.shape
    tkv = _pick_block(N, 512, 8)
    grid = (B, N // tkv)
    return pl.pallas_call(
        _pam_kernel,
        out_shape=jax.ShapeDtypeStruct((B, N, C), jnp.float32),
        grid=grid,
        in_specs=[
            pl.BlockSpec(memory_space=pltpu.MemorySpace.SMEM),   # gamma (1,)
            pl.BlockSpec((1, N, Cq), lambda b, kv: (b, 0, 0)),
            pl.BlockSpec((1, tkv, Cq), lambda b, kv: (b, kv, 0)),
            pl.BlockSpec((1, tkv, C), lambda b, kv: (b, kv, 0)),
            pl.BlockSpec((1, N, C), lambda b, kv: (b, 0, 0)),
            pl.BlockSpec((1, 1, C), lambda b, kv: (b, 0, 0)),
        ],
        out_specs=pl.BlockSpec((1, N, C), lambda b, kv: (b, 0, 0)),
        scratch_shapes=[pltpu.VMEM((N, 1), jnp.float32),
                        pltpu.VMEM((N, 1), jnp.float32),
                        pltpu.VMEM((N, C), jnp.float32)],
        compiler_params=pltpu.CompilerParams(
            dimension_semantics=("parallel", "arbitrary")),
    )(gamma, q_bnc, k_bnc, v_bnc, x_bnc, gate_b1c)


# ----------------------------------------------------------------------------
# Fused SE gate: sigmoid(relu(mean @ W1 + b1) @ W2 + b2) in one kernel
# ----------------------------------------------------------------------------
def _se_gate_kernel(xm_ref, w1_ref, b1_ref, w2_ref, b2_ref, o_ref):
    h = jnp.dot(xm_ref[...].astype(jnp.bfloat16), w1_ref[...].astype(jnp.bfloat16),
                preferred_element_type=jnp.float32) + b1_ref[...]
    h = jnp.maximum(h, 0.0)
    g = jnp.dot(h.astype(jnp.bfloat16), w2_ref[...].astype(jnp.bfloat16),
                preferred_element_type=jnp.float32) + b2_ref[...]
    o_ref[...] = jax.nn.sigmoid(g)


def pallas_se_gate(xm, w1, b1, w2, b2):
    B, C = xm.shape
    Cr = w1.shape[1]
    return pl.pallas_call(
        _se_gate_kernel,
        out_shape=jax.ShapeDtypeStruct((B, C), jnp.float32),
        grid=(1,),
        in_specs=[
            pl.BlockSpec((B, C), lambda i: (0, 0)),
            pl.BlockSpec((C, Cr), lambda i: (0, 0)),
            pl.BlockSpec((1, Cr), lambda i: (0, 0)),
            pl.BlockSpec((Cr, C), lambda i: (0, 0)),
            pl.BlockSpec((1, C), lambda i: (0, 0)),
        ],
        out_specs=pl.BlockSpec((B, C), lambda i: (0, 0)),
    )(xm, w1, b1.reshape(1, Cr), w2, b2.reshape(1, C))


# ----------------------------------------------------------------------------
# Parameters (deterministic, synthetic).  Eval-mode BN scales are folded here.
# ----------------------------------------------------------------------------
def make_params(key, ch, r_2):
    keys = iter(jax.random.split(key, 32))

    def w(shape, scale=0.1):
        return (scale * jax.random.normal(next(keys), shape)).astype(jnp.float32)

    s = jnp.float32(1.0 / np.sqrt(1.0 + _BN_EPS))   # eval-mode BN, default stats
    cq = max(ch // 8, 1)
    chh = ch // 2
    p = {
        # W_g / W_x : Conv(ch, ch, 1, bn=True, relu=False)  (BN folded)
        "wg_w": w((ch, ch)) * s, "wg_b": w((ch,)) * s,
        "wx_w": w((ch, ch)) * s, "wx_b": w((ch,)) * s,
        # W : Conv(ch, ch, 3, bn=True, relu=True)   weight layout (k*k, Cin, Cout)
        "w_w": w((9, ch, ch)) * s, "w_b": w((ch,)) * s,
        # spatial : Conv(2, 1, 7, bn=True, relu=False, bias=False)
        "sp_w": w((49, 2, 1)) * s, "sp_b": jnp.zeros((1,), jnp.float32),
        # SE gate fc1/fc2
        "fc1_w": w((ch, ch // r_2)), "fc1_b": w((ch // r_2,)),
        "fc2_w": w((ch // r_2, ch)), "fc2_b": w((ch,)),
        # PAM: q/k/v projections fused into one (C, 2*Cq + C) matmul
        "qkv_w": w((ch, 2 * cq + ch)), "qkv_b": w((2 * cq + ch,)),
        "pam_gamma": jnp.zeros((1,), jnp.float32),
        "cam_gamma": jnp.zeros((1,), jnp.float32),
        # Residual(3*ch, ch): skip (no BN); bn1/bn2/bn3 scales folded into the
        # conv weight that consumes each BN'd activation.
        "skip_w": w((3 * ch, ch)), "skip_b": w((ch,)),
        "r1_w": w((3 * ch, chh)) * s, "r1_b": w((chh,)),
        "r2_w": w((9, chh, chh)) * s, "r2_b": w((chh,)),
        "r3_w": w((chh, ch)) * s, "r3_b": w((ch,)),
    }
    return p


# ----------------------------------------------------------------------------
# DDA forward
# ----------------------------------------------------------------------------
def dda_forward(g_nchw, x_nchw, p):
    g = jnp.transpose(g_nchw, (0, 2, 3, 1)).astype(jnp.float32)   # NHWC
    x = jnp.transpose(x_nchw, (0, 2, 3, 1)).astype(jnp.float32)   # NHWC
    B, H, W, C = g.shape
    N = H * W
    cq = max(C // 8, 1)
    g2 = g.reshape(B * N, C)      # free channels-last flatten
    x2 = x.reshape(B * N, C)

    # --- bilinear-pooling branch: bp = relu(bn(W(W_g(g) * W_x(x)))) ---
    Wg = pallas_matmul(g2, p["wg_w"], p["wg_b"])                  # BN folded
    Wx = pallas_matmul(x2, p["wx_w"], p["wx_b"])
    prod = (Wg * Wx).reshape(B, H, W, C)
    bp = conv_kxk(prod, p["w_w"], p["w_b"], 3, act="relu")        # (B,N,C)

    # --- g branch: spatial gate (7x7 conv on channel pool) fused into CAM ---
    g_pool = jnp.concatenate([jnp.max(g, axis=-1, keepdims=True),
                              jnp.mean(g, axis=-1, keepdims=True)], axis=-1)
    g_sp = conv_kxk(g_pool, p["sp_w"], p["sp_b"], 7)              # (B,N,1)
    g_out = pallas_cam(g.reshape(B, N, C), g_sp, p["cam_gamma"])  # (B,N,C)

    # --- x branch: fused q/k/v projection + KV-tiled PAM + fused SE gate ---
    qkv = pallas_matmul(x2, p["qkv_w"], p["qkv_b"]).reshape(B, N, -1)
    q = qkv[:, :, :cq]
    k = qkv[:, :, cq:2 * cq]
    v = qkv[:, :, 2 * cq:]
    x_mean = jnp.mean(x, axis=(1, 2))                              # (B,C)
    gate = pallas_se_gate(x_mean, p["fc1_w"], p["fc1_b"], p["fc2_w"], p["fc2_b"])
    x_out = pallas_pam(q, k, v, x.reshape(B, N, C),
                       gate.reshape(B, 1, C), p["pam_gamma"])      # (B,N,C)

    # --- fuse = Residual(cat([g, x, bp], channel)) ---
    cat = jnp.concatenate([g_out, x_out, bp], axis=-1).reshape(B * N, 3 * C)
    # TODO(synk): skip_w/r1_w both read `cat` but differ by a ReLU; kept as two
    # matmul calls (a dual-output kernel would save one pass over `cat`).
    residual = pallas_matmul(cat, p["skip_w"], p["skip_b"])        # skip_layer
    h1 = pallas_matmul(cat, p["r1_w"], p["r1_b"], pre_relu=True)   # bn1+relu+conv1
    h2 = conv_kxk(h1.reshape(B, H, W, C // 2), p["r2_w"], p["r2_b"], 3,
                  pre_relu=True)                                   # bn2+relu+conv2
    fuse = pallas_matmul(h2.reshape(B * N, C // 2), p["r3_w"], p["r3_b"],
                         pre_relu=True, residual=residual)         # bn3+relu+conv3 (+skip)

    # Dropout2d (eval mode) -> identity
    out = fuse.reshape(B, H, W, C)
    return jnp.transpose(out, (0, 3, 1, 2))                        # back to NCHW


# ----------------------------------------------------------------------------
if __name__ == "__main__":
    ch, r_2 = 16, 4
    B, H, W = 2, 8, 8

    key = jax.random.PRNGKey(0)
    kp, kg, kx = jax.random.split(key, 3)
    params = make_params(kp, ch, r_2)
    g = jax.random.normal(kg, (B, ch, H, W), dtype=jnp.float32)
    x = jax.random.normal(kx, (B, ch, H, W), dtype=jnp.float32)

    out = jax.jit(dda_forward)(g, x, params)
    out = jax.block_until_ready(out)
    assert out.shape == (B, ch, H, W)
    assert bool(jnp.all(jnp.isfinite(out)))
    print("KERNEL_OK")
</pallas_src>

<mosaic_0001>
module attributes {stable_mosaic.version = 11 : i64} {
  func.func @_mm_kernel(%arg0: i32, %arg1: i32, %arg2: i32, %arg3: memref<128x16xf32, #tpu.memory_space<vmem>>, %arg4: memref<16x20xf32, #tpu.memory_space<vmem>>, %arg5: memref<1x20xf32, #tpu.memory_space<vmem>>, %arg6: memref<128x20xf32, #tpu.memory_space<vmem>>, %arg7: memref<128x20xf32, #tpu.memory_space<vmem>>) attributes {dimension_semantics = [#tpu.dimension_semantics<parallel>, #tpu.dimension_semantics<parallel>, #tpu.dimension_semantics<arbitrary>], iteration_bounds = array<i64: 1, 1, 1>, scalar_prefetch = 0 : i64, scratch_operands = 1 : i64, tpu.core_type = #tpu.core_type<tc>, window_params = [{transform_indices = @transform_0, window_bounds = array<i64: 128, 16>}, {transform_indices = @transform_1, window_bounds = array<i64: 16, 20>}, {transform_indices = @transform_2, window_bounds = array<i64: 1, 20>}, {transform_indices = @transform_3, window_bounds = array<i64: 128, 20>}]} {
    %c0_i32 = arith.constant 0 : i32
    %0 = arith.cmpi eq, %arg2, %c0_i32 : i32
    %1 = arith.extui %0 : i1 to i32
    %c0_i32_0 = arith.constant 0 : i32
    %2 = arith.cmpi ne, %1, %c0_i32_0 : i32
    scf.if %2 {
      %cst_10 = arith.constant 0.000000e+00 : f32
      %14 = vector.broadcast %cst_10 : f32 to vector<128x20xf32>
      %c0_11 = arith.constant 0 : index
      %c0_12 = arith.constant 0 : index
      %15 = vector.load %arg7[%c0_11, %c0_12] : memref<128x20xf32, #tpu.memory_space<vmem>>, vector<128x20xf32>
      tpu.vector_store %arg7[%c0_11, %c0_12], %14 {strides = array<i32>} : memref<128x20xf32, #tpu.memory_space<vmem>>, vector<128x20xf32>,
    } else {
    }
    %c0 = arith.constant 0 : index
    %c0_1 = arith.constant 0 : index
    %3 = vector.load %arg3[%c0, %c0_1] : memref<128x16xf32, #tpu.memory_space<vmem>>, vector<128x16xf32>
    %c0_2 = arith.constant 0 : index
    %c0_3 = arith.constant 0 : index
    %4 = vector.load %arg7[%c0_2, %c0_3] : memref<128x20xf32, #tpu.memory_space<vmem>>, vector<128x20xf32>
    %5 = arith.truncf %3 : vector<128x16xf32> to vector<128x16xbf16>
    %c0_4 = arith.constant 0 : index
    %c0_5 = arith.constant 0 : index
    %6 = vector.load %arg4[%c0_4, %c0_5] : memref<16x20xf32, #tpu.memory_space<vmem>>, vector<16x20xf32>
    %7 = arith.truncf %6 : vector<16x20xf32> to vector<16x20xbf16>
    %cst = arith.constant dense<0.000000e+00> : vector<128x20xf32>
    %8 = tpu.matmul %5, %7, %cst {dimension_numbers = #tpu.dot_dimension_numbers<[1], [0], [0], [1], [0, 0, 1, 1], [], []>} : vector<128x16xbf16>, vector<16x20xbf16>, vector<128x20xf32> -> vector<128x20xf32>
    %9 = arith.addf %4, %8 : vector<128x20xf32>
    %c0_6 = arith.constant 0 : index
    %c0_7 = arith.constant 0 : index
    %10 = vector.load %arg7[%c0_6, %c0_7] : memref<128x20xf32, #tpu.memory_space<vmem>>, vector<128x20xf32>
    tpu.vector_store %arg7[%c0_6, %c0_7], %9 {strides = array<i32>} : memref<128x20xf32, #tpu.memory_space<vmem>>, vector<128x20xf32>,
    %c0_i32_8 = arith.constant 0 : i32
    %11 = arith.cmpi eq, %arg2, %c0_i32_8 : i32
    %12 = arith.extui %11 : i1 to i32
    %c0_i32_9 = arith.constant 0 : i32
    %13 = arith.cmpi ne, %12, %c0_i32_9 : i32
    scf.if %13 {
      %c0_10 = arith.constant 0 : index
      %c0_11 = arith.constant 0 : index
      %14 = vector.load %arg7[%c0_10, %c0_11] : memref<128x20xf32, #tpu.memory_space<vmem>>, vector<128x20xf32>
      %c0_12 = arith.constant 0 : index
      %c0_13 = arith.constant 0 : index
      %15 = vector.load %arg5[%c0_12, %c0_13] : memref<1x20xf32, #tpu.memory_space<vmem>>, vector<1x20xf32>
      %16 = vector.broadcast %15 : vector<1x20xf32> to vector<128x20xf32>
      %17 = arith.addf %14, %16 : vector<128x20xf32>
      %c0_14 = arith.constant 0 : index
      %c0_15 = arith.constant 0 : index
      %18 = vector.load %arg6[%c0_14, %c0_15] : memref<128x20xf32, #tpu.memory_space<vmem>>, vector<128x20xf32>
      tpu.vector_store %arg6[%c0_14, %c0_15], %17 {strides = array<i32>} : memref<128x20xf32, #tpu.memory_space<vmem>>, vector<128x20xf32>,
    } else {
    }
    return
  }
  func.func @transform_0(%arg0: i32, %arg1: i32, %arg2: i32) -> (i32, i32) {
    %c0_i32 = arith.constant 0 : i32
    return %arg0, %arg2 : i32, i32
  }
  func.func @transform_1(%arg0: i32, %arg1: i32, %arg2: i32) -> (i32, i32) {
    %c0_i32 = arith.constant 0 : i32
    return %arg2, %arg1 : i32, i32
  }
  func.func @transform_2(%arg0: i32, %arg1: i32, %arg2: i32) -> (i32, i32) {
    %c0_i32 = arith.constant 0 : i32
    %c0_i32_0 = arith.constant 0 : i32
    return %c0_i32, %arg1 : i32, i32
  }
  func.func @transform_3(%arg0: i32, %arg1: i32, %arg2: i32) -> (i32, i32) {
    %c0_i32 = arith.constant 0 : i32
    return %arg0, %arg1 : i32, i32
  }
}

module attributes {stable_mosaic.version = 11 : i64} {
  func.func @_se_gate_kernel(%arg0: i32, %arg1: memref<2x16xf32, #tpu.memory_space<vmem>>, %arg2: memref<16x4xf32, #tpu.memory_space<vmem>>, %arg3: memref<1x4xf32, #tpu.memory_space<vmem>>, %arg4: memref<4x16xf32, #tpu.memory_space<vmem>>, %arg5: memref<1x16xf32, #tpu.memory_space<vmem>>, %arg6: memref<2x16xf32, #tpu.memory_space<vmem>>) attributes {dimension_semantics = [#tpu.dimension_semantics<arbitrary>], iteration_bounds = array<i64: 1>, scalar_prefetch = 0 : i64, scratch_operands = 0 : i64, tpu.core_type = #tpu.core_type<tc>, window_params = [{pipeline_mode = #tpu.pipeline_mode<synchronous>, transform_indices = @transform_0, window_bounds = array<i64: 2, 16>}, {pipeline_mode = #tpu.pipeline_mode<synchronous>, transform_indices = @transform_1, window_bounds = array<i64: 16, 4>}, {pipeline_mode = #tpu.pipeline_mode<synchronous>, transform_indices = @transform_2, window_bounds = array<i64: 1, 4>}, {pipeline_mode = #tpu.pipeline_mode<synchronous>, transform_indices = @transform_3, window_bounds = array<i64: 4, 16>}, {pipeline_mode = #tpu.pipeline_mode<synchronous>, transform_indices = @transform_4, window_bounds = array<i64: 1, 16>}, {pipeline_mode = #tpu.pipeline_mode<synchronous>, transform_indices = @transform_5, window_bounds = array<i64: 2, 16>}]} {
    %c0 = arith.constant 0 : index
    %c0_0 = arith.constant 0 : index
    %0 = vector.load %arg1[%c0, %c0_0] : memref<2x16xf32, #tpu.memory_space<vmem>>, vector<2x16xf32>
    %1 = arith.truncf %0 : vector<2x16xf32> to vector<2x16xbf16>
    %c0_1 = arith.constant 0 : index
    %c0_2 = arith.constant 0 : index
    %2 = vector.load %arg2[%c0_1, %c0_2] : memref<16x4xf32, #tpu.memory_space<vmem>>, vector<16x4xf32>
    %3 = arith.truncf %2 : vector<16x4xf32> to vector<16x4xbf16>
    %cst = arith.constant dense<0.000000e+00> : vector<2x4xf32>
    %4 = tpu.matmul %1, %3, %cst {dimension_numbers = #tpu.dot_dimension_numbers<[1], [0], [0], [1], [0, 0, 1, 1], [], []>} : vector<2x16xbf16>, vector<16x4xbf16>, vector<2x4xf32> -> vector<2x4xf32>
    %c0_3 = arith.constant 0 : index
    %c0_4 = arith.constant 0 : index
    %5 = vector.load %arg3[%c0_3, %c0_4] : memref<1x4xf32, #tpu.memory_space<vmem>>, vector<1x4xf32>
    %6 = vector.broadcast %5 : vector<1x4xf32> to vector<2x4xf32>
    %7 = arith.addf %4, %6 : vector<2x4xf32>
    %cst_5 = arith.constant 0.000000e+00 : f32
    %8 = vector.broadcast %cst_5 : f32 to vector<2x4xf32>
    %9 = arith.maximumf %7, %8 : vector<2x4xf32>
    %10 = arith.truncf %9 : vector<2x4xf32> to vector<2x4xbf16>
    %c0_6 = arith.constant 0 : index
    %c0_7 = arith.constant 0 : index
    %11 = vector.load %arg4[%c0_6, %c0_7] : memref<4x16xf32, #tpu.memory_space<vmem>>, vector<4x16xf32>
    %12 = arith.truncf %11 : vector<4x16xf32> to vector<4x16xbf16>
    %cst_8 = arith.constant dense<0.000000e+00> : vector<2x16xf32>
    %13 = tpu.matmul %10, %12, %cst_8 {dimension_numbers = #tpu.dot_dimension_numbers<[1], [0], [0], [1], [0, 0, 1, 1], [], []>} : vector<2x4xbf16>, vector<4x16xbf16>, vector<2x16xf32> -> vector<2x16xf32>
    %c0_9 = arith.constant 0 : index
    %c0_10 = arith.constant 0 : index
    %14 = vector.load %arg5[%c0_9, %c0_10] : memref<1x16xf32, #tpu.memory_space<vmem>>, vector<1x16xf32>
    %15 = vector.broadcast %14 : vector<1x16xf32> to vector<2x16xf32>
    %16 = arith.addf %13, %15 : vector<2x16xf32>
    %17 = arith.negf %16 : vector<2x16xf32>
    %18 = math.exp %17 : vector<2x16xf32>
    %cst_11 = arith.constant 1.000000e+00 : f32
    %19 = vector.broadcast %cst_11 : f32 to vector<2x16xf32>
    %20 = arith.addf %19, %18 : vector<2x16xf32>
    %21 = arith.divf %19, %20 : vector<2x16xf32>
    %c0_12 = arith.constant 0 : index
    %c0_13 = arith.constant 0 : index
    %22 = vector.load %arg6[%c0_12, %c0_13] : memref<2x16xf32, #tpu.memory_space<vmem>>, vector<2x16xf32>
    tpu.vector_store %arg6[%c0_12, %c0_13], %21 {strides = array<i32>} : memref<2x16xf32, #tpu.memory_space<vmem>>, vector<2x16xf32>,
    return
  }
  func.func @transform_0(%arg0: i32) -> (i32, i32) {
    %c0_i32 = arith.constant 0 : i32
    %c0_i32_0 = arith.constant 0 : i32
    %c0_i32_1 = arith.constant 0 : i32
    return %c0_i32, %c0_i32_0 : i32, i32
  }
  func.func @transform_1(%arg0: i32) -> (i32, i32) {
    %c0_i32 = arith.constant 0 : i32
    %c0_i32_0 = arith.constant 0 : i32
    %c0_i32_1 = arith.constant 0 : i32
    return %c0_i32, %c0_i32_0 : i32, i32
  }
  func.func @transform_2(%arg0: i32) -> (i32, i32) {
    %c0_i32 = arith.constant 0 : i32
    %c0_i32_0 = arith.constant 0 : i32
    %c0_i32_1 = arith.constant 0 : i32
    return %c0_i32, %c0_i32_0 : i32, i32
  }
  func.func @transform_3(%arg0: i32) -> (i32, i32) {
    %c0_i32 = arith.constant 0 : i32
    %c0_i32_0 = arith.constant 0 : i32
    %c0_i32_1 = arith.constant 0 : i32
    return %c0_i32, %c0_i32_0 : i32, i32
  }
  func.func @transform_4(%arg0: i32) -> (i32, i32) {
    %c0_i32 = arith.constant 0 : i32
    %c0_i32_0 = arith.constant 0 : i32
    %c0_i32_1 = arith.constant 0 : i32
    return %c0_i32, %c0_i32_0 : i32, i32
  }
  func.func @transform_5(%arg0: i32) -> (i32, i32) {
    %c0_i32 = arith.constant 0 : i32
    %c0_i32_0 = arith.constant 0 : i32
    %c0_i32_1 = arith.constant 0 : i32
    return %c0_i32, %c0_i32_0 : i32, i32
  }
}

module attributes {stable_mosaic.version = 11 : i64} {
  func.func @_pam_kernel(%arg0: i32, %arg1: i32, %arg2: memref<1xf32, #tpu.memory_space<smem>>, %arg3: memref<1x64x2xf32, #tpu.memory_space<vmem>>, %arg4: memref<1x64x2xf32, #tpu.memory_space<vmem>>, %arg5: memref<1x64x16xf32, #tpu.memory_space<vmem>>, %arg6: memref<1x64x16xf32, #tpu.memory_space<vmem>>, %arg7: memref<1x1x16xf32, #tpu.memory_space<vmem>>, %arg8: memref<1x64x16xf32, #tpu.memory_space<vmem>>, %arg9: memref<64x1xf32, #tpu.memory_space<vmem>>, %arg10: memref<64x1xf32, #tpu.memory_space<vmem>>, %arg11: memref<64x16xf32, #tpu.memory_space<vmem>>) attributes {dimension_semantics = [#tpu.dimension_semantics<parallel>, #tpu.dimension_semantics<arbitrary>], iteration_bounds = array<i64: 2, 1>, scalar_prefetch = 0 : i64, scratch_operands = 3 : i64, tpu.core_type = #tpu.core_type<tc>, window_params = [{transform_indices = @transform_0, window_bounds = array<i64: 1>}, {transform_indices = @transform_1, window_bounds = array<i64: 1, 64, 2>}, {transform_indices = @transform_2, window_bounds = array<i64: 1, 64, 2>}, {transform_indices = @transform_3, window_bounds = array<i64: 1, 64, 16>}, {transform_indices = @transform_4, window_bounds = array<i64: 1, 64, 16>}, {transform_indices = @transform_5, window_bounds = array<i64: 1, 1, 16>}, {transform_indices = @transform_6, window_bounds = array<i64: 1, 64, 16>}]} {
    %c0_i32 = arith.constant 0 : i32
    %0 = arith.cmpi eq, %arg1, %c0_i32 : i32
    %1 = arith.extui %0 : i1 to i32
    %c0_i32_0 = arith.constant 0 : i32
    %2 = arith.cmpi ne, %1, %c0_i32_0 : i32
    scf.if %2 {
      %cst_26 = arith.constant 0xFF800000 : f32
      %39 = vector.broadcast %cst_26 : f32 to vector<64x1xf32>
      %c0_27 = arith.constant 0 : index
      %c0_28 = arith.constant 0 : index
      %40 = vector.load %arg9[%c0_27, %c0_28] : memref<64x1xf32, #tpu.memory_space<vmem>>, vector<64x1xf32>
      tpu.vector_store %arg9[%c0_27, %c0_28], %39 {strides = array<i32>} : memref<64x1xf32, #tpu.memory_space<vmem>>, vector<64x1xf32>,
      %cst_29 = arith.constant 0.000000e+00 : f32
      %41 = vector.broadcast %cst_29 : f32 to vector<64x1xf32>
      %c0_30 = arith.constant 0 : index
      %c0_31 = arith.constant 0 : index
      %42 = vector.load %arg10[%c0_30, %c0_31] : memref<64x1xf32, #tpu.memory_space<vmem>>, vector<64x1xf32>
      tpu.vector_store %arg10[%c0_30, %c0_31], %41 {strides = array<i32>} : memref<64x1xf32, #tpu.memory_space<vmem>>, vector<64x1xf32>,
      %cst_32 = arith.constant 0.000000e+00 : f32
      %43 = vector.broadcast %cst_32 : f32 to vector<64x16xf32>
      %c0_33 = arith.constant 0 : index
      %c0_34 = arith.constant 0 : index
      %44 = vector.load %arg11[%c0_33, %c0_34] : memref<64x16xf32, #tpu.memory_space<vmem>>, vector<64x16xf32>
      tpu.vector_store %arg11[%c0_33, %c0_34], %43 {strides = array<i32>} : memref<64x16xf32, #tpu.memory_space<vmem>>, vector<64x16xf32>,
    } else {
    }
    %c0 = arith.constant 0 : index
    %c0_1 = arith.constant 0 : index
    %c0_2 = arith.constant 0 : index
    %3 = vector.load %arg3[%c0, %c0_1, %c0_2] : memref<1x64x2xf32, #tpu.memory_space<vmem>>, vector<1x64x2xf32>
    %4 = vector.shape_cast %3 : vector<1x64x2xf32> to vector<64x2xf32>
    %5 = arith.truncf %4 : vector<64x2xf32> to vector<64x2xbf16>
    %c0_3 = arith.constant 0 : index
    %c0_4 = arith.constant 0 : index
    %c0_5 = arith.constant 0 : index
    %6 = vector.load %arg4[%c0_3, %c0_4, %c0_5] : memref<1x64x2xf32, #tpu.memory_space<vmem>>, vector<1x64x2xf32>
    %7 = vector.shape_cast %6 : vector<1x64x2xf32> to vector<64x2xf32>
    %8 = arith.truncf %7 : vector<64x2xf32> to vector<64x2xbf16>
    %cst = arith.constant dense<0.000000e+00> : vector<64x64xf32>
    %9 = tpu.matmul %5, %8, %cst {dimension_numbers = #tpu.dot_dimension_numbers<[1], [1], [0], [0], [0, 0, 1, 0], [], []>} : vector<64x2xbf16>, vector<64x2xbf16>, vector<64x64xf32> -> vector<64x64xf32>
    %c0_6 = arith.constant 0 : index
    %c0_7 = arith.constant 0 : index
    %10 = vector.load %arg9[%c0_6, %c0_7] : memref<64x1xf32, #tpu.memory_space<vmem>>, vector<64x1xf32>
    %cst_8 = arith.constant dense<0xFF800000> : vector<64xf32>
    %11 = vector.multi_reduction <maximumf>, %9, %cst_8 [1] : vector<64x64xf32> to vector<64xf32>
    %12 = vector.shape_cast %11 : vector<64xf32> to vector<64x1xf32>
    %13 = arith.maximumf %10, %12 : vector<64x1xf32>
    %14 = arith.subf %10, %13 : vector<64x1xf32>
    %15 = math.exp %14 : vector<64x1xf32>
    %16 = vector.broadcast %13 : vector<64x1xf32> to vector<64x64xf32>
    %17 = arith.subf %9, %16 : vector<64x64xf32>
    %18 = math.exp %17 : vector<64x64xf32>
    %c0_9 = arith.constant 0 : index
    %c0_10 = arith.constant 0 : index
    %19 = vector.load %arg10[%c0_9, %c0_10] : memref<64x1xf32, #tpu.memory_space<vmem>>, vector<64x1xf32>
    %20 = arith.mulf %15, %19 : vector<64x1xf32>
    %cst_11 = arith.constant dense<0.000000e+00> : vector<64xf32>
    %21 = vector.multi_reduction <add>, %18, %cst_11 [1] : vector<64x64xf32> to vector<64xf32>
    %22 = vector.shape_cast %21 : vector<64xf32> to vector<64x1xf32>
    %23 = arith.addf %20, %22 : vector<64x1xf32>
    %c0_12 = arith.constant 0 : index
    %c0_13 = arith.constant 0 : index
    %24 = vector.load %arg10[%c0_12, %c0_13] : memref<64x1xf32, #tpu.memory_space<vmem>>, vector<64x1xf32>
    tpu.vector_store %arg10[%c0_12, %c0_13], %23 {strides = array<i32>} : memref<64x1xf32, #tpu.memory_space<vmem>>, vector<64x1xf32>,
    %c0_14 = arith.constant 0 : index
    %c0_15 = arith.constant 0 : index
    %25 = vector.load %arg11[%c0_14, %c0_15] : memref<64x16xf32, #tpu.memory_space<vmem>>, vector<64x16xf32>
    %26 = vector.broadcast %15 : vector<64x1xf32> to vector<64x16xf32>
    %27 = arith.mulf %26, %25 : vector<64x16xf32>
    %28 = arith.truncf %18 : vector<64x64xf32> to vector<64x64xbf16>
    %c0_16 = arith.constant 0 : index
    %c0_17 = arith.constant 0 : index
    %c0_18 = arith.constant 0 : index
    %29 = vector.load %arg5[%c0_16, %c0_17, %c0_18] : memref<1x64x16xf32, #tpu.memory_space<vmem>>, vector<1x64x16xf32>
    %30 = vector.shape_cast %29 : vector<1x64x16xf32> to vector<64x16xf32>
    %31 = arith.truncf %30 : vector<64x16xf32> to vector<64x16xbf16>
    %cst_19 = arith.constant dense<0.000000e+00> : vector<64x16xf32>
    %32 = tpu.matmul %28, %31, %cst_19 {dimension_numbers = #tpu.dot_dimension_numbers<[1], [0], [0], [1], [0, 0, 1, 1], [], []>} : vector<64x64xbf16>, vector<64x16xbf16>, vector<64x16xf32> -> vector<64x16xf32>
    %33 = arith.addf %27, %32 : vector<64x16xf32>
    %c0_20 = arith.constant 0 : index
    %c0_21 = arith.constant 0 : index
    %34 = vector.load %arg11[%c0_20, %c0_21] : memref<64x16xf32, #tpu.memory_space<vmem>>, vector<64x16xf32>
    tpu.vector_store %arg11[%c0_20, %c0_21], %33 {strides = array<i32>} : memref<64x16xf32, #tpu.memory_space<vmem>>, vector<64x16xf32>,
    %c0_22 = arith.constant 0 : index
    %c0_23 = arith.constant 0 : index
    %35 = vector.load %arg9[%c0_22, %c0_23] : memref<64x1xf32, #tpu.memory_space<vmem>>, vector<64x1xf32>
    tpu.vector_store %arg9[%c0_22, %c0_23], %13 {strides = array<i32>} : memref<64x1xf32, #tpu.memory_space<vmem>>, vector<64x1xf32>,
    %c0_i32_24 = arith.constant 0 : i32
    %36 = arith.cmpi eq, %arg1, %c0_i32_24 : i32
    %37 = arith.extui %36 : i1 to i32
    %c0_i32_25 = arith.constant 0 : i32
    %38 = arith.cmpi ne, %37, %c0_i32_25 : i32
    scf.if %38 {
      %c0_26 = arith.constant 0 : index
      %c0_27 = arith.constant 0 : index
      %39 = vector.load %arg11[%c0_26, %c0_27] : memref<64x16xf32, #tpu.memory_space<vmem>>, vector<64x16xf32>
      %c0_28 = arith.constant 0 : index
      %c0_29 = arith.constant 0 : index
      %40 = vector.load %arg10[%c0_28, %c0_29] : memref<64x1xf32, #tpu.memory_space<vmem>>, vector<64x1xf32>
      %41 = tpu.reciprocal %40 {approx = true} : vector<64x1xf32> -> vector<64x1xf32>
      %42 = vector.broadcast %41 : vector<64x1xf32> to vector<64x16xf32>
      %43 = arith.mulf %39, %42 : vector<64x16xf32>
      %c0_30 = arith.constant 0 : index
      %c0_31 = arith.constant 0 : index
      %c0_32 = arith.constant 0 : index
      %44 = vector.load %arg7[%c0_30, %c0_31, %c0_32] : memref<1x1x16xf32, #tpu.memory_space<vmem>>, vector<1x1x16xf32>
      %45 = vector.shape_cast %44 : vector<1x1x16xf32> to vector<1x16xf32>
      %c0_33 = arith.constant 0 : index
      %46 = memref.load %arg2[%c0_33] : memref<1xf32, #tpu.memory_space<smem>>
      %47 = vector.broadcast %46 : f32 to vector<64x16xf32>
      %48 = arith.mulf %47, %43 : vector<64x16xf32>
      %c0_34 = arith.constant 0 : index
      %c0_35 = arith.constant 0 : index
      %c0_36 = arith.constant 0 : index
      %49 = vector.load %arg6[%c0_34, %c0_35, %c0_36] : memref<1x64x16xf32, #tpu.memory_space<vmem>>, vector<1x64x16xf32>
      %50 = vector.shape_cast %49 : vector<1x64x16xf32> to vector<64x16xf32>
      %51 = arith.addf %48, %50 : vector<64x16xf32>
      %52 = vector.broadcast %45 : vector<1x16xf32> to vector<64x16xf32>
      %53 = arith.mulf %52, %51 : vector<64x16xf32>
      %c0_37 = arith.constant 0 : index
      %c0_38 = arith.constant 0 : index
      %c0_39 = arith.constant 0 : index
      %54 = vector.load %arg8[%c0_37, %c0_38, %c0_39] : memref<1x64x16xf32, #tpu.memory_space<vmem>>, vector<1x64x16xf32>
      %55 = vector.shape_cast %54 : vector<1x64x16xf32> to vector<64x16xf32>
      %56 = vector.shape_cast %53 : vector<64x16xf32> to vector<1x64x16xf32>
      tpu.vector_store %arg8[%c0_37, %c0_38, %c0_39], %56 {strides = array<i32>} : memref<1x64x16xf32, #tpu.memory_space<vmem>>, vector<1x64x16xf32>,
    } else {
    }
    return
  }
  func.func @transform_0(%arg0: i32, %arg1: i32) -> i32 {
    %c0_i32 = arith.constant 0 : i32
    %c0_i32_0 = arith.constant 0 : i32
    return %c0_i32 : i32
  }
  func.func @transform_1(%arg0: i32, %arg1: i32) -> (i32, i32, i32) {
    %c0_i32 = arith.constant 0 : i32
    %c0_i32_0 = arith.constant 0 : i32
    %c0_i32_1 = arith.constant 0 : i32
    return %arg0, %c0_i32, %c0_i32_0 : i32, i32, i32
  }
  func.func @transform_2(%arg0: i32, %arg1: i32) -> (i32, i32, i32) {
    %c0_i32 = arith.constant 0 : i32
    %c0_i32_0 = arith.constant 0 : i32
    return %arg0, %arg1, %c0_i32 : i32, i32, i32
  }
  func.func @transform_3(%arg0: i32, %arg1: i32) -> (i32, i32, i32) {
    %c0_i32 = arith.constant 0 : i32
    %c0_i32_0 = arith.constant 0 : i32
    return %arg0, %arg1, %c0_i32 : i32, i32, i32
  }
  func.func @transform_4(%arg0: i32, %arg1: i32) -> (i32, i32, i32) {
    %c0_i32 = arith.constant 0 : i32
    %c0_i32_0 = arith.constant 0 : i32
    %c0_i32_1 = arith.constant 0 : i32
    return %arg0, %c0_i32, %c0_i32_0 : i32, i32, i32
  }
  func.func @transform_5(%arg0: i32, %arg1: i32) -> (i32, i32, i32) {
    %c0_i32 = arith.constant 0 : i32
    %c0_i32_0 = arith.constant 0 : i32
    %c0_i32_1 = arith.constant 0 : i32
    return %arg0, %c0_i32, %c0_i32_0 : i32, i32, i32
  }
  func.func @transform_6(%arg0: i32, %arg1: i32) -> (i32, i32, i32) {
    %c0_i32 = arith.constant 0 : i32
    %c0_i32_0 = arith.constant 0 : i32
    %c0_i32_1 = arith.constant 0 : i32
    return %arg0, %c0_i32, %c0_i32_0 : i32, i32, i32
  }
}

module attributes {stable_mosaic.version = 11 : i64} {
  func.func @_cam_kernel(%arg0: i32, %arg1: memref<1xf32, #tpu.memory_space<smem>>, %arg2: memref<1x64x16xf32, #tpu.memory_space<vmem>>, %arg3: memref<1x64x1xf32, #tpu.memory_space<vmem>>, %arg4: memref<1x64x16xf32, #tpu.memory_space<vmem>>) attributes {dimension_semantics = [#tpu.dimension_semantics<parallel>], iteration_bounds = array<i64: 2>, scalar_prefetch = 0 : i64, scratch_operands = 0 : i64, tpu.core_type = #tpu.core_type<tc>, window_params = [{transform_indices = @transform_0, window_bounds = array<i64: 1>}, {transform_indices = @transform_1, window_bounds = array<i64: 1, 64, 16>}, {transform_indices = @transform_2, window_bounds = array<i64: 1, 64, 1>}, {transform_indices = @transform_3, window_bounds = array<i64: 1, 64, 16>}]} {
    %c0 = arith.constant 0 : index
    %c0_0 = arith.constant 0 : index
    %c0_1 = arith.constant 0 : index
    %0 = vector.load %arg2[%c0, %c0_0, %c0_1] : memref<1x64x16xf32, #tpu.memory_space<vmem>>, vector<1x64x16xf32>
    %1 = vector.shape_cast %0 : vector<1x64x16xf32> to vector<64x16xf32>
    %2 = tpu.transpose %1, [1, 0] : vector<64x16xf32> -> vector<16x64xf32>
    %3 = arith.truncf %2 : vector<16x64xf32> to vector<16x64xbf16>
    %cst = arith.constant dense<0.000000e+00> : vector<16x16xf32>
    %4 = tpu.matmul %3, %3, %cst {dimension_numbers = #tpu.dot_dimension_numbers<[1], [1], [0], [0], [0, 0, 1, 0], [], []>} : vector<16x64xbf16>, vector<16x64xbf16>, vector<16x16xf32> -> vector<16x16xf32>
    %cst_2 = arith.constant dense<0xFF800000> : vector<16xf32>
    %5 = vector.multi_reduction <maximumf>, %4, %cst_2 [1] : vector<16x16xf32> to vector<16xf32>
    %6 = vector.shape_cast %5 : vector<16xf32> to vector<16x1xf32>
    %7 = vector.broadcast %6 : vector<16x1xf32> to vector<16x16xf32>
    %8 = arith.subf %7, %4 : vector<16x16xf32>
    %cst_3 = arith.constant dense<0xFF800000> : vector<16xf32>
    %9 = vector.multi_reduction <maximumf>, %8, %cst_3 [1] : vector<16x16xf32> to vector<16xf32>
    %10 = vector.shape_cast %9 : vector<16xf32> to vector<16x1xf32>
    %11 = vector.broadcast %10 : vector<16x1xf32> to vector<16x16xf32>
    %12 = arith.subf %8, %11 : vector<16x16xf32>
    %13 = math.exp %12 : vector<16x16xf32>
    %cst_4 = arith.constant dense<0.000000e+00> : vector<16xf32>
    %14 = vector.multi_reduction <add>, %13, %cst_4 [1] : vector<16x16xf32> to vector<16xf32>
    %15 = vector.shape_cast %14 : vector<16xf32> to vector<16x1xf32>
    %16 = tpu.reciprocal %15 {approx = true} : vector<16x1xf32> -> vector<16x1xf32>
    %17 = vector.broadcast %16 : vector<16x1xf32> to vector<16x16xf32>
    %18 = arith.mulf %13, %17 : vector<16x16xf32>
    %19 = arith.truncf %1 : vector<64x16xf32> to vector<64x16xbf16>
    %20 = arith.truncf %18 : vector<16x16xf32> to vector<16x16xbf16>
    %cst_5 = arith.constant dense<0.000000e+00> : vector<64x16xf32>
    %21 = tpu.matmul %19, %20, %cst_5 {dimension_numbers = #tpu.dot_dimension_numbers<[1], [1], [0], [0], [0, 0, 1, 0], [], []>} : vector<64x16xbf16>, vector<16x16xbf16>, vector<64x16xf32> -> vector<64x16xf32>
    %c0_6 = arith.constant 0 : index
    %c0_7 = arith.constant 0 : index
    %c0_8 = arith.constant 0 : index
    %22 = vector.load %arg3[%c0_6, %c0_7, %c0_8] : memref<1x64x1xf32, #tpu.memory_space<vmem>>, vector<1x64x1xf32>
    %23 = vector.shape_cast %22 : vector<1x64x1xf32> to vector<64x1xf32>
    %24 = arith.negf %23 : vector<64x1xf32>
    %25 = math.exp %24 : vector<64x1xf32>
    %cst_9 = arith.constant 1.000000e+00 : f32
    %26 = vector.broadcast %cst_9 : f32 to vector<64x1xf32>
    %27 = arith.addf %26, %25 : vector<64x1xf32>
    %28 = arith.divf %26, %27 : vector<64x1xf32>
    %c0_10 = arith.constant 0 : index
    %29 = memref.load %arg1[%c0_10] : memref<1xf32, #tpu.memory_space<smem>>
    %30 = vector.broadcast %29 : f32 to vector<64x16xf32>
    %31 = arith.mulf %30, %21 : vector<64x16xf32>
    %32 = arith.addf %31, %1 : vector<64x16xf32>
    %33 = vector.broadcast %28 : vector<64x1xf32> to vector<64x16xf32>
    %34 = arith.mulf %33, %32 : vector<64x16xf32>
    %c0_11 = arith.constant 0 : index
    %c0_12 = arith.constant 0 : index
    %c0_13 = arith.constant 0 : index
    %35 = vector.load %arg4[%c0_11, %c0_12, %c0_13] : memref<1x64x16xf32, #tpu.memory_space<vmem>>, vector<1x64x16xf32>
    %36 = vector.shape_cast %35 : vector<1x64x16xf32> to vector<64x16xf32>
    %37 = vector.shape_cast %34 : vector<64x16xf32> to vector<1x64x16xf32>
    tpu.vector_store %arg4[%c0_11, %c0_12, %c0_13], %37 {strides = array<i32>} : memref<1x64x16xf32, #tpu.memory_space<vmem>>, vector<1x64x16xf32>,
    return
  }
  func.func @transform_0(%arg0: i32) -> i32 {
    %c0_i32 = arith.constant 0 : i32
    %c0_i32_0 = arith.constant 0 : i32
    return %c0_i32 : i32
  }
  func.func @transform_1(%arg0: i32) -> (i32, i32, i32) {
    %c0_i32 = arith.constant 0 : i32
    %c0_i32_0 = arith.constant 0 : i32
    %c0_i32_1 = arith.constant 0 : i32
    return %arg0, %c0_i32, %c0_i32_0 : i32, i32, i32
  }
  func.func @transform_2(%arg0: i32) -> (i32, i32, i32) {
    %c0_i32 = arith.constant 0 : i32
    %c0_i32_0 = arith.constant 0 : i32
    %c0_i32_1 = arith.constant 0 : i32
    return %arg0, %c0_i32, %c0_i32_0 : i32, i32, i32
  }
  func.func @transform_3(%arg0: i32) -> (i32, i32, i32) {
    %c0_i32 = arith.constant 0 : i32
    %c0_i32_0 = arith.constant 0 : i32
    %c0_i32_1 = arith.constant 0 : i32
    return %arg0, %c0_i32, %c0_i32_0 : i32, i32, i32
  }
}

module attributes {stable_mosaic.version = 11 : i64} {
  func.func @_conv_kxk_kernel(%arg0: i32, %arg1: memref<1x14x14x2xf32, #tpu.memory_space<vmem>>, %arg2: memref<49x2x1xf32, #tpu.memory_space<vmem>>, %arg3: memref<1x1xf32, #tpu.memory_space<vmem>>, %arg4: memref<1x64x1xf32, #tpu.memory_space<vmem>>) attributes {dimension_semantics = [#tpu.dimension_semantics<parallel>], iteration_bounds = array<i64: 2>, scalar_prefetch = 0 : i64, scratch_operands = 0 : i64, tpu.core_type = #tpu.core_type<tc>, window_params = [{transform_indices = @transform_0, window_bounds = array<i64: 1, 14, 14, 2>}, {pipeline_mode = #tpu.pipeline_mode<synchronous>, transform_indices = @transform_1, window_bounds = array<i64: 49, 2, 1>}, {pipeline_mode = #tpu.pipeline_mode<synchronous>, transform_indices = @transform_2, window_bounds = array<i64: 1, 1>}, {transform_indices = @transform_3, window_bounds = array<i64: 1, 64, 1>}]} {
    %c0 = arith.constant 0 : index
    %c0_0 = arith.constant 0 : index
    %c0_1 = arith.constant 0 : index
    %c0_2 = arith.constant 0 : index
    %0 = vector.load %arg1[%c0, %c0_0, %c0_1, %c0_2] : memref<1x14x14x2xf32, #tpu.memory_space<vmem>>, vector<1x14x14x2xf32>
    %1 = vector.shape_cast %0 : vector<1x14x14x2xf32> to vector<14x14x2xf32>
    %cst = arith.constant 0.000000e+00 : f32
    %2 = vector.broadcast %cst : f32 to vector<64x1xf32>
    %3 = vector.extract_strided_slice %1 {offsets = [0, 0, 0], sizes = [8, 8, 2], strides = [1, 1, 1]} : vector<14x14x2xf32> to vector<8x8x2xf32>
    %4 = vector.shape_cast %3 : vector<8x8x2xf32> to vector<64x2xf32>
    %5 = arith.truncf %4 : vector<64x2xf32> to vector<64x2xbf16>
    %c0_3 = arith.constant 0 : index
    %c0_4 = arith.constant 0 : index
    %c0_5 = arith.constant 0 : index
    %6 = vector.load %arg2[%c0_3, %c0_4, %c0_5] : memref<49x2x1xf32, #tpu.memory_space<vmem>>, vector<1x2x1xf32>
    %7 = vector.shape_cast %6 : vector<1x2x1xf32> to vector<2x1xf32>
    %8 = arith.truncf %7 : vector<2x1xf32> to vector<2x1xbf16>
    %cst_6 = arith.constant dense<0.000000e+00> : vector<64x1xf32>
    %9 = tpu.matmul %5, %8, %cst_6 {dimension_numbers = #tpu.dot_dimension_numbers<[1], [0], [0], [1], [0, 0, 1, 1], [], []>} : vector<64x2xbf16>, vector<2x1xbf16>, vector<64x1xf32> -> vector<64x1xf32>
    %10 = arith.addf %2, %9 : vector<64x1xf32>
    %11 = vector.extract_strided_slice %1 {offsets = [0, 1, 0], sizes = [8, 8, 2], strides = [1, 1, 1]} : vector<14x14x2xf32> to vector<8x8x2xf32>
    %12 = vector.shape_cast %11 : vector<8x8x2xf32> to vector<64x2xf32>
    %13 = arith.truncf %12 : vector<64x2xf32> to vector<64x2xbf16>
    %c1 = arith.constant 1 : index
    %c0_7 = arith.constant 0 : index
    %c0_8 = arith.constant 0 : index
    %14 = vector.load %arg2[%c1, %c0_7, %c0_8] : memref<49x2x1xf32, #tpu.memory_space<vmem>>, vector<1x2x1xf32>
    %15 = vector.shape_cast %14 : vector<1x2x1xf32> to vector<2x1xf32>
    %16 = arith.truncf %15 : vector<2x1xf32> to vector<2x1xbf16>
    %cst_9 = arith.constant dense<0.000000e+00> : vector<64x1xf32>
    %17 = tpu.matmul %13, %16, %cst_9 {dimension_numbers = #tpu.dot_dimension_numbers<[1], [0], [0], [1], [0, 0, 1, 1], [], []>} : vector<64x2xbf16>, vector<2x1xbf16>, vector<64x1xf32> -> vector<64x1xf32>
    %18 = arith.addf %10, %17 : vector<64x1xf32>
    %19 = vector.extract_strided_slice %1 {offsets = [0, 2, 0], sizes = [8, 8, 2], strides = [1, 1, 1]} : vector<14x14x2xf32> to vector<8x8x2xf32>
    %20 = vector.shape_cast %19 : vector<8x8x2xf32> to vector<64x2xf32>
    %21 = arith.truncf %20 : vector<64x2xf32> to vector<64x2xbf16>
    %c2 = arith.constant 2 : index
    %c0_10 = arith.constant 0 : index
    %c0_11 = arith.constant 0 : index
    %22 = vector.load %arg2[%c2, %c0_10, %c0_11] : memref<49x2x1xf32, #tpu.memory_space<vmem>>, vector<1x2x1xf32>
    %23 = vector.shape_cast %22 : vector<1x2x1xf32> to vector<2x1xf32>
    %24 = arith.truncf %23 : vector<2x1xf32> to vector<2x1xbf16>
    %cst_12 = arith.constant dense<0.000000e+00> : vector<64x1xf32>
    %25 = tpu.matmul %21, %24, %cst_12 {dimension_numbers = #tpu.dot_dimension_numbers<[1], [0], [0], [1], [0, 0, 1, 1], [], []>} : vector<64x2xbf16>, vector<2x1xbf16>, vector<64x1xf32> -> vector<64x1xf32>
    %26 = arith.addf %18, %25 : vector<64x1xf32>
    %27 = vector.extract_strided_slice %1 {offsets = [0, 3, 0], sizes = [8, 8, 2], strides = [1, 1, 1]} : vector<14x14x2xf32> to vector<8x8x2xf32>
    %28 = vector.shape_cast %27 : vector<8x8x2xf32> to vector<64x2xf32>
    %29 = arith.truncf %28 : vector<64x2xf32> to vector<64x2xbf16>
    %c3 = arith.constant 3 : index
    %c0_13 = arith.constant 0 : index
    %c0_14 = arith.constant 0 : index
    %30 = vector.load %arg2[%c3, %c0_13, %c0_14] : memref<49x2x1xf32, #tpu.memory_space<vmem>>, vector<1x2x1xf32>
    %31 = vector.shape_cast %30 : vector<1x2x1xf32> to vector<2x1xf32>
    %32 = arith.truncf %31 : vector<2x1xf32> to vector<2x1xbf16>
    %cst_15 = arith.constant dense<0.000000e+00> : vector<64x1xf32>
    %33 = tpu.matmul %29, %32, %cst_15 {dimension_numbers = #tpu.dot_dimension_numbers<[1], [0], [0], [1], [0, 0, 1, 1], [], []>} : vector<64x2xbf16>, vector<2x1xbf16>, vector<64x1xf32> -> vector<64x1xf32>
    %34 = arith.addf %26, %33 : vector<64x1xf32>
    %35 = vector.extract_strided_slice %1 {offsets = [0, 4, 0], sizes = [8, 8, 2], strides = [1, 1, 1]} : vector<14x14x2xf32> to vector<8x8x2xf32>
    %36 = vector.shape_cast %35 : vector<8x8x2xf32> to vector<64x2xf32>
    %37 = arith.truncf %36 : vector<64x2xf32> to vector<64x2xbf16>
    %c4 = arith.constant 4 : index
    %c0_16 = arith.constant 0 : index
    %c0_17 = arith.constant 0 : index
    %38 = vector.load %arg2[%c4, %c0_16, %c0_17] : memref<49x2x1xf32, #tpu.memory_space<vmem>>, vector<1x2x1xf32>
    %39 = vector.shape_cast %38 : vector<1x2x1xf32> to vector<2x1xf32>
    %40 = arith.truncf %39 : vector<2x1xf32> to vector<2x1xbf16>
    %cst_18 = arith.constant dense<0.000000e+00> : vector<64x1xf32>
    %41 = tpu.matmul %37, %40, %cst_18 {dimension_numbers = #tpu.dot_dimension_numbers<[1], [0], [0], [1], [0, 0, 1, 1], [], []>} : vector<64x2xbf16>, vector<2x1xbf16>, vector<64x1xf32> -> vector<64x1xf32>
    %42 = arith.addf %34, %41 : vector<64x1xf32>
    %43 = vector.extract_strided_slice %1 {offsets = [0, 5, 0], sizes = [8, 8, 2], strides = [1, 1, 1]} : vector<14x14x2xf32> to vector<8x8x2xf32>
    %44 = vector.shape_cast %43 : vector<8x8x2xf32> to vector<64x2xf32>
    %45 = arith.truncf %44 : vector<64x2xf32> to vector<64x2xbf16>
    %c5 = arith.constant 5 : index
    %c0_19 = arith.constant 0 : index
    %c0_20 = arith.constant 0 : index
    %46 = vector.load %arg2[%c5, %c0_19, %c0_20] : memref<49x2x1xf32, #tpu.memory_space<vmem>>, vector<1x2x1xf32>
    %47 = vector.shape_cast %46 : vector<1x2x1xf32> to vector<2x1xf32>
    %48 = arith.truncf %47 : vector<2x1xf32> to vector<2x1xbf16>
    %cst_21 = arith.constant dense<0.000000e+00> : vector<64x1xf32>
    %49 = tpu.matmul %45, %48, %cst_21 {dimension_numbers = #tpu.dot_dimension_numbers<[1], [0], [0], [1], [0, 0, 1, 1], [], []>} : vector<64x2xbf16>, vector<2x1xbf16>, vector<64x1xf32> -> vector<64x1xf32>
    %50 = arith.addf %42, %49 : vector<64x1xf32>
    %51 = vector.extract_strided_slice %1 {offsets = [0, 6, 0], sizes = [8, 8, 2], strides = [1, 1, 1]} : vector<14x14x2xf32> to vector<8x8x2xf32>
    %52 = vector.shape_cast %51 : vector<8x8x2xf32> to vector<64x2xf32>
    %53 = arith.truncf %52 : vector<64x2xf32> to vector<64x2xbf16>
    %c6 = arith.constant 6 : index
    %c0_22 = arith.constant 0 : index
    %c0_23 = arith.constant 0 : index
    %54 = vector.load %arg2[%c6, %c0_22, %c0_23] : memref<49x2x1xf32, #tpu.memory_space<vmem>>, vector<1x2x1xf32>
    %55 = vector.shape_cast %54 : vector<1x2x1xf32> to vector<2x1xf32>
    %56 = arith.truncf %55 : vector<2x1xf32> to vector<2x1xbf16>
    %cst_24 = arith.constant dense<0.000000e+00> : vector<64x1xf32>
    %57 = tpu.matmul %53, %56, %cst_24 {dimension_numbers = #tpu.dot_dimension_numbers<[1], [0], [0], [1], [0, 0, 1, 1], [], []>} : vector<64x2xbf16>, vector<2x1xbf16>, vector<64x1xf32> -> vector<64x1xf32>
    %58 = arith.addf %50, %57 : vector<64x1xf32>
    %59 = vector.extract_strided_slice %1 {offsets = [1, 0, 0], sizes = [8, 8, 2], strides = [1, 1, 1]} : vector<14x14x2xf32> to vector<8x8x2xf32>
    %60 = vector.shape_cast %59 : vector<8x8x2xf32> to vector<64x2xf32>
    %61 = arith.truncf %60 : vector<64x2xf32> to vector<64x2xbf16>
    %c7 = arith.constant 7 : index
    %c0_25 = arith.constant 0 : index
    %c0_26 = arith.constant 0 : index
    %62 = vector.load %arg2[%c7, %c0_25, %c0_26] : memref<49x2x1xf32, #tpu.memory_space<vmem>>, vector<1x2x1xf32>
    %63 = vector.shape_cast %62 : vector<1x2x1xf32> to vector<2x1xf32>
    %64 = arith.truncf %63 : vector<2x1xf32> to vector<2x1xbf16>
    %cst_27 = arith.constant dense<0.000000e+00> : vector<64x1xf32>
    %65 = tpu.matmul %61, %64, %cst_27 {dimension_numbers = #tpu.dot_dimension_numbers<[1], [0], [0], [1], [0, 0, 1, 1], [], []>} : vector<64x2xbf16>, vector<2x1xbf16>, vector<64x1xf32> -> vector<64x1xf32>
    %66 = arith.addf %58, %65 : vector<64x1xf32>
    %67 = vector.extract_strided_slice %1 {offsets = [1, 1, 0], sizes = [8, 8, 2], strides = [1, 1, 1]} : vector<14x14x2xf32> to vector<8x8x2xf32>
    %68 = vector.shape_cast %67 : vector<8x8x2xf32> to vector<64x2xf32>
    %69 = arith.truncf %68 : vector<64x2xf32> to vector<64x2xbf16>
    %c8 = arith.constant 8 : index
    %c0_28 = arith.constant 0 : index
    %c0_29 = arith.constant 0 : index
    %70 = vector.load %arg2[%c8, %c0_28, %c0_29] : memref<49x2x1xf32, #tpu.memory_space<vmem>>, vector<1x2x1xf32>
    %71 = vector.shape_cast %70 : vector<1x2x1xf32> to vector<2x1xf32>
    %72 = arith.truncf %71 : vector<2x1xf32> to vector<2x1xbf16>
    %cst_30 = arith.constant dense<0.000000e+00> : vector<64x1xf32>
    %73 = tpu.matmul %69, %72, %cst_30 {dimension_numbers = #tpu.dot_dimension_numbers<[1], [0], [0], [1], [0, 0, 1, 1], [], []>} : vector<64x2xbf16>, vector<2x1xbf16>, vector<64x1xf32> -> vector<64x1xf32>
    %74 = arith.addf %66, %73 : vector<64x1xf32>
    %75 = vector.extract_strided_slice %1 {offsets = [1, 2, 0], sizes = [8, 8, 2], strides = [1, 1, 1]} : vector<14x14x2xf32> to vector<8x8x2xf32>
    %76 = vector.shape_cast %75 : vector<8x8x2xf32> to vector<64x2xf32>
    %77 = arith.truncf %76 : vector<64x2xf32> to vector<64x2xbf16>
    %c9 = arith.constant 9 : index
    %c0_31 = arith.constant 0 : index
    %c0_32 = arith.constant 0 : index
    %78 = vector.load %arg2[%c9, %c0_31, %c0_32] : memref<49x2x1xf32, #tpu.memory_space<vmem>>, vector<1x2x1xf32>
    %79 = vector.shape_cast %78 : vector<1x2x1xf32> to vector<2x1xf32>
    %80 = arith.truncf %79 : vector<2x1xf32> to vector<2x1xbf16>
    %cst_33 = arith.constant dense<0.000000e+00> : vector<64x1xf32>
    %81 = tpu.matmul %77, %80, %cst_33 {dimension_numbers = #tpu.dot_dimension_numbers<[1], [0], [0], [1], [0, 0, 1, 1], [], []>} : vector<64x2xbf16>, vector<2x1xbf16>, vector<64x1xf32> -> vector<64x1xf32>
    %82 = arith.addf %74, %81 : vector<64x1xf32>
    %83 = vector.extract_strided_slice %1 {offsets = [1, 3, 0], sizes = [8, 8, 2], strides = [1, 1, 1]} : vector<14x14x2xf32> to vector<8x8x2xf32>
    %84 = vector.shape_cast %83 : vector<8x8x2xf32> to vector<64x2xf32>
    %85 = arith.truncf %84 : vector<64x2xf32> to vector<64x2xbf16>
    %c10 = arith.constant 10 : index
    %c0_34 = arith.constant 0 : index
    %c0_35 = arith.constant 0 : index
    %86 = vector.load %arg2[%c10, %c0_34, %c0_35] : memref<49x2x1xf32, #tpu.memory_space<vmem>>, vector<1x2x1xf32>
    %87 = vector.shape_cast %86 : vector<1x2x1xf32> to vector<2x1xf32>
    %88 = arith.truncf %87 : vector<2x1xf32> to vector<2x1xbf16>
    %cst_36 = arith.constant dense<0.000000e+00> : vector<64x1xf32>
    %89 = tpu.matmul %85, %88, %cst_36 {dimension_numbers = #tpu.dot_dimension_numbers<[1], [0], [0], [1], [0, 0, 1, 1], [], []>} : vector<64x2xbf16>, vector<2x1xbf16>, vector<64x1xf32> -> vector<64x1xf32>
    %90 = arith.addf %82, %89 : vector<64x1xf32>
    %91 = vector.extract_strided_slice %1 {offsets = [1, 4, 0], sizes = [8, 8, 2], strides = [1, 1, 1]} : vector<14x14x2xf32> to vector<8x8x2xf32>
    %92 = vector.shape_cast %91 : vector<8x8x2xf32> to vector<64x2xf32>
    %93 = arith.truncf %92 : vector<64x2xf32> to vector<64x2xbf16>
    %c11 = arith.constant 11 : index
    %c0_37 = arith.constant 0 : index
    %c0_38 = arith.constant 0 : index
    %94 = vector.load %arg2[%c11, %c0_37, %c0_38] : memref<49x2x1xf32, #tpu.memory_space<vmem>>, vector<1x2x1xf32>
    %95 = vector.shape_cast %94 : vector<1x2x1xf32> to vector<2x1xf32>
    %96 = arith.truncf %95 : vector<2x1xf32> to vector<2x1xbf16>
    %cst_39 = arith.constant dense<0.000000e+00> : vector<64x1xf32>
    %97 = tpu.matmul %93, %96, %cst_39 {dimension_numbers = #tpu.dot_dimension_numbers<[1], [0], [0], [1], [0, 0, 1, 1], [], []>} : vector<64x2xbf16>, vector<2x1xbf16>, vector<64x1xf32> -> vector<64x1xf32>
    %98 = arith.addf %90, %97 : vector<64x1xf32>
    %99 = vector.extract_strided_slice %1 {offsets = [1, 5, 0], sizes = [8, 8, 2], strides = [1, 1, 1]} : vector<14x14x2xf32> to vector<8x8x2xf32>
    %100 = vector.shape_cast %99 : vector<8x8x2xf32> to vector<64x2xf32>
    %101 = arith.truncf %100 : vector<64x2xf32> to vector<64x2xbf16>
    %c12 = arith.constant 12 : index
    %c0_40 = arith.constant 0 : index
    %c0_41 = arith.constant 0 : index
    %102 = vector.load %arg2[%c12, %c0_40, %c0_41] : memref<49x2x1xf32, #tpu.memory_space<vmem>>, vector<1x2x1xf32>
    %103 = vector.shape_cast %102 : vector<1x2x1xf32> to vector<2x1xf32>
    %104 = arith.truncf %103 : vector<2x1xf32> to vector<2x1xbf16>
    %cst_42 = arith.constant dense<0.000000e+00> : vector<64x1xf32>
    %105 = tpu.matmul %101, %104, %cst_42 {dimension_numbers = #tpu.dot_dimension_numbers<[1], [0], [0], [1], [0, 0, 1, 1], [], []>} : vector<64x2xbf16>, vector<2x1xbf16>, vector<64x1xf32> -> vector<64x1xf32>
    %106 = arith.addf %98, %105 : vector<64x1xf32>
    %107 = vector.extract_strided_slice %1 {offsets = [1, 6, 0], sizes = [8, 8, 2], strides = [1, 1, 1]} : vector<14x14x2xf32> to vector<8x8x2xf32>
    %108 = vector.shape_cast %107 : vector<8x8x2xf32> to vector<64x2xf32>
    %109 = arith.truncf %108 : vector<64x2xf32> to vector<64x2xbf16>
    %c13 = arith.constant 13 : index
    %c0_43 = arith.constant 0 : index
    %c0_44 = arith.constant 0 : index
    %110 = vector.load %arg2[%c13, %c0_43, %c0_44] : memref<49x2x1xf32, #tpu.memory_space<vmem>>, vector<1x2x1xf32>
    %111 = vector.shape_cast %110 : vector<1x2x1xf32> to vector<2x1xf32>
    %112 = arith.truncf %111 : vector<2x1xf32> to vector<2x1xbf16>
    %cst_45 = arith.constant dense<0.000000e+00> : vector<64x1xf32>
    %113 = tpu.matmul %109, %112, %cst_45 {dimension_numbers = #tpu.dot_dimension_numbers<[1], [0], [0], [1], [0, 0, 1, 1], [], []>} : vector<64x2xbf16>, vector<2x1xbf16>, vector<64x1xf32> -> vector<64x1xf32>
    %114 = arith.addf %106, %113 : vector<64x1xf32>
    %115 = vector.extract_strided_slice %1 {offsets = [2, 0, 0], sizes = [8, 8, 2], strides = [1, 1, 1]} : vector<14x14x2xf32> to vector<8x8x2xf32>
    %116 = vector.shape_cast %115 : vector<8x8x2xf32> to vector<64x2xf32>
    %117 = arith.truncf %116 : vector<64x2xf32> to vector<64x2xbf16>
    %c14 = arith.constant 14 : index
    %c0_46 = arith.constant 0 : index
    %c0_47 = arith.constant 0 : index
    %118 = vector.load %arg2[%c14, %c0_46, %c0_47] : memref<49x2x1xf32, #tpu.memory_space<vmem>>, vector<1x2x1xf32>
    %119 = vector.shape_cast %118 : vector<1x2x1xf32> to vector<2x1xf32>
    %120 = arith.truncf %119 : vector<2x1xf32> to vector<2x1xbf16>
    %cst_48 = arith.constant dense<0.000000e+00> : vector<64x1xf32>
    %121 = tpu.matmul %117, %120, %cst_48 {dimension_numbers = #tpu.dot_dimension_numbers<[1], [0], [0], [1], [0, 0, 1, 1], [], []>} : vector<64x2xbf16>, vector<2x1xbf16>, vector<64x1xf32> -> vector<64x1xf32>
    %122 = arith.addf %114, %121 : vector<64x1xf32>
    %123 = vector.extract_strided_slice %1 {offsets = [2, 1, 0], sizes = [8, 8, 2], strides = [1, 1, 1]} : vector<14x14x2xf32> to vector<8x8x2xf32>
    %124 = vector.shape_cast %123 : vector<8x8x2xf32> to vector<64x2xf32>
    %125 = arith.truncf %124 : vector<64x2xf32> to vector<64x2xbf16>
    %c15 = arith.constant 15 : index
    %c0_49 = arith.constant 0 : index
    %c0_50 = arith.constant 0 : index
    %126 = vector.load %arg2[%c15, %c0_49, %c0_50] : memref<49x2x1xf32, #tpu.memory_space<vmem>>, vector<1x2x1xf32>
    %127 = vector.shape_cast %126 : vector<1x2x1xf32> to vector<2x1xf32>
    %128 = arith.truncf %127 : vector<2x1xf32> to vector<2x1xbf16>
    %cst_51 = arith.constant dense<0.000000e+00> : vector<64x1xf32>
    %129 = tpu.matmul %125, %128, %cst_51 {dimension_numbers = #tpu.dot_dimension_numbers<[1], [0], [0], [1], [0, 0, 1, 1], [], []>} : vector<64x2xbf16>, vector<2x1xbf16>, vector<64x1xf32> -> vector<64x1xf32>
    %130 = arith.addf %122, %129 : vector<64x1xf32>
    %131 = vector.extract_strided_slice %1 {offsets = [2, 2, 0], sizes = [8, 8, 2], strides = [1, 1, 1]} : vector<14x14x2xf32> to vector<8x8x2xf32>
    %132 = vector.shape_cast %131 : vector<8x8x2xf32> to vector<64x2xf32>
    %133 = arith.truncf %132 : vector<64x2xf32> to vector<64x2xbf16>
    %c16 = arith.constant 16 : index
    %c0_52 = arith.constant 0 : index
    %c0_53 = arith.constant 0 : index
    %134 = vector.load %arg2[%c16, %c0_52, %c0_53] : memref<49x2x1xf32, #tpu.memory_space<vmem>>, vector<1x2x1xf32>
    %135 = vector.shape_cast %134 : vector<1x2x1xf32> to vector<2x1xf32>
    %136 = arith.truncf %135 : vector<2x1xf32> to vector<2x1xbf16>
    %cst_54 = arith.constant dense<0.000000e+00> : vector<64x1xf32>
    %137 = tpu.matmul %133, %136, %cst_54 {dimension_numbers = #tpu.dot_dimension_numbers<[1], [0], [0], [1], [0, 0, 1, 1], [], []>} : vector<64x2xbf16>, vector<2x1xbf16>, vector<64x1xf32> -> vector<64x1xf32>
    %138 = arith.addf %130, %137 : vector<64x1xf32>
    %139 = vector.extract_strided_slice %1 {offsets = [2, 3, 0], sizes = [8, 8, 2], strides = [1, 1, 1]} : vector<14x14x2xf32> to vector<8x8x2xf32>
    %140 = vector.shape_cast %139 : vector<8x8x2xf32> to vector<64x2xf32>
    %141 = arith.truncf %140 : vector<64x2xf32> to vector<64x2xbf16>
    %c17 = arith.constant 17 : index
    %c0_55 = arith.constant 0 : index
    %c0_56 = arith.constant 0 : index
    %142 = vector.load %arg2[%c17, %c0_55, %c0_56] : memref<49x2x1xf32, #tpu.memory_space<vmem>>, vector<1x2x1xf32>
    %143 = vector.shape_cast %142 : vector<1x2x1xf32> to vector<2x1xf32>
    %144 = arith.truncf %143 : vector<2x1xf32> to vector<2x1xbf16>
    %cst_57 = arith.constant dense<0.000000e+00> : vector<64x1xf32>
    %145 = tpu.matmul %141, %144, %cst_57 {dimension_numbers = #tpu.dot_dimension_numbers<[1], [0], [0], [1], [0, 0, 1, 1], [], []>} : vector<64x2xbf16>, vector<2x1xbf16>, vector<64x1xf32> -> vector<64x1xf32>
    %146 = arith.addf %138, %145 : vector<64x1xf32>
    %147 = vector.extract_strided_slice %1 {offsets = [2, 4, 0], sizes = [8, 8, 2], strides = [1, 1, 1]} : vector<14x14x2xf32> to vector<8x8x2xf32>
    %148 = vector.shape_cast %147 : vector<8x8x2xf32> to vector<64x2xf32>
    %149 = arith.truncf %148 : vector<64x2xf32> to vector<64x2xbf16>
    %c18 = arith.constant 18 : index
    %c0_58 = arith.constant 0 : index
    %c0_59 = arith.constant 0 : index
    %150 = vector.load %arg2[%c18, %c0_58, %c0_59] : memref<49x2x1xf32, #tpu.memory_space<vmem>>, vector<1x2x1xf32>
    %151 = vector.shape_cast %150 : vector<1x2x1xf32> to vector<2x1xf32>
    %152 = arith.truncf %151 : vector<2x1xf32> to vector<2x1xbf16>
    %cst_60 = arith.constant dense<0.000000e+00> : vector<64x1xf32>
    %153 = tpu.matmul %149, %152, %cst_60 {dimension_numbers = #tpu.dot_dimension_numbers<[1], [0], [0], [1], [0, 0, 1, 1], [], []>} : vector<64x2xbf16>, vector<2x1xbf16>, vector<64x1xf32> -> vector<64x1xf32>
    %154 = arith.addf %146, %153 : vector<64x1xf32>
    %155 = vector.extract_strided_slice %1 {offsets = [2, 5, 0], sizes = [8, 8, 2], strides = [1, 1, 1]} : vector<14x14x2xf32> to vector<8x8x2xf32>
    %156 = vector.shape_cast %155 : vector<8x8x2xf32> to vector<64x2xf32>
    %157 = arith.truncf %156 : vector<64x2xf32> to vector<64x2xbf16>
    %c19 = arith.constant 19 : index
    %c0_61 = arith.constant 0 : index
    %c0_62 = arith.constant 0 : index
    %158 = vector.load %arg2[%c19, %c0_61, %c0_62] : memref<49x2x1xf32, #tpu.memory_space<vmem>>, vector<1x2x1xf32>
    %159 = vector.shape_cast %158 : vector<1x2x1xf32> to vector<2x1xf32>
    %160 = arith.truncf %159 : vector<2x1xf32> to vector<2x1xbf16>
    %cst_63 = arith.constant dense<0.000000e+00> : vector<64x1xf32>
    %161 = tpu.matmul %157, %160, %cst_63 {dimension_numbers = #tpu.dot_dimension_numbers<[1], [0], [0], [1], [0, 0, 1, 1], [], []>} : vector<64x2xbf16>, vector<2x1xbf16>, vector<64x1xf32> -> vector<64x1xf32>
    %162 = arith.addf %154, %161 : vector<64x1xf32>
    %163 = vector.extract_strided_slice %1 {offsets = [2, 6, 0], sizes = [8, 8, 2], strides = [1, 1, 1]} : vector<14x14x2xf32> to vector<8x8x2xf32>
    %164 = vector.shape_cast %163 : vector<8x8x2xf32> to vector<64x2xf32>
    %165 = arith.truncf %164 : vector<64x2xf32> to vector<64x2xbf16>
    %c20 = arith.constant 20 : index
    %c0_64 = arith.constant 0 : index
    %c0_65 = arith.constant 0 : index
    %166 = vector.load %arg2[%c20, %c0_64, %c0_65] : memref<49x2x1xf32, #tpu.memory_space<vmem>>, vector<1x2x1xf32>
    %167 = vector.shape_cast %166 : vector<1x2x1xf32> to vector<2x1xf32>
    %168 = arith.truncf %167 : vector<2x1xf32> to vector<2x1xbf16>
    %cst_66 = arith.constant dense<0.000000e+00> : vector<64x1xf32>
    %169 = tpu.matmul %165, %168, %cst_66 {dimension_numbers = #tpu.dot_dimension_numbers<[1], [0], [0], [1], [0, 0, 1, 1], [], []>} : vector<64x2xbf16>, vector<2x1xbf16>, vector<64x1xf32> -> vector<64x1xf32>
    %170 = arith.addf %162, %169 : vector<64x1xf32>
    %171 = vector.extract_strided_slice %1 {offsets = [3, 0, 0], sizes = [8, 8, 2], strides = [1, 1, 1]} : vector<14x14x2xf32> to vector<8x8x2xf32>
    %172 = vector.shape_cast %171 : vector<8x8x2xf32> to vector<64x2xf32>
    %173 = arith.truncf %172 : vector<64x2xf32> to vector<64x2xbf16>
    %c21 = arith.constant 21 : index
    %c0_67 = arith.constant 0 : index
    %c0_68 = arith.constant 0 : index
    %174 = vector.load %arg2[%c21, %c0_67, %c0_68] : memref<49x2x1xf32, #tpu.memory_space<vmem>>, vector<1x2x1xf32>
    %175 = vector.shape_cast %174 : vector<1x2x1xf32> to vector<2x1xf32>
    %176 = arith.truncf %175 : vector<2x1xf32> to vector<2x1xbf16>
    %cst_69 = arith.constant dense<0.000000e+00> : vector<64x1xf32>
    %177 = tpu.matmul %173, %176, %cst_69 {dimension_numbers = #tpu.dot_dimension_numbers<[1], [0], [0], [1], [0, 0, 1, 1], [], []>} : vector<64x2xbf16>, vector<2x1xbf16>, vector<64x1xf32> -> vector<64x1xf32>
    %178 = arith.addf %170, %177 : vector<64x1xf32>
    %179 = vector.extract_strided_slice %1 {offsets = [3, 1, 0], sizes = [8, 8, 2], strides = [1, 1, 1]} : vector<14x14x2xf32> to vector<8x8x2xf32>
    %180 = vector.shape_cast %179 : vector<8x8x2xf32> to vector<64x2xf32>
    %181 = arith.truncf %180 : vector<64x2xf32> to vector<64x2xbf16>
    %c22 = arith.constant 22 : index
    %c0_70 = arith.constant 0 : index
    %c0_71 = arith.constant 0 : index
    %182 = vector.load %arg2[%c22, %c0_70, %c0_71] : memref<49x2x1xf32, #tpu.memory_space<vmem>>, vector<1x2x1xf32>
    %183 = vector.shape_cast %182 : vector<1x2x1xf32> to vector<2x1xf32>
    %184 = arith.truncf %183 : vector<2x1xf32> to vector<2x1xbf16>
    %cst_72 = arith.constant dense<0.000000e+00> : vector<64x1xf32>
    %185 = tpu.matmul %181, %184, %cst_72 {dimension_numbers = #tpu.dot_dimension_numbers<[1], [0], [0], [1], [0, 0, 1, 1], [], []>} : vector<64x2xbf16>, vector<2x1xbf16>, vector<64x1xf32> -> vector<64x1xf32>
    %186 = arith.addf %178, %185 : vector<64x1xf32>
    %187 = vector.extract_strided_slice %1 {offsets = [3, 2, 0], sizes = [8, 8, 2], strides = [1, 1, 1]} : vector<14x14x2xf32> to vector<8x8x2xf32>
    %188 = vector.shape_cast %187 : vector<8x8x2xf32> to vector<64x2xf32>
    %189 = arith.truncf %188 : vector<64x2xf32> to vector<64x2xbf16>
    %c23 = arith.constant 23 : index
    %c0_73 = arith.constant 0 : index
    %c0_74 = arith.constant 0 : index
    %190 = vector.load %arg2[%c23, %c0_73, %c0_74] : memref<49x2x1xf32, #tpu.memory_space<vmem>>, vector<1x2x1xf32>
    %191 = vector.shape_cast %190 : vector<1x2x1xf32> to vector<2x1xf32>
    %192 = arith.truncf %191 : vector<2x1xf32> to vector<2x1xbf16>
    %cst_75 = arith.constant dense<0.000000e+00> : vector<64x1xf32>
    %193 = tpu.matmul %189, %192, %cst_75 {dimension_numbers = #tpu.dot_dimension_numbers<[1], [0], [0], [1], [0, 0, 1, 1], [], []>} : vector<64x2xbf16>, vector<2x1xbf16>, vector<64x1xf32> -> vector<64x1xf32>
    %194 = arith.addf %186, %193 : vector<64x1xf32>
    %195 = vector.extract_strided_slice %1 {offsets = [3, 3, 0], sizes = [8, 8, 2], strides = [1, 1, 1]} : vector<14x14x2xf32> to vector<8x8x2xf32>
    %196 = vector.shape_cast %195 : vector<8x8x2xf32> to vector<64x2xf32>
    %197 = arith.truncf %196 : vector<64x2xf32> to vector<64x2xbf16>
    %c24 = arith.constant 24 : index
    %c0_76 = arith.constant 0 : index
    %c0_77 = arith.constant 0 : index
    %198 = vector.load %arg2[%c24, %c0_76, %c0_77] : memref<49x2x1xf32, #tpu.memory_space<vmem>>, vector<1x2x1xf32>
    %199 = vector.shape_cast %198 : vector<1x2x1xf32> to vector<2x1xf32>
    %200 = arith.truncf %199 : vector<2x1xf32> to vector<2x1xbf16>
    %cst_78 = arith.constant dense<0.000000e+00> : vector<64x1xf32>
    %201 = tpu.matmul %197, %200, %cst_78 {dimension_numbers = #tpu.dot_dimension_numbers<[1], [0], [0], [1], [0, 0, 1, 1], [], []>} : vector<64x2xbf16>, vector<2x1xbf16>, vector<64x1xf32> -> vector<64x1xf32>
    %202 = arith.addf %194, %201 : vector<64x1xf32>
    %203 = vector.extract_strided_slice %1 {offsets = [3, 4, 0], sizes = [8, 8, 2], strides = [1, 1, 1]} : vector<14x14x2xf32> to vector<8x8x2xf32>
    %204 = vector.shape_cast %203 : vector<8x8x2xf32> to vector<64x2xf32>
    %205 = arith.truncf %204 : vector<64x2xf32> to vector<64x2xbf16>
    %c25 = arith.constant 25 : index
    %c0_79 = arith.constant 0 : index
    %c0_80 = arith.constant 0 : index
    %206 = vector.load %arg2[%c25, %c0_79, %c0_80] : memref<49x2x1xf32, #tpu.memory_space<vmem>>, vector<1x2x1xf32>
    %207 = vector.shape_cast %206 : vector<1x2x1xf32> to vector<2x1xf32>
    %208 = arith.truncf %207 : vector<2x1xf32> to vector<2x1xbf16>
    %cst_81 = arith.constant dense<0.000000e+00> : vector<64x1xf32>
    %209 = tpu.matmul %205, %208, %cst_81 {dimension_numbers = #tpu.dot_dimension_numbers<[1], [0], [0], [1], [0, 0, 1, 1], [], []>} : vector<64x2xbf16>, vector<2x1xbf16>, vector<64x1xf32> -> vector<64x1xf32>
    %210 = arith.addf %202, %209 : vector<64x1xf32>
    %211 = vector.extract_strided_slice %1 {offsets = [3, 5, 0], sizes = [8, 8, 2], strides = [1, 1, 1]} : vector<14x14x2xf32> to vector<8x8x2xf32>
    %212 = vector.shape_cast %211 : vector<8x8x2xf32> to vector<64x2xf32>
    %213 = arith.truncf %212 : vector<64x2xf32> to vector<64x2xbf16>
    %c26 = arith.constant 26 : index
    %c0_82 = arith.constant 0 : index
    %c0_83 = arith.constant 0 : index
    %214 = vector.load %arg2[%c26, %c0_82, %c0_83] : memref<49x2x1xf32, #tpu.memory_space<vmem>>, vector<1x2x1xf32>
    %215 = vector.shape_cast %214 : vector<1x2x1xf32> to vector<2x1xf32>
    %216 = arith.truncf %215 : vector<2x1xf32> to vector<2x1xbf16>
    %cst_84 = arith.constant dense<0.000000e+00> : vector<64x1xf32>
    %217 = tpu.matmul %213, %216, %cst_84 {dimension_numbers = #tpu.dot_dimension_numbers<[1], [0], [0], [1], [0, 0, 1, 1], [], []>} : vector<64x2xbf16>, vector<2x1xbf16>, vector<64x1xf32> -> vector<64x1xf32>
    %218 = arith.addf %210, %217 : vector<64x1xf32>
    %219 = vector.extract_strided_slice %1 {offsets = [3, 6, 0], sizes = [8, 8, 2], strides = [1, 1, 1]} : vector<14x14x2xf32> to vector<8x8x2xf32>
    %220 = vector.shape_cast %219 : vector<8x8x2xf32> to vector<64x2xf32>
    %221 = arith.truncf %220 : vector<64x2xf32> to vector<64x2xbf16>
    %c27 = arith.constant 27 : index
    %c0_85 = arith.constant 0 : index
    %c0_86 = arith.constant 0 : index
    %222 = vector.load %arg2[%c27, %c0_85, %c0_86] : memref<49x2x1xf32, #tpu.memory_space<vmem>>, vector<1x2x1xf32>
    %223 = vector.shape_cast %222 : vector<1x2x1xf32> to vector<2x1xf32>
    %224 = arith.truncf %223 : vector<2x1xf32> to vector<2x1xbf16>
    %cst_87 = arith.constant dense<0.000000e+00> : vector<64x1xf32>
    %225 = tpu.matmul %221, %224, %cst_87 {dimension_numbers = #tpu.dot_dimension_numbers<[1], [0], [0], [1], [0, 0, 1, 1], [], []>} : vector<64x2xbf16>, vector<2x1xbf16>, vector<64x1xf32> -> vector<64x1xf32>
    %226 = arith.addf %218, %225 : vector<64x1xf32>
    %227 = vector.extract_strided_slice %1 {offsets = [4, 0, 0], sizes = [8, 8, 2], strides = [1, 1, 1]} : vector<14x14x2xf32> to vector<8x8x2xf32>
    %228 = vector.shape_cast %227 : vector<8x8x2xf32> to vector<64x2xf32>
    %229 = arith.truncf %228 : vector<64x2xf32> to vector<64x2xbf16>
    %c28 = arith.constant 28 : index
    %c0_88 = arith.constant 0 : index
    %c0_89 = arith.constant 0 : index
    %230 = vector.load %arg2[%c28, %c0_88, %c0_89] : memref<49x2x1xf32, #tpu.memory_space<vmem>>, vector<1x2x1xf32>
    %231 = vector.shape_cast %230 : vector<1x2x1xf32> to vector<2x1xf32>
    %232 = arith.truncf %231 : vector<2x1xf32> to vector<2x1xbf16>
    %cst_90 = arith.constant dense<0.000000e+00> : vector<64x1xf32>
    %233 = tpu.matmul %229, %232, %cst_90 {dimension_numbers = #tpu.dot_dimension_numbers<[1], [0], [0], [1], [0, 0, 1, 1], [], []>} : vector<64x2xbf16>, vector<2x1xbf16>, vector<64x1xf32> -> vector<64x1xf32>
    %234 = arith.addf %226, %233 : vector<64x1xf32>
    %235 = vector.extract_strided_slice %1 {offsets = [4, 1, 0], sizes = [8, 8, 2], strides = [1, 1, 1]} : vector<14x14x2xf32> to vector<8x8x2xf32>
    %236 = vector.shape_cast %235 : vector<8x8x2xf32> to vector<64x2xf32>
    %237 = arith.truncf %236 : vector<64x2xf32> to vector<64x2xbf16>
    %c29 = arith.constant 29 : index
    %c0_91 = arith.constant 0 : index
    %c0_92 = arith.constant 0 : index
    %238 = vector.load %arg2[%c29, %c0_91, %c0_92] : memref<49x2x1xf32, #tpu.memory_space<vmem>>, vector<1x2x1xf32>
    %239 = vector.shape_cast %238 : vector<1x2x1xf32> to vector<2x1xf32>
    %240 = arith.truncf %239 : vector<2x1xf32> to vector<2x1xbf16>
    %cst_93 = arith.constant dense<0.000000e+00> : vector<64x1xf32>
    %241 = tpu.matmul %237, %240, %cst_93 {dimension_numbers = #tpu.dot_dimension_numbers<[1], [0], [0], [1], [0, 0, 1, 1], [], []>} : vector<64x2xbf16>, vector<2x1xbf16>, vector<64x1xf32> -> vector<64x1xf32>
    %242 = arith.addf %234, %241 : vector<64x1xf32>
    %243 = vector.extract_strided_slice %1 {offsets = [4, 2, 0], sizes = [8, 8, 2], strides = [1, 1, 1]} : vector<14x14x2xf32> to vector<8x8x2xf32>
    %244 = vector.shape_cast %243 : vector<8x8x2xf32> to vector<64x2xf32>
    %245 = arith.truncf %244 : vector<64x2xf32> to vector<64x2xbf16>
    %c30 = arith.constant 30 : index
    %c0_94 = arith.constant 0 : index
    %c0_95 = arith.constant 0 : index
    %246 = vector.load %arg2[%c30, %c0_94, %c0_95] : memref<49x2x1xf32, #tpu.memory_space<vmem>>, vector<1x2x1xf32>
    %247 = vector.shape_cast %246 : vector<1x2x1xf32> to vector<2x1xf32>
    %248 = arith.truncf %247 : vector<2x1xf32> to vector<2x1xbf16>
    %cst_96 = arith.constant dense<0.000000e+00> : vector<64x1xf32>
    %249 = tpu.matmul %245, %248, %cst_96 {dimension_numbers = #tpu.dot_dimension_numbers<[1], [0], [0], [1], [0, 0, 1, 1], [], []>} : vector<64x2xbf16>, vector<2x1xbf16>, vector<64x1xf32> -> vector<64x1xf32>
    %250 = arith.addf %242, %249 : vector<64x1xf32>
    %251 = vector.extract_strided_slice %1 {offsets = [4, 3, 0], sizes = [8, 8, 2], strides = [1, 1, 1]} : vector<14x14x2xf32> to vector<8x8x2xf32>
    %252 = vector.shape_cast %251 : vector<8x8x2xf32> to vector<64x2xf32>
    %253 = arith.truncf %252 : vector<64x2xf32> to vector<64x2xbf16>
    %c31 = arith.constant 31 : index
    %c0_97 = arith.constant 0 : index
    %c0_98 = arith.constant 0 : index
    %254 = vector.load %arg2[%c31, %c0_97, %c0_98] : memref<49x2x1xf32, #tpu.memory_space<vmem>>, vector<1x2x1xf32>
    %255 = vector.shape_cast %254 : vector<1x2x1xf32> to vector<2x1xf32>
    %256 = arith.truncf %255 : vector<2x1xf32> to vector<2x1xbf16>
    %cst_99 = arith.constant dense<0.000000e+00> : vector<64x1xf32>
    %257 = tpu.matmul %253, %256, %cst_99 {dimension_numbers = #tpu.dot_dimension_numbers<[1], [0], [0], [1], [0, 0, 1, 1], [], []>} : vector<64x2xbf16>, vector<2x1xbf16>, vector<64x1xf32> -> vector<64x1xf32>
    %258 = arith.addf %250, %257 : vector<64x1xf32>
    %259 = vector.extract_strided_slice %1 {offsets = [4, 4, 0], sizes = [8, 8, 2], strides = [1, 1, 1]} : vector<14x14x2xf32> to vector<8x8x2xf32>
    %260 = vector.shape_cast %259 : vector<8x8x2xf32> to vector<64x2xf32>
    %261 = arith.truncf %260 : vector<64x2xf32> to vector<64x2xbf16>
    %c32 = arith.constant 32 : index
    %c0_100 = arith.constant 0 : index
    %c0_101 = arith.constant 0 : index
    %262 = vector.load %arg2[%c32, %c0_100, %c0_101] : memref<49x2x1xf32, #tpu.memory_space<vmem>>, vector<1x2x1xf32>
    %263 = vector.shape_cast %262 : vector<1x2x1xf32> to vector<2x1xf32>
    %264 = arith.truncf %263 : vector<2x1xf32> to vector<2x1xbf16>
    %cst_102 = arith.constant dense<0.000000e+00> : vector<64x1xf32>
    %265 = tpu.matmul %261, %264, %cst_102 {dimension_numbers = #tpu.dot_dimension_numbers<[1], [0], [0], [1], [0, 0, 1, 1], [], []>} : vector<64x2xbf16>, vector<2x1xbf16>, vector<64x1xf32> -> vector<64x1xf32>
    %266 = arith.addf %258, %265 : vector<64x1xf32>
    %267 = vector.extract_strided_slice %1 {offsets = [4, 5, 0], sizes = [8, 8, 2], strides = [1, 1, 1]} : vector<14x14x2xf32> to vector<8x8x2xf32>
    %268 = vector.shape_cast %267 : vector<8x8x2xf32> to vector<64x2xf32>
    %269 = arith.truncf %268 : vector<64x2xf32> to vector<64x2xbf16>
    %c33 = arith.constant 33 : index
    %c0_103 = arith.constant 0 : index
    %c0_104 = arith.constant 0 : index
    %270 = vector.load %arg2[%c33, %c0_103, %c0_104] : memref<49x2x1xf32, #tpu.memory_space<vmem>>, vector<1x2x1xf32>
    %271 = vector.shape_cast %270 : vector<1x2x1xf32> to vector<2x1xf32>
    %272 = arith.truncf %271 : vector<2x1xf32> to vector<2x1xbf16>
    %cst_105 = arith.constant dense<0.000000e+00> : vector<64x1xf32>
    %273 = tpu.matmul %269, %272, %cst_105 {dimension_numbers = #tpu.dot_dimension_numbers<[1], [0], [0], [1], [0, 0, 1, 1], [], []>} : vector<64x2xbf16>, vector<2x1xbf16>, vector<64x1xf32> -> vector<64x1xf32>
    %274 = arith.addf %266, %273 : vector<64x1xf32>
    %275 = vector.extract_strided_slice %1 {offsets = [4, 6, 0], sizes = [8, 8, 2], strides = [1, 1, 1]} : vector<14x14x2xf32> to vector<8x8x2xf32>
    %276 = vector.shape_cast %275 : vector<8x8x2xf32> to vector<64x2xf32>
    %277 = arith.truncf %276 : vector<64x2xf32> to vector<64x2xbf16>
    %c34 = arith.constant 34 : index
    %c0_106 = arith.constant 0 : index
    %c0_107 = arith.constant 0 : index
    %278 = vector.load %arg2[%c34, %c0_106, %c0_107] : memref<49x2x1xf32, #tpu.memory_space<vmem>>, vector<1x2x1xf32>
    %279 = vector.shape_cast %278 : vector<1x2x1xf32> to vector<2x1xf32>
    %280 = arith.truncf %279 : vector<2x1xf32> to vector<2x1xbf16>
    %cst_108 = arith.constant dense<0.000000e+00> : vector<64x1xf32>
    %281 = tpu.matmul %277, %280, %cst_108 {dimension_numbers = #tpu.dot_dimension_numbers<[1], [0], [0], [1], [0, 0, 1, 1], [], []>} : vector<64x2xbf16>, vector<2x1xbf16>, vector<64x1xf32> -> vector<64x1xf32>
    %282 = arith.addf %274, %281 : vector<64x1xf32>
    %283 = vector.extract_strided_slice %1 {offsets = [5, 0, 0], sizes = [8, 8, 2], strides = [1, 1, 1]} : vector<14x14x2xf32> to vector<8x8x2xf32>
    %284 = vector.shape_cast %283 : vector<8x8x2xf32> to vector<64x2xf32>
    %285 = arith.truncf %284 : vector<64x2xf32> to vector<64x2xbf16>
    %c35 = arith.constant 35 : index
    %c0_109 = arith.constant 0 : index
    %c0_110 = arith.constant 0 : index
    %286 = vector.load %arg2[%c35, %c0_109, %c0_110] : memref<49x2x1xf32, #tpu.memory_space<vmem>>, vector<1x2x1xf32>
    %287 = vector.shape_cast %286 : vector<1x2x1xf32> to vector<2x1xf32>
    %288 = arith.truncf %287 : vector<2x1xf32> to vector<2x1xbf16>
    %cst_111 = arith.constant dense<0.000000e+00> : vector<64x1xf32>
    %289 = tpu.matmul %285, %288, %cst_111 {dimension_numbers = #tpu.dot_dimension_numbers<[1], [0], [0], [1], [0, 0, 1, 1], [], []>} : vector<64x2xbf16>, vector<2x1xbf16>, vector<64x1xf32> -> vector<64x1xf32>
    %290 = arith.addf %282, %289 : vector<64x1xf32>
    %291 = vector.extract_strided_slice %1 {offsets = [5, 1, 0], sizes = [8, 8, 2], strides = [1, 1, 1]} : vector<14x14x2xf32> to vector<8x8x2xf32>
    %292 = vector.shape_cast %291 : vector<8x8x2xf32> to vector<64x2xf32>
    %293 = arith.truncf %292 : vector<64x2xf32> to vector<64x2xbf16>
    %c36 = arith.constant 36 : index
    %c0_112 = arith.constant 0 : index
    %c0_113 = arith.constant 0 : index
    %294 = vector.load %arg2[%c36, %c0_112, %c0_113] : memref<49x2x1xf32, #tpu.memory_space<vmem>>, vector<1x2x1xf32>
    %295 = vector.shape_cast %294 : vector<1x2x1xf32> to vector<2x1xf32>
    %296 = arith.truncf %295 : vector<2x1xf32> to vector<2x1xbf16>
    %cst_114 = arith.constant dense<0.000000e+00> : vector<64x1xf32>
    %297 = tpu.matmul %293, %296, %cst_114 {dimension_numbers = #tpu.dot_dimension_numbers<[1], [0], [0], [1], [0, 0, 1, 1], [], []>} : vector<64x2xbf16>, vector<2x1xbf16>, vector<64x1xf32> -> vector<64x1xf32>
    %298 = arith.addf %290, %297 : vector<64x1xf32>
    %299 = vector.extract_strided_slice %1 {offsets = [5, 2, 0], sizes = [8, 8, 2], strides = [1, 1, 1]} : vector<14x14x2xf32> to vector<8x8x2xf32>
    %300 = vector.shape_cast %299 : vector<8x8x2xf32> to vector<64x2xf32>
    %301 = arith.truncf %300 : vector<64x2xf32> to vector<64x2xbf16>
    %c37 = arith.constant 37 : index
    %c0_115 = arith.constant 0 : index
    %c0_116 = arith.constant 0 : index
    %302 = vector.load %arg2[%c37, %c0_115, %c0_116] : memref<49x2x1xf32, #tpu.memory_space<vmem>>, vector<1x2x1xf32>
    %303 = vector.shape_cast %302 : vector<1x2x1xf32> to vector<2x1xf32>
    %304 = arith.truncf %303 : vector<2x1xf32> to vector<2x1xbf16>
    %cst_117 = arith.constant dense<0.000000e+00> : vector<64x1xf32>
    %305 = tpu.matmul %301, %304, %cst_117 {dimension_numbers = #tpu.dot_dimension_numbers<[1], [0], [0], [1], [0, 0, 1, 1], [], []>} : vector<64x2xbf16>, vector<2x1xbf16>, vector<64x1xf32> -> vector<64x1xf32>
    %306 = arith.addf %298, %305 : vector<64x1xf32>
    %307 = vector.extract_strided_slice %1 {offsets = [5, 3, 0], sizes = [8, 8, 2], strides = [1, 1, 1]} : vector<14x14x2xf32> to vector<8x8x2xf32>
    %308 = vector.shape_cast %307 : vector<8x8x2xf32> to vector<64x2xf32>
    %309 = arith.truncf %308 : vector<64x2xf32> to vector<64x2xbf16>
    %c38 = arith.constant 38 : index
    %c0_118 = arith.constant 0 : index
    %c0_119 = arith.constant 0 : index
    %310 = vector.load %arg2[%c38, %c0_118, %c0_119] : memref<49x2x1xf32, #tpu.memory_space<vmem>>, vector<1x2x1xf32>
    %311 = vector.shape_cast %310 : vector<1x2x1xf32> to vector<2x1xf32>
    %312 = arith.truncf %311 : vector<2x1xf32> to vector<2x1xbf16>
    %cst_120 = arith.constant dense<0.000000e+00> : vector<64x1xf32>
    %313 = tpu.matmul %309, %312, %cst_120 {dimension_numbers = #tpu.dot_dimension_numbers<[1], [0], [0], [1], [0, 0, 1, 1], [], []>} : vector<64x2xbf16>, vector<2x1xbf16>, vector<64x1xf32> -> vector<64x1xf32>
    %314 = arith.addf %306, %313 : vector<64x1xf32>
    %315 = vector.extract_strided_slice %1 {offsets = [5, 4, 0], sizes = [8, 8, 2], strides = [1, 1, 1]} : vector<14x14x2xf32> to vector<8x8x2xf32>
    %316 = vector.shape_cast %315 : vector<8x8x2xf32> to vector<64x2xf32>
    %317 = arith.truncf %316 : vector<64x2xf32> to vector<64x2xbf16>
    %c39 = arith.constant 39 : index
    %c0_121 = arith.constant 0 : index
    %c0_122 = arith.constant 0 : index
    %318 = vector.load %arg2[%c39, %c0_121, %c0_122] : memref<49x2x1xf32, #tpu.memory_space<vmem>>, vector<1x2x1xf32>
    %319 = vector.shape_cast %318 : vector<1x2x1xf32> to vector<2x1xf32>
    %320 = arith.truncf %319 : vector<2x1xf32> to vector<2x1xbf16>
    %cst_123 = arith.constant dense<0.000000e+00> : vector<64x1xf32>
    %321 = tpu.matmul %317, %320, %cst_123 {dimension_numbers = #tpu.dot_dimension_numbers<[1], [0], [0], [1], [0, 0, 1, 1], [], []>} : vector<64x2xbf16>, vector<2x1xbf16>, vector<64x1xf32> -> vector<64x1xf32>
    %322 = arith.addf %314, %321 : vector<64x1xf32>
    %323 = vector.extract_strided_slice %1 {offsets = [5, 5, 0], sizes = [8, 8, 2], strides = [1, 1, 1]} : vector<14x14x2xf32> to vector<8x8x2xf32>
    %324 = vector.shape_cast %323 : vector<8x8x2xf32> to vector<64x2xf32>
    %325 = arith.truncf %324 : vector<64x2xf32> to vector<64x2xbf16>
    %c40 = arith.constant 40 : index
    %c0_124 = arith.constant 0 : index
    %c0_125 = arith.constant 0 : index
    %326 = vector.load %arg2[%c40, %c0_124, %c0_125] : memref<49x2x1xf32, #tpu.memory_space<vmem>>, vector<1x2x1xf32>
    %327 = vector.shape_cast %326 : vector<1x2x1xf32> to vector<2x1xf32>
    %328 = arith.truncf %327 : vector<2x1xf32> to vector<2x1xbf16>
    %cst_126 = arith.constant dense<0.000000e+00> : vector<64x1xf32>
    %329 = tpu.matmul %325, %328, %cst_126 {dimension_numbers = #tpu.dot_dimension_numbers<[1], [0], [0], [1], [0, 0, 1, 1], [], []>} : vector<64x2xbf16>, vector<2x1xbf16>, vector<64x1xf32> -> vector<64x1xf32>
    %330 = arith.addf %322, %329 : vector<64x1xf32>
    %331 = vector.extract_strided_slice %1 {offsets = [5, 6, 0], sizes = [8, 8, 2], strides = [1, 1, 1]} : vector<14x14x2xf32> to vector<8x8x2xf32>
    %332 = vector.shape_cast %331 : vector<8x8x2xf32> to vector<64x2xf32>
    %333 = arith.truncf %332 : vector<64x2xf32> to vector<64x2xbf16>
    %c41 = arith.constant 41 : index
    %c0_127 = arith.constant 0 : index
    %c0_128 = arith.constant 0 : index
    %334 = vector.load %arg2[%c41, %c0_127, %c0_128] : memref<49x2x1xf32, #tpu.memory_space<vmem>>, vector<1x2x1xf32>
    %335 = vector.shape_cast %334 : vector<1x2x1xf32> to vector<2x1xf32>
    %336 = arith.truncf %335 : vector<2x1xf32> to vector<2x1xbf16>
    %cst_129 = arith.constant dense<0.000000e+00> : vector<64x1xf32>
    %337 = tpu.matmul %333, %336, %cst_129 {dimension_numbers = #tpu.dot_dimension_numbers<[1], [0], [0], [1], [0, 0, 1, 1], [], []>} : vector<64x2xbf16>, vector<2x1xbf16>, vector<64x1xf32> -> vector<64x1xf32>
    %338 = arith.addf %330, %337 : vector<64x1xf32>
    %339 = vector.extract_strided_slice %1 {offsets = [6, 0, 0], sizes = [8, 8, 2], strides = [1, 1, 1]} : vector<14x14x2xf32> to vector<8x8x2xf32>
    %340 = vector.shape_cast %339 : vector<8x8x2xf32> to vector<64x2xf32>
    %341 = arith.truncf %340 : vector<64x2xf32> to vector<64x2xbf16>
    %c42 = arith.constant 42 : index
    %c0_130 = arith.constant 0 : index
    %c0_131 = arith.constant 0 : index
    %342 = vector.load %arg2[%c42, %c0_130, %c0_131] : memref<49x2x1xf32, #tpu.memory_space<vmem>>, vector<1x2x1xf32>
    %343 = vector.shape_cast %342 : vector<1x2x1xf32> to vector<2x1xf32>
    %344 = arith.truncf %343 : vector<2x1xf32> to vector<2x1xbf16>
    %cst_132 = arith.constant dense<0.000000e+00> : vector<64x1xf32>
    %345 = tpu.matmul %341, %344, %cst_132 {dimension_numbers = #tpu.dot_dimension_numbers<[1], [0], [0], [1], [0, 0, 1, 1], [], []>} : vector<64x2xbf16>, vector<2x1xbf16>, vector<64x1xf32> -> vector<64x1xf32>
    %346 = arith.addf %338, %345 : vector<64x1xf32>
    %347 = vector.extract_strided_slice %1 {offsets = [6, 1, 0], sizes = [8, 8, 2], strides = [1, 1, 1]} : vector<14x14x2xf32> to vector<8x8x2xf32>
    %348 = vector.shape_cast %347 : vector<8x8x2xf32> to vector<64x2xf32>
    %349 = arith.truncf %348 : vector<64x2xf32> to vector<64x2xbf16>
    %c43 = arith.constant 43 : index
    %c0_133 = arith.constant 0 : index
    %c0_134 = arith.constant 0 : index
    %350 = vector.load %arg2[%c43, %c0_133, %c0_134] : memref<49x2x1xf32, #tpu.memory_space<vmem>>, vector<1x2x1xf32>
    %351 = vector.shape_cast %350 : vector<1x2x1xf32> to vector<2x1xf32>
    %352 = arith.truncf %351 : vector<2x1xf32> to vector<2x1xbf16>
    %cst_135 = arith.constant dense<0.000000e+00> : vector<64x1xf32>
    %353 = tpu.matmul %349, %352, %cst_135 {dimension_numbers = #tpu.dot_dimension_numbers<[1], [0], [0], [1], [0, 0, 1, 1], [], []>} : vector<64x2xbf16>, vector<2x1xbf16>, vector<64x1xf32> -> vector<64x1xf32>
    %354 = arith.addf %346, %353 : vector<64x1xf32>
    %355 = vector.extract_strided_slice %1 {offsets = [6, 2, 0], sizes = [8, 8, 2], strides = [1, 1, 1]} : vector<14x14x2xf32> to vector<8x8x2xf32>
    %356 = vector.shape_cast %355 : vector<8x8x2xf32> to vector<64x2xf32>
    %357 = arith.truncf %356 : vector<64x2xf32> to vector<64x2xbf16>
    %c44 = arith.constant 44 : index
    %c0_136 = arith.constant 0 : index
    %c0_137 = arith.constant 0 : index
    %358 = vector.load %arg2[%c44, %c0_136, %c0_137] : memref<49x2x1xf32, #tpu.memory_space<vmem>>, vector<1x2x1xf32>
    %359 = vector.shape_cast %358 : vector<1x2x1xf32> to vector<2x1xf32>
    %360 = arith.truncf %359 : vector<2x1xf32> to vector<2x1xbf16>
    %cst_138 = arith.constant dense<0.000000e+00> : vector<64x1xf32>
    %361 = tpu.matmul %357, %360, %cst_138 {dimension_numbers = #tpu.dot_dimension_numbers<[1], [0], [0], [1], [0, 0, 1, 1], [], []>} : vector<64x2xbf16>, vector<2x1xbf16>, vector<64x1xf32> -> vector<64x1xf32>
    %362 = arith.addf %354, %361 : vector<64x1xf32>
    %363 = vector.extract_strided_slice %1 {offsets = [6, 3, 0], sizes = [8, 8, 2], strides = [1, 1, 1]} : vector<14x14x2xf32> to vector<8x8x2xf32>
    %364 = vector.shape_cast %363 : vector<8x8x2xf32> to vector<64x2xf32>
    %365 = arith.truncf %364 : vector<64x2xf32> to vector<64x2xbf16>
    %c45 = arith.constant 45 : index
    %c0_139 = arith.constant 0 : index
    %c0_140 = arith.constant 0 : index
    %366 = vector.load %arg2[%c45, %c0_139, %c0_140] : memref<49x2x1xf32, #tpu.memory_space<vmem>>, vector<1x2x1xf32>
    %367 = vector.shape_cast %366 : vector<1x2x1xf32> to vector<2x1xf32>
    %368 = arith.truncf %367 : vector<2x1xf32> to vector<2x1xbf16>
    %cst_141 = arith.constant dense<0.000000e+00> : vector<64x1xf32>
    %369 = tpu.matmul %365, %368, %cst_141 {dimension_numbers = #tpu.dot_dimension_numbers<[1], [0], [0], [1], [0, 0, 1, 1], [], []>} : vector<64x2xbf16>, vector<2x1xbf16>, vector<64x1xf32> -> vector<64x1xf32>
    %370 = arith.addf %362, %369 : vector<64x1xf32>
    %371 = vector.extract_strided_slice %1 {offsets = [6, 4, 0], sizes = [8, 8, 2], strides = [1, 1, 1]} : vector<14x14x2xf32> to vector<8x8x2xf32>
    %372 = vector.shape_cast %371 : vector<8x8x2xf32> to vector<64x2xf32>
    %373 = arith.truncf %372 : vector<64x2xf32> to vector<64x2xbf16>
    %c46 = arith.constant 46 : index
    %c0_142 = arith.constant 0 : index
    %c0_143 = arith.constant 0 : index
    %374 = vector.load %arg2[%c46, %c0_142, %c0_143] : memref<49x2x1xf32, #tpu.memory_space<vmem>>, vector<1x2x1xf32>
    %375 = vector.shape_cast %374 : vector<1x2x1xf32> to vector<2x1xf32>
    %376 = arith.truncf %375 : vector<2x1xf32> to vector<2x1xbf16>
    %cst_144 = arith.constant dense<0.000000e+00> : vector<64x1xf32>
    %377 = tpu.matmul %373, %376, %cst_144 {dimension_numbers = #tpu.dot_dimension_numbers<[1], [0], [0], [1], [0, 0, 1, 1], [], []>} : vector<64x2xbf16>, vector<2x1xbf16>, vector<64x1xf32> -> vector<64x1xf32>
    %378 = arith.addf %370, %377 : vector<64x1xf32>
    %379 = vector.extract_strided_slice %1 {offsets = [6, 5, 0], sizes = [8, 8, 2], strides = [1, 1, 1]} : vector<14x14x2xf32> to vector<8x8x2xf32>
    %380 = vector.shape_cast %379 : vector<8x8x2xf32> to vector<64x2xf32>
    %381 = arith.truncf %380 : vector<64x2xf32> to vector<64x2xbf16>
    %c47 = arith.constant 47 : index
    %c0_145 = arith.constant 0 : index
    %c0_146 = arith.constant 0 : index
    %382 = vector.load %arg2[%c47, %c0_145, %c0_146] : memref<49x2x1xf32, #tpu.memory_space<vmem>>, vector<1x2x1xf32>
    %383 = vector.shape_cast %382 : vector<1x2x1xf32> to vector<2x1xf32>
    %384 = arith.truncf %383 : vector<2x1xf32> to vector<2x1xbf16>
    %cst_147 = arith.constant dense<0.000000e+00> : vector<64x1xf32>
    %385 = tpu.matmul %381, %384, %cst_147 {dimension_numbers = #tpu.dot_dimension_numbers<[1], [0], [0], [1], [0, 0, 1, 1], [], []>} : vector<64x2xbf16>, vector<2x1xbf16>, vector<64x1xf32> -> vector<64x1xf32>
    %386 = arith.addf %378, %385 : vector<64x1xf32>
    %387 = vector.extract_strided_slice %1 {offsets = [6, 6, 0], sizes = [8, 8, 2], strides = [1, 1, 1]} : vector<14x14x2xf32> to vector<8x8x2xf32>
    %388 = vector.shape_cast %387 : vector<8x8x2xf32> to vector<64x2xf32>
    %389 = arith.truncf %388 : vector<64x2xf32> to vector<64x2xbf16>
    %c48 = arith.constant 48 : index
    %c0_148 = arith.constant 0 : index
    %c0_149 = arith.constant 0 : index
    %390 = vector.load %arg2[%c48, %c0_148, %c0_149] : memref<49x2x1xf32, #tpu.memory_space<vmem>>, vector<1x2x1xf32>
    %391 = vector.shape_cast %390 : vector<1x2x1xf32> to vector<2x1xf32>
    %392 = arith.truncf %391 : vector<2x1xf32> to vector<2x1xbf16>
    %cst_150 = arith.constant dense<0.000000e+00> : vector<64x1xf32>
    %393 = tpu.matmul %389, %392, %cst_150 {dimension_numbers = #tpu.dot_dimension_numbers<[1], [0], [0], [1], [0, 0, 1, 1], [], []>} : vector<64x2xbf16>, vector<2x1xbf16>, vector<64x1xf32> -> vector<64x1xf32>
    %394 = arith.addf %386, %393 : vector<64x1xf32>
    %c0_151 = arith.constant 0 : index
    %c0_152 = arith.constant 0 : index
    %395 = vector.load %arg3[%c0_151, %c0_152] : memref<1x1xf32, #tpu.memory_space<vmem>>, vector<1x1xf32>
    %396 = vector.broadcast %395 : vector<1x1xf32> to vector<64x1xf32>
    %397 = arith.addf %394, %396 : vector<64x1xf32>
    %c0_153 = arith.constant 0 : index
    %c0_154 = arith.constant 0 : index
    %c0_155 = arith.constant 0 : index
    %398 = vector.load %arg4[%c0_153, %c0_154, %c0_155] : memref<1x64x1xf32, #tpu.memory_space<vmem>>, vector<1x64x1xf32>
    %399 = vector.shape_cast %398 : vector<1x64x1xf32> to vector<64x1xf32>
    %400 = vector.shape_cast %397 : vector<64x1xf32> to vector<1x64x1xf32>
    tpu.vector_store %arg4[%c0_153, %c0_154, %c0_155], %400 {strides = array<i32>} : memref<1x64x1xf32, #tpu.memory_space<vmem>>, vector<1x64x1xf32>,
    return
  }
  func.func @transform_0(%arg0: i32) -> (i32, i32, i32, i32) {
    %c0_i32 = arith.constant 0 : i32
    %c0_i32_0 = arith.constant 0 : i32
    %c0_i32_1 = arith.constant 0 : i32
    %c0_i32_2 = arith.constant 0 : i32
    return %arg0, %c0_i32, %c0_i32_0, %c0_i32_1 : i32, i32, i32, i32
  }
  func.func @transform_1(%arg0: i32) -> (i32, i32, i32) {
    %c0_i32 = arith.constant 0 : i32
    %c0_i32_0 = arith.constant 0 : i32
    %c0_i32_1 = arith.constant 0 : i32
    %c0_i32_2 = arith.constant 0 : i32
    return %c0_i32, %c0_i32_0, %c0_i32_1 : i32, i32, i32
  }
  func.func @transform_2(%arg0: i32) -> (i32, i32) {
    %c0_i32 = arith.constant 0 : i32
    %c0_i32_0 = arith.constant 0 : i32
    %c0_i32_1 = arith.constant 0 : i32
    return %c0_i32, %c0_i32_0 : i32, i32
  }
  func.func @transform_3(%arg0: i32) -> (i32, i32, i32) {
    %c0_i32 = arith.constant 0 : i32
    %c0_i32_0 = arith.constant 0 : i32
    %c0_i32_1 = arith.constant 0 : i32
    return %arg0, %c0_i32, %c0_i32_0 : i32, i32, i32
  }
}

module attributes {stable_mosaic.version = 11 : i64} {
  func.func @_mm_kernel(%arg0: i32, %arg1: i32, %arg2: i32, %arg3: memref<128x16xf32, #tpu.memory_space<vmem>>, %arg4: memref<16x16xf32, #tpu.memory_space<vmem>>, %arg5: memref<1x16xf32, #tpu.memory_space<vmem>>, %arg6: memref<128x16xf32, #tpu.memory_space<vmem>>, %arg7: memref<128x16xf32, #tpu.memory_space<vmem>>) attributes {dimension_semantics = [#tpu.dimension_semantics<parallel>, #tpu.dimension_semantics<parallel>, #tpu.dimension_semantics<arbitrary>], iteration_bounds = array<i64: 1, 1, 1>, scalar_prefetch = 0 : i64, scratch_operands = 1 : i64, tpu.core_type = #tpu.core_type<tc>, window_params = [{transform_indices = @transform_0, window_bounds = array<i64: 128, 16>}, {transform_indices = @transform_1, window_bounds = array<i64: 16, 16>}, {transform_indices = @transform_2, window_bounds = array<i64: 1, 16>}, {transform_indices = @transform_3, window_bounds = array<i64: 128, 16>}]} {
    %c0_i32 = arith.constant 0 : i32
    %0 = arith.cmpi eq, %arg2, %c0_i32 : i32
    %1 = arith.extui %0 : i1 to i32
    %c0_i32_0 = arith.constant 0 : i32
    %2 = arith.cmpi ne, %1, %c0_i32_0 : i32
    scf.if %2 {
      %cst_10 = arith.constant 0.000000e+00 : f32
      %14 = vector.broadcast %cst_10 : f32 to vector<128x16xf32>
      %c0_11 = arith.constant 0 : index
      %c0_12 = arith.constant 0 : index
      %15 = vector.load %arg7[%c0_11, %c0_12] : memref<128x16xf32, #tpu.memory_space<vmem>>, vector<128x16xf32>
      tpu.vector_store %arg7[%c0_11, %c0_12], %14 {strides = array<i32>} : memref<128x16xf32, #tpu.memory_space<vmem>>, vector<128x16xf32>,
    } else {
    }
    %c0 = arith.constant 0 : index
    %c0_1 = arith.constant 0 : index
    %3 = vector.load %arg3[%c0, %c0_1] : memref<128x16xf32, #tpu.memory_space<vmem>>, vector<128x16xf32>
    %c0_2 = arith.constant 0 : index
    %c0_3 = arith.constant 0 : index
    %4 = vector.load %arg7[%c0_2, %c0_3] : memref<128x16xf32, #tpu.memory_space<vmem>>, vector<128x16xf32>
    %5 = arith.truncf %3 : vector<128x16xf32> to vector<128x16xbf16>
    %c0_4 = arith.constant 0 : index
    %c0_5 = arith.constant 0 : index
    %6 = vector.load %arg4[%c0_4, %c0_5] : memref<16x16xf32, #tpu.memory_space<vmem>>, vector<16x16xf32>
    %7 = arith.truncf %6 : vector<16x16xf32> to vector<16x16xbf16>
    %cst = arith.constant dense<0.000000e+00> : vector<128x16xf32>
    %8 = tpu.matmul %5, %7, %cst {dimension_numbers = #tpu.dot_dimension_numbers<[1], [0], [0], [1], [0, 0, 1, 1], [], []>} : vector<128x16xbf16>, vector<16x16xbf16>, vector<128x16xf32> -> vector<128x16xf32>
    %9 = arith.addf %4, %8 : vector<128x16xf32>
    %c0_6 = arith.constant 0 : index
    %c0_7 = arith.constant 0 : index
    %10 = vector.load %arg7[%c0_6, %c0_7] : memref<128x16xf32, #tpu.memory_space<vmem>>, vector<128x16xf32>
    tpu.vector_store %arg7[%c0_6, %c0_7], %9 {strides = array<i32>} : memref<128x16xf32, #tpu.memory_space<vmem>>, vector<128x16xf32>,
    %c0_i32_8 = arith.constant 0 : i32
    %11 = arith.cmpi eq, %arg2, %c0_i32_8 : i32
    %12 = arith.extui %11 : i1 to i32
    %c0_i32_9 = arith.constant 0 : i32
    %13 = arith.cmpi ne, %12, %c0_i32_9 : i32
    scf.if %13 {
      %c0_10 = arith.constant 0 : index
      %c0_11 = arith.constant 0 : index
      %14 = vector.load %arg7[%c0_10, %c0_11] : memref<128x16xf32, #tpu.memory_space<vmem>>, vector<128x16xf32>
      %c0_12 = arith.constant 0 : index
      %c0_13 = arith.constant 0 : index
      %15 = vector.load %arg5[%c0_12, %c0_13] : memref<1x16xf32, #tpu.memory_space<vmem>>, vector<1x16xf32>
      %16 = vector.broadcast %15 : vector<1x16xf32> to vector<128x16xf32>
      %17 = arith.addf %14, %16 : vector<128x16xf32>
      %c0_14 = arith.constant 0 : index
      %c0_15 = arith.constant 0 : index
      %18 = vector.load %arg6[%c0_14, %c0_15] : memref<128x16xf32, #tpu.memory_space<vmem>>, vector<128x16xf32>
      tpu.vector_store %arg6[%c0_14, %c0_15], %17 {strides = array<i32>} : memref<128x16xf32, #tpu.memory_space<vmem>>, vector<128x16xf32>,
    } else {
    }
    return
  }
  func.func @transform_0(%arg0: i32, %arg1: i32, %arg2: i32) -> (i32, i32) {
    %c0_i32 = arith.constant 0 : i32
    return %arg0, %arg2 : i32, i32
  }
  func.func @transform_1(%arg0: i32, %arg1: i32, %arg2: i32) -> (i32, i32) {
    %c0_i32 = arith.constant 0 : i32
    return %arg2, %arg1 : i32, i32
  }
  func.func @transform_2(%arg0: i32, %arg1: i32, %arg2: i32) -> (i32, i32) {
    %c0_i32 = arith.constant 0 : i32
    %c0_i32_0 = arith.constant 0 : i32
    return %c0_i32, %arg1 : i32, i32
  }
  func.func @transform_3(%arg0: i32, %arg1: i32, %arg2: i32) -> (i32, i32) {
    %c0_i32 = arith.constant 0 : i32
    return %arg0, %arg1 : i32, i32
  }
}

module attributes {stable_mosaic.version = 11 : i64} {
  func.func @_conv_kxk_kernel(%arg0: i32, %arg1: memref<1x10x10x16xf32, #tpu.memory_space<vmem>>, %arg2: memref<9x16x16xf32, #tpu.memory_space<vmem>>, %arg3: memref<1x16xf32, #tpu.memory_space<vmem>>, %arg4: memref<1x64x16xf32, #tpu.memory_space<vmem>>) attributes {dimension_semantics = [#tpu.dimension_semantics<parallel>], iteration_bounds = array<i64: 2>, scalar_prefetch = 0 : i64, scratch_operands = 0 : i64, tpu.core_type = #tpu.core_type<tc>, window_params = [{transform_indices = @transform_0, window_bounds = array<i64: 1, 10, 10, 16>}, {pipeline_mode = #tpu.pipeline_mode<synchronous>, transform_indices = @transform_1, window_bounds = array<i64: 9, 16, 16>}, {pipeline_mode = #tpu.pipeline_mode<synchronous>, transform_indices = @transform_2, window_bounds = array<i64: 1, 16>}, {transform_indices = @transform_3, window_bounds = array<i64: 1, 64, 16>}]} {
    %c0 = arith.constant 0 : index
    %c0_0 = arith.constant 0 : index
    %c0_1 = arith.constant 0 : index
    %c0_2 = arith.constant 0 : index
    %0 = vector.load %arg1[%c0, %c0_0, %c0_1, %c0_2] : memref<1x10x10x16xf32, #tpu.memory_space<vmem>>, vector<1x10x10x16xf32>
    %1 = vector.shape_cast %0 : vector<1x10x10x16xf32> to vector<10x10x16xf32>
    %cst = arith.constant 0.000000e+00 : f32
    %2 = vector.broadcast %cst : f32 to vector<64x16xf32>
    %3 = vector.extract_strided_slice %1 {offsets = [0, 0, 0], sizes = [8, 8, 16], strides = [1, 1, 1]} : vector<10x10x16xf32> to vector<8x8x16xf32>
    %4 = vector.shape_cast %3 : vector<8x8x16xf32> to vector<64x16xf32>
    %5 = arith.truncf %4 : vector<64x16xf32> to vector<64x16xbf16>
    %c0_3 = arith.constant 0 : index
    %c0_4 = arith.constant 0 : index
    %c0_5 = arith.constant 0 : index
    %6 = vector.load %arg2[%c0_3, %c0_4, %c0_5] : memref<9x16x16xf32, #tpu.memory_space<vmem>>, vector<1x16x16xf32>
    %7 = vector.shape_cast %6 : vector<1x16x16xf32> to vector<16x16xf32>
    %8 = arith.truncf %7 : vector<16x16xf32> to vector<16x16xbf16>
    %cst_6 = arith.constant dense<0.000000e+00> : vector<64x16xf32>
    %9 = tpu.matmul %5, %8, %cst_6 {dimension_numbers = #tpu.dot_dimension_numbers<[1], [0], [0], [1], [0, 0, 1, 1], [], []>} : vector<64x16xbf16>, vector<16x16xbf16>, vector<64x16xf32> -> vector<64x16xf32>
    %10 = arith.addf %2, %9 : vector<64x16xf32>
    %11 = vector.extract_strided_slice %1 {offsets = [0, 1, 0], sizes = [8, 8, 16], strides = [1, 1, 1]} : vector<10x10x16xf32> to vector<8x8x16xf32>
    %12 = vector.shape_cast %11 : vector<8x8x16xf32> to vector<64x16xf32>
    %13 = arith.truncf %12 : vector<64x16xf32> to vector<64x16xbf16>
    %c1 = arith.constant 1 : index
    %c0_7 = arith.constant 0 : index
    %c0_8 = arith.constant 0 : index
    %14 = vector.load %arg2[%c1, %c0_7, %c0_8] : memref<9x16x16xf32, #tpu.memory_space<vmem>>, vector<1x16x16xf32>
    %15 = vector.shape_cast %14 : vector<1x16x16xf32> to vector<16x16xf32>
    %16 = arith.truncf %15 : vector<16x16xf32> to vector<16x16xbf16>
    %cst_9 = arith.constant dense<0.000000e+00> : vector<64x16xf32>
    %17 = tpu.matmul %13, %16, %cst_9 {dimension_numbers = #tpu.dot_dimension_numbers<[1], [0], [0], [1], [0, 0, 1, 1], [], []>} : vector<64x16xbf16>, vector<16x16xbf16>, vector<64x16xf32> -> vector<64x16xf32>
    %18 = arith.addf %10, %17 : vector<64x16xf32>
    %19 = vector.extract_strided_slice %1 {offsets = [0, 2, 0], sizes = [8, 8, 16], strides = [1, 1, 1]} : vector<10x10x16xf32> to vector<8x8x16xf32>
    %20 = vector.shape_cast %19 : vector<8x8x16xf32> to vector<64x16xf32>
    %21 = arith.truncf %20 : vector<64x16xf32> to vector<64x16xbf16>
    %c2 = arith.constant 2 : index
    %c0_10 = arith.constant 0 : index
    %c0_11 = arith.constant 0 : index
    %22 = vector.load %arg2[%c2, %c0_10, %c0_11] : memref<9x16x16xf32, #tpu.memory_space<vmem>>, vector<1x16x16xf32>
    %23 = vector.shape_cast %22 : vector<1x16x16xf32> to vector<16x16xf32>
    %24 = arith.truncf %23 : vector<16x16xf32> to vector<16x16xbf16>
    %cst_12 = arith.constant dense<0.000000e+00> : vector<64x16xf32>
    %25 = tpu.matmul %21, %24, %cst_12 {dimension_numbers = #tpu.dot_dimension_numbers<[1], [0], [0], [1], [0, 0, 1, 1], [], []>} : vector<64x16xbf16>, vector<16x16xbf16>, vector<64x16xf32> -> vector<64x16xf32>
    %26 = arith.addf %18, %25 : vector<64x16xf32>
    %27 = vector.extract_strided_slice %1 {offsets = [1, 0, 0], sizes = [8, 8, 16], strides = [1, 1, 1]} : vector<10x10x16xf32> to vector<8x8x16xf32>
    %28 = vector.shape_cast %27 : vector<8x8x16xf32> to vector<64x16xf32>
    %29 = arith.truncf %28 : vector<64x16xf32> to vector<64x16xbf16>
    %c3 = arith.constant 3 : index
    %c0_13 = arith.constant 0 : index
    %c0_14 = arith.constant 0 : index
    %30 = vector.load %arg2[%c3, %c0_13, %c0_14] : memref<9x16x16xf32, #tpu.memory_space<vmem>>, vector<1x16x16xf32>
    %31 = vector.shape_cast %30 : vector<1x16x16xf32> to vector<16x16xf32>
    %32 = arith.truncf %31 : vector<16x16xf32> to vector<16x16xbf16>
    %cst_15 = arith.constant dense<0.000000e+00> : vector<64x16xf32>
    %33 = tpu.matmul %29, %32, %cst_15 {dimension_numbers = #tpu.dot_dimension_numbers<[1], [0], [0], [1], [0, 0, 1, 1], [], []>} : vector<64x16xbf16>, vector<16x16xbf16>, vector<64x16xf32> -> vector<64x16xf32>
    %34 = arith.addf %26, %33 : vector<64x16xf32>
    %35 = vector.extract_strided_slice %1 {offsets = [1, 1, 0], sizes = [8, 8, 16], strides = [1, 1, 1]} : vector<10x10x16xf32> to vector<8x8x16xf32>
    %36 = vector.shape_cast %35 : vector<8x8x16xf32> to vector<64x16xf32>
    %37 = arith.truncf %36 : vector<64x16xf32> to vector<64x16xbf16>
    %c4 = arith.constant 4 : index
    %c0_16 = arith.constant 0 : index
    %c0_17 = arith.constant 0 : index
    %38 = vector.load %arg2[%c4, %c0_16, %c0_17] : memref<9x16x16xf32, #tpu.memory_space<vmem>>, vector<1x16x16xf32>
    %39 = vector.shape_cast %38 : vector<1x16x16xf32> to vector<16x16xf32>
    %40 = arith.truncf %39 : vector<16x16xf32> to vector<16x16xbf16>
    %cst_18 = arith.constant dense<0.000000e+00> : vector<64x16xf32>
    %41 = tpu.matmul %37, %40, %cst_18 {dimension_numbers = #tpu.dot_dimension_numbers<[1], [0], [0], [1], [0, 0, 1, 1], [], []>} : vector<64x16xbf16>, vector<16x16xbf16>, vector<64x16xf32> -> vector<64x16xf32>
    %42 = arith.addf %34, %41 : vector<64x16xf32>
    %43 = vector.extract_strided_slice %1 {offsets = [1, 2, 0], sizes = [8, 8, 16], strides = [1, 1, 1]} : vector<10x10x16xf32> to vector<8x8x16xf32>
    %44 = vector.shape_cast %43 : vector<8x8x16xf32> to vector<64x16xf32>
    %45 = arith.truncf %44 : vector<64x16xf32> to vector<64x16xbf16>
    %c5 = arith.constant 5 : index
    %c0_19 = arith.constant 0 : index
    %c0_20 = arith.constant 0 : index
    %46 = vector.load %arg2[%c5, %c0_19, %c0_20] : memref<9x16x16xf32, #tpu.memory_space<vmem>>, vector<1x16x16xf32>
    %47 = vector.shape_cast %46 : vector<1x16x16xf32> to vector<16x16xf32>
    %48 = arith.truncf %47 : vector<16x16xf32> to vector<16x16xbf16>
    %cst_21 = arith.constant dense<0.000000e+00> : vector<64x16xf32>
    %49 = tpu.matmul %45, %48, %cst_21 {dimension_numbers = #tpu.dot_dimension_numbers<[1], [0], [0], [1], [0, 0, 1, 1], [], []>} : vector<64x16xbf16>, vector<16x16xbf16>, vector<64x16xf32> -> vector<64x16xf32>
    %50 = arith.addf %42, %49 : vector<64x16xf32>
    %51 = vector.extract_strided_slice %1 {offsets = [2, 0, 0], sizes = [8, 8, 16], strides = [1, 1, 1]} : vector<10x10x16xf32> to vector<8x8x16xf32>
    %52 = vector.shape_cast %51 : vector<8x8x16xf32> to vector<64x16xf32>
    %53 = arith.truncf %52 : vector<64x16xf32> to vector<64x16xbf16>
    %c6 = arith.constant 6 : index
    %c0_22 = arith.constant 0 : index
    %c0_23 = arith.constant 0 : index
    %54 = vector.load %arg2[%c6, %c0_22, %c0_23] : memref<9x16x16xf32, #tpu.memory_space<vmem>>, vector<1x16x16xf32>
    %55 = vector.shape_cast %54 : vector<1x16x16xf32> to vector<16x16xf32>
    %56 = arith.truncf %55 : vector<16x16xf32> to vector<16x16xbf16>
    %cst_24 = arith.constant dense<0.000000e+00> : vector<64x16xf32>
    %57 = tpu.matmul %53, %56, %cst_24 {dimension_numbers = #tpu.dot_dimension_numbers<[1], [0], [0], [1], [0, 0, 1, 1], [], []>} : vector<64x16xbf16>, vector<16x16xbf16>, vector<64x16xf32> -> vector<64x16xf32>
    %58 = arith.addf %50, %57 : vector<64x16xf32>
    %59 = vector.extract_strided_slice %1 {offsets = [2, 1, 0], sizes = [8, 8, 16], strides = [1, 1, 1]} : vector<10x10x16xf32> to vector<8x8x16xf32>
    %60 = vector.shape_cast %59 : vector<8x8x16xf32> to vector<64x16xf32>
    %61 = arith.truncf %60 : vector<64x16xf32> to vector<64x16xbf16>
    %c7 = arith.constant 7 : index
    %c0_25 = arith.constant 0 : index
    %c0_26 = arith.constant 0 : index
    %62 = vector.load %arg2[%c7, %c0_25, %c0_26] : memref<9x16x16xf32, #tpu.memory_space<vmem>>, vector<1x16x16xf32>
    %63 = vector.shape_cast %62 : vector<1x16x16xf32> to vector<16x16xf32>
    %64 = arith.truncf %63 : vector<16x16xf32> to vector<16x16xbf16>
    %cst_27 = arith.constant dense<0.000000e+00> : vector<64x16xf32>
    %65 = tpu.matmul %61, %64, %cst_27 {dimension_numbers = #tpu.dot_dimension_numbers<[1], [0], [0], [1], [0, 0, 1, 1], [], []>} : vector<64x16xbf16>, vector<16x16xbf16>, vector<64x16xf32> -> vector<64x16xf32>
    %66 = arith.addf %58, %65 : vector<64x16xf32>
    %67 = vector.extract_strided_slice %1 {offsets = [2, 2, 0], sizes = [8, 8, 16], strides = [1, 1, 1]} : vector<10x10x16xf32> to vector<8x8x16xf32>
    %68 = vector.shape_cast %67 : vector<8x8x16xf32> to vector<64x16xf32>
    %69 = arith.truncf %68 : vector<64x16xf32> to vector<64x16xbf16>
    %c8 = arith.constant 8 : index
    %c0_28 = arith.constant 0 : index
    %c0_29 = arith.constant 0 : index
    %70 = vector.load %arg2[%c8, %c0_28, %c0_29] : memref<9x16x16xf32, #tpu.memory_space<vmem>>, vector<1x16x16xf32>
    %71 = vector.shape_cast %70 : vector<1x16x16xf32> to vector<16x16xf32>
    %72 = arith.truncf %71 : vector<16x16xf32> to vector<16x16xbf16>
    %cst_30 = arith.constant dense<0.000000e+00> : vector<64x16xf32>
    %73 = tpu.matmul %69, %72, %cst_30 {dimension_numbers = #tpu.dot_dimension_numbers<[1], [0], [0], [1], [0, 0, 1, 1], [], []>} : vector<64x16xbf16>, vector<16x16xbf16>, vector<64x16xf32> -> vector<64x16xf32>
    %74 = arith.addf %66, %73 : vector<64x16xf32>
    %c0_31 = arith.constant 0 : index
    %c0_32 = arith.constant 0 : index
    %75 = vector.load %arg3[%c0_31, %c0_32] : memref<1x16xf32, #tpu.memory_space<vmem>>, vector<1x16xf32>
    %76 = vector.broadcast %75 : vector<1x16xf32> to vector<64x16xf32>
    %77 = arith.addf %74, %76 : vector<64x16xf32>
    %cst_33 = arith.constant 0.000000e+00 : f32
    %78 = vector.broadcast %cst_33 : f32 to vector<64x16xf32>
    %79 = arith.maximumf %77, %78 : vector<64x16xf32>
    %c0_34 = arith.constant 0 : index
    %c0_35 = arith.constant 0 : index
    %c0_36 = arith.constant 0 : index
    %80 = vector.load %arg4[%c0_34, %c0_35, %c0_36] : memref<1x64x16xf32, #tpu.memory_space<vmem>>, vector<1x64x16xf32>
    %81 = vector.shape_cast %80 : vector<1x64x16xf32> to vector<64x16xf32>
    %82 = vector.shape_cast %79 : vector<64x16xf32> to vector<1x64x16xf32>
    tpu.vector_store %arg4[%c0_34, %c0_35, %c0_36], %82 {strides = array<i32>} : memref<1x64x16xf32, #tpu.memory_space<vmem>>, vector<1x64x16xf32>,
    return
  }
  func.func @transform_0(%arg0: i32) -> (i32, i32, i32, i32) {
    %c0_i32 = arith.constant 0 : i32
    %c0_i32_0 = arith.constant 0 : i32
    %c0_i32_1 = arith.constant 0 : i32
    %c0_i32_2 = arith.constant 0 : i32
    return %arg0, %c0_i32, %c0_i32_0, %c0_i32_1 : i32, i32, i32, i32
  }
  func.func @transform_1(%arg0: i32) -> (i32, i32, i32) {
    %c0_i32 = arith.constant 0 : i32
    %c0_i32_0 = arith.constant 0 : i32
    %c0_i32_1 = arith.constant 0 : i32
    %c0_i32_2 = arith.constant 0 : i32
    return %c0_i32, %c0_i32_0, %c0_i32_1 : i32, i32, i32
  }
  func.func @transform_2(%arg0: i32) -> (i32, i32) {
    %c0_i32 = arith.constant 0 : i32
    %c0_i32_0 = arith.constant 0 : i32
    %c0_i32_1 = arith.constant 0 : i32
    return %c0_i32, %c0_i32_0 : i32, i32
  }
  func.func @transform_3(%arg0: i32) -> (i32, i32, i32) {
    %c0_i32 = arith.constant 0 : i32
    %c0_i32_0 = arith.constant 0 : i32
    %c0_i32_1 = arith.constant 0 : i32
    return %arg0, %c0_i32, %c0_i32_0 : i32, i32, i32
  }
}

module attributes {stable_mosaic.version = 11 : i64} {
  func.func @_mm_kernel(%arg0: i32, %arg1: i32, %arg2: i32, %arg3: memref<128x48xf32, #tpu.memory_space<vmem>>, %arg4: memref<48x8xf32, #tpu.memory_space<vmem>>, %arg5: memref<1x8xf32, #tpu.memory_space<vmem>>, %arg6: memref<128x8xf32, #tpu.memory_space<vmem>>, %arg7: memref<128x8xf32, #tpu.memory_space<vmem>>) attributes {dimension_semantics = [#tpu.dimension_semantics<parallel>, #tpu.dimension_semantics<parallel>, #tpu.dimension_semantics<arbitrary>], iteration_bounds = array<i64: 1, 1, 1>, scalar_prefetch = 0 : i64, scratch_operands = 1 : i64, tpu.core_type = #tpu.core_type<tc>, window_params = [{transform_indices = @transform_0, window_bounds = array<i64: 128, 48>}, {transform_indices = @transform_1, window_bounds = array<i64: 48, 8>}, {transform_indices = @transform_2, window_bounds = array<i64: 1, 8>}, {transform_indices = @transform_3, window_bounds = array<i64: 128, 8>}]} {
    %c0_i32 = arith.constant 0 : i32
    %0 = arith.cmpi eq, %arg2, %c0_i32 : i32
    %1 = arith.extui %0 : i1 to i32
    %c0_i32_0 = arith.constant 0 : i32
    %2 = arith.cmpi ne, %1, %c0_i32_0 : i32
    scf.if %2 {
      %cst_11 = arith.constant 0.000000e+00 : f32
      %16 = vector.broadcast %cst_11 : f32 to vector<128x8xf32>
      %c0_12 = arith.constant 0 : index
      %c0_13 = arith.constant 0 : index
      %17 = vector.load %arg7[%c0_12, %c0_13] : memref<128x8xf32, #tpu.memory_space<vmem>>, vector<128x8xf32>
      tpu.vector_store %arg7[%c0_12, %c0_13], %16 {strides = array<i32>} : memref<128x8xf32, #tpu.memory_space<vmem>>, vector<128x8xf32>,
    } else {
    }
    %c0 = arith.constant 0 : index
    %c0_1 = arith.constant 0 : index
    %3 = vector.load %arg3[%c0, %c0_1] : memref<128x48xf32, #tpu.memory_space<vmem>>, vector<128x48xf32>
    %cst = arith.constant 0.000000e+00 : f32
    %4 = vector.broadcast %cst : f32 to vector<128x48xf32>
    %5 = arith.maximumf %3, %4 : vector<128x48xf32>
    %c0_2 = arith.constant 0 : index
    %c0_3 = arith.constant 0 : index
    %6 = vector.load %arg7[%c0_2, %c0_3] : memref<128x8xf32, #tpu.memory_space<vmem>>, vector<128x8xf32>
    %7 = arith.truncf %5 : vector<128x48xf32> to vector<128x48xbf16>
    %c0_4 = arith.constant 0 : index
    %c0_5 = arith.constant 0 : index
    %8 = vector.load %arg4[%c0_4, %c0_5] : memref<48x8xf32, #tpu.memory_space<vmem>>, vector<48x8xf32>
    %9 = arith.truncf %8 : vector<48x8xf32> to vector<48x8xbf16>
    %cst_6 = arith.constant dense<0.000000e+00> : vector<128x8xf32>
    %10 = tpu.matmul %7, %9, %cst_6 {dimension_numbers = #tpu.dot_dimension_numbers<[1], [0], [0], [1], [0, 0, 1, 1], [], []>} : vector<128x48xbf16>, vector<48x8xbf16>, vector<128x8xf32> -> vector<128x8xf32>
    %11 = arith.addf %6, %10 : vector<128x8xf32>
    %c0_7 = arith.constant 0 : index
    %c0_8 = arith.constant 0 : index
    %12 = vector.load %arg7[%c0_7, %c0_8] : memref<128x8xf32, #tpu.memory_space<vmem>>, vector<128x8xf32>
    tpu.vector_store %arg7[%c0_7, %c0_8], %11 {strides = array<i32>} : memref<128x8xf32, #tpu.memory_space<vmem>>, vector<128x8xf32>,
    %c0_i32_9 = arith.constant 0 : i32
    %13 = arith.cmpi eq, %arg2, %c0_i32_9 : i32
    %14 = arith.extui %13 : i1 to i32
    %c0_i32_10 = arith.constant 0 : i32
    %15 = arith.cmpi ne, %14, %c0_i32_10 : i32
    scf.if %15 {
      %c0_11 = arith.constant 0 : index
      %c0_12 = arith.constant 0 : index
      %16 = vector.load %arg7[%c0_11, %c0_12] : memref<128x8xf32, #tpu.memory_space<vmem>>, vector<128x8xf32>
      %c0_13 = arith.constant 0 : index
      %c0_14 = arith.constant 0 : index
      %17 = vector.load %arg5[%c0_13, %c0_14] : memref<1x8xf32, #tpu.memory_space<vmem>>, vector<1x8xf32>
      %18 = vector.broadcast %17 : vector<1x8xf32> to vector<128x8xf32>
      %19 = arith.addf %16, %18 : vector<128x8xf32>
      %c0_15 = arith.constant 0 : index
      %c0_16 = arith.constant 0 : index
      %20 = vector.load %arg6[%c0_15, %c0_16] : memref<128x8xf32, #tpu.memory_space<vmem>>, vector<128x8xf32>
      tpu.vector_store %arg6[%c0_15, %c0_16], %19 {strides = array<i32>} : memref<128x8xf32, #tpu.memory_space<vmem>>, vector<128x8xf32>,
    } else {
    }
    return
  }
  func.func @transform_0(%arg0: i32, %arg1: i32, %arg2: i32) -> (i32, i32) {
    %c0_i32 = arith.constant 0 : i32
    return %arg0, %arg2 : i32, i32
  }
  func.func @transform_1(%arg0: i32, %arg1: i32, %arg2: i32) -> (i32, i32) {
    %c0_i32 = arith.constant 0 : i32
    return %arg2, %arg1 : i32, i32
  }
  func.func @transform_2(%arg0: i32, %arg1: i32, %arg2: i32) -> (i32, i32) {
    %c0_i32 = arith.constant 0 : i32
    %c0_i32_0 = arith.constant 0 : i32
    return %c0_i32, %arg1 : i32, i32
  }
  func.func @transform_3(%arg0: i32, %arg1: i32, %arg2: i32) -> (i32, i32) {
    %c0_i32 = arith.constant 0 : i32
    return %arg0, %arg1 : i32, i32
  }
}

module attributes {stable_mosaic.version = 11 : i64} {
  func.func @_conv_kxk_kernel(%arg0: i32, %arg1: memref<1x10x10x8xf32, #tpu.memory_space<vmem>>, %arg2: memref<9x8x8xf32, #tpu.memory_space<vmem>>, %arg3: memref<1x8xf32, #tpu.memory_space<vmem>>, %arg4: memref<1x64x8xf32, #tpu.memory_space<vmem>>) attributes {dimension_semantics = [#tpu.dimension_semantics<parallel>], iteration_bounds = array<i64: 2>, scalar_prefetch = 0 : i64, scratch_operands = 0 : i64, tpu.core_type = #tpu.core_type<tc>, window_params = [{transform_indices = @transform_0, window_bounds = array<i64: 1, 10, 10, 8>}, {pipeline_mode = #tpu.pipeline_mode<synchronous>, transform_indices = @transform_1, window_bounds = array<i64: 9, 8, 8>}, {pipeline_mode = #tpu.pipeline_mode<synchronous>, transform_indices = @transform_2, window_bounds = array<i64: 1, 8>}, {transform_indices = @transform_3, window_bounds = array<i64: 1, 64, 8>}]} {
    %c0 = arith.constant 0 : index
    %c0_0 = arith.constant 0 : index
    %c0_1 = arith.constant 0 : index
    %c0_2 = arith.constant 0 : index
    %0 = vector.load %arg1[%c0, %c0_0, %c0_1, %c0_2] : memref<1x10x10x8xf32, #tpu.memory_space<vmem>>, vector<1x10x10x8xf32>
    %1 = vector.shape_cast %0 : vector<1x10x10x8xf32> to vector<10x10x8xf32>
    %cst = arith.constant 0.000000e+00 : f32
    %2 = vector.broadcast %cst : f32 to vector<10x10x8xf32>
    %3 = arith.maximumf %1, %2 : vector<10x10x8xf32>
    %cst_3 = arith.constant 0.000000e+00 : f32
    %4 = vector.broadcast %cst_3 : f32 to vector<64x8xf32>
    %5 = vector.extract_strided_slice %3 {offsets = [0, 0, 0], sizes = [8, 8, 8], strides = [1, 1, 1]} : vector<10x10x8xf32> to vector<8x8x8xf32>
    %6 = vector.shape_cast %5 : vector<8x8x8xf32> to vector<64x8xf32>
    %7 = arith.truncf %6 : vector<64x8xf32> to vector<64x8xbf16>
    %c0_4 = arith.constant 0 : index
    %c0_5 = arith.constant 0 : index
    %c0_6 = arith.constant 0 : index
    %8 = vector.load %arg2[%c0_4, %c0_5, %c0_6] : memref<9x8x8xf32, #tpu.memory_space<vmem>>, vector<1x8x8xf32>
    %9 = vector.shape_cast %8 : vector<1x8x8xf32> to vector<8x8xf32>
    %10 = arith.truncf %9 : vector<8x8xf32> to vector<8x8xbf16>
    %cst_7 = arith.constant dense<0.000000e+00> : vector<64x8xf32>
    %11 = tpu.matmul %7, %10, %cst_7 {dimension_numbers = #tpu.dot_dimension_numbers<[1], [0], [0], [1], [0, 0, 1, 1], [], []>} : vector<64x8xbf16>, vector<8x8xbf16>, vector<64x8xf32> -> vector<64x8xf32>
    %12 = arith.addf %4, %11 : vector<64x8xf32>
    %13 = vector.extract_strided_slice %3 {offsets = [0, 1, 0], sizes = [8, 8, 8], strides = [1, 1, 1]} : vector<10x10x8xf32> to vector<8x8x8xf32>
    %14 = vector.shape_cast %13 : vector<8x8x8xf32> to vector<64x8xf32>
    %15 = arith.truncf %14 : vector<64x8xf32> to vector<64x8xbf16>
    %c1 = arith.constant 1 : index
    %c0_8 = arith.constant 0 : index
    %c0_9 = arith.constant 0 : index
    %16 = vector.load %arg2[%c1, %c0_8, %c0_9] : memref<9x8x8xf32, #tpu.memory_space<vmem>>, vector<1x8x8xf32>
    %17 = vector.shape_cast %16 : vector<1x8x8xf32> to vector<8x8xf32>
    %18 = arith.truncf %17 : vector<8x8xf32> to vector<8x8xbf16>
    %cst_10 = arith.constant dense<0.000000e+00> : vector<64x8xf32>
    %19 = tpu.matmul %15, %18, %cst_10 {dimension_numbers = #tpu.dot_dimension_numbers<[1], [0], [0], [1], [0, 0, 1, 1], [], []>} : vector<64x8xbf16>, vector<8x8xbf16>, vector<64x8xf32> -> vector<64x8xf32>
    %20 = arith.addf %12, %19 : vector<64x8xf32>
    %21 = vector.extract_strided_slice %3 {offsets = [0, 2, 0], sizes = [8, 8, 8], strides = [1, 1, 1]} : vector<10x10x8xf32> to vector<8x8x8xf32>
    %22 = vector.shape_cast %21 : vector<8x8x8xf32> to vector<64x8xf32>
    %23 = arith.truncf %22 : vector<64x8xf32> to vector<64x8xbf16>
    %c2 = arith.constant 2 : index
    %c0_11 = arith.constant 0 : index
    %c0_12 = arith.constant 0 : index
    %24 = vector.load %arg2[%c2, %c0_11, %c0_12] : memref<9x8x8xf32, #tpu.memory_space<vmem>>, vector<1x8x8xf32>
    %25 = vector.shape_cast %24 : vector<1x8x8xf32> to vector<8x8xf32>
    %26 = arith.truncf %25 : vector<8x8xf32> to vector<8x8xbf16>
    %cst_13 = arith.constant dense<0.000000e+00> : vector<64x8xf32>
    %27 = tpu.matmul %23, %26, %cst_13 {dimension_numbers = #tpu.dot_dimension_numbers<[1], [0], [0], [1], [0, 0, 1, 1], [], []>} : vector<64x8xbf16>, vector<8x8xbf16>, vector<64x8xf32> -> vector<64x8xf32>
    %28 = arith.addf %20, %27 : vector<64x8xf32>
    %29 = vector.extract_strided_slice %3 {offsets = [1, 0, 0], sizes = [8, 8, 8], strides = [1, 1, 1]} : vector<10x10x8xf32> to vector<8x8x8xf32>
    %30 = vector.shape_cast %29 : vector<8x8x8xf32> to vector<64x8xf32>
    %31 = arith.truncf %30 : vector<64x8xf32> to vector<64x8xbf16>
    %c3 = arith.constant 3 : index
    %c0_14 = arith.constant 0 : index
    %c0_15 = arith.constant 0 : index
    %32 = vector.load %arg2[%c3, %c0_14, %c0_15] : memref<9x8x8xf32, #tpu.memory_space<vmem>>, vector<1x8x8xf32>
    %33 = vector.shape_cast %32 : vector<1x8x8xf32> to vector<8x8xf32>
    %34 = arith.truncf %33 : vector<8x8xf32> to vector<8x8xbf16>
    %cst_16 = arith.constant dense<0.000000e+00> : vector<64x8xf32>
    %35 = tpu.matmul %31, %34, %cst_16 {dimension_numbers = #tpu.dot_dimension_numbers<[1], [0], [0], [1], [0, 0, 1, 1], [], []>} : vector<64x8xbf16>, vector<8x8xbf16>, vector<64x8xf32> -> vector<64x8xf32>
    %36 = arith.addf %28, %35 : vector<64x8xf32>
    %37 = vector.extract_strided_slice %3 {offsets = [1, 1, 0], sizes = [8, 8, 8], strides = [1, 1, 1]} : vector<10x10x8xf32> to vector<8x8x8xf32>
    %38 = vector.shape_cast %37 : vector<8x8x8xf32> to vector<64x8xf32>
    %39 = arith.truncf %38 : vector<64x8xf32> to vector<64x8xbf16>
    %c4 = arith.constant 4 : index
    %c0_17 = arith.constant 0 : index
    %c0_18 = arith.constant 0 : index
    %40 = vector.load %arg2[%c4, %c0_17, %c0_18] : memref<9x8x8xf32, #tpu.memory_space<vmem>>, vector<1x8x8xf32>
    %41 = vector.shape_cast %40 : vector<1x8x8xf32> to vector<8x8xf32>
    %42 = arith.truncf %41 : vector<8x8xf32> to vector<8x8xbf16>
    %cst_19 = arith.constant dense<0.000000e+00> : vector<64x8xf32>
    %43 = tpu.matmul %39, %42, %cst_19 {dimension_numbers = #tpu.dot_dimension_numbers<[1], [0], [0], [1], [0, 0, 1, 1], [], []>} : vector<64x8xbf16>, vector<8x8xbf16>, vector<64x8xf32> -> vector<64x8xf32>
    %44 = arith.addf %36, %43 : vector<64x8xf32>
    %45 = vector.extract_strided_slice %3 {offsets = [1, 2, 0], sizes = [8, 8, 8], strides = [1, 1, 1]} : vector<10x10x8xf32> to vector<8x8x8xf32>
    %46 = vector.shape_cast %45 : vector<8x8x8xf32> to vector<64x8xf32>
    %47 = arith.truncf %46 : vector<64x8xf32> to vector<64x8xbf16>
    %c5 = arith.constant 5 : index
    %c0_20 = arith.constant 0 : index
    %c0_21 = arith.constant 0 : index
    %48 = vector.load %arg2[%c5, %c0_20, %c0_21] : memref<9x8x8xf32, #tpu.memory_space<vmem>>, vector<1x8x8xf32>
    %49 = vector.shape_cast %48 : vector<1x8x8xf32> to vector<8x8xf32>
    %50 = arith.truncf %49 : vector<8x8xf32> to vector<8x8xbf16>
    %cst_22 = arith.constant dense<0.000000e+00> : vector<64x8xf32>
    %51 = tpu.matmul %47, %50, %cst_22 {dimension_numbers = #tpu.dot_dimension_numbers<[1], [0], [0], [1], [0, 0, 1, 1], [], []>} : vector<64x8xbf16>, vector<8x8xbf16>, vector<64x8xf32> -> vector<64x8xf32>
    %52 = arith.addf %44, %51 : vector<64x8xf32>
    %53 = vector.extract_strided_slice %3 {offsets = [2, 0, 0], sizes = [8, 8, 8], strides = [1, 1, 1]} : vector<10x10x8xf32> to vector<8x8x8xf32>
    %54 = vector.shape_cast %53 : vector<8x8x8xf32> to vector<64x8xf32>
    %55 = arith.truncf %54 : vector<64x8xf32> to vector<64x8xbf16>
    %c6 = arith.constant 6 : index
    %c0_23 = arith.constant 0 : index
    %c0_24 = arith.constant 0 : index
    %56 = vector.load %arg2[%c6, %c0_23, %c0_24] : memref<9x8x8xf32, #tpu.memory_space<vmem>>, vector<1x8x8xf32>
    %57 = vector.shape_cast %56 : vector<1x8x8xf32> to vector<8x8xf32>
    %58 = arith.truncf %57 : vector<8x8xf32> to vector<8x8xbf16>
    %cst_25 = arith.constant dense<0.000000e+00> : vector<64x8xf32>
    %59 = tpu.matmul %55, %58, %cst_25 {dimension_numbers = #tpu.dot_dimension_numbers<[1], [0], [0], [1], [0, 0, 1, 1], [], []>} : vector<64x8xbf16>, vector<8x8xbf16>, vector<64x8xf32> -> vector<64x8xf32>
    %60 = arith.addf %52, %59 : vector<64x8xf32>
    %61 = vector.extract_strided_slice %3 {offsets = [2, 1, 0], sizes = [8, 8, 8], strides = [1, 1, 1]} : vector<10x10x8xf32> to vector<8x8x8xf32>
    %62 = vector.shape_cast %61 : vector<8x8x8xf32> to vector<64x8xf32>
    %63 = arith.truncf %62 : vector<64x8xf32> to vector<64x8xbf16>
    %c7 = arith.constant 7 : index
    %c0_26 = arith.constant 0 : index
    %c0_27 = arith.constant 0 : index
    %64 = vector.load %arg2[%c7, %c0_26, %c0_27] : memref<9x8x8xf32, #tpu.memory_space<vmem>>, vector<1x8x8xf32>
    %65 = vector.shape_cast %64 : vector<1x8x8xf32> to vector<8x8xf32>
    %66 = arith.truncf %65 : vector<8x8xf32> to vector<8x8xbf16>
    %cst_28 = arith.constant dense<0.000000e+00> : vector<64x8xf32>
    %67 = tpu.matmul %63, %66, %cst_28 {dimension_numbers = #tpu.dot_dimension_numbers<[1], [0], [0], [1], [0, 0, 1, 1], [], []>} : vector<64x8xbf16>, vector<8x8xbf16>, vector<64x8xf32> -> vector<64x8xf32>
    %68 = arith.addf %60, %67 : vector<64x8xf32>
    %69 = vector.extract_strided_slice %3 {offsets = [2, 2, 0], sizes = [8, 8, 8], strides = [1, 1, 1]} : vector<10x10x8xf32> to vector<8x8x8xf32>
    %70 = vector.shape_cast %69 : vector<8x8x8xf32> to vector<64x8xf32>
    %71 = arith.truncf %70 : vector<64x8xf32> to vector<64x8xbf16>
    %c8 = arith.constant 8 : index
    %c0_29 = arith.constant 0 : index
    %c0_30 = arith.constant 0 : index
    %72 = vector.load %arg2[%c8, %c0_29, %c0_30] : memref<9x8x8xf32, #tpu.memory_space<vmem>>, vector<1x8x8xf32>
    %73 = vector.shape_cast %72 : vector<1x8x8xf32> to vector<8x8xf32>
    %74 = arith.truncf %73 : vector<8x8xf32> to vector<8x8xbf16>
    %cst_31 = arith.constant dense<0.000000e+00> : vector<64x8xf32>
    %75 = tpu.matmul %71, %74, %cst_31 {dimension_numbers = #tpu.dot_dimension_numbers<[1], [0], [0], [1], [0, 0, 1, 1], [], []>} : vector<64x8xbf16>, vector<8x8xbf16>, vector<64x8xf32> -> vector<64x8xf32>
    %76 = arith.addf %68, %75 : vector<64x8xf32>
    %c0_32 = arith.constant 0 : index
    %c0_33 = arith.constant 0 : index
    %77 = vector.load %arg3[%c0_32, %c0_33] : memref<1x8xf32, #tpu.memory_space<vmem>>, vector<1x8xf32>
    %78 = vector.broadcast %77 : vector<1x8xf32> to vector<64x8xf32>
    %79 = arith.addf %76, %78 : vector<64x8xf32>
    %c0_34 = arith.constant 0 : index
    %c0_35 = arith.constant 0 : index
    %c0_36 = arith.constant 0 : index
    %80 = vector.load %arg4[%c0_34, %c0_35, %c0_36] : memref<1x64x8xf32, #tpu.memory_space<vmem>>, vector<1x64x8xf32>
    %81 = vector.shape_cast %80 : vector<1x64x8xf32> to vector<64x8xf32>
    %82 = vector.shape_cast %79 : vector<64x8xf32> to vector<1x64x8xf32>
    tpu.vector_store %arg4[%c0_34, %c0_35, %c0_36], %82 {strides = array<i32>} : memref<1x64x8xf32, #tpu.memory_space<vmem>>, vector<1x64x8xf32>,
    return
  }
  func.func @transform_0(%arg0: i32) -> (i32, i32, i32, i32) {
    %c0_i32 = arith.constant 0 : i32
    %c0_i32_0 = arith.constant 0 : i32
    %c0_i32_1 = arith.constant 0 : i32
    %c0_i32_2 = arith.constant 0 : i32
    return %arg0, %c0_i32, %c0_i32_0, %c0_i32_1 : i32, i32, i32, i32
  }
  func.func @transform_1(%arg0: i32) -> (i32, i32, i32) {
    %c0_i32 = arith.constant 0 : i32
    %c0_i32_0 = arith.constant 0 : i32
    %c0_i32_1 = arith.constant 0 : i32
    %c0_i32_2 = arith.constant 0 : i32
    return %c0_i32, %c0_i32_0, %c0_i32_1 : i32, i32, i32
  }
  func.func @transform_2(%arg0: i32) -> (i32, i32) {
    %c0_i32 = arith.constant 0 : i32
    %c0_i32_0 = arith.constant 0 : i32
    %c0_i32_1 = arith.constant 0 : i32
    return %c0_i32, %c0_i32_0 : i32, i32
  }
  func.func @transform_3(%arg0: i32) -> (i32, i32, i32) {
    %c0_i32 = arith.constant 0 : i32
    %c0_i32_0 = arith.constant 0 : i32
    %c0_i32_1 = arith.constant 0 : i32
    return %arg0, %c0_i32, %c0_i32_0 : i32, i32, i32
  }
}

module attributes {stable_mosaic.version = 11 : i64} {
  func.func @_mm_kernel(%arg0: i32, %arg1: i32, %arg2: i32, %arg3: memref<128x48xf32, #tpu.memory_space<vmem>>, %arg4: memref<48x16xf32, #tpu.memory_space<vmem>>, %arg5: memref<1x16xf32, #tpu.memory_space<vmem>>, %arg6: memref<128x16xf32, #tpu.memory_space<vmem>>, %arg7: memref<128x16xf32, #tpu.memory_space<vmem>>) attributes {dimension_semantics = [#tpu.dimension_semantics<parallel>, #tpu.dimension_semantics<parallel>, #tpu.dimension_semantics<arbitrary>], iteration_bounds = array<i64: 1, 1, 1>, scalar_prefetch = 0 : i64, scratch_operands = 1 : i64, tpu.core_type = #tpu.core_type<tc>, window_params = [{transform_indices = @transform_0, window_bounds = array<i64: 128, 48>}, {transform_indices = @transform_1, window_bounds = array<i64: 48, 16>}, {transform_indices = @transform_2, window_bounds = array<i64: 1, 16>}, {transform_indices = @transform_3, window_bounds = array<i64: 128, 16>}]} {
    %c0_i32 = arith.constant 0 : i32
    %0 = arith.cmpi eq, %arg2, %c0_i32 : i32
    %1 = arith.extui %0 : i1 to i32
    %c0_i32_0 = arith.constant 0 : i32
    %2 = arith.cmpi ne, %1, %c0_i32_0 : i32
    scf.if %2 {
      %cst_10 = arith.constant 0.000000e+00 : f32
      %14 = vector.broadcast %cst_10 : f32 to vector<128x16xf32>
      %c0_11 = arith.constant 0 : index
      %c0_12 = arith.constant 0 : index
      %15 = vector.load %arg7[%c0_11, %c0_12] : memref<128x16xf32, #tpu.memory_space<vmem>>, vector<128x16xf32>
      tpu.vector_store %arg7[%c0_11, %c0_12], %14 {strides = array<i32>} : memref<128x16xf32, #tpu.memory_space<vmem>>, vector<128x16xf32>,
    } else {
    }
    %c0 = arith.constant 0 : index
    %c0_1 = arith.constant 0 : index
    %3 = vector.load %arg3[%c0, %c0_1] : memref<128x48xf32, #tpu.memory_space<vmem>>, vector<128x48xf32>
    %c0_2 = arith.constant 0 : index
    %c0_3 = arith.constant 0 : index
    %4 = vector.load %arg7[%c0_2, %c0_3] : memref<128x16xf32, #tpu.memory_space<vmem>>, vector<128x16xf32>
    %5 = arith.truncf %3 : vector<128x48xf32> to vector<128x48xbf16>
    %c0_4 = arith.constant 0 : index
    %c0_5 = arith.constant 0 : index
    %6 = vector.load %arg4[%c0_4, %c0_5] : memref<48x16xf32, #tpu.memory_space<vmem>>, vector<48x16xf32>
    %7 = arith.truncf %6 : vector<48x16xf32> to vector<48x16xbf16>
    %cst = arith.constant dense<0.000000e+00> : vector<128x16xf32>
    %8 = tpu.matmul %5, %7, %cst {dimension_numbers = #tpu.dot_dimension_numbers<[1], [0], [0], [1], [0, 0, 1, 1], [], []>} : vector<128x48xbf16>, vector<48x16xbf16>, vector<128x16xf32> -> vector<128x16xf32>
    %9 = arith.addf %4, %8 : vector<128x16xf32>
    %c0_6 = arith.constant 0 : index
    %c0_7 = arith.constant 0 : index
    %10 = vector.load %arg7[%c0_6, %c0_7] : memref<128x16xf32, #tpu.memory_space<vmem>>, vector<128x16xf32>
    tpu.vector_store %arg7[%c0_6, %c0_7], %9 {strides = array<i32>} : memref<128x16xf32, #tpu.memory_space<vmem>>, vector<128x16xf32>,
    %c0_i32_8 = arith.constant 0 : i32
    %11 = arith.cmpi eq, %arg2, %c0_i32_8 : i32
    %12 = arith.extui %11 : i1 to i32
    %c0_i32_9 = arith.constant 0 : i32
    %13 = arith.cmpi ne, %12, %c0_i32_9 : i32
    scf.if %13 {
      %c0_10 = arith.constant 0 : index
      %c0_11 = arith.constant 0 : index
      %14 = vector.load %arg7[%c0_10, %c0_11] : memref<128x16xf32, #tpu.memory_space<vmem>>, vector<128x16xf32>
      %c0_12 = arith.constant 0 : index
      %c0_13 = arith.constant 0 : index
      %15 = vector.load %arg5[%c0_12, %c0_13] : memref<1x16xf32, #tpu.memory_space<vmem>>, vector<1x16xf32>
      %16 = vector.broadcast %15 : vector<1x16xf32> to vector<128x16xf32>
      %17 = arith.addf %14, %16 : vector<128x16xf32>
      %c0_14 = arith.constant 0 : index
      %c0_15 = arith.constant 0 : index
      %18 = vector.load %arg6[%c0_14, %c0_15] : memref<128x16xf32, #tpu.memory_space<vmem>>, vector<128x16xf32>
      tpu.vector_store %arg6[%c0_14, %c0_15], %17 {strides = array<i32>} : memref<128x16xf32, #tpu.memory_space<vmem>>, vector<128x16xf32>,
    } else {
    }
    return
  }
  func.func @transform_0(%arg0: i32, %arg1: i32, %arg2: i32) -> (i32, i32) {
    %c0_i32 = arith.constant 0 : i32
    return %arg0, %arg2 : i32, i32
  }
  func.func @transform_1(%arg0: i32, %arg1: i32, %arg2: i32) -> (i32, i32) {
    %c0_i32 = arith.constant 0 : i32
    return %arg2, %arg1 : i32, i32
  }
  func.func @transform_2(%arg0: i32, %arg1: i32, %arg2: i32) -> (i32, i32) {
    %c0_i32 = arith.constant 0 : i32
    %c0_i32_0 = arith.constant 0 : i32
    return %c0_i32, %arg1 : i32, i32
  }
  func.func @transform_3(%arg0: i32, %arg1: i32, %arg2: i32) -> (i32, i32) {
    %c0_i32 = arith.constant 0 : i32
    return %arg0, %arg1 : i32, i32
  }
}

module attributes {stable_mosaic.version = 11 : i64} {
  func.func @_mm_kernel(%arg0: i32, %arg1: i32, %arg2: i32, %arg3: memref<128x8xf32, #tpu.memory_space<vmem>>, %arg4: memref<8x16xf32, #tpu.memory_space<vmem>>, %arg5: memref<1x16xf32, #tpu.memory_space<vmem>>, %arg6: memref<128x16xf32, #tpu.memory_space<vmem>>, %arg7: memref<128x16xf32, #tpu.memory_space<vmem>>, %arg8: memref<128x16xf32, #tpu.memory_space<vmem>>) attributes {dimension_semantics = [#tpu.dimension_semantics<parallel>, #tpu.dimension_semantics<parallel>, #tpu.dimension_semantics<arbitrary>], iteration_bounds = array<i64: 1, 1, 1>, scalar_prefetch = 0 : i64, scratch_operands = 1 : i64, tpu.core_type = #tpu.core_type<tc>, window_params = [{transform_indices = @transform_0, window_bounds = array<i64: 128, 8>}, {transform_indices = @transform_1, window_bounds = array<i64: 8, 16>}, {transform_indices = @transform_2, window_bounds = array<i64: 1, 16>}, {transform_indices = @transform_3, window_bounds = array<i64: 128, 16>}, {transform_indices = @transform_4, window_bounds = array<i64: 128, 16>}]} {
    %c0_i32 = arith.constant 0 : i32
    %0 = arith.cmpi eq, %arg2, %c0_i32 : i32
    %1 = arith.extui %0 : i1 to i32
    %c0_i32_0 = arith.constant 0 : i32
    %2 = arith.cmpi ne, %1, %c0_i32_0 : i32
    scf.if %2 {
      %cst_11 = arith.constant 0.000000e+00 : f32
      %16 = vector.broadcast %cst_11 : f32 to vector<128x16xf32>
      %c0_12 = arith.constant 0 : index
      %c0_13 = arith.constant 0 : index
      %17 = vector.load %arg8[%c0_12, %c0_13] : memref<128x16xf32, #tpu.memory_space<vmem>>, vector<128x16xf32>
      tpu.vector_store %arg8[%c0_12, %c0_13], %16 {strides = array<i32>} : memref<128x16xf32, #tpu.memory_space<vmem>>, vector<128x16xf32>,
    } else {
    }
    %c0 = arith.constant 0 : index
    %c0_1 = arith.constant 0 : index
    %3 = vector.load %arg3[%c0, %c0_1] : memref<128x8xf32, #tpu.memory_space<vmem>>, vector<128x8xf32>
    %cst = arith.constant 0.000000e+00 : f32
    %4 = vector.broadcast %cst : f32 to vector<128x8xf32>
    %5 = arith.maximumf %3, %4 : vector<128x8xf32>
    %c0_2 = arith.constant 0 : index
    %c0_3 = arith.constant 0 : index
    %6 = vector.load %arg8[%c0_2, %c0_3] : memref<128x16xf32, #tpu.memory_space<vmem>>, vector<128x16xf32>
    %7 = arith.truncf %5 : vector<128x8xf32> to vector<128x8xbf16>
    %c0_4 = arith.constant 0 : index
    %c0_5 = arith.constant 0 : index
    %8 = vector.load %arg4[%c0_4, %c0_5] : memref<8x16xf32, #tpu.memory_space<vmem>>, vector<8x16xf32>
    %9 = arith.truncf %8 : vector<8x16xf32> to vector<8x16xbf16>
    %cst_6 = arith.constant dense<0.000000e+00> : vector<128x16xf32>
    %10 = tpu.matmul %7, %9, %cst_6 {dimension_numbers = #tpu.dot_dimension_numbers<[1], [0], [0], [1], [0, 0, 1, 1], [], []>} : vector<128x8xbf16>, vector<8x16xbf16>, vector<128x16xf32> -> vector<128x16xf32>
    %11 = arith.addf %6, %10 : vector<128x16xf32>
    %c0_7 = arith.constant 0 : index
    %c0_8 = arith.constant 0 : index
    %12 = vector.load %arg8[%c0_7, %c0_8] : memref<128x16xf32, #tpu.memory_space<vmem>>, vector<128x16xf32>
    tpu.vector_store %arg8[%c0_7, %c0_8], %11 {strides = array<i32>} : memref<128x16xf32, #tpu.memory_space<vmem>>, vector<128x16xf32>,
    %c0_i32_9 = arith.constant 0 : i32
    %13 = arith.cmpi eq, %arg2, %c0_i32_9 : i32
    %14 = arith.extui %13 : i1 to i32
    %c0_i32_10 = arith.constant 0 : i32
    %15 = arith.cmpi ne, %14, %c0_i32_10 : i32
    scf.if %15 {
      %c0_11 = arith.constant 0 : index
      %c0_12 = arith.constant 0 : index
      %16 = vector.load %arg8[%c0_11, %c0_12] : memref<128x16xf32, #tpu.memory_space<vmem>>, vector<128x16xf32>
      %c0_13 = arith.constant 0 : index
      %c0_14 = arith.constant 0 : index
      %17 = vector.load %arg5[%c0_13, %c0_14] : memref<1x16xf32, #tpu.memory_space<vmem>>, vector<1x16xf32>
      %18 = vector.broadcast %17 : vector<1x16xf32> to vector<128x16xf32>
      %19 = arith.addf %16, %18 : vector<128x16xf32>
      %c0_15 = arith.constant 0 : index
      %c0_16 = arith.constant 0 : index
      %20 = vector.load %arg6[%c0_15, %c0_16] : memref<128x16xf32, #tpu.memory_space<vmem>>, vector<128x16xf32>
      %21 = arith.addf %19, %20 : vector<128x16xf32>
      %c0_17 = arith.constant 0 : index
      %c0_18 = arith.constant 0 : index
      %22 = vector.load %arg7[%c0_17, %c0_18] : memref<128x16xf32, #tpu.memory_space<vmem>>, vector<128x16xf32>
      tpu.vector_store %arg7[%c0_17, %c0_18], %21 {strides = array<i32>} : memref<128x16xf32, #tpu.memory_space<vmem>>, vector<128x16xf32>,
    } else {
    }
    return
  }
  func.func @transform_0(%arg0: i32, %arg1: i32, %arg2: i32) -> (i32, i32) {
    %c0_i32 = arith.constant 0 : i32
    return %arg0, %arg2 : i32, i32
  }
  func.func @transform_1(%arg0: i32, %arg1: i32, %arg2: i32) -> (i32, i32) {
    %c0_i32 = arith.constant 0 : i32
    return %arg2, %arg1 : i32, i32
  }
  func.func @transform_2(%arg0: i32, %arg1: i32, %arg2: i32) -> (i32, i32) {
    %c0_i32 = arith.constant 0 : i32
    %c0_i32_0 = arith.constant 0 : i32
    return %c0_i32, %arg1 : i32, i32
  }
  func.func @transform_3(%arg0: i32, %arg1: i32, %arg2: i32) -> (i32, i32) {
    %c0_i32 = arith.constant 0 : i32
    return %arg0, %arg1 : i32, i32
  }
  func.func @transform_4(%arg0: i32, %arg1: i32, %arg2: i32) -> (i32, i32) {
    %c0_i32 = arith.constant 0 : i32
    return %arg0, %arg1 : i32, i32
  }
}

</mosaic_0001>

<bundles_post_ra>
// kernel: dda_forward.17
= control target key start
LH: loop header
LB: loop body
LE: loop exit
PB: predicated region body
PF: predicated region fallthrough
CT: control target
= control target key end

     0   :  { %8 = vsyncpa [#allocation4], 0  ;;  %s377_s12 = smov [#allocation3]   ;;  %s544_s0 = inlined_call_operand.hbm [shape: f32[128,16], index: 0, kind: input, shape index: {}]   ;;  %s545_s1 = inlined_call_operand.vmem [shape: f32[16,20], index: 1, kind: input, shape index: {}]   ;;  %s546_s2 = inlined_call_operand.vmem [shape: f32[1,20], index: 2, kind: input, shape index: {}]   ;;  %s547_s3 = inlined_call_operand.vmem [shape: f32[128,20], index: 3, kind: output, shape index: {}]  }
   0x1   :  { %s14_s13 = sshll.u32 %s377_s12, 4  ;;  %s353_s16 = scalar_lea.hbm %s544_s0, 2048  ;;  %s15_s13 = int_to_ptr.vmem [resolvable:$true] %s14_s13 }
   0x2   :  { %p354_p0 = scmp.ne.s32.totalorder %s544_s0, %s353_s16  ;;  %p357_p1 = scmp.lt.u32.totalorder %s353_s16, %s544_s0 }
   0x4   :  { %p359_p2 = pnand %p357_p1, %p354_p0 }
   0x6   :  { %362 = shalt.err (!%p359_p2)
}
   0x7   :  { %s363_s21 = scalar_lea.vmem %s15_s13, 2048  ;;  %p368_p4 = scmp.lt.s32.totalorder %s15_s13, %s15_s13 }
   0x8   :  { %p364_p3 = scmp.ne.s32.totalorder %s15_s13, %s363_s21  ;;  %p369_p5 = scmp.lt.s32.totalorder %s363_s21, %s363_s21 }
   0xa   :  { %p370_p6 = por %p369_p5, %p368_p4 }
   0xc   :  { %p371_p7 = pnand %p370_p6, %p364_p3 }
   0xe   :  { %374 = shalt.err (!%p371_p7)
}
   0xf   :  { %s378_s22 = smov 128   ;;  %s379_s23 = smov 8  }
  0x10   :  { %20 = dma.hbm_to_vmem [thread:$0]  %s544_s0, 2048, %s15_s13, [#allocation4], %s378_s22, %s378_s22, %s379_s23  }
  0x11   :  { %375 = dma.done.wait [#allocation4], 2048  }
  0x12   :  { %376 = vsyncadd [#allocation4], 4294965248  ;;  %vm33_vm0 = vcmask 162816   ;;  %v380_v0 = vmov 0.0   ;;  %v90_v1 = vld [vmem:[%s545_s1] sm:$0xff]  ;;  %v91_v2 = vld [vmem:[%s545_s1 + $0x8] sm:$0xff] }
  0x13   :  { %36 = vst.msk [vmem:[#allocation2 + $0x10] sm:$0xff] %vm33_vm0, %v380_v0  ;;  %34 = vst.msk [vmem:[#allocation2] sm:$0xff] %vm33_vm0, %v380_v0  ;;  %v50_v3 = vld [vmem:[#allocation3] sm:$0xff]  ;;  %v92_v4 = vpack.c.bf16 %v91_v2, %v90_v1  ;;  %v51_v5 = vld [vmem:[#allocation3 + $0x8] sm:$0xff]  ;;  %vm93_vm1 = vcmask 130048  }
  0x14   :  { %35 = vst.msk [vmem:[#allocation2 + $0x8] sm:$0xff] %vm33_vm0, %v380_v0  ;;  %37 = vst.msk [vmem:[#allocation2 + $0x18] sm:$0xff] %vm33_vm0, %v380_v0  ;;  %v58_v6 = vld [vmem:[#allocation3 + $0x40] sm:$0xff]  ;;  %v59_v7 = vld [vmem:[#allocation3 + $0x48] sm:$0xff]  ;;  %v82_v8 = vpack.c.bf16 %v51_v5, %v50_v3 }
  0x15   :  { %38 = vst.msk [vmem:[#allocation2 + $0x20] sm:$0xff] %vm33_vm0, %v380_v0  ;;  %39 = vst.msk [vmem:[#allocation2 + $0x28] sm:$0xff] %vm33_vm0, %v380_v0  ;;  %v86_v9 = vpack.c.bf16 %v59_v7, %v58_v6  ;;  %v52_v10 = vld [vmem:[#allocation3 + $0x10] sm:$0xff]  ;;  %v53_v11 = vld [vmem:[#allocation3 + $0x18] sm:$0xff]  ;;  %329 = vmatprep.subr.bf16.mxu0 %v92_v4  ;;  %347 = vmatprep.subr.bf16.mxu1 %v92_v4 }
  0x16   :  { %40 = vst.msk [vmem:[#allocation2 + $0x30] sm:$0xff] %vm33_vm0, %v380_v0  ;;  %41 = vst.msk [vmem:[#allocation2 + $0x38] sm:$0xff] %vm33_vm0, %v380_v0  ;;  %v60_v12 = vld [vmem:[#allocation3 + $0x50] sm:$0xff]  ;;  %v83_v13 = vpack.c.bf16 %v53_v11, %v52_v10  ;;  %v61_v14 = vld [vmem:[#allocation3 + $0x58] sm:$0xff]  ;;  %330 = vmatpush3.bf16.msra.mxu0 %v92_v4  ;;  %348 = vmatpush3.bf16.msra.mxu1 %v92_v4 }
  0x17   :  { %42 = vst.msk [vmem:[#allocation2 + $0x40] sm:$0xff] %vm33_vm0, %v380_v0  ;;  %43 = vst.msk [vmem:[#allocation2 + $0x48] sm:$0xff] %vm33_vm0, %v380_v0  ;;  %v54_v15 = vld [vmem:[#allocation3 + $0x20] sm:$0xff]  ;;  %v55_v16 = vld [vmem:[#allocation3 + $0x28] sm:$0xff]  ;;  %v87_v17 = vpack.c.bf16 %v61_v14, %v60_v12  ;;  %331 = vmatprep.mubr.msk.bf16.mxu0 %vm93_vm1, %v82_v8  ;;  %339 = vmatprep.mubr.msk.bf16.mxu1 %vm93_vm1, %v86_v9 }
  0x18   :  { %44 = vst.msk [vmem:[#allocation2 + $0x50] sm:$0xff] %vm33_vm0, %v380_v0  ;;  %45 = vst.msk [vmem:[#allocation2 + $0x58] sm:$0xff] %vm33_vm0, %v380_v0  ;;  %v84_v18 = vpack.c.bf16 %v55_v16, %v54_v15  ;;  %v62_v19 = vld [vmem:[#allocation3 + $0x60] sm:$0xff]  ;;  %v63_v20 = vld [vmem:[#allocation3 + $0x68] sm:$0xff] }
  0x19   :  { %46 = vst.msk [vmem:[#allocation2 + $0x60] sm:$0xff] %vm33_vm0, %v380_v0  ;;  %47 = vst.msk [vmem:[#allocation2 + $0x68] sm:$0xff] %vm33_vm0, %v380_v0  ;;  %v88_v21 = vpack.c.bf16 %v63_v20, %v62_v19  ;;  %332 = vmatmul.mubr.msk.bf16.vlgmr.msra.gmra.mrb[0].mxu0 %vm93_vm1, %v83_v13  ;;  %340 = vmatmul.mubr.msk.bf16.vlgmr.msra.gmra.mrb[0].mxu1 %vm93_vm1, %v87_v17  ;;  %v56_v22 = vld [vmem:[#allocation3 + $0x30] sm:$0xff]  ;;  %v57_v23 = vld [vmem:[#allocation3 + $0x38] sm:$0xff] }
  0x1a   :  { %48 = vst.msk [vmem:[#allocation2 + $0x70] sm:$0xff] %vm33_vm0, %v380_v0  ;;  %49 = vst.msk [vmem:[#allocation2 + $0x78] sm:$0xff] %vm33_vm0, %v380_v0  ;;  %335 = vmatprep.mubr.msk.bf16.mxu0 %vm93_vm1, %v84_v18  ;;  %v64_v24 = vld [vmem:[#allocation3 + $0x70] sm:$0xff]  ;;  %v65_v25 = vld [vmem:[#allocation3 + $0x78] sm:$0xff]  ;;  %v85_v26 = vpack.c.bf16 %v57_v23, %v56_v22 }
  0x1b   :  { %343 = vmatprep.mubr.msk.bf16.mxu1 %vm93_vm1, %v88_v21  ;;  %v89_v27 = vpack.c.bf16 %v65_v25, %v64_v24  ;;  %v68_v28 = vld [vmem:[#allocation2 + $0x10] sm:$0xff]  ;;  %v66_v30 = vld [vmem:[#allocation2] sm:$0xff]  ;;  %v69_v34 = vld [vmem:[#allocation2 + $0x18] sm:$0xff] }
  0x1c   :  { %v67_v40 = vld [vmem:[#allocation2 + $0x8] sm:$0xff]  ;;  %v70_v54 = vld [vmem:[#allocation2 + $0x20] sm:$0xff] }
  0x1d   :  { %v72_v52 = vld [vmem:[#allocation2 + $0x30] sm:$0xff]  ;;  %v454_v56 = vld [vmem:[%s546_s2] ss:$0 sm:$0xff]  ;;  %v73_v59 = vld [vmem:[#allocation2 + $0x38] sm:$0xff] }
  0x1e   :  { %v74_v31 = vld [vmem:[#allocation2 + $0x40] sm:$0xff]  ;;  %v75_v41 = vld [vmem:[#allocation2 + $0x48] sm:$0xff] }
  0x1f   :  { %v76_v29 = vld [vmem:[#allocation2 + $0x50] sm:$0xff]  ;;  %v77_v35 = vld [vmem:[#allocation2 + $0x58] sm:$0xff]  ;;  %v71_v1 = vld [vmem:[#allocation2 + $0x28] sm:$0xff] }
  0x20   :  { %v78_v55 = vld [vmem:[#allocation2 + $0x60] sm:$0xff]  ;;  %v79_v2 = vld [vmem:[#allocation2 + $0x68] sm:$0xff] }
  0x21   :  { %336 = vmatmul.mubr.msk.bf16.gmra.mrb[4].mxu0 %vm93_vm1, %v85_v26  ;;  %344 = vmatmul.mubr.msk.bf16.gmra.mrb[4].mxu1 %vm93_vm1, %v89_v27  ;;  %v80_v53 = vld [vmem:[#allocation2 + $0x70] sm:$0xff]  ;;  %v81_v60 = vld [vmem:[#allocation2 + $0x78] sm:$0xff] }
  0xec   :  { %v333_v32 = vpop.f32.mrb[0].mxu0  ;;  %v341_v33 = vpop.f32.mrb[0].mxu1 }
  0xed   :  { %v217_v36 = vadd.f32 %v333_v32, %v68_v28  ;;  %v225_v37 = vadd.f32 %v341_v33, %v76_v29  ;;  %v152_v38 = vpop.f32.mrb[1].mxu0  ;;  %v184_v39 = vpop.f32.mrb[1].mxu1 }
  0xee   :  { %v215_v42 = vadd.f32 %v152_v38, %v66_v30  ;;  %v223_v43 = vadd.f32 %v184_v39, %v74_v31  ;;  %v334_v44 = vpop.f32.mrb[2].mxu0  ;;  %v342_v45 = vpop.f32.mrb[2].mxu1 }
  0xef   :  { %234 = vst.msk [vmem:[#allocation2 + $0x10] sm:$0xff] %vm33_vm0, %v217_v36  ;;  %242 = vst.msk [vmem:[#allocation2 + $0x50] sm:$0xff] %vm33_vm0, %v225_v37  ;;  %v218_v46 = vadd.f32 %v334_v44, %v69_v34  ;;  %v226_v47 = vadd.f32 %v342_v45, %v77_v35  ;;  %v155_v48 = vpop.f32.mrb[3].mxu0  ;;  %v187_v49 = vpop.f32.mrb[3].mxu1 }
  0xf0   :  { %232 = vst.msk [vmem:[#allocation2] sm:$0xff] %vm33_vm0, %v215_v42  ;;  %240 = vst.msk [vmem:[#allocation2 + $0x40] sm:$0xff] %vm33_vm0, %v223_v43  ;;  %v216_v50 = vadd.f32 %v155_v48, %v67_v40  ;;  %v224_v51 = vadd.f32 %v187_v49, %v75_v41 }
  0xf1   :  { %235 = vst.msk [vmem:[#allocation2 + $0x18] sm:$0xff] %vm33_vm0, %v218_v46  ;;  %243 = vst.msk [vmem:[#allocation2 + $0x58] sm:$0xff] %vm33_vm0, %v226_v47 }
  0xf2   :  { %233 = vst.msk [vmem:[#allocation2 + $0x8] sm:$0xff] %vm33_vm0, %v216_v50  ;;  %241 = vst.msk [vmem:[#allocation2 + $0x48] sm:$0xff] %vm33_vm0, %v224_v51 }
  0xf4   :  { %v337_v57 = vpop.f32.mrb[4].mxu0  ;;  %v345_v58 = vpop.f32.mrb[4].mxu1 }
  0xf5   :  { %v221_v61 = vadd.f32 %v337_v57, %v72_v52  ;;  %v229_v62 = vadd.f32 %v345_v58, %v80_v53  ;;  %v168_v63 = vpop.f32.mrb[5].mxu0  ;;  %v200_v0 = vpop.f32.mrb[5].mxu1 }
  0xf6   :  { %v253_v3 = vld [vmem:[#allocation2 + $0x10] sm:$0xff]  ;;  %v219_v5 = vadd.f32 %v168_v63, %v70_v54  ;;  %v227_v6 = vadd.f32 %v200_v0, %v78_v55  ;;  %v338_v7 = vpop.f32.mrb[6].mxu0  ;;  %v346_v8 = vpop.f32.mrb[6].mxu1 }
  0xf7   :  { %v261_v4 = vld [vmem:[#allocation2 + $0x50] sm:$0xff]  ;;  %v276_v9 = vadd.f32 %v454_v56, %v253_v3  ;;  %v251_v11 = vld [vmem:[#allocation2] sm:$0xff]  ;;  %238 = vst.msk [vmem:[#allocation2 + $0x30] sm:$0xff] %vm33_vm0, %v221_v61  ;;  %246 = vst.msk [vmem:[#allocation2 + $0x70] sm:$0xff] %vm33_vm0, %v229_v62  ;;  %v222_v13 = vadd.f32 %v338_v7, %v73_v59  ;;  %v230_v14 = vadd.f32 %v346_v8, %v81_v60  ;;  %v171_v15 = vpop.f32.mrb[7].mxu0  ;;  %v203_v16 = vpop.f32.mrb[7].mxu1 }
  0xf8   :  { %v284_v10 = vadd.f32 %v454_v56, %v261_v4  ;;  %v259_v12 = vld [vmem:[#allocation2 + $0x40] sm:$0xff]  ;;  %v274_v17 = vadd.f32 %v454_v56, %v251_v11  ;;  %v254_v19 = vld [vmem:[#allocation2 + $0x18] sm:$0xff]  ;;  %236 = vst.msk [vmem:[#allocation2 + $0x20] sm:$0xff] %vm33_vm0, %v219_v5  ;;  %244 = vst.msk [vmem:[#allocation2 + $0x60] sm:$0xff] %vm33_vm0, %v227_v6  ;;  %v220_v21 = vadd.f32 %v171_v15, %v71_v1 }
  0xf9   :  { %v282_v18 = vadd.f32 %v454_v56, %v259_v12  ;;  %v262_v20 = vld [vmem:[#allocation2 + $0x58] sm:$0xff]  ;;  %v228_v22 = vadd.f32 %v203_v16, %v79_v2  ;;  %292 = vst.msk [vmem:[%s547_s3 + $0x10] sm:$0xff] %vm33_vm0, %v276_v9  ;;  %v277_v23 = vadd.f32 %v454_v56, %v254_v19  ;;  %v252_v25 = vld [vmem:[#allocation2 + $0x8] sm:$0xff]  ;;  %239 = vst.msk [vmem:[#allocation2 + $0x38] sm:$0xff] %vm33_vm0, %v222_v13 }
  0xfa   :  { %300 = vst.msk [vmem:[%s547_s3 + $0x50] sm:$0xff] %vm33_vm0, %v284_v10  ;;  %v285_v24 = vadd.f32 %v454_v56, %v262_v20  ;;  %v260_v26 = vld [vmem:[#allocation2 + $0x48] sm:$0xff]  ;;  %247 = vst.msk [vmem:[#allocation2 + $0x78] sm:$0xff] %vm33_vm0, %v230_v14  ;;  %v275_v27 = vadd.f32 %v454_v56, %v252_v25 }
  0xfb   :  { %290 = vst.msk [vmem:[%s547_s3] sm:$0xff] %vm33_vm0, %v274_v17  ;;  %298 = vst.msk [vmem:[%s547_s3 + $0x40] sm:$0xff] %vm33_vm0, %v282_v18  ;;  %v283_v28 = vadd.f32 %v454_v56, %v260_v26 }
  0xfc   :  { %237 = vst.msk [vmem:[#allocation2 + $0x28] sm:$0xff] %vm33_vm0, %v220_v21  ;;  %245 = vst.msk [vmem:[#allocation2 + $0x68] sm:$0xff] %vm33_vm0, %v228_v22 }
  0xfd   :  { %293 = vst.msk [vmem:[%s547_s3 + $0x18] sm:$0xff] %vm33_vm0, %v277_v23  ;;  %301 = vst.msk [vmem:[%s547_s3 + $0x58] sm:$0xff] %vm33_vm0, %v285_v24 }
  0xfe   :  { %291 = vst.msk [vmem:[%s547_s3 + $0x8] sm:$0xff] %vm33_vm0, %v275_v27  ;;  %299 = vst.msk [vmem:[%s547_s3 + $0x48] sm:$0xff] %vm33_vm0, %v283_v28  ;;  %v257_v29 = vld [vmem:[#allocation2 + $0x30] sm:$0xff] }
  0xff   :  { %v265_v30 = vld [vmem:[#allocation2 + $0x70] sm:$0xff]  ;;  %v280_v31 = vadd.f32 %v454_v56, %v257_v29  ;;  %v255_v33 = vld [vmem:[#allocation2 + $0x20] sm:$0xff] }
 0x100   :  { %v288_v32 = vadd.f32 %v454_v56, %v265_v30  ;;  %v263_v34 = vld [vmem:[#allocation2 + $0x60] sm:$0xff]  ;;  %v278_v35 = vadd.f32 %v454_v56, %v255_v33  ;;  %v258_v37 = vld [vmem:[#allocation2 + $0x38] sm:$0xff] }
 0x101   :  { %v286_v36 = vadd.f32 %v454_v56, %v263_v34  ;;  %v266_v38 = vld [vmem:[#allocation2 + $0x78] sm:$0xff]  ;;  %296 = vst.msk [vmem:[%s547_s3 + $0x30] sm:$0xff] %vm33_vm0, %v280_v31  ;;  %v281_v39 = vadd.f32 %v454_v56, %v258_v37 }
 0x102   :  { %304 = vst.msk [vmem:[%s547_s3 + $0x70] sm:$0xff] %vm33_vm0, %v288_v32  ;;  %v289_v40 = vadd.f32 %v454_v56, %v266_v38  ;;  %294 = vst.msk [vmem:[%s547_s3 + $0x20] sm:$0xff] %vm33_vm0, %v278_v35 }
 0x103   :  { %v256_v41 = vld [vmem:[#allocation2 + $0x28] sm:$0xff]  ;;  %302 = vst.msk [vmem:[%s547_s3 + $0x60] sm:$0xff] %vm33_vm0, %v286_v36  ;;  %297 = vst.msk [vmem:[%s547_s3 + $0x38] sm:$0xff] %vm33_vm0, %v281_v39 }
 0x104   :  { %v264_v42 = vld [vmem:[#allocation2 + $0x68] sm:$0xff]  ;;  %v279_v43 = vadd.f32 %v454_v56, %v256_v41  ;;  %305 = vst.msk [vmem:[%s547_s3 + $0x78] sm:$0xff] %vm33_vm0, %v289_v40 }
 0x105   :  { %v287_v44 = vadd.f32 %v454_v56, %v264_v42 }
 0x106   :  { %295 = vst.msk [vmem:[%s547_s3 + $0x28] sm:$0xff] %vm33_vm0, %v279_v43 }
 0x107   :  { %303 = vst.msk [vmem:[%s547_s3 + $0x68] sm:$0xff] %vm33_vm0, %v287_v44 }
 0x108   :  { %310 = vsyncpa [#allocation4], 1 }

// kernel: dda_forward.18
= control target key start
LH: loop header
LB: loop body
LE: loop exit
PB: predicated region body
PF: predicated region fallthrough
CT: control target
= control target key end

     0   :  { %v175_v0 = vmov 0.0   ;;  %vm176_vm0 = vmmov 0   ;;  %vm33_vm1 = vcmask 130048   ;;  %vm92_vm2 = vcmask 1041408   ;;  %s228_s1 = inlined_call_operand.vmem [shape: f32[16,4], index: 1, kind: input, shape index: {}]   ;;  %s229_s0 = inlined_call_operand.vmem [shape: f32[2,16], index: 0, kind: input, shape index: {}]   ;;  %s230_s3 = inlined_call_operand.vmem [shape: f32[4,16], index: 3, kind: input, shape index: {}]   ;;  %s231_s2 = inlined_call_operand.vmem [shape: f32[1,4], index: 2, kind: input, shape index: {}]   ;;  %s232_s4 = inlined_call_operand.vmem [shape: f32[1,16], index: 4, kind: input, shape index: {}]   ;;  %s233_s5 = inlined_call_operand.vmem [shape: f32[2,16], index: 5, kind: output, shape index: {}]  }
   0x1   :  { %157 = vmatprep.subr.bf16.mxu0 %v175_v0  ;;  %v23_v1 = vld [vmem:[%s228_s1] sm:$0xff]  ;;  %v24_v2 = vld [vmem:[%s228_s1 + $0x8] sm:$0xff]  ;;  %159 = vmatprep.mubr.msk.bf16.mxu0 %vm176_vm0, %v175_v0  ;;  %vm88_vm3 = vcmask 31744   ;;  %vm142_vm4 = vcmask 123904  }
   0x2   :  { %v21_v3 = vld [vmem:[%s229_s0] sm:$0x3]  ;;  %v25_v4 = vpack.c.bf16 %v24_v2, %v23_v1  ;;  %163 = vmatprep.subr.bf16.mxu1 %v175_v0  ;;  %165 = vmatprep.mubr.msk.bf16.mxu1 %vm176_vm0, %v175_v0 }
   0x3   :  { %v22_v5 = vpack.c.bf16 %v21_v3, %v21_v3  ;;  %v79_v6 = vld [vmem:[%s230_s3] sm:$0xf] }
   0x4   :  { %158 = vmatpush3.bf16.msra.mxu0 %v25_v4  ;;  %v80_v7 = vpack.c.bf16 %v79_v6, %v79_v6  ;;  %v148_v9 = vld [vmem:[%s231_s2] ss:$0 sm:$0xff] }
   0x5   :  { %v150_v17 = vld [vmem:[%s232_s4] ss:$0 sm:$0xff] }
   0x6   :  { %v94_v8 = vsel %vm92_vm2, %v80_v7, 0 }
   0x7   :  { %160 = vmatmul.mubr.msk.bf16.vlgmr.msra.gmra.mrb[0].mxu0 %vm33_vm1, %v22_v5  ;;  %164 = vmatpush3.bf16.msra.mxu1 %v94_v8 }
  0xda   :  { %v71_v10 = vpop.f32.mrb[0].mxu0 }
  0xdb   :  { %v72_v11 = vadd.f32 %v148_v9, %v71_v10  ;;  %v161_v12 = vpop.f32.mrb[1].mxu0 }
  0xdc   :  { %v74_v13 = vpop.f32.mrb[2].mxu0 }
  0xdd   :  { %v77_v14 = vmax.f32 %v72_v11, 0.0  ;;  %v162_v15 = vpop.f32.mrb[3].mxu0 }
  0xdf   :  { %v78_v16 = vpack.c.bf16 %v77_v14, %v77_v14 }
  0xe1   :  { %166 = vmatmul.mubr.msk.bf16.vlgmr.msra.gmra.mrb[0].mxu1 %vm88_vm3, %v78_v16 }
 0x1b4   :  { %v130_v18 = vpop.f32.mrb[0].mxu1 }
 0x1b5   :  { %v131_v19 = vadd.f32 %v150_v17, %v130_v18  ;;  %v167_v20 = vpop.f32.mrb[1].mxu1 }
 0x1b6   :  { %v133_v21 = vpop.f32.mrb[2].mxu1 }
 0x1b7   :  { %v152_v22 = vmul.f32 -1.442695, %v131_v19  ;;  %v168_v23 = vpop.f32.mrb[3].mxu1 }
 0x1b9   :  { %171 = vpow2.f32 %v152_v22 }
 0x1c3   :  { %v172_v24 = vpop.eup %171 }
 0x1c4   :  { %v139_v25 = vadd.f32 1.0, %v172_v24 }
 0x1c6   :  { %173 = vrcp.f32 %v139_v25 }
 0x1d0   :  { %v174_v26 = vpop.eup %173 }
 0x1d1   :  { %143 = vst.msk [vmem:[%s233_s5] sm:$0x3] %vm142_vm4, %v174_v26 }

// kernel: dda_forward.19
= control target key start
LH: loop header
LB: loop body
LE: loop exit
PB: predicated region body
PF: predicated region fallthrough
CT: control target
= control target key end

     0   :  { %s1345_s23 = smov 0   ;;  %s1347_s24 = smov 0   ;;  %s1673_s0 = inlined_call_operand.<no memory space> [shape: f32[1], index: 0, kind: input, shape index: {}]   ;;  %s1674_s1 = inlined_call_operand.vmem [shape: f32[2,64,2], index: 1, kind: input, shape index: {}]   ;;  %s1675_s2 = inlined_call_operand.vmem [shape: f32[2,64,2], index: 2, kind: input, shape index: {}]   ;;  %s1676_s3 = inlined_call_operand.vmem [shape: f32[2,64,16], index: 3, kind: input, shape index: {}]   ;;  %s1677_s4 = inlined_call_operand.vmem [shape: f32[2,64,16], index: 4, kind: input, shape index: {}]   ;;  %s1678_s5 = inlined_call_operand.vmem [shape: f32[2,1,16], index: 5, kind: input, shape index: {}]   ;;  %s1679_s6 = inlined_call_operand.vmem [shape: f32[2,64,16], index: 6, kind: output, shape index: {}]  }
   0x1   :  { %11 = sst [smem:[#allocation5]] %s1673_s0  ;;  %s1349_s25 = smov 0  }
   0x2 LB: > { %s29_s0 = sadd.s32 1, %s1298_s24  ;;  %p1124_p0 = scmp.ge.s32.totalorder %s1302_s25, 1  ;;  %s1302_s25 = sphi %s1349_s25, %s17_s25   ;;  %s1298_s24 = sphi %s1347_s24, %s1681_s24   ;;  %s1294_s23 = sphi %s1345_s23, %s1680_s23  }
   0x3   : > { %p31_p1 = scmp.ge.s32.totalorder %s29_s0, 2  ;;  %p277_p2 = scmp.lt.s32.totalorder %s1302_s25, 3 }
   0x5   : > { %s1683_s0 = smov (%p31_p1, %s29_s0), 0  ;;  %p278_p3 = pnand %p1124_p0, %p277_p2 }
   0x6   : > { %p333_p4 = scmp.lt.s32.totalorder (!%p278_p3), %s1294_s23, 1  ;;  %vm426_vm0 = vcmask (!%p278_p3), 15360   ;;  %vm376_vm1 = vcmask (!%p278_p3), 7168   ;;  %v1304_v28 = vmov (!%p278_p3), -inf   ;;  %vm524_vm2 = vcmask (!%p278_p3), 523264   ;;  %s952_s12 = sld [smem:[#allocation5]] (!%p278_p3) }
   0x7   : > { %281 = sbr.rel (%p278_p3) target bundleno = 879 (0x36f), region = 44  ;;  %379 = vst.msk [vmem:[#allocation2 + $0x10] sm:$0xff] (!%p278_p3), %vm376_vm1, %v1304_v28  ;;  %377 = vst.msk [vmem:[#allocation2] sm:$0xff] (!%p278_p3), %vm376_vm1, %v1304_v28  ;;  %v1305_v45 = vmov (!%p278_p3), 0   ;;  %v1306_v46 = vmov (!%p278_p3), 0.0   ;;  %vm393_vm3 = vcmask (!%p278_p3), 130048  }
   0x8   : > { %378 = vst.msk [vmem:[#allocation2 + $0x8] sm:$0xff] (!%p278_p3), %vm376_vm1, %v1304_v28  ;;  %380 = vst.msk [vmem:[#allocation2 + $0x18] sm:$0xff] (!%p278_p3), %vm376_vm1, %v1304_v28  ;;  %1230 = vset.pattern.permute.xlu0 (!%p278_p3), %v1305_v45  ;;  %1231 = vset.pattern.permute.xlu1 (!%p278_p3), %v1305_v45 }
   0x9   : > { %381 = vst.msk [vmem:[#allocation2 + $0x20] sm:$0xff] (!%p278_p3), %vm376_vm1, %v1304_v28  ;;  %382 = vst.msk [vmem:[#allocation2 + $0x28] sm:$0xff] (!%p278_p3), %vm376_vm1, %v1304_v28 }
   0xa   : > { %383 = vst.msk [vmem:[#allocation2 + $0x30] sm:$0xff] (!%p278_p3), %vm376_vm1, %v1304_v28  ;;  %384 = vst.msk [vmem:[#allocation2 + $0x38] sm:$0xff] (!%p278_p3), %vm376_vm1, %v1304_v28 }
   0xb   : > { %387 = vst.msk [vmem:[#allocation3 + $0x10] sm:$0xff] (!%p278_p3), %vm376_vm1, %v1306_v46  ;;  %385 = vst.msk [vmem:[#allocation3] sm:$0xff] (!%p278_p3), %vm376_vm1, %v1306_v46 }
   0xc   : > { %386 = vst.msk [vmem:[#allocation3 + $0x8] sm:$0xff] (!%p278_p3), %vm376_vm1, %v1306_v46  ;;  %388 = vst.msk [vmem:[#allocation3 + $0x18] sm:$0xff] (!%p278_p3), %vm376_vm1, %v1306_v46 }
   0xd   : > { %389 = vst.msk [vmem:[#allocation3 + $0x20] sm:$0xff] (!%p278_p3), %vm376_vm1, %v1306_v46  ;;  %390 = vst.msk [vmem:[#allocation3 + $0x28] sm:$0xff] (!%p278_p3), %vm376_vm1, %v1306_v46 }
   0xe   : > { %s1685_s23 = smov (!%p333_p4, %s1294_s23), 1  ;;  %391 = vst.msk [vmem:[#allocation3 + $0x30] sm:$0xff] %vm376_vm1, %v1306_v46  ;;  %392 = vst.msk [vmem:[#allocation3 + $0x38] sm:$0xff] %vm376_vm1, %v1306_v46  ;;  %v1454_v47 = vld [vmem:[#allocation2 + $0x10] sm:$0xff]  ;;  %v1456_v48 = vld [vmem:[#allocation2] sm:$0xff] }
   0xf   : > { %s1366_s26 = sshll.u32 %s1685_s23, 6  ;;  %v1464_v53 = vld [vmem:[#allocation2 + $0x18] sm:$0xff]  ;;  %v1471_v55 = vld [vmem:[#allocation2 + $0x8] sm:$0xff]  ;;  %394 = vst.msk [vmem:[#allocation4] sm:$0xff] %vm393_vm3, %v1306_v46  ;;  %395 = vst.msk [vmem:[#allocation4 + $0x8] sm:$0xff] %vm393_vm3, %v1306_v46  ;;  %s365_s18 = scalar_lea.vmem %s1678_s5, %s1685_s23 }
  0x10   : > { %s346_s29 = scalar_lea.vmem %s1675_s2, %s1366_s26  ;;  %s1376_s8 = scalar_lea.vmem %s1674_s1, %s1366_s26  ;;  %v1489_v62 = vld [vmem:[#allocation2 + $0x20] sm:$0xff]  ;;  %396 = vst.msk [vmem:[#allocation4 + $0x10] sm:$0xff] %vm393_vm3, %v1306_v46  ;;  %397 = vst.msk [vmem:[#allocation4 + $0x18] sm:$0xff] %vm393_vm3, %v1306_v46 }
  0x11   : > { %v414_v0 = vld [vmem:[%s346_s29] sm:$0xff]  ;;  %v415_v1 = vld [vmem:[%s346_s29 + $0x8] sm:$0xff]  ;;  %v416_v2 = vld [vmem:[%s346_s29 + $0x10] sm:$0xff]  ;;  %s1501_s11 = scalar_lea.vmem %s1676_s3, %s1366_s26  ;;  %398 = vst.msk [vmem:[#allocation4 + $0x20] sm:$0xff] %vm393_vm3, %v1306_v46  ;;  %s1628_s15 = scalar_lea.vmem %s1677_s4, %s1366_s26 }
  0x12   : > { %v422_v3 = vpack.c.bf16 %v415_v1, %v414_v0  ;;  %v417_v4 = vld [vmem:[%s346_s29 + $0x18] sm:$0xff]  ;;  %v402_v6 = vld [vmem:[%s1376_s8] sm:$0xff]  ;;  %v403_v8 = vld [vmem:[%s1376_s8 + $0x8] sm:$0xff]  ;;  %399 = vst.msk [vmem:[#allocation4 + $0x28] sm:$0xff] %vm393_vm3, %v1306_v46  ;;  %s1639_s21 = scalar_lea.vmem %s1679_s6, %s1366_s26 }
  0x13   : > { %v423_v5 = vpack.c.bf16 %v417_v4, %v416_v2  ;;  %v410_v9 = vpack.c.bf16 %v403_v8, %v402_v6  ;;  %v418_v10 = vld [vmem:[%s346_s29 + $0x20] sm:$0xff]  ;;  %v419_v11 = vld [vmem:[%s346_s29 + $0x28] sm:$0xff]  ;;  %v420_v14 = vld [vmem:[%s346_s29 + $0x30] sm:$0xff]  ;;  %400 = vst.msk [vmem:[#allocation4 + $0x30] sm:$0xff] %vm393_vm3, %v1306_v46 }
  0x14   : > { %1199 = vmatprep.subr.msk.bf16.mxu0 %vm426_vm0, %v422_v3  ;;  %v440_v7 = vsel %vm426_vm0, %v422_v3, 0  ;;  %v424_v13 = vpack.c.bf16 %v419_v11, %v418_v10  ;;  %v421_v15 = vld [vmem:[%s346_s29 + $0x38] sm:$0xff]  ;;  %v404_v19 = vld [vmem:[%s1376_s8 + $0x10] sm:$0xff]  ;;  %v406_v21 = vld [vmem:[%s1376_s8 + $0x20] sm:$0xff]  ;;  %401 = vst.msk [vmem:[#allocation4 + $0x38] sm:$0xff] %vm393_vm3, %v1306_v46 }
  0x15   : > { %1168 = vmatpush3.bf16.xpose.msra.mxu0 %v440_v7  ;;  %1175 = vmatprep.mubr.msk.bf16.mxu0 %vm426_vm0, %v410_v9  ;;  %v443_v12 = vsel %vm426_vm0, %v423_v5, 0  ;;  %v425_v17 = vpack.c.bf16 %v421_v15, %v420_v14  ;;  %v405_v20 = vld [vmem:[%s1376_s8 + $0x18] sm:$0xff]  ;;  %v407_v22 = vld [vmem:[%s1376_s8 + $0x28] sm:$0xff]  ;;  %v408_v25 = vld [vmem:[%s1376_s8 + $0x30] sm:$0xff] }
  0x16   : > { %1200 = vmatprep.subr.msk.bf16.mxu0 %vm426_vm0, %v423_v5  ;;  %v446_v16 = vsel %vm426_vm0, %v424_v13, 0  ;;  %v411_v23 = vpack.c.bf16 %v405_v20, %v404_v19  ;;  %v412_v24 = vpack.c.bf16 %v407_v22, %v406_v21  ;;  %v409_v26 = vld [vmem:[%s1376_s8 + $0x38] sm:$0xff]  ;;  %v1495_v1 = vld [vmem:[#allocation2 + $0x28] sm:$0xff]  ;;  %v762_v3 = vld [vmem:[%s1501_s11] sm:$0xff] }
  0x17   : > { %v449_v18 = vsel %vm426_vm0, %v425_v17, 0  ;;  %v413_v27 = vpack.c.bf16 %v409_v26, %v408_v25  ;;  %v763_v4 = vld [vmem:[%s1501_s11 + $0x8] sm:$0xff]  ;;  %v1509_v6 = vld [vmem:[#allocation2 + $0x30] sm:$0xff]  ;;  %v1518_v11 = vld [vmem:[#allocation2 + $0x38] sm:$0xff] }
  0x18   : > { %v770_v7 = vpack.c.bf16 %v763_v4, %v762_v3  ;;  %v764_v14 = vld [vmem:[%s1501_s11 + $0x10] sm:$0xff]  ;;  %v765_v15 = vld [vmem:[%s1501_s11 + $0x18] sm:$0xff]  ;;  %v766_v21 = vld [vmem:[%s1501_s11 + $0x20] sm:$0xff] }
  0x19   : > { %v767_v22 = vld [vmem:[%s1501_s11 + $0x28] sm:$0xff]  ;;  %v769_v25 = vld [vmem:[%s1501_s11 + $0x38] sm:$0xff] }
  0x1a   : > { %1183 = vmatprep.subr.bf16.mxu1 %v770_v7 }
  0x1b   : > { %1184 = vmatpush3.bf16.msra.mxu1 %v770_v7 }
  0x1d   : > { %1170 = vmatpush3.bf16.xpose.msra.mxu0 %v443_v12 }
  0x1e   : > { %1201 = vmatprep.subr.msk.bf16.mxu0 %vm426_vm0, %v424_v13 }
  0x25   : > { %1172 = vmatpush3.bf16.xpose.msra.mxu0 %v446_v16 }
  0x26   : > { %1202 = vmatprep.subr.msk.bf16.mxu0 %vm426_vm0, %v425_v17  ;;  %v771_v17 = vpack.c.bf16 %v765_v15, %v764_v14 }
  0x28   : > { %1185 = vmatprep.subr.bf16.mxu1 %v771_v17 }
  0x29   : > { %1186 = vmatpush3.bf16.msra.mxu1 %v771_v17 }
  0x2d   : > { %1174 = vmatpush3.bf16.xpose.msra.mxu0 %v449_v18 }
  0x34   : > { %1176 = vmatmul.mubr.msk.bf16.vlgmr.msra.gmra.mrb[0].mxu0 %vm426_vm0, %v411_v23  ;;  %v772_v23 = vpack.c.bf16 %v767_v22, %v766_v21 }
  0x35   : > { %1179 = vmatprep.mubr.msk.bf16.mxu0 %vm426_vm0, %v412_v24  ;;  %v768_v24 = vld [vmem:[%s1501_s11 + $0x30] sm:$0xff] }
  0x36   : > { %1187 = vmatprep.subr.bf16.mxu1 %v772_v23  ;;  %v773_v26 = vpack.c.bf16 %v769_v25, %v768_v24 }
  0x37   : > { %1188 = vmatpush3.bf16.msra.mxu1 %v772_v23 }
  0x38   : > { %1189 = vmatprep.subr.bf16.mxu1 %v773_v26 }
  0x3b   : > { %1190 = vmatpush3.bf16.msra.mxu1 %v773_v26 }
  0x3c   : > { %1180 = vmatmul.mubr.msk.bf16.gmra.mrb[4].mxu0 %vm426_vm0, %v413_v27 }
 0x107   : > { %v1406_v29 = vpop.f32.mrb[0].mxu0 }
 0x108   : > { %v1408_v30 = vpop.f32.mrb[1].mxu0  ;;  %v531_v31 = vsel %vm524_vm2, %v1406_v29, -inf }
 0x109   : > { %532 = vmax.xlane.f32.xlu1 %v531_v31  ;;  %v1412_v32 = vpop.f32.mrb[2].mxu0  ;;  %v525_v33 = vsel %vm524_vm2, %v1408_v30, -inf }
 0x10a   : > { %526 = vmax.xlane.f32.xlu0 %v525_v33  ;;  %v1416_v34 = vpop.f32.mrb[3].mxu0  ;;  %v534_v35 = vsel %vm524_vm2, %v1412_v32, -inf }
 0x10b   : > { %v528_v36 = vsel %vm524_vm2, %v1416_v34, -inf }
 0x10d   : > { %535 = vmax.xlane.f32.xlu1 %v534_v35 }
 0x10e   : > { %529 = vmax.xlane.f32.xlu0 %v528_v36 }
 0x10f   : > { %v1422_v37 = vpop.f32.mrb[4].mxu0 }
 0x110   : > { %v1424_v38 = vpop.f32.mrb[5].mxu0  ;;  %v543_v43 = vsel %vm524_vm2, %v1422_v37, -inf }
 0x111   : > { %v1426_v39 = vpop.f32.mrb[6].mxu0  ;;  %v537_v40 = vsel %vm524_vm2, %v1424_v38, -inf }
 0x112   : > { %538 = vmax.xlane.f32.xlu0 %v537_v40  ;;  %v1430_v41 = vpop.f32.mrb[7].mxu0  ;;  %v546_v44 = vsel %vm524_vm2, %v1426_v39, -inf }
 0x113   : > { %v540_v42 = vsel %vm524_vm2, %v1430_v41, -inf }
 0x114   : > { %541 = vmax.xlane.f32.xlu1 %v540_v42 }
 0x116   : > { %544 = vmax.xlane.f32.xlu0 %v543_v43 }
 0x118   : > { %547 = vmax.xlane.f32.xlu1 %v546_v44 }
 0x196   : > { %v533_v49 = vpop.xlane.xlu1 %532 }
 0x197   : > { %v1459_v50 = vmax.f32 %v1454_v47, %v533_v49  ;;  %v527_v51 = vpop.xlane.xlu0 %526 }
 0x198   : > { %v1462_v52 = vmax.f32 %v1456_v48, %v527_v51 }
 0x199   : > { %v559_v54 = vsub.f32 %v1454_v47, %v1459_v50  ;;  %870 = vst.msk [vmem:[#allocation2 + $0x10] sm:$0xff] %vm376_vm1, %v1459_v50  ;;  %593 = vperm.xlu1 %1231, %v1459_v50  }
 0x19a   : > { %v557_v56 = vsub.f32 %v1456_v48, %v1462_v52  ;;  %868 = vst.msk [vmem:[#allocation2] sm:$0xff] %vm376_vm1, %v1462_v52  ;;  %v536_v57 = vpop.xlane.xlu1 %535  ;;  %583 = vperm.xlu0 %1230, %v1462_v52  }
 0x19b   : > { %v1479_v58 = vmax.f32 %v1464_v53, %v536_v57  ;;  %v530_v59 = vpop.xlane.xlu0 %529 }
 0x19c   : > { %v1482_v60 = vmax.f32 %v1471_v55, %v530_v59 }
 0x19d   : > { %v560_v61 = vsub.f32 %v1464_v53, %v1479_v58  ;;  %871 = vst.msk [vmem:[#allocation2 + $0x18] sm:$0xff] %vm376_vm1, %v1479_v58  ;;  %598 = vperm.xlu1 %1231, %v1479_v58  }
 0x19e   : > { %v558_v63 = vsub.f32 %v1471_v55, %v1482_v60  ;;  %869 = vst.msk [vmem:[#allocation2 + $0x8] sm:$0xff] %vm376_vm1, %v1482_v60 }
 0x19f   : > { %v539_v0 = vpop.xlane.xlu0 %538 }
 0x1a0   : > { %v1504_v2 = vmax.f32 %v1489_v62, %v539_v0 }
 0x1a1   : > { %588 = vperm.xlu1 %1231, %v1482_v60   ;;  %v542_v5 = vpop.xlane.xlu1 %541 }
 0x1a2   : > { %v561_v8 = vsub.f32 %v1489_v62, %v1504_v2  ;;  %872 = vst.msk [vmem:[#allocation2 + $0x20] sm:$0xff] %vm376_vm1, %v1504_v2  ;;  %v1516_v9 = vmax.f32 %v1495_v1, %v542_v5  ;;  %v647_v62 = vld [vmem:[#allocation3 + $0x10] sm:$0xff] }
 0x1a3   : > { %v545_v10 = vpop.xlane.xlu0 %544 }
 0x1a4   : > { %v562_v12 = vsub.f32 %v1495_v1, %v1516_v9  ;;  %873 = vst.msk [vmem:[#allocation2 + $0x28] sm:$0xff] %vm376_vm1, %v1516_v9  ;;  %v1525_v13 = vmax.f32 %v1509_v6, %v545_v10  ;;  %v573_v55 = vmul.f32 1.442695, %v561_v8 }
 0x1a5   : > { %v548_v16 = vpop.xlane.xlu1 %547 }
 0x1a6   : > { %v563_v18 = vsub.f32 %v1509_v6, %v1525_v13  ;;  %874 = vst.msk [vmem:[#allocation2 + $0x30] sm:$0xff] %vm376_vm1, %v1525_v13  ;;  %v1534_v19 = vmax.f32 %v1518_v11, %v548_v16  ;;  %613 = vperm.xlu1 %1231, %v1525_v13   ;;  %v575_v47 = vmul.f32 1.442695, %v562_v12 }
 0x1a8   : > { %v564_v20 = vsub.f32 %v1518_v11, %v1534_v19  ;;  %875 = vst.msk [vmem:[#allocation2 + $0x38] sm:$0xff] %vm376_vm1, %v1534_v19  ;;  %v577_v48 = vmul.f32 1.442695, %v563_v18  ;;  %v648_v11 = vld [vmem:[#allocation3 + $0x18] sm:$0xff]  ;;  %v646_v18 = vld [vmem:[#allocation3 + $0x8] sm:$0xff] }
 0x1aa   : > { %603 = vperm.xlu1 %1231, %v1504_v2   ;;  %v579_v50 = vmul.f32 1.442695, %v564_v20 }
 0x1ae   : > { %608 = vperm.xlu1 %1231, %v1516_v9  }
 0x1b2   : > { %618 = vperm.xlu1 %1231, %v1534_v19  }
 0x218   : > { %v594_v27 = vpop.permute.xlu1 %593 }
 0x219   : > { %v623_v28 = vsub.f32 %v1406_v29, %v594_v27  ;;  %v584_v31 = vpop.permute.xlu0 %583 }
 0x21a   : > { %v621_v33 = vsub.f32 %v1408_v30, %v584_v31 }
 0x21b   : > { %v633_v35 = vmul.f32 1.442695, %v623_v28 }
 0x21c   : > { %v629_v36 = vmul.f32 1.442695, %v621_v33  ;;  %v599_v40 = vpop.permute.xlu1 %598 }
 0x21d   : > { %1232 = vpow2.f32 %v633_v35  ;;  %v624_v42 = vsub.f32 %v1412_v32, %v599_v40  ;;  %v565_v40 = vmul.f32 1.442695, %v557_v56 }
 0x21e   : > { %1234 = vpow2.f32 %v629_v36  ;;  %v567_v36 = vmul.f32 1.442695, %v558_v63  ;;  %v645_v63 = vld [vmem:[#allocation3] sm:$0xff] }
 0x21f   : > { %v635_v43 = vmul.f32 1.442695, %v624_v42  ;;  %v569_v42 = vmul.f32 1.442695, %v559_v54 }
 0x220   : > { %v589_v44 = vpop.permute.xlu1 %588 }
 0x221   : > { %1236 = vpow2.f32 %v635_v43  ;;  %v622_v45 = vsub.f32 %v1416_v34, %v589_v44  ;;  %v571_v43 = vmul.f32 1.442695, %v560_v61 }
 0x223   : > { %v631_v49 = vmul.f32 1.442695, %v622_v45 }
 0x225   : > { %1238 = vpow2.f32 %v631_v49  ;;  %v614_v51 = vpop.permute.xlu1 %613 }
 0x226   : > { %v627_v59 = vsub.f32 %v1422_v37, %v614_v51 }
 0x227   : > { %v1233_v57 = vpop.eup %1232 }
 0x228   : > { %v1235_v29 = vpop.eup %1234  ;;  %v667_v30 = vsel %vm524_vm2, %v1233_v57, 0.0  ;;  %v641_v5 = vmul.f32 1.442695, %v627_v59 }
 0x229   : > { %668 = vadd.xlane.f32.xlu0 %v667_v30  ;;  %v604_v0 = vpop.permute.xlu1 %603  ;;  %v661_v3 = vsel %vm524_vm2, %v1235_v29, 0.0 }
 0x22a   : > { %v625_v32 = vsub.f32 %v1424_v38, %v604_v0  ;;  %662 = vadd.xlane.f32.xlu1 %v661_v3  ;;  %v651_v3 = vld [vmem:[#allocation3 + $0x30] sm:$0xff] }
 0x22b   : > { %v1237_v4 = vpop.eup %1236 }
 0x22c   : > { %v637_v7 = vmul.f32 1.442695, %v625_v32  ;;  %v670_v34 = vsel %vm524_vm2, %v1237_v4, 0.0  ;;  %v759_v10 = vpack.c.bf16 %v1237_v4, %v1233_v57  ;;  %v650_v32 = vld [vmem:[#allocation3 + $0x28] sm:$0xff] }
 0x22d   : > { %v609_v14 = vpop.permute.xlu1 %608 }
 0x22e   : > { %1240 = vpow2.f32 %v637_v7  ;;  %v626_v15 = vsub.f32 %v1430_v41, %v609_v14  ;;  %671 = vadd.xlane.f32.xlu1 %v670_v34 }
 0x22f   : > { %v1239_v37 = vpop.eup %1238  ;;  %1242 = vpow2.f32 %v641_v5 }
 0x230   : > { %v639_v16 = vmul.f32 1.442695, %v626_v15  ;;  %v664_v17 = vsel %vm524_vm2, %v1239_v37, 0.0  ;;  %v758_v21 = vpack.c.bf16 %v1239_v37, %v1235_v29  ;;  %v649_v29 = vld [vmem:[#allocation3 + $0x20] sm:$0xff]  ;;  %v652_v37 = vld [vmem:[#allocation3 + $0x38] sm:$0xff] }
 0x231   : > { %665 = vadd.xlane.f32.xlu0 %v664_v17  ;;  %v619_v38 = vpop.permute.xlu1 %618 }
 0x232   : > { %1244 = vpow2.f32 %v639_v16  ;;  %v628_v22 = vsub.f32 %v1426_v39, %v619_v38  ;;  %1191 = vmatprep.mubr.msk.bf16.mxu1 %vm524_vm2, %v758_v21 }
 0x233   : > { %1192 = vmatmul.mubr.msk.bf16.vlgmr.msra.gmra.mrb[0].mxu1 %vm524_vm2, %v759_v10 }
 0x234   : > { %v643_v23 = vmul.f32 1.442695, %v628_v22 }
 0x236   : > { %1246 = vpow2.f32 %v643_v23 }
 0x237   : > { %1248 = vpow2.f32 %v567_v36 }
 0x238   : > { %v1241_v24 = vpop.eup %1240  ;;  %1250 = vpow2.f32 %v565_v40 }
 0x239   : > { %v673_v41 = vsel %vm524_vm2, %v1241_v24, 0.0  ;;  %v1243_v25 = vpop.eup %1242  ;;  %1252 = vpow2.f32 %v569_v42  ;;  %v704_v42 = vld [vmem:[#allocation4 + $0x10] sm:$0xff] }
 0x23a   : > { %674 = vadd.xlane.f32.xlu0 %v673_v41  ;;  %v679_v27 = vsel %vm524_vm2, %v1243_v25, 0.0  ;;  %1254 = vpow2.f32 %v571_v43 }
 0x23b   : > { %1256 = vpow2.f32 %v573_v55  ;;  %v702_v55 = vld [vmem:[#allocation4] sm:$0xff] }
 0x23c   : > { %v1245_v26 = vpop.eup %1244  ;;  %1258 = vpow2.f32 %v575_v47  ;;  %v705_v47 = vld [vmem:[#allocation4 + $0x18] sm:$0xff] }
 0x23d   : > { %v676_v28 = vsel %vm524_vm2, %v1245_v26, 0.0  ;;  %v760_v31 = vpack.c.bf16 %v1245_v26, %v1241_v24  ;;  %1260 = vpow2.f32 %v577_v48 }
 0x23e   : > { %680 = vadd.xlane.f32.xlu0 %v679_v27  ;;  %677 = vadd.xlane.f32.xlu1 %v676_v28  ;;  %1262 = vpow2.f32 %v579_v50  ;;  %v703_v50 = vld [vmem:[#allocation4 + $0x8] sm:$0xff] }
 0x23f   : > { %1195 = vmatprep.mubr.msk.bf16.mxu1 %vm524_vm2, %v760_v31 }
 0x240   : > { %v1247_v39 = vpop.eup %1246 }
 0x241   : > { %v682_v33 = vsel %vm524_vm2, %v1247_v39, 0.0  ;;  %v761_v35 = vpack.c.bf16 %v1247_v39, %v1243_v25  ;;  %v1249_v52 = vpop.eup %1248 }
 0x242   : > { %683 = vadd.xlane.f32.xlu1 %v682_v33  ;;  %v1251_v53 = vpop.eup %1250  ;;  %v654_v44 = vmul.f32 %v1249_v52, %v646_v18 }
 0x243   : > { %1196 = vmatmul.mubr.msk.bf16.gmra.mrb[4].mxu1 %vm524_vm2, %v761_v35  ;;  %v1253_v46 = vpop.eup %1252  ;;  %v653_v6 = vmul.f32 %v1251_v53, %v645_v63 }
 0x244   : > { %v1255_v54 = vpop.eup %1254  ;;  %v655_v1 = vmul.f32 %v1253_v46, %v647_v62 }
 0x245   : > { %v1257_v56 = vpop.eup %1256  ;;  %v656_v13 = vmul.f32 %v1255_v54, %v648_v11 }
 0x246   : > { %v1259_v58 = vpop.eup %1258  ;;  %v657_v30 = vmul.f32 %v1257_v56, %v649_v29 }
 0x247   : > { %v1261_v60 = vpop.eup %1260  ;;  %v658_v34 = vmul.f32 %v1259_v58, %v650_v32 }
 0x248   : > { %v1263_v61 = vpop.eup %1262  ;;  %v659_v7 = vmul.f32 %v1261_v60, %v651_v3 }
 0x249   : > { %v660_v21 = vmul.f32 %v1263_v61, %v652_v37 }
 0x253   : > { %717 = vperm.xlu1 %1231, %v1249_v52  }
 0x254   : > { %712 = vperm.xlu0 %1230, %v1251_v53  }
 0x257   : > { %722 = vperm.xlu1 %1231, %v1253_v46  }
 0x258   : > { %727 = vperm.xlu0 %1230, %v1255_v54  }
 0x25b   : > { %732 = vperm.xlu1 %1231, %v1257_v56  }
 0x25c   : > { %737 = vperm.xlu0 %1230, %v1259_v58  }
 0x25f   : > { %742 = vperm.xlu1 %1231, %v1261_v60  }
 0x260   : > { %747 = vperm.xlu0 %1230, %v1263_v61  }
 0x2b6   : > { %v669_v2 = vpop.xlane.xlu0 %668 }
 0x2b7   : > { %v687_v8 = vadd.f32 %v669_v2, %v655_v1  ;;  %v663_v9 = vpop.xlane.xlu1 %662 }
 0x2b8   : > { %v685_v12 = vadd.f32 %v663_v9, %v653_v6  ;;  %v708_v9 = vld [vmem:[#allocation4 + $0x30] sm:$0xff] }
 0x2b9   : > { %696 = vst.msk [vmem:[#allocation3 + $0x10] sm:$0xff] %vm376_vm1, %v687_v8 }
 0x2ba   : > { %694 = vst.msk [vmem:[#allocation3] sm:$0xff] %vm376_vm1, %v685_v12  ;;  %v706_v12 = vld [vmem:[#allocation4 + $0x20] sm:$0xff] }
 0x2bb   : > { %v672_v19 = vpop.xlane.xlu1 %671 }
 0x2bc   : > { %v688_v20 = vadd.f32 %v672_v19, %v656_v13  ;;  %v709_v13 = vld [vmem:[#allocation4 + $0x38] sm:$0xff]  ;;  %v707_v19 = vld [vmem:[#allocation4 + $0x28] sm:$0xff] }
 0x2be   : > { %697 = vst.msk [vmem:[#allocation3 + $0x18] sm:$0xff] %vm376_vm1, %v688_v20  ;;  %v666_v45 = vpop.xlane.xlu0 %665 }
 0x2bf   : > { %v686_v49 = vadd.f32 %v666_v45, %v654_v44 }
 0x2c0   : > { %v889_v51 = vld [vmem:[#allocation3 + $0x10] sm:$0xff] }
 0x2c1   : > { %695 = vst.msk [vmem:[#allocation3 + $0x8] sm:$0xff] %vm376_vm1, %v686_v49  ;;  %1264 = vrcp.f32 %v889_v51  ;;  %v887_v57 = vld [vmem:[#allocation3] sm:$0xff] }
 0x2c2   : > { %1266 = vrcp.f32 %v887_v57 }
 0x2c5   : > { %v890_v59 = vld [vmem:[#allocation3 + $0x18] sm:$0xff] }
 0x2c6   : > { %1268 = vrcp.f32 %v890_v59 }
 0x2c7   : > { %v675_v0 = vpop.xlane.xlu0 %674 }
 0x2c8   : > { %v689_v4 = vadd.f32 %v675_v0, %v657_v30  ;;  %v888_v5 = vld [vmem:[#allocation3 + $0x8] sm:$0xff] }
 0x2c9   : > { %1270 = vrcp.f32 %v888_v5  ;;  %v953_v5 = vstv %s952_s12 }
 0x2ca   : > { %698 = vst.msk [vmem:[#allocation3 + $0x20] sm:$0xff] %vm376_vm1, %v689_v4 }
 0x2cb   : > { %v1265_v10 = vpop.eup %1264  ;;  %v681_v14 = vpop.xlane.xlu0 %680 }
 0x2cc   : > { %v678_v15 = vpop.xlane.xlu1 %677  ;;  %v691_v16 = vadd.f32 %v681_v14, %v659_v7  ;;  %915 = vperm.xlu1 %1231, %v1265_v10   ;;  %v1267_v38 = vpop.eup %1266  ;;  %v964_v10 = vld [vmem:[%s1628_s15 + $0x10] sm:$0xff] }
 0x2cd   : > { %v690_v17 = vadd.f32 %v678_v15, %v658_v34  ;;  %v1143_v15 = vld [vmem:[%s365_s18] ss:$0 sm:$0xff] }
 0x2ce   : > { %700 = vst.msk [vmem:[#allocation3 + $0x30] sm:$0xff] %vm376_vm1, %v691_v16 }
 0x2cf   : > { %699 = vst.msk [vmem:[#allocation3 + $0x28] sm:$0xff] %vm376_vm1, %v690_v17 }
 0x2d0   : > { %v684_v22 = vpop.xlane.xlu1 %683  ;;  %v1269_v23 = vpop.eup %1268  ;;  %905 = vperm.xlu1 %1231, %v1267_v38  }
 0x2d1   : > { %v692_v24 = vadd.f32 %v684_v22, %v660_v21  ;;  %920 = vperm.xlu0 %1230, %v1269_v23   ;;  %v891_v41 = vld [vmem:[#allocation3 + $0x20] sm:$0xff] }
 0x2d2   : > { %1272 = vrcp.f32 %v891_v41  ;;  %v962_v23 = vld [vmem:[%s1628_s15] sm:$0xff] }
 0x2d3   : > { %701 = vst.msk [vmem:[#allocation3 + $0x38] sm:$0xff] %vm376_vm1, %v692_v24  ;;  %v1271_v25 = vpop.eup %1270  ;;  %v713_v40 = vpop.permute.xlu0 %712 }
 0x2d4   : > { %v718_v36 = vpop.permute.xlu1 %717  ;;  %v750_v53 = vmul.f32 %v713_v40, %v702_v55  ;;  %v963_v40 = vld [vmem:[%s1628_s15 + $0x8] sm:$0xff] }
 0x2d5   : > { %910 = vperm.xlu0 %1230, %v1271_v25   ;;  %v893_v26 = vld [vmem:[#allocation3 + $0x30] sm:$0xff]  ;;  %v751_v60 = vmul.f32 %v718_v36, %v703_v50 }
 0x2d6   : > { %v892_v27 = vld [vmem:[#allocation3 + $0x28] sm:$0xff]  ;;  %1274 = vrcp.f32 %v893_v26  ;;  %v965_v26 = vld [vmem:[%s1628_s15 + $0x18] sm:$0xff] }
 0x2d7   : > { %1276 = vrcp.f32 %v892_v27  ;;  %v728_v48 = vpop.permute.xlu0 %727 }
 0x2d8   : > { %v723_v43 = vpop.permute.xlu1 %722  ;;  %v753_v54 = vmul.f32 %v728_v48, %v705_v47 }
 0x2d9   : > { %v752_v52 = vmul.f32 %v723_v43, %v704_v42 }
 0x2da   : > { %v894_v28 = vld [vmem:[#allocation3 + $0x38] sm:$0xff] }
 0x2db   : > { %1278 = vrcp.f32 %v894_v28  ;;  %v738_v8 = vpop.permute.xlu0 %737 }
 0x2dc   : > { %v1273_v31 = vpop.eup %1272  ;;  %v733_v6 = vpop.permute.xlu1 %732  ;;  %v755_v29 = vmul.f32 %v738_v8, %v707_v19 }
 0x2dd   : > { %925 = vperm.xlu1 %1231, %v1273_v31   ;;  %v754_v44 = vmul.f32 %v733_v6, %v706_v12  ;;  %v967_v6 = vld [vmem:[%s1628_s15 + $0x28] sm:$0xff] }
 0x2df   : > { %v748_v18 = vpop.permute.xlu0 %747 }
 0x2e0   : > { %v1275_v39 = vpop.eup %1274  ;;  %v743_v11 = vpop.permute.xlu1 %742  ;;  %v757_v49 = vmul.f32 %v748_v18, %v709_v13 }
 0x2e1   : > { %v1277_v33 = vpop.eup %1276  ;;  %935 = vperm.xlu1 %1231, %v1275_v39   ;;  %v756_v20 = vmul.f32 %v743_v11, %v708_v9 }
 0x2e2   : > { %930 = vperm.xlu0 %1230, %v1277_v33  }
 0x2e5   : > { %v1279_v35 = vpop.eup %1278 }
 0x2e6   : > { %940 = vperm.xlu0 %1230, %v1279_v35  }
 0x306   : > { %v1193_v46 = vpop.f32.mrb[0].mxu1 }
 0x307   : > { %v853_v56 = vadd.f32 %v1193_v46, %v752_v52  ;;  %v820_v58 = vpop.f32.mrb[1].mxu1 }
 0x308   : > { %v851_v61 = vadd.f32 %v820_v58, %v750_v53  ;;  %v1194_v62 = vpop.f32.mrb[2].mxu1  ;;  %v966_v53 = vld [vmem:[%s1628_s15 + $0x20] sm:$0xff] }
 0x309   : > { %862 = vst.msk [vmem:[#allocation4 + $0x10] sm:$0xff] %vm393_vm3, %v853_v56  ;;  %v854_v63 = vadd.f32 %v1194_v62, %v753_v54  ;;  %v823_v1 = vpop.f32.mrb[3].mxu1 }
 0x30a   : > { %860 = vst.msk [vmem:[#allocation4] sm:$0xff] %vm393_vm3, %v851_v61  ;;  %v852_v2 = vadd.f32 %v823_v1, %v751_v60  ;;  %v968_v1 = vld [vmem:[%s1628_s15 + $0x30] sm:$0xff] }
 0x30b   : > { %863 = vst.msk [vmem:[#allocation4 + $0x18] sm:$0xff] %vm393_vm3, %v854_v63 }
 0x30c   : > { %861 = vst.msk [vmem:[#allocation4 + $0x8] sm:$0xff] %vm393_vm3, %v852_v2 }
 0x310   : > { %v881_v4 = vld [vmem:[#allocation4 + $0x10] sm:$0xff] }
 0x311   : > { %v879_v37 = vld [vmem:[#allocation4] sm:$0xff] }
 0x312   : > { %v882_v38 = vld [vmem:[#allocation4 + $0x18] sm:$0xff] }
 0x313   : > { %v880_v39 = vld [vmem:[#allocation4 + $0x8] sm:$0xff] }
 0x316   : > { %v1197_v45 = vpop.f32.mrb[4].mxu1 }
 0x317   : > { %v857_v51 = vadd.f32 %v1197_v45, %v756_v20  ;;  %v836_v57 = vpop.f32.mrb[5].mxu1 }
 0x318   : > { %v855_v59 = vadd.f32 %v836_v57, %v754_v44  ;;  %v1198_v30 = vpop.f32.mrb[6].mxu1  ;;  %v969_v44 = vld [vmem:[%s1628_s15 + $0x38] sm:$0xff] }
 0x319   : > { %866 = vst.msk [vmem:[#allocation4 + $0x30] sm:$0xff] %vm393_vm3, %v857_v51  ;;  %v858_v0 = vadd.f32 %v1198_v30, %v757_v49  ;;  %v839_v3 = vpop.f32.mrb[7].mxu1 }
 0x31a   : > { %864 = vst.msk [vmem:[#allocation4 + $0x20] sm:$0xff] %vm393_vm3, %v855_v59  ;;  %v856_v32 = vadd.f32 %v839_v3, %v755_v29 }
 0x31b   : > { %867 = vst.msk [vmem:[#allocation4 + $0x38] sm:$0xff] %vm393_vm3, %v858_v0 }
 0x31c   : > { %865 = vst.msk [vmem:[#allocation4 + $0x28] sm:$0xff] %vm393_vm3, %v856_v32 }
 0x320   : > { %v885_v54 = vld [vmem:[#allocation4 + $0x30] sm:$0xff] }
 0x321   : > { %v883_v48 = vld [vmem:[#allocation4 + $0x20] sm:$0xff] }
 0x322   : > { %v886_v12 = vld [vmem:[#allocation4 + $0x38] sm:$0xff] }
 0x323   : > { %v884_v60 = vld [vmem:[#allocation4 + $0x28] sm:$0xff] }
 0x34b   : > { %v916_v7 = vpop.permute.xlu1 %915 }
 0x34c   : > { %v945_v34 = vmul.f32 %v916_v7, %v881_v4 }
 0x34e   : > { %v956_v14 = vmul.f32 %v953_v5, %v945_v34 }
 0x34f   : > { %v906_v16 = vpop.permute.xlu1 %905 }
 0x350   : > { %v972_v17 = vadd.f32 %v964_v10, %v956_v14  ;;  %v943_v21 = vmul.f32 %v906_v16, %v879_v37  ;;  %v921_v22 = vpop.permute.xlu0 %920 }
 0x351   : > { %v946_v24 = vmul.f32 %v921_v22, %v882_v38 }
 0x352   : > { %v986_v41 = vmul.f32 %v1143_v15, %v972_v17  ;;  %v954_v25 = vmul.f32 %v953_v5, %v943_v21 }
 0x353   : > { %v957_v27 = vmul.f32 %v953_v5, %v946_v24 }
 0x354   : > { %994 = vst.msk [vmem:[%s1639_s21 + $0x10] sm:$0xff] %vm393_vm3, %v986_v41  ;;  %v970_v28 = vadd.f32 %v962_v23, %v954_v25  ;;  %v911_v31 = vpop.permute.xlu0 %910 }
 0x355   : > { %v973_v33 = vadd.f32 %v965_v26, %v957_v27  ;;  %v944_v35 = vmul.f32 %v911_v31, %v880_v39 }
 0x356   : > { %v984_v36 = vmul.f32 %v1143_v15, %v970_v28 }
 0x357   : > { %v987_v42 = vmul.f32 %v1143_v15, %v973_v33  ;;  %v955_v43 = vmul.f32 %v953_v5, %v944_v35 }
 0x358   : > { %992 = vst.msk [vmem:[%s1639_s21] sm:$0xff] %vm393_vm3, %v984_v36 }
 0x359   : > { %995 = vst.msk [vmem:[%s1639_s21 + $0x18] sm:$0xff] %vm393_vm3, %v987_v42  ;;  %v971_v55 = vadd.f32 %v963_v40, %v955_v43 }
 0x35b   : > { %v985_v47 = vmul.f32 %v1143_v15, %v971_v55 }
 0x35c   : > { %v926_v50 = vpop.permute.xlu1 %925 }
 0x35d   : > { %993 = vst.msk [vmem:[%s1639_s21 + $0x8] sm:$0xff] %vm393_vm3, %v985_v47  ;;  %v947_v52 = vmul.f32 %v926_v50, %v883_v48 }
 0x35f   : > { %v958_v46 = vmul.f32 %v953_v5, %v947_v52 }
 0x360   : > { %v936_v56 = vpop.permute.xlu1 %935 }
 0x361   : > { %v974_v58 = vadd.f32 %v966_v53, %v958_v46  ;;  %v931_v61 = vpop.permute.xlu0 %930  ;;  %v949_v62 = vmul.f32 %v936_v56, %v885_v54 }
 0x362   : > { %v948_v63 = vmul.f32 %v931_v61, %v884_v60 }
 0x363   : > { %v988_v2 = vmul.f32 %v1143_v15, %v974_v58  ;;  %v960_v8 = vmul.f32 %v953_v5, %v949_v62 }
 0x364   : > { %v959_v9 = vmul.f32 %v953_v5, %v948_v63 }
 0x365   : > { %996 = vst.msk [vmem:[%s1639_s21 + $0x20] sm:$0xff] %vm393_vm3, %v988_v2  ;;  %v976_v11 = vadd.f32 %v968_v1, %v960_v8  ;;  %v941_v13 = vpop.permute.xlu0 %940 }
 0x366   : > { %v975_v18 = vadd.f32 %v967_v6, %v959_v9  ;;  %v950_v19 = vmul.f32 %v941_v13, %v886_v12 }
 0x367   : > { %v990_v20 = vmul.f32 %v1143_v15, %v976_v11 }
 0x368   : > { %v989_v45 = vmul.f32 %v1143_v15, %v975_v18  ;;  %v961_v49 = vmul.f32 %v953_v5, %v950_v19 }
 0x369   : > { %998 = vst.msk [vmem:[%s1639_s21 + $0x30] sm:$0xff] %vm393_vm3, %v990_v20 }
 0x36a   : > { %997 = vst.msk [vmem:[%s1639_s21 + $0x28] sm:$0xff] %vm393_vm3, %v989_v45  ;;  %v977_v51 = vadd.f32 %v969_v44, %v961_v49 }
 0x36c   : > { %v991_v57 = vmul.f32 %v1143_v15, %v977_v51 }
 0x36e   : > { %999 = vst.msk [vmem:[%s1639_s21 + $0x38] sm:$0xff] %vm393_vm3, %v991_v57 }
 0x36f PF: > { %s17_s25 = sadd.s32 1, %s1302_s25   ;;  %s1680_s23 = smov %s1298_s24 }
 0x370   : > { %p14_p5 = scmp.ge.s32.totalorder %s17_s25, 4   ;;  %s1681_s24 = smov %s1683_s0 }
 0x372   :  { %16 = sbr.rel (!%p14_p5) target bundleno = 2 (0x2), region = 94 }

// kernel: mul.1
= control target key start
LH: loop header
LB: loop body
LE: loop exit
PB: predicated region body
PF: predicated region fallthrough
CT: control target
= control target key end

     0   :  { %s364_s0 = inlined_call_operand.vmem [shape: f32[128,16], index: 0, kind: input, shape index: {}]   ;;  %s365_s1 = inlined_call_operand.vmem [shape: f32[128,16], index: 1, kind: input, shape index: {}]   ;;  %s366_s2 = inlined_call_operand.vmem [shape: f32[128,16], index: 2, kind: output, shape index: {}]  }
   0x1   :  { %v3_v0 = vld [vmem:[%s364_s0] sm:$0xff]  ;;  %v160_v2 = vld [vmem:[%s364_s0 + $0x8] sm:$0xff]  ;;  %v163_v5 = vld [vmem:[%s364_s0 + $0x10] sm:$0xff] }
   0x2   :  { %v4_v1 = vld [vmem:[%s365_s1] sm:$0xff]  ;;  %v161_v4 = vld [vmem:[%s365_s1 + $0x8] sm:$0xff]  ;;  %v164_v6 = vld [vmem:[%s365_s1 + $0x10] sm:$0xff] }
   0x3   :  { %v7_v3 = vmul.f32 %v4_v1, %v3_v0  ;;  %v16_v7 = vmul.f32 %v161_v4, %v160_v2  ;;  %v26_v8 = vmul.f32 %v164_v6, %v163_v5  ;;  %v166_v9 = vld [vmem:[%s364_s0 + $0x18] sm:$0xff]  ;;  %v169_v11 = vld [vmem:[%s364_s0 + $0x20] sm:$0xff]  ;;  %v172_v14 = vld [vmem:[%s364_s0 + $0x28] sm:$0xff] }
   0x4   :  { %v167_v10 = vld [vmem:[%s365_s1 + $0x18] sm:$0xff]  ;;  %v170_v13 = vld [vmem:[%s365_s1 + $0x20] sm:$0xff]  ;;  %v173_v15 = vld [vmem:[%s365_s1 + $0x28] sm:$0xff] }
   0x5   :  { %9 = vst [vmem:[%s366_s2] sm:$0xff] %v7_v3  ;;  %v36_v12 = vmul.f32 %v167_v10, %v166_v9  ;;  %162 = vst [vmem:[%s366_s2 + $0x8] sm:$0xff] %v16_v7  ;;  %v46_v16 = vmul.f32 %v170_v13, %v169_v11  ;;  %v56_v17 = vmul.f32 %v173_v15, %v172_v14  ;;  %v175_v18 = vld [vmem:[%s364_s0 + $0x30] sm:$0xff]  ;;  %v178_v20 = vld [vmem:[%s364_s0 + $0x38] sm:$0xff] }
   0x6   :  { %165 = vst [vmem:[%s366_s2 + $0x10] sm:$0xff] %v26_v8  ;;  %v176_v19 = vld [vmem:[%s365_s1 + $0x30] sm:$0xff]  ;;  %v179_v22 = vld [vmem:[%s365_s1 + $0x38] sm:$0xff]  ;;  %v181_v23 = vld [vmem:[%s364_s0 + $0x40] sm:$0xff] }
   0x7   :  { %168 = vst [vmem:[%s366_s2 + $0x18] sm:$0xff] %v36_v12  ;;  %v66_v21 = vmul.f32 %v176_v19, %v175_v18  ;;  %v182_v24 = vld [vmem:[%s365_s1 + $0x40] sm:$0xff]  ;;  %171 = vst [vmem:[%s366_s2 + $0x20] sm:$0xff] %v46_v16  ;;  %v76_v25 = vmul.f32 %v179_v22, %v178_v20  ;;  %v184_v27 = vld [vmem:[%s364_s0 + $0x48] sm:$0xff] }
   0x8   :  { %174 = vst [vmem:[%s366_s2 + $0x28] sm:$0xff] %v56_v17  ;;  %v86_v26 = vmul.f32 %v182_v24, %v181_v23  ;;  %v185_v28 = vld [vmem:[%s365_s1 + $0x48] sm:$0xff]  ;;  %v187_v29 = vld [vmem:[%s364_s0 + $0x50] sm:$0xff]  ;;  %v190_v32 = vld [vmem:[%s364_s0 + $0x58] sm:$0xff] }
   0x9   :  { %177 = vst [vmem:[%s366_s2 + $0x30] sm:$0xff] %v66_v21  ;;  %v96_v30 = vmul.f32 %v185_v28, %v184_v27  ;;  %v188_v31 = vld [vmem:[%s365_s1 + $0x50] sm:$0xff]  ;;  %v191_v33 = vld [vmem:[%s365_s1 + $0x58] sm:$0xff]  ;;  %180 = vst [vmem:[%s366_s2 + $0x38] sm:$0xff] %v76_v25 }
   0xa   :  { %183 = vst [vmem:[%s366_s2 + $0x40] sm:$0xff] %v86_v26  ;;  %v106_v34 = vmul.f32 %v188_v31, %v187_v29  ;;  %v116_v35 = vmul.f32 %v191_v33, %v190_v32  ;;  %v193_v36 = vld [vmem:[%s364_s0 + $0x60] sm:$0xff]  ;;  %v196_v38 = vld [vmem:[%s364_s0 + $0x68] sm:$0xff]  ;;  %v199_v41 = vld [vmem:[%s364_s0 + $0x70] sm:$0xff] }
   0xb   :  { %v194_v37 = vld [vmem:[%s365_s1 + $0x60] sm:$0xff]  ;;  %186 = vst [vmem:[%s366_s2 + $0x48] sm:$0xff] %v96_v30  ;;  %v197_v40 = vld [vmem:[%s365_s1 + $0x68] sm:$0xff]  ;;  %v200_v42 = vld [vmem:[%s365_s1 + $0x70] sm:$0xff] }
   0xc   :  { %v126_v39 = vmul.f32 %v194_v37, %v193_v36  ;;  %189 = vst [vmem:[%s366_s2 + $0x50] sm:$0xff] %v106_v34  ;;  %192 = vst [vmem:[%s366_s2 + $0x58] sm:$0xff] %v116_v35  ;;  %v136_v43 = vmul.f32 %v197_v40, %v196_v38  ;;  %v146_v44 = vmul.f32 %v200_v42, %v199_v41  ;;  %v202_v45 = vld [vmem:[%s364_s0 + $0x78] sm:$0xff] }
   0xd   :  { %v203_v46 = vld [vmem:[%s365_s1 + $0x78] sm:$0xff] }
   0xe   :  { %195 = vst [vmem:[%s366_s2 + $0x60] sm:$0xff] %v126_v39  ;;  %v156_v47 = vmul.f32 %v203_v46, %v202_v45  ;;  %198 = vst [vmem:[%s366_s2 + $0x68] sm:$0xff] %v136_v43 }
   0xf   :  { %201 = vst [vmem:[%s366_s2 + $0x70] sm:$0xff] %v146_v44 }
  0x10   :  { %204 = vst [vmem:[%s366_s2 + $0x78] sm:$0xff] %v156_v47 }

// kernel: dda_forward.16
= control target key start
LH: loop header
LB: loop body
LE: loop exit
PB: predicated region body
PF: predicated region fallthrough
CT: control target
= control target key end

     0   :  { %s732_s14 = smov 0   ;;  %s835_s0 = inlined_call_operand.<no memory space> [shape: f32[1], index: 0, kind: input, shape index: {}]   ;;  %s836_s1 = inlined_call_operand.vmem [shape: f32[2,64,16], index: 1, kind: input, shape index: {}]   ;;  %s837_s2 = inlined_call_operand.vmem [shape: f32[2,64,1], index: 2, kind: input, shape index: {}]   ;;  %s838_s3 = inlined_call_operand.vmem [shape: f32[2,64,16], index: 3, kind: output, shape index: {}]  }
   0x1   :  { %8 = sst [smem:[#allocation2]] %s835_s0 }
   0x2 LB: > { %s592_s15 = sadd.s32 4294967295, %s704_s14   ;;  %p596_p0 = scmp.ge.s32.totalorder %s704_s14, 1  ;;  %s704_s14 = sphi %s732_s14, %s14_s14  }
   0x3   : > { %p148_p1 = scmp.lt.s32.totalorder %s704_s14, 3 }
   0x5   : > { %p149_p2 = pnand %p596_p0, %p148_p1 }
   0x6   : > { %p177_p3 = scmp.lt.s32.totalorder (!%p149_p2), %s592_s15, 1  ;;  %v706_v3 = vmov (!%p149_p2), 0.0   ;;  %vm707_vm0 = vmmov (!%p149_p2), 0   ;;  %vm234_vm1 = vcmask (!%p149_p2), 523264   ;;  %vm279_vm2 = vcmask (!%p149_p2), 130048   ;;  %s451_s22 = sld [smem:[#allocation2]] (!%p149_p2) }
   0x7   : > { %152 = sbr.rel (%p149_p2) target bundleno = 1076 (0x434), region = 32  ;;  %628 = vmatprep.subr.bf16.mxu0 (!%p149_p2), %v706_v3  ;;  %630 = vmatprep.mubr.msk.bf16.mxu0 (!%p149_p2), %vm707_vm0, %v706_v3  ;;  %v708_v39 = vmov (!%p149_p2), 0  }
   0x8   : > { %656 = vset.pattern.permute.xlu1 (!%p149_p2), %v708_v39 }
   0xe   : > { %s840_s15 = smov (!%p177_p3, %s592_s15), 1 }
   0xf   : > { %s740_s16 = sshll.u32 %s840_s15, 6 }
  0x10   : > { %s181_s18 = scalar_lea.vmem %s836_s1, %s740_s16  ;;  %s186_s21 = scalar_lea.vmem %s837_s2, %s740_s16 }
  0x11   : > { %v746_v0 = vld [vmem:[%s181_s18] sm:$0xff]  ;;  %v749_v1 = vld [vmem:[%s181_s18 + $0x8] sm:$0xff]  ;;  %v752_v2 = vld [vmem:[%s181_s18 + $0x10] sm:$0xff]  ;;  %s807_s25 = scalar_lea.vmem %s838_s3, %s740_s16 }
  0x12   : > { %201 = vxpose.xlu0.b32.start [1/8] (short) (narrow) %v746_v0, 16  ;;  %v755_v4 = vld [vmem:[%s181_s18 + $0x18] sm:$0xff]  ;;  %v758_v5 = vld [vmem:[%s181_s18 + $0x20] sm:$0xff]  ;;  %v761_v6 = vld [vmem:[%s181_s18 + $0x28] sm:$0xff]  ;;  %v310_v35 = vpack.c.bf16 %v749_v1, %v746_v0 }
  0x13   : > { %v764_v7 = vld [vmem:[%s181_s18 + $0x30] sm:$0xff]  ;;  %v767_v8 = vld [vmem:[%s181_s18 + $0x38] sm:$0xff]  ;;  %v395_v36 = vld [vmem:[%s186_s21] sm:$0xff] }
  0x14   : > { %636 = vmatprep.mubr.msk.bf16.mxu1 %vm279_vm2, %v310_v35  ;;  %v397_v37 = vld [vmem:[%s186_s21 + $0x10] sm:$0xff]  ;;  %v398_v38 = vld [vmem:[%s186_s21 + $0x18] sm:$0xff]  ;;  %v608_v40 = vmul.f32 -1.442695, %v395_v36  ;;  %v399_v43 = vld [vmem:[%s186_s21 + $0x20] sm:$0xff]  ;;  %v452_v36 = vstv %s451_s22 }
  0x15   : > { %v610_v41 = vmul.f32 -1.442695, %v397_v37  ;;  %v611_v42 = vmul.f32 -1.442695, %v398_v38  ;;  %v396_v44 = vld [vmem:[%s186_s21 + $0x8] sm:$0xff]  ;;  %v401_v49 = vld [vmem:[%s186_s21 + $0x30] sm:$0xff] }
  0x16   : > { %202 = vxpose.xlu0.b32.cont [2/8] (short) (narrow) %v749_v1, 16  ;;  %v612_v45 = vmul.f32 -1.442695, %v399_v43  ;;  %v400_v46 = vld [vmem:[%s186_s21 + $0x28] sm:$0xff]  ;;  %v609_v47 = vmul.f32 -1.442695, %v396_v44 }
  0x17   : > { %v613_v48 = vmul.f32 -1.442695, %v400_v46  ;;  %v614_v51 = vmul.f32 -1.442695, %v401_v49  ;;  %v402_v54 = vld [vmem:[%s186_s21 + $0x38] sm:$0xff] }
  0x18   : > { %v615_v57 = vmul.f32 -1.442695, %v402_v54 }
  0x1a   : > { %203 = vxpose.xlu0.b32.cont [3/8] (short) (narrow) %v752_v2, 16 }
  0x1e   : > { %204 = vxpose.xlu0.b32.cont [4/8] (short) (narrow) %v755_v4, 16 }
  0x22   : > { %205 = vxpose.xlu0.b32.cont [5/8] (short) (narrow) %v758_v5, 16 }
  0x26   : > { %206 = vxpose.xlu0.b32.cont [6/8] (short) (narrow) %v761_v6, 16 }
  0x2a   : > { %207 = vxpose.xlu0.b32.cont [7/8] (short) (narrow) %v764_v7, 16 }
  0x2e   : > { %208 = vxpose.xlu0.b32.end [8/8] (short) (narrow) %v767_v8, 16 }
  0x57   : > { %657 = vset.pattern.permute.xlu0 %v708_v39 }
  0x92   : > { %v217_v9 = vpop.trf.xlu0 }
  0x96   : > { %v218_v10 = vpop.trf.xlu0 }
  0x97   : > { %v233_v11 = vpack.c.bf16 %v218_v10, %v217_v9 }
  0x99   : > { %v236_v12 = vsel %vm234_vm1, %v233_v11, 0 }
  0x9a   : > { %629 = vmatpush3.bf16.xpose.msra.mxu0 %v236_v12 }
  0xa1   : > { %631 = vmatmul.mubr.msk.bf16.vlgmr.msra.gmra.mrb[0].mxu0 %vm234_vm1, %v233_v11 }
 0x174   : > { %v272_v13 = vpop.f32.mrb[0].mxu0 }
 0x175   : > { %v632_v14 = vpop.f32.mrb[1].mxu0  ;;  %v280_v15 = vsel %vm279_vm2, %v272_v13, -inf }
 0x176   : > { %281 = vmax.xlane.f32.xlu1 %v280_v15  ;;  %v275_v16 = vpop.f32.mrb[2].mxu0 }
 0x177   : > { %v633_v17 = vpop.f32.mrb[3].mxu0  ;;  %v283_v18 = vsel %vm279_vm2, %v275_v16, -inf }
 0x17a   : > { %284 = vmax.xlane.f32.xlu1 %v283_v18 }
 0x203   : > { %v282_v19 = vpop.xlane.xlu1 %281 }
 0x204   : > { %v286_v20 = vsub.f32 %v282_v19, %v272_v13 }
 0x206   : > { %v288_v21 = vsel %vm279_vm2, %v286_v20, -inf }
 0x207   : > { %289 = vmax.xlane.f32.xlu1 %v288_v21  ;;  %v285_v22 = vpop.xlane.xlu1 %284 }
 0x208   : > { %v287_v23 = vsub.f32 %v285_v22, %v275_v16 }
 0x20a   : > { %v291_v24 = vsel %vm279_vm2, %v287_v23, -inf }
 0x20b   : > { %292 = vmax.xlane.f32.xlu1 %v291_v24 }
 0x294   : > { %v290_v25 = vpop.xlane.xlu1 %289 }
 0x295   : > { %v294_v26 = vsub.f32 %v286_v20, %v290_v25 }
 0x297   : > { %v296_v27 = vmul.f32 1.442695, %v294_v26 }
 0x298   : > { %v293_v28 = vpop.xlane.xlu1 %292 }
 0x299   : > { %658 = vpow2.f32 %v296_v27  ;;  %v295_v29 = vsub.f32 %v287_v23, %v293_v28 }
 0x29b   : > { %v298_v30 = vmul.f32 1.442695, %v295_v29  ;;  %v311_v29 = vpack.c.bf16 %v755_v4, %v752_v2 }
 0x29d   : > { %660 = vpow2.f32 %v298_v30  ;;  %v312_v30 = vpack.c.bf16 %v761_v6, %v758_v5 }
 0x29e   : > { %662 = vpow2.f32 %v608_v40 }
 0x29f   : > { %664 = vpow2.f32 %v610_v41 }
 0x2a0   : > { %666 = vpow2.f32 %v611_v42 }
 0x2a1   : > { %668 = vpow2.f32 %v612_v45 }
 0x2a2   : > { %670 = vpow2.f32 %v609_v47 }
 0x2a3   : > { %v774_v31 = vpop.eup %658  ;;  %672 = vpow2.f32 %v613_v48 }
 0x2a4   : > { %v300_v32 = vsel %vm279_vm2, %v774_v31, 0.0 }
 0x2a5   : > { %301 = vadd.xlane.f32.xlu1 %v300_v32 }
 0x2a7   : > { %v778_v33 = vpop.eup %660 }
 0x2a8   : > { %v303_v34 = vsel %vm279_vm2, %v778_v33, 0.0  ;;  %v663_v50 = vpop.eup %662 }
 0x2a9   : > { %304 = vadd.xlane.f32.xlu1 %v303_v34  ;;  %v665_v52 = vpop.eup %664  ;;  %v427_v53 = vadd.f32 1.0, %v663_v50 }
 0x2aa   : > { %v667_v55 = vpop.eup %666  ;;  %v429_v56 = vadd.f32 1.0, %v665_v52 }
 0x2ab   : > { %674 = vrcp.f32 %v427_v53  ;;  %v430_v58 = vadd.f32 1.0, %v667_v55  ;;  %v669_v59 = vpop.eup %668 }
 0x2ac   : > { %676 = vpow2.f32 %v614_v51  ;;  %v671_v60 = vpop.eup %670  ;;  %v431_v62 = vadd.f32 1.0, %v669_v59 }
 0x2ad   : > { %678 = vrcp.f32 %v429_v56  ;;  %v428_v61 = vadd.f32 1.0, %v671_v60  ;;  %v673_v63 = vpop.eup %672 }
 0x2ae   : > { %680 = vpow2.f32 %v615_v57  ;;  %v432_v9 = vadd.f32 1.0, %v673_v63 }
 0x2af   : > { %682 = vrcp.f32 %v430_v58 }
 0x2b0   : > { %684 = vrcp.f32 %v428_v61 }
 0x2b1   : > { %686 = vrcp.f32 %v431_v62 }
 0x2b2   : > { %688 = vrcp.f32 %v432_v9 }
 0x2b5   : > { %v675_v3 = vpop.eup %674 }
 0x2b6   : > { %v677_v10 = vpop.eup %676 }
 0x2b7   : > { %v679_v11 = vpop.eup %678  ;;  %v433_v12 = vadd.f32 1.0, %v677_v10 }
 0x2b8   : > { %v681_v13 = vpop.eup %680 }
 0x2b9   : > { %v683_v14 = vpop.eup %682  ;;  %690 = vrcp.f32 %v433_v12  ;;  %v434_v16 = vadd.f32 1.0, %v681_v13 }
 0x2ba   : > { %471 = vperm.xlu1 %656, %v675_v3   ;;  %v685_v15 = vpop.eup %684 }
 0x2bb   : > { %476 = vperm.xlu0 %657, %v685_v15   ;;  %v687_v17 = vpop.eup %686  ;;  %692 = vrcp.f32 %v434_v16 }
 0x2bc   : > { %v689_v18 = vpop.eup %688 }
 0x2be   : > { %481 = vperm.xlu1 %656, %v679_v11  }
 0x2c2   : > { %486 = vperm.xlu1 %656, %v683_v14  }
 0x2c3   : > { %v691_v19 = vpop.eup %690 }
 0x2c5   : > { %v693_v20 = vpop.eup %692 }
 0x2c6   : > { %491 = vperm.xlu1 %656, %v687_v17  }
 0x2ca   : > { %496 = vperm.xlu1 %656, %v689_v18  }
 0x2ce   : > { %501 = vperm.xlu1 %656, %v691_v19  }
 0x2d2   : > { %506 = vperm.xlu1 %656, %v693_v20  }
 0x332   : > { %v302_v21 = vpop.xlane.xlu1 %301 }
 0x333   : > { %694 = vrcp.f32 %v302_v21 }
 0x336   : > { %v305_v22 = vpop.xlane.xlu1 %304 }
 0x337   : > { %696 = vrcp.f32 %v305_v22 }
 0x33a   : > { %v472_v32 = vpop.permute.xlu1 %471  ;;  %v477_v50 = vpop.permute.xlu0 %476 }
 0x33d   : > { %v695_v23 = vpop.eup %694 }
 0x33e   : > { %v308_v25 = vmul.f32 %v695_v23, %v774_v31  ;;  %v313_v31 = vpack.c.bf16 %v767_v8, %v764_v7 }
 0x341   : > { %v697_v24 = vpop.eup %696 }
 0x342   : > { %v309_v26 = vmul.f32 %v697_v24, %v778_v33  ;;  %v482_v33 = vpop.permute.xlu1 %481 }
 0x344   : > { %v314_v27 = vpack.c.bf16 %v309_v26, %v308_v25 }
 0x346   : > { %644 = vmatprep.subr.msk.bf16.mxu1 %vm279_vm2, %v314_v27  ;;  %v328_v28 = vsel %vm279_vm2, %v314_v27, 0  ;;  %v487_v34 = vpop.permute.xlu1 %486 }
 0x347   : > { %635 = vmatpush3.bf16.xpose.msra.mxu1 %v328_v28 }
 0x34a   : > { %v492_v35 = vpop.permute.xlu1 %491 }
 0x34e   : > { %637 = vmatmul.mubr.msk.bf16.vlgmr.msra.gmra.mrb[0].mxu1 %vm279_vm2, %v311_v29  ;;  %v497_v40 = vpop.permute.xlu1 %496 }
 0x34f   : > { %640 = vmatprep.mubr.msk.bf16.mxu1 %vm279_vm2, %v312_v30 }
 0x352   : > { %v502_v53 = vpop.permute.xlu1 %501 }
 0x356   : > { %641 = vmatmul.mubr.msk.bf16.gmra.mrb[4].mxu1 %vm279_vm2, %v313_v31  ;;  %v507_v3 = vpop.permute.xlu1 %506 }
 0x421   : > { %v638_v37 = vpop.f32.mrb[0].mxu1 }
 0x422   : > { %v455_v38 = vmul.f32 %v638_v37, %v452_v36  ;;  %v364_v39 = vpop.f32.mrb[1].mxu1 }
 0x423   : > { %v453_v41 = vmul.f32 %v452_v36, %v364_v39  ;;  %v639_v42 = vpop.f32.mrb[2].mxu1 }
 0x424   : > { %v463_v43 = vadd.f32 %v455_v38, %v752_v2  ;;  %v456_v44 = vmul.f32 %v639_v42, %v452_v36  ;;  %v367_v45 = vpop.f32.mrb[3].mxu1 }
 0x425   : > { %v461_v46 = vadd.f32 %v453_v41, %v746_v0  ;;  %v454_v47 = vmul.f32 %v452_v36, %v367_v45 }
 0x426   : > { %v511_v48 = vmul.f32 %v482_v33, %v463_v43  ;;  %v464_v49 = vadd.f32 %v456_v44, %v755_v4 }
 0x427   : > { %v509_v51 = vmul.f32 %v472_v32, %v461_v46  ;;  %v462_v2 = vadd.f32 %v454_v47, %v749_v1 }
 0x428   : > { %519 = vst.msk [vmem:[%s807_s25 + $0x10] sm:$0xff] %vm279_vm2, %v511_v48  ;;  %v512_v52 = vmul.f32 %v487_v34, %v464_v49 }
 0x429   : > { %517 = vst.msk [vmem:[%s807_s25] sm:$0xff] %vm279_vm2, %v509_v51  ;;  %v510_v54 = vmul.f32 %v477_v50, %v462_v2  ;;  %v642_v55 = vpop.f32.mrb[4].mxu1 }
 0x42a   : > { %520 = vst.msk [vmem:[%s807_s25 + $0x18] sm:$0xff] %vm279_vm2, %v512_v52  ;;  %v459_v0 = vmul.f32 %v642_v55, %v452_v36  ;;  %v380_v56 = vpop.f32.mrb[5].mxu1 }
 0x42b   : > { %518 = vst.msk [vmem:[%s807_s25 + $0x8] sm:$0xff] %vm279_vm2, %v510_v54  ;;  %v457_v4 = vmul.f32 %v452_v36, %v380_v56  ;;  %v643_v57 = vpop.f32.mrb[6].mxu1 }
 0x42c   : > { %v467_v1 = vadd.f32 %v459_v0, %v764_v7  ;;  %v460_v58 = vmul.f32 %v643_v57, %v452_v36  ;;  %v383_v59 = vpop.f32.mrb[7].mxu1 }
 0x42d   : > { %v465_v60 = vadd.f32 %v457_v4, %v758_v5  ;;  %v458_v61 = vmul.f32 %v452_v36, %v383_v59 }
 0x42e   : > { %v515_v62 = vmul.f32 %v502_v53, %v467_v1  ;;  %v468_v63 = vadd.f32 %v460_v58, %v767_v8 }
 0x42f   : > { %v513_v9 = vmul.f32 %v492_v35, %v465_v60  ;;  %v466_v10 = vadd.f32 %v458_v61, %v761_v6 }
 0x430   : > { %523 = vst.msk [vmem:[%s807_s25 + $0x30] sm:$0xff] %vm279_vm2, %v515_v62  ;;  %v516_v11 = vmul.f32 %v507_v3, %v468_v63 }
 0x431   : > { %521 = vst.msk [vmem:[%s807_s25 + $0x20] sm:$0xff] %vm279_vm2, %v513_v9  ;;  %v514_v12 = vmul.f32 %v497_v40, %v466_v10 }
 0x432   : > { %524 = vst.msk [vmem:[%s807_s25 + $0x38] sm:$0xff] %vm279_vm2, %v516_v11 }
 0x433   : > { %522 = vst.msk [vmem:[%s807_s25 + $0x28] sm:$0xff] %vm279_vm2, %v514_v12 }
 0x434 PF: > { %s14_s14 = sadd.s32 1, %s704_s14  }
 0x435   : > { %p11_p4 = scmp.ge.s32.totalorder %s14_s14, 4  }
 0x437   :  { %13 = sbr.rel (!%p11_p4) target bundleno = 2 (0x2), region = 65 }

// kernel: dda_forward.13
= control target key start
LH: loop header
LB: loop body
LE: loop exit
PB: predicated region body
PF: predicated region fallthrough
CT: control target
= control target key end

     0   :  { %vm19_vm0 = vcmask 130048   ;;  %v334_v3 = vmov 0.0   ;;  %s534_s1 = inlined_call_operand.vmem [shape: f32[16,16], index: 1, kind: input, shape index: {}]   ;;  %s535_s0 = inlined_call_operand.vmem [shape: f32[128,16], index: 0, kind: input, shape index: {}]   ;;  %s536_s2 = inlined_call_operand.vmem [shape: f32[1,16], index: 2, kind: input, shape index: {}]   ;;  %s537_s3 = inlined_call_operand.vmem [shape: f32[128,16], index: 3, kind: output, shape index: {}]  }
   0x1   :  { %v76_v0 = vld [vmem:[%s534_s1] sm:$0xff]  ;;  %v77_v1 = vld [vmem:[%s534_s1 + $0x8] sm:$0xff]  ;;  %22 = vst.msk [vmem:[#allocation2 + $0x10] sm:$0xff] %vm19_vm0, %v334_v3  ;;  %20 = vst.msk [vmem:[#allocation2] sm:$0xff] %vm19_vm0, %v334_v3 }
   0x2   :  { %v36_v2 = vld [vmem:[%s535_s0] sm:$0xff]  ;;  %21 = vst.msk [vmem:[#allocation2 + $0x8] sm:$0xff] %vm19_vm0, %v334_v3  ;;  %23 = vst.msk [vmem:[#allocation2 + $0x18] sm:$0xff] %vm19_vm0, %v334_v3  ;;  %v78_v4 = vpack.c.bf16 %v77_v1, %v76_v0  ;;  %v37_v5 = vld [vmem:[%s535_s0 + $0x8] sm:$0xff] }
   0x3   :  { %24 = vst.msk [vmem:[#allocation2 + $0x20] sm:$0xff] %vm19_vm0, %v334_v3  ;;  %25 = vst.msk [vmem:[#allocation2 + $0x28] sm:$0xff] %vm19_vm0, %v334_v3  ;;  %v44_v6 = vld [vmem:[%s535_s0 + $0x40] sm:$0xff]  ;;  %v45_v7 = vld [vmem:[%s535_s0 + $0x48] sm:$0xff]  ;;  %v68_v8 = vpack.c.bf16 %v37_v5, %v36_v2 }
   0x4   :  { %26 = vst.msk [vmem:[#allocation2 + $0x30] sm:$0xff] %vm19_vm0, %v334_v3  ;;  %27 = vst.msk [vmem:[#allocation2 + $0x38] sm:$0xff] %vm19_vm0, %v334_v3  ;;  %v72_v9 = vpack.c.bf16 %v45_v7, %v44_v6  ;;  %v38_v10 = vld [vmem:[%s535_s0 + $0x10] sm:$0xff]  ;;  %v39_v11 = vld [vmem:[%s535_s0 + $0x18] sm:$0xff]  ;;  %313 = vmatprep.subr.bf16.mxu0 %v78_v4  ;;  %331 = vmatprep.subr.bf16.mxu1 %v78_v4 }
   0x5   :  { %28 = vst.msk [vmem:[#allocation2 + $0x40] sm:$0xff] %vm19_vm0, %v334_v3  ;;  %29 = vst.msk [vmem:[#allocation2 + $0x48] sm:$0xff] %vm19_vm0, %v334_v3  ;;  %v46_v12 = vld [vmem:[%s535_s0 + $0x50] sm:$0xff]  ;;  %v69_v13 = vpack.c.bf16 %v39_v11, %v38_v10  ;;  %v47_v14 = vld [vmem:[%s535_s0 + $0x58] sm:$0xff]  ;;  %314 = vmatpush3.bf16.msra.mxu0 %v78_v4  ;;  %332 = vmatpush3.bf16.msra.mxu1 %v78_v4 }
   0x6   :  { %30 = vst.msk [vmem:[#allocation2 + $0x50] sm:$0xff] %vm19_vm0, %v334_v3  ;;  %31 = vst.msk [vmem:[#allocation2 + $0x58] sm:$0xff] %vm19_vm0, %v334_v3  ;;  %v40_v15 = vld [vmem:[%s535_s0 + $0x20] sm:$0xff]  ;;  %v41_v16 = vld [vmem:[%s535_s0 + $0x28] sm:$0xff]  ;;  %v73_v17 = vpack.c.bf16 %v47_v14, %v46_v12  ;;  %315 = vmatprep.mubr.msk.bf16.mxu0 %vm19_vm0, %v68_v8  ;;  %323 = vmatprep.mubr.msk.bf16.mxu1 %vm19_vm0, %v72_v9 }
   0x7   :  { %32 = vst.msk [vmem:[#allocation2 + $0x60] sm:$0xff] %vm19_vm0, %v334_v3  ;;  %33 = vst.msk [vmem:[#allocation2 + $0x68] sm:$0xff] %vm19_vm0, %v334_v3  ;;  %v70_v18 = vpack.c.bf16 %v41_v16, %v40_v15  ;;  %v48_v19 = vld [vmem:[%s535_s0 + $0x60] sm:$0xff]  ;;  %v49_v20 = vld [vmem:[%s535_s0 + $0x68] sm:$0xff] }
   0x8   :  { %34 = vst.msk [vmem:[#allocation2 + $0x70] sm:$0xff] %vm19_vm0, %v334_v3  ;;  %35 = vst.msk [vmem:[#allocation2 + $0x78] sm:$0xff] %vm19_vm0, %v334_v3  ;;  %v74_v21 = vpack.c.bf16 %v49_v20, %v48_v19  ;;  %316 = vmatmul.mubr.msk.bf16.vlgmr.msra.gmra.mrb[0].mxu0 %vm19_vm0, %v69_v13  ;;  %324 = vmatmul.mubr.msk.bf16.vlgmr.msra.gmra.mrb[0].mxu1 %vm19_vm0, %v73_v17  ;;  %v42_v22 = vld [vmem:[%s535_s0 + $0x30] sm:$0xff]  ;;  %v43_v23 = vld [vmem:[%s535_s0 + $0x38] sm:$0xff] }
   0x9   :  { %319 = vmatprep.mubr.msk.bf16.mxu0 %vm19_vm0, %v70_v18  ;;  %v50_v24 = vld [vmem:[%s535_s0 + $0x70] sm:$0xff]  ;;  %v51_v25 = vld [vmem:[%s535_s0 + $0x78] sm:$0xff]  ;;  %v71_v26 = vpack.c.bf16 %v43_v23, %v42_v22  ;;  %v52_v30 = vld [vmem:[#allocation2] sm:$0xff] }
   0xa   :  { %327 = vmatprep.mubr.msk.bf16.mxu1 %vm19_vm0, %v74_v21  ;;  %v75_v27 = vpack.c.bf16 %v51_v25, %v50_v24  ;;  %v54_v28 = vld [vmem:[#allocation2 + $0x10] sm:$0xff]  ;;  %v55_v34 = vld [vmem:[#allocation2 + $0x18] sm:$0xff]  ;;  %v53_v40 = vld [vmem:[#allocation2 + $0x8] sm:$0xff] }
   0xb   :  { %v58_v52 = vld [vmem:[#allocation2 + $0x30] sm:$0xff]  ;;  %v56_v54 = vld [vmem:[#allocation2 + $0x20] sm:$0xff]  ;;  %v59_v59 = vld [vmem:[#allocation2 + $0x38] sm:$0xff] }
   0xc   :  { %v60_v31 = vld [vmem:[#allocation2 + $0x40] sm:$0xff]  ;;  %v61_v41 = vld [vmem:[#allocation2 + $0x48] sm:$0xff] }
   0xd   :  { %v62_v29 = vld [vmem:[#allocation2 + $0x50] sm:$0xff]  ;;  %v63_v35 = vld [vmem:[#allocation2 + $0x58] sm:$0xff]  ;;  %v444_v56 = vld [vmem:[%s536_s2] ss:$0 sm:$0xff] }
   0xe   :  { %v64_v55 = vld [vmem:[#allocation2 + $0x60] sm:$0xff]  ;;  %v57_v1 = vld [vmem:[#allocation2 + $0x28] sm:$0xff] }
   0xf   :  { %v66_v53 = vld [vmem:[#allocation2 + $0x70] sm:$0xff]  ;;  %v67_v60 = vld [vmem:[#allocation2 + $0x78] sm:$0xff]  ;;  %v65_v2 = vld [vmem:[#allocation2 + $0x68] sm:$0xff] }
  0x10   :  { %320 = vmatmul.mubr.msk.bf16.gmra.mrb[4].mxu0 %vm19_vm0, %v71_v26  ;;  %328 = vmatmul.mubr.msk.bf16.gmra.mrb[4].mxu1 %vm19_vm0, %v75_v27 }
  0xdb   :  { %v317_v32 = vpop.f32.mrb[0].mxu0  ;;  %v325_v33 = vpop.f32.mrb[0].mxu1 }
  0xdc   :  { %v203_v36 = vadd.f32 %v317_v32, %v54_v28  ;;  %v211_v37 = vadd.f32 %v325_v33, %v62_v29  ;;  %v138_v38 = vpop.f32.mrb[1].mxu0  ;;  %v170_v39 = vpop.f32.mrb[1].mxu1 }
  0xdd   :  { %v201_v42 = vadd.f32 %v138_v38, %v52_v30  ;;  %v209_v43 = vadd.f32 %v170_v39, %v60_v31  ;;  %v318_v44 = vpop.f32.mrb[2].mxu0  ;;  %v326_v45 = vpop.f32.mrb[2].mxu1 }
  0xde   :  { %219 = vst.msk [vmem:[#allocation2 + $0x10] sm:$0xff] %vm19_vm0, %v203_v36  ;;  %227 = vst.msk [vmem:[#allocation2 + $0x50] sm:$0xff] %vm19_vm0, %v211_v37  ;;  %v204_v46 = vadd.f32 %v318_v44, %v55_v34  ;;  %v212_v47 = vadd.f32 %v326_v45, %v63_v35  ;;  %v141_v48 = vpop.f32.mrb[3].mxu0  ;;  %v173_v49 = vpop.f32.mrb[3].mxu1 }
  0xdf   :  { %217 = vst.msk [vmem:[#allocation2] sm:$0xff] %vm19_vm0, %v201_v42  ;;  %225 = vst.msk [vmem:[#allocation2 + $0x40] sm:$0xff] %vm19_vm0, %v209_v43  ;;  %v202_v50 = vadd.f32 %v141_v48, %v53_v40  ;;  %v210_v51 = vadd.f32 %v173_v49, %v61_v41 }
  0xe0   :  { %220 = vst.msk [vmem:[#allocation2 + $0x18] sm:$0xff] %vm19_vm0, %v204_v46  ;;  %228 = vst.msk [vmem:[#allocation2 + $0x58] sm:$0xff] %vm19_vm0, %v212_v47 }
  0xe1   :  { %218 = vst.msk [vmem:[#allocation2 + $0x8] sm:$0xff] %vm19_vm0, %v202_v50  ;;  %226 = vst.msk [vmem:[#allocation2 + $0x48] sm:$0xff] %vm19_vm0, %v210_v51 }
  0xe3   :  { %v321_v57 = vpop.f32.mrb[4].mxu0  ;;  %v329_v58 = vpop.f32.mrb[4].mxu1 }
  0xe4   :  { %v207_v61 = vadd.f32 %v321_v57, %v58_v52  ;;  %v215_v62 = vadd.f32 %v329_v58, %v66_v53  ;;  %v154_v63 = vpop.f32.mrb[5].mxu0  ;;  %v186_v0 = vpop.f32.mrb[5].mxu1 }
  0xe5   :  { %v238_v3 = vld [vmem:[#allocation2 + $0x10] sm:$0xff]  ;;  %v205_v5 = vadd.f32 %v154_v63, %v56_v54  ;;  %v213_v6 = vadd.f32 %v186_v0, %v64_v55  ;;  %v322_v7 = vpop.f32.mrb[6].mxu0  ;;  %v330_v8 = vpop.f32.mrb[6].mxu1 }
  0xe6   :  { %v246_v4 = vld [vmem:[#allocation2 + $0x50] sm:$0xff]  ;;  %v261_v9 = vadd.f32 %v444_v56, %v238_v3  ;;  %v236_v11 = vld [vmem:[#allocation2] sm:$0xff]  ;;  %223 = vst.msk [vmem:[#allocation2 + $0x30] sm:$0xff] %vm19_vm0, %v207_v61  ;;  %231 = vst.msk [vmem:[#allocation2 + $0x70] sm:$0xff] %vm19_vm0, %v215_v62  ;;  %v208_v13 = vadd.f32 %v322_v7, %v59_v59  ;;  %v216_v14 = vadd.f32 %v330_v8, %v67_v60  ;;  %v157_v15 = vpop.f32.mrb[7].mxu0  ;;  %v189_v16 = vpop.f32.mrb[7].mxu1 }
  0xe7   :  { %v269_v10 = vadd.f32 %v444_v56, %v246_v4  ;;  %v244_v12 = vld [vmem:[#allocation2 + $0x40] sm:$0xff]  ;;  %v259_v17 = vadd.f32 %v444_v56, %v236_v11  ;;  %v239_v19 = vld [vmem:[#allocation2 + $0x18] sm:$0xff]  ;;  %221 = vst.msk [vmem:[#allocation2 + $0x20] sm:$0xff] %vm19_vm0, %v205_v5  ;;  %229 = vst.msk [vmem:[#allocation2 + $0x60] sm:$0xff] %vm19_vm0, %v213_v6  ;;  %v206_v21 = vadd.f32 %v157_v15, %v57_v1 }
  0xe8   :  { %v267_v18 = vadd.f32 %v444_v56, %v244_v12  ;;  %v247_v20 = vld [vmem:[#allocation2 + $0x58] sm:$0xff]  ;;  %v214_v22 = vadd.f32 %v189_v16, %v65_v2  ;;  %277 = vst.msk [vmem:[%s537_s3 + $0x10] sm:$0xff] %vm19_vm0, %v261_v9  ;;  %v262_v23 = vadd.f32 %v444_v56, %v239_v19  ;;  %v237_v25 = vld [vmem:[#allocation2 + $0x8] sm:$0xff]  ;;  %224 = vst.msk [vmem:[#allocation2 + $0x38] sm:$0xff] %vm19_vm0, %v208_v13 }
  0xe9   :  { %285 = vst.msk [vmem:[%s537_s3 + $0x50] sm:$0xff] %vm19_vm0, %v269_v10  ;;  %v270_v24 = vadd.f32 %v444_v56, %v247_v20  ;;  %v245_v26 = vld [vmem:[#allocation2 + $0x48] sm:$0xff]  ;;  %232 = vst.msk [vmem:[#allocation2 + $0x78] sm:$0xff] %vm19_vm0, %v216_v14  ;;  %v260_v27 = vadd.f32 %v444_v56, %v237_v25 }
  0xea   :  { %275 = vst.msk [vmem:[%s537_s3] sm:$0xff] %vm19_vm0, %v259_v17  ;;  %283 = vst.msk [vmem:[%s537_s3 + $0x40] sm:$0xff] %vm19_vm0, %v267_v18  ;;  %v268_v28 = vadd.f32 %v444_v56, %v245_v26 }
  0xeb   :  { %222 = vst.msk [vmem:[#allocation2 + $0x28] sm:$0xff] %vm19_vm0, %v206_v21  ;;  %230 = vst.msk [vmem:[#allocation2 + $0x68] sm:$0xff] %vm19_vm0, %v214_v22 }
  0xec   :  { %278 = vst.msk [vmem:[%s537_s3 + $0x18] sm:$0xff] %vm19_vm0, %v262_v23  ;;  %286 = vst.msk [vmem:[%s537_s3 + $0x58] sm:$0xff] %vm19_vm0, %v270_v24 }
  0xed   :  { %276 = vst.msk [vmem:[%s537_s3 + $0x8] sm:$0xff] %vm19_vm0, %v260_v27  ;;  %284 = vst.msk [vmem:[%s537_s3 + $0x48] sm:$0xff] %vm19_vm0, %v268_v28  ;;  %v242_v29 = vld [vmem:[#allocation2 + $0x30] sm:$0xff] }
  0xee   :  { %v250_v30 = vld [vmem:[#allocation2 + $0x70] sm:$0xff]  ;;  %v265_v31 = vadd.f32 %v444_v56, %v242_v29  ;;  %v240_v33 = vld [vmem:[#allocation2 + $0x20] sm:$0xff] }
  0xef   :  { %v273_v32 = vadd.f32 %v444_v56, %v250_v30  ;;  %v248_v34 = vld [vmem:[#allocation2 + $0x60] sm:$0xff]  ;;  %v263_v35 = vadd.f32 %v444_v56, %v240_v33  ;;  %v243_v37 = vld [vmem:[#allocation2 + $0x38] sm:$0xff] }
  0xf0   :  { %v271_v36 = vadd.f32 %v444_v56, %v248_v34  ;;  %v251_v38 = vld [vmem:[#allocation2 + $0x78] sm:$0xff]  ;;  %281 = vst.msk [vmem:[%s537_s3 + $0x30] sm:$0xff] %vm19_vm0, %v265_v31  ;;  %v266_v39 = vadd.f32 %v444_v56, %v243_v37 }
  0xf1   :  { %289 = vst.msk [vmem:[%s537_s3 + $0x70] sm:$0xff] %vm19_vm0, %v273_v32  ;;  %v274_v40 = vadd.f32 %v444_v56, %v251_v38  ;;  %279 = vst.msk [vmem:[%s537_s3 + $0x20] sm:$0xff] %vm19_vm0, %v263_v35 }
  0xf2   :  { %v241_v41 = vld [vmem:[#allocation2 + $0x28] sm:$0xff]  ;;  %287 = vst.msk [vmem:[%s537_s3 + $0x60] sm:$0xff] %vm19_vm0, %v271_v36  ;;  %282 = vst.msk [vmem:[%s537_s3 + $0x38] sm:$0xff] %vm19_vm0, %v266_v39 }
  0xf3   :  { %v249_v42 = vld [vmem:[#allocation2 + $0x68] sm:$0xff]  ;;  %v264_v43 = vadd.f32 %v444_v56, %v241_v41  ;;  %290 = vst.msk [vmem:[%s537_s3 + $0x78] sm:$0xff] %vm19_vm0, %v274_v40 }
  0xf4   :  { %v272_v44 = vadd.f32 %v444_v56, %v249_v42 }
  0xf5   :  { %280 = vst.msk [vmem:[%s537_s3 + $0x28] sm:$0xff] %vm19_vm0, %v264_v43 }
  0xf6   :  { %288 = vst.msk [vmem:[%s537_s3 + $0x68] sm:$0xff] %vm19_vm0, %v272_v44 }

// kernel: dda_forward.21
= control target key start
LH: loop header
LB: loop body
LE: loop exit
PB: predicated region body
PF: predicated region fallthrough
CT: control target
= control target key end

     0   :  { %vm19_vm0 = vcmask 64512   ;;  %v367_v3 = vmov 0.0   ;;  %vm101_vm1 = vcmask 392192   ;;  %s579_s1 = inlined_call_operand.vmem [shape: f32[48,8], index: 1, kind: input, shape index: {}]   ;;  %s580_s0 = inlined_call_operand.vmem [shape: f32[128,48], index: 0, kind: input, shape index: {}]   ;;  %s581_s2 = inlined_call_operand.vmem [shape: f32[1,8], index: 2, kind: input, shape index: {}]   ;;  %s582_s3 = inlined_call_operand.vmem [shape: f32[128,8], index: 3, kind: output, shape index: {}]  }
   0x1   :  { %v92_v0 = vld [vmem:[%s579_s1] sm:$0xff]  ;;  %v93_v1 = vld [vmem:[%s579_s1 + $0x8] sm:$0xff]  ;;  %v94_v2 = vld [vmem:[%s579_s1 + $0x10] sm:$0xff]  ;;  %22 = vst.msk [vmem:[#allocation2 + $0x10] sm:$0xff] %vm19_vm0, %v367_v3 }
   0x2   :  { %20 = vst.msk [vmem:[#allocation2] sm:$0xff] %vm19_vm0, %v367_v3  ;;  %21 = vst.msk [vmem:[#allocation2 + $0x8] sm:$0xff] %vm19_vm0, %v367_v3  ;;  %v98_v4 = vpack.c.bf16 %v93_v1, %v92_v0  ;;  %v95_v5 = vld [vmem:[%s579_s1 + $0x18] sm:$0xff]  ;;  %v96_v6 = vld [vmem:[%s579_s1 + $0x20] sm:$0xff] }
   0x3   :  { %23 = vst.msk [vmem:[#allocation2 + $0x18] sm:$0xff] %vm19_vm0, %v367_v3  ;;  %24 = vst.msk [vmem:[#allocation2 + $0x20] sm:$0xff] %vm19_vm0, %v367_v3  ;;  %v97_v7 = vld [vmem:[%s579_s1 + $0x28] sm:$0xff]  ;;  %v99_v8 = vpack.c.bf16 %v95_v5, %v94_v2  ;;  %v36_v9 = vld [vmem:[%s580_s0] sm:$0xff] }
   0x4   :  { %25 = vst.msk [vmem:[#allocation2 + $0x28] sm:$0xff] %vm19_vm0, %v367_v3  ;;  %26 = vst.msk [vmem:[#allocation2 + $0x30] sm:$0xff] %vm19_vm0, %v367_v3  ;;  %v37_v10 = vld [vmem:[%s580_s0 + $0x8] sm:$0xff]  ;;  %v44_v11 = vld [vmem:[%s580_s0 + $0x40] sm:$0xff]  ;;  %338 = vmatprep.subr.bf16.mxu0 %v98_v4  ;;  %360 = vmatprep.subr.bf16.mxu1 %v98_v4  ;;  %v52_v12 = vmax.f32 %v36_v9, 0.0  ;;  %v100_v22 = vpack.c.bf16 %v97_v7, %v96_v6 }
   0x5   :  { %27 = vst.msk [vmem:[#allocation2 + $0x38] sm:$0xff] %vm19_vm0, %v367_v3  ;;  %28 = vst.msk [vmem:[#allocation2 + $0x40] sm:$0xff] %vm19_vm0, %v367_v3  ;;  %v53_v13 = vmax.f32 %v37_v10, 0.0  ;;  %v45_v14 = vld [vmem:[%s580_s0 + $0x48] sm:$0xff]  ;;  %v60_v15 = vmax.f32 %v44_v11, 0.0  ;;  %v38_v16 = vld [vmem:[%s580_s0 + $0x10] sm:$0xff]  ;;  %339 = vmatpush3.bf16.msra.mxu0 %v98_v4  ;;  %363 = vmatpush3.bf16.msra.mxu1 %v98_v4 }
   0x6   :  { %29 = vst.msk [vmem:[#allocation2 + $0x48] sm:$0xff] %vm19_vm0, %v367_v3  ;;  %30 = vst.msk [vmem:[#allocation2 + $0x50] sm:$0xff] %vm19_vm0, %v367_v3  ;;  %v39_v17 = vld [vmem:[%s580_s0 + $0x18] sm:$0xff]  ;;  %v61_v18 = vmax.f32 %v45_v14, 0.0  ;;  %v46_v19 = vld [vmem:[%s580_s0 + $0x50] sm:$0xff]  ;;  %340 = vmatprep.subr.bf16.mxu0 %v99_v8  ;;  %361 = vmatprep.subr.bf16.mxu1 %v99_v8  ;;  %v54_v28 = vmax.f32 %v38_v16, 0.0 }
   0x7   :  { %31 = vst.msk [vmem:[#allocation2 + $0x58] sm:$0xff] %vm19_vm0, %v367_v3  ;;  %32 = vst.msk [vmem:[#allocation2 + $0x60] sm:$0xff] %vm19_vm0, %v367_v3  ;;  %v47_v20 = vld [vmem:[%s580_s0 + $0x58] sm:$0xff]  ;;  %v40_v21 = vld [vmem:[%s580_s0 + $0x20] sm:$0xff]  ;;  %v84_v23 = vpack.c.bf16 %v53_v13, %v52_v12  ;;  %v55_v29 = vmax.f32 %v39_v17, 0.0  ;;  %v62_v30 = vmax.f32 %v46_v19, 0.0 }
   0x8   :  { %33 = vst.msk [vmem:[#allocation2 + $0x68] sm:$0xff] %vm19_vm0, %v367_v3  ;;  %34 = vst.msk [vmem:[#allocation2 + $0x70] sm:$0xff] %vm19_vm0, %v367_v3  ;;  %v41_v24 = vld [vmem:[%s580_s0 + $0x28] sm:$0xff]  ;;  %v48_v25 = vld [vmem:[%s580_s0 + $0x60] sm:$0xff]  ;;  %v88_v27 = vpack.c.bf16 %v61_v18, %v60_v15  ;;  %v63_v31 = vmax.f32 %v47_v20, 0.0  ;;  %v56_v32 = vmax.f32 %v40_v21, 0.0 }
   0x9   :  { %35 = vst.msk [vmem:[#allocation2 + $0x78] sm:$0xff] %vm19_vm0, %v367_v3  ;;  %v49_v26 = vld [vmem:[%s580_s0 + $0x68] sm:$0xff]  ;;  %344 = vmatprep.mubr.msk.bf16.mxu0 %vm101_vm1, %v84_v23  ;;  %341 = vmatpush3.bf16.msra.mxu0 %v99_v8  ;;  %v57_v33 = vmax.f32 %v41_v24, 0.0  ;;  %v64_v34 = vmax.f32 %v48_v25, 0.0  ;;  %v85_v36 = vpack.c.bf16 %v55_v29, %v54_v28  ;;  %v42_v38 = vld [vmem:[%s580_s0 + $0x30] sm:$0xff]  ;;  %v43_v41 = vld [vmem:[%s580_s0 + $0x38] sm:$0xff] }
   0xa   :  { %364 = vmatpush3.bf16.msra.mxu1 %v99_v8  ;;  %v65_v35 = vmax.f32 %v49_v26, 0.0  ;;  %342 = vmatprep.subr.bf16.mxu0 %v100_v22  ;;  %v89_v37 = vpack.c.bf16 %v63_v31, %v62_v30  ;;  %v50_v42 = vld [vmem:[%s580_s0 + $0x70] sm:$0xff]  ;;  %v51_v43 = vld [vmem:[%s580_s0 + $0x78] sm:$0xff]  ;;  %v58_v44 = vmax.f32 %v42_v38, 0.0  ;;  %v59_v45 = vmax.f32 %v43_v41, 0.0  ;;  %v68_v52 = vld [vmem:[#allocation2] sm:$0xff] }
   0xb   :  { %362 = vmatprep.subr.bf16.mxu1 %v100_v22  ;;  %352 = vmatprep.mubr.msk.bf16.mxu1 %vm101_vm1, %v88_v27  ;;  %v86_v39 = vpack.c.bf16 %v57_v33, %v56_v32  ;;  %v66_v46 = vmax.f32 %v50_v42, 0.0  ;;  %v67_v47 = vmax.f32 %v51_v43, 0.0  ;;  %v70_v50 = vld [vmem:[#allocation2 + $0x10] sm:$0xff]  ;;  %v71_v56 = vld [vmem:[#allocation2 + $0x18] sm:$0xff]  ;;  %v69_v62 = vld [vmem:[#allocation2 + $0x8] sm:$0xff] }
   0xc   :  { %v90_v40 = vpack.c.bf16 %v65_v35, %v64_v34  ;;  %v87_v48 = vpack.c.bf16 %v59_v45, %v58_v44  ;;  %v76_v53 = vld [vmem:[#allocation2 + $0x40] sm:$0xff]  ;;  %v74_v10 = vld [vmem:[#allocation2 + $0x30] sm:$0xff]  ;;  %v75_v17 = vld [vmem:[#allocation2 + $0x38] sm:$0xff] }
   0xd   :  { %343 = vmatpush3.bf16.msra.mxu0 %v100_v22  ;;  %v91_v49 = vpack.c.bf16 %v67_v47, %v66_v46  ;;  %v78_v51 = vld [vmem:[#allocation2 + $0x50] sm:$0xff]  ;;  %v77_v63 = vld [vmem:[#allocation2 + $0x48] sm:$0xff]  ;;  %v72_v12 = vld [vmem:[#allocation2 + $0x20] sm:$0xff] }
   0xe   :  { %365 = vmatpush3.bf16.msra.mxu1 %v100_v22  ;;  %v79_v57 = vld [vmem:[#allocation2 + $0x58] sm:$0xff]  ;;  %v80_v13 = vld [vmem:[#allocation2 + $0x60] sm:$0xff]  ;;  %v73_v23 = vld [vmem:[#allocation2 + $0x28] sm:$0xff] }
   0xf   :  { %v82_v11 = vld [vmem:[#allocation2 + $0x70] sm:$0xff]  ;;  %v489_v14 = vld [vmem:[%s581_s2] ss:$0 sm:$0xff]  ;;  %v81_v24 = vld [vmem:[#allocation2 + $0x68] sm:$0xff] }
  0x10   :  { %345 = vmatmul.mubr.msk.bf16.vlgmr.msra.gmra.mrb[0].mxu0 %vm101_vm1, %v85_v36  ;;  %v83_v18 = vld [vmem:[#allocation2 + $0x78] sm:$0xff] }
  0x11   :  { %353 = vmatmul.mubr.msk.bf16.vlgmr.msra.gmra.mrb[0].mxu1 %vm101_vm1, %v89_v37  ;;  %348 = vmatprep.mubr.msk.bf16.mxu0 %vm101_vm1, %v86_v39 }
  0x12   :  { %356 = vmatprep.mubr.msk.bf16.mxu1 %vm101_vm1, %v90_v40 }
  0x18   :  { %349 = vmatmul.mubr.msk.bf16.gmra.mrb[4].mxu0 %vm101_vm1, %v87_v48 }
  0x19   :  { %357 = vmatmul.mubr.msk.bf16.gmra.mrb[4].mxu1 %vm101_vm1, %v91_v49 }
  0xe3   :  { %v346_v54 = vpop.f32.mrb[0].mxu0 }
  0xe4   :  { %v354_v55 = vpop.f32.mrb[0].mxu1  ;;  %v225_v58 = vadd.f32 %v346_v54, %v70_v50  ;;  %v160_v60 = vpop.f32.mrb[1].mxu0 }
  0xe5   :  { %v233_v59 = vadd.f32 %v354_v55, %v78_v51  ;;  %v192_v61 = vpop.f32.mrb[1].mxu1  ;;  %v223_v0 = vadd.f32 %v160_v60, %v68_v52  ;;  %v347_v2 = vpop.f32.mrb[2].mxu0 }
  0xe6   :  { %v231_v1 = vadd.f32 %v192_v61, %v76_v53  ;;  %v355_v3 = vpop.f32.mrb[2].mxu1  ;;  %242 = vst.msk [vmem:[#allocation2 + $0x10] sm:$0xff] %vm19_vm0, %v225_v58  ;;  %v226_v4 = vadd.f32 %v347_v2, %v71_v56  ;;  %v163_v6 = vpop.f32.mrb[3].mxu0 }
  0xe7   :  { %250 = vst.msk [vmem:[#allocation2 + $0x50] sm:$0xff] %vm19_vm0, %v233_v59  ;;  %v234_v5 = vadd.f32 %v355_v3, %v79_v57  ;;  %v195_v7 = vpop.f32.mrb[3].mxu1  ;;  %240 = vst.msk [vmem:[#allocation2] sm:$0xff] %vm19_vm0, %v223_v0  ;;  %v224_v8 = vadd.f32 %v163_v6, %v69_v62 }
  0xe8   :  { %248 = vst.msk [vmem:[#allocation2 + $0x40] sm:$0xff] %vm19_vm0, %v231_v1  ;;  %v232_v9 = vadd.f32 %v195_v7, %v77_v63  ;;  %243 = vst.msk [vmem:[#allocation2 + $0x18] sm:$0xff] %vm19_vm0, %v226_v4 }
  0xe9   :  { %251 = vst.msk [vmem:[#allocation2 + $0x58] sm:$0xff] %vm19_vm0, %v234_v5  ;;  %241 = vst.msk [vmem:[#allocation2 + $0x8] sm:$0xff] %vm19_vm0, %v224_v8 }
  0xea   :  { %249 = vst.msk [vmem:[#allocation2 + $0x48] sm:$0xff] %vm19_vm0, %v232_v9 }
  0xeb   :  { %v350_v15 = vpop.f32.mrb[4].mxu0 }
  0xec   :  { %v358_v16 = vpop.f32.mrb[4].mxu1  ;;  %v229_v19 = vadd.f32 %v350_v15, %v74_v10  ;;  %v176_v21 = vpop.f32.mrb[5].mxu0 }
  0xed   :  { %v237_v20 = vadd.f32 %v358_v16, %v82_v11  ;;  %v208_v22 = vpop.f32.mrb[5].mxu1  ;;  %v261_v25 = vld [vmem:[#allocation2 + $0x10] sm:$0xff]  ;;  %v227_v27 = vadd.f32 %v176_v21, %v72_v12  ;;  %v351_v29 = vpop.f32.mrb[6].mxu0 }
  0xee   :  { %v269_v26 = vld [vmem:[#allocation2 + $0x50] sm:$0xff]  ;;  %v235_v28 = vadd.f32 %v208_v22, %v80_v13  ;;  %v359_v30 = vpop.f32.mrb[6].mxu1  ;;  %v284_v31 = vadd.f32 %v489_v14, %v261_v25  ;;  %v259_v33 = vld [vmem:[#allocation2] sm:$0xff]  ;;  %246 = vst.msk [vmem:[#allocation2 + $0x30] sm:$0xff] %vm19_vm0, %v229_v19  ;;  %v230_v35 = vadd.f32 %v351_v29, %v75_v17  ;;  %v179_v37 = vpop.f32.mrb[7].mxu0 }
  0xef   :  { %v292_v32 = vadd.f32 %v489_v14, %v269_v26  ;;  %v267_v34 = vld [vmem:[#allocation2 + $0x40] sm:$0xff]  ;;  %254 = vst.msk [vmem:[#allocation2 + $0x70] sm:$0xff] %vm19_vm0, %v237_v20  ;;  %v238_v36 = vadd.f32 %v359_v30, %v83_v18  ;;  %v211_v38 = vpop.f32.mrb[7].mxu1  ;;  %v282_v39 = vadd.f32 %v489_v14, %v259_v33  ;;  %v262_v41 = vld [vmem:[#allocation2 + $0x18] sm:$0xff]  ;;  %244 = vst.msk [vmem:[#allocation2 + $0x20] sm:$0xff] %vm19_vm0, %v227_v27 }
  0xf0   :  { %v290_v40 = vadd.f32 %v489_v14, %v267_v34  ;;  %v270_v42 = vld [vmem:[#allocation2 + $0x58] sm:$0xff]  ;;  %252 = vst.msk [vmem:[#allocation2 + $0x60] sm:$0xff] %vm19_vm0, %v235_v28  ;;  %v228_v43 = vadd.f32 %v179_v37, %v73_v23  ;;  %v236_v44 = vadd.f32 %v211_v38, %v81_v24  ;;  %300 = vst.msk [vmem:[%s582_s3 + $0x10] sm:$0xff] %vm19_vm0, %v284_v31  ;;  %v260_v47 = vld [vmem:[#allocation2 + $0x8] sm:$0xff] }
  0xf1   :  { %308 = vst.msk [vmem:[%s582_s3 + $0x50] sm:$0xff] %vm19_vm0, %v292_v32  ;;  %v285_v45 = vadd.f32 %v489_v14, %v262_v41  ;;  %v293_v46 = vadd.f32 %v489_v14, %v270_v42  ;;  %v268_v48 = vld [vmem:[#allocation2 + $0x48] sm:$0xff]  ;;  %247 = vst.msk [vmem:[#allocation2 + $0x38] sm:$0xff] %vm19_vm0, %v230_v35  ;;  %v283_v49 = vadd.f32 %v489_v14, %v260_v47 }
  0xf2   :  { %255 = vst.msk [vmem:[#allocation2 + $0x78] sm:$0xff] %vm19_vm0, %v238_v36  ;;  %298 = vst.msk [vmem:[%s582_s3] sm:$0xff] %vm19_vm0, %v282_v39  ;;  %v291_v50 = vadd.f32 %v489_v14, %v268_v48 }
  0xf3   :  { %306 = vst.msk [vmem:[%s582_s3 + $0x40] sm:$0xff] %vm19_vm0, %v290_v40  ;;  %245 = vst.msk [vmem:[#allocation2 + $0x28] sm:$0xff] %vm19_vm0, %v228_v43 }
  0xf4   :  { %253 = vst.msk [vmem:[#allocation2 + $0x68] sm:$0xff] %vm19_vm0, %v236_v44  ;;  %301 = vst.msk [vmem:[%s582_s3 + $0x18] sm:$0xff] %vm19_vm0, %v285_v45 }
  0xf5   :  { %309 = vst.msk [vmem:[%s582_s3 + $0x58] sm:$0xff] %vm19_vm0, %v293_v46  ;;  %299 = vst.msk [vmem:[%s582_s3 + $0x8] sm:$0xff] %vm19_vm0, %v283_v49  ;;  %v265_v51 = vld [vmem:[#allocation2 + $0x30] sm:$0xff] }
  0xf6   :  { %307 = vst.msk [vmem:[%s582_s3 + $0x48] sm:$0xff] %vm19_vm0, %v291_v50  ;;  %v273_v52 = vld [vmem:[#allocation2 + $0x70] sm:$0xff]  ;;  %v288_v53 = vadd.f32 %v489_v14, %v265_v51  ;;  %v263_v55 = vld [vmem:[#allocation2 + $0x20] sm:$0xff] }
  0xf7   :  { %v296_v54 = vadd.f32 %v489_v14, %v273_v52  ;;  %v271_v56 = vld [vmem:[#allocation2 + $0x60] sm:$0xff]  ;;  %v286_v57 = vadd.f32 %v489_v14, %v263_v55 }
  0xf8   :  { %v294_v58 = vadd.f32 %v489_v14, %v271_v56  ;;  %v266_v59 = vld [vmem:[#allocation2 + $0x38] sm:$0xff]  ;;  %304 = vst.msk [vmem:[%s582_s3 + $0x30] sm:$0xff] %vm19_vm0, %v288_v53 }
  0xf9   :  { %v274_v60 = vld [vmem:[#allocation2 + $0x78] sm:$0xff]  ;;  %312 = vst.msk [vmem:[%s582_s3 + $0x70] sm:$0xff] %vm19_vm0, %v296_v54  ;;  %v289_v61 = vadd.f32 %v489_v14, %v266_v59  ;;  %302 = vst.msk [vmem:[%s582_s3 + $0x20] sm:$0xff] %vm19_vm0, %v286_v57 }
  0xfa   :  { %v297_v62 = vadd.f32 %v489_v14, %v274_v60  ;;  %v264_v63 = vld [vmem:[#allocation2 + $0x28] sm:$0xff]  ;;  %310 = vst.msk [vmem:[%s582_s3 + $0x60] sm:$0xff] %vm19_vm0, %v294_v58 }
  0xfb   :  { %v272_v0 = vld [vmem:[#allocation2 + $0x68] sm:$0xff]  ;;  %v287_v1 = vadd.f32 %v489_v14, %v264_v63  ;;  %305 = vst.msk [vmem:[%s582_s3 + $0x38] sm:$0xff] %vm19_vm0, %v289_v61 }
  0xfc   :  { %v295_v2 = vadd.f32 %v489_v14, %v272_v0  ;;  %313 = vst.msk [vmem:[%s582_s3 + $0x78] sm:$0xff] %vm19_vm0, %v297_v62 }
  0xfd   :  { %303 = vst.msk [vmem:[%s582_s3 + $0x28] sm:$0xff] %vm19_vm0, %v287_v1 }
  0xfe   :  { %311 = vst.msk [vmem:[%s582_s3 + $0x68] sm:$0xff] %vm19_vm0, %v295_v2 }

// kernel: dda_forward.14
= control target key start
LH: loop header
LB: loop body
LE: loop exit
PB: predicated region body
PF: predicated region fallthrough
CT: control target
= control target key end

     0   :  { %s1467_s12 = smov 0   ;;  %s1764_s0 = inlined_call_operand.vmem [shape: f32[2,10,10,16], index: 0, kind: input, shape index: {}]   ;;  %s1765_s1 = inlined_call_operand.vmem [shape: f32[9,16,16], index: 1, kind: input, shape index: {}]   ;;  %s1766_s2 = inlined_call_operand.vmem [shape: f32[1,16], index: 2, kind: input, shape index: {}]   ;;  %s1767_s3 = inlined_call_operand.vmem [shape: f32[2,64,16], index: 3, kind: output, shape index: {}]  }
   0x1 LB: > { %s1165_s13 = sadd.s32 4294967295, %s1445_s12   ;;  %p1169_p0 = scmp.ge.s32.totalorder %s1445_s12, 1  ;;  %s1445_s12 = sphi %s1467_s12, %s13_s12  }
   0x2   : > { %p137_p1 = scmp.lt.s32.totalorder %s1445_s12, 3 }
   0x4   : > { %p138_p2 = pnand %p1169_p0, %p137_p1 }
   0x5   : > { %v1173_v0 = vld [vmem:[%s1765_s1 + $0x10] sm:$0xff] (!%p138_p2)  ;;  %v1174_v1 = vld [vmem:[%s1765_s1 + $0x18] sm:$0xff] (!%p138_p2)  ;;  %v1195_v2 = vld [vmem:[%s1765_s1 + $0x40] sm:$0xff] (!%p138_p2)  ;;  %p161_p3 = scmp.lt.s32.totalorder (!%p138_p2), %s1165_s13, 1  ;;  %vm215_vm0 = vcmask (!%p138_p2), 1046528   ;;  %vm256_vm1 = vcmask (!%p138_p2), 130048  }
   0x6   : > { %141 = sbr.rel (%p138_p2) target bundleno = 317 (0x13d), region = 32  ;;  %v255_v3 = vpack.c.bf16 (!%p138_p2), %v1174_v1, %v1173_v0  ;;  %v1196_v4 = vld [vmem:[%s1765_s1 + $0x48] sm:$0xff] (!%p138_p2)  ;;  %v196_v5 = vld [vmem:[%s1765_s1] sm:$0xff] (!%p138_p2)  ;;  %v1201_v9 = vld [vmem:[%s1765_s1 + $0x50] sm:$0xff] (!%p138_p2)  ;;  %vm411_vm2 = vcmask (!%p138_p2), 1045504  }
   0x7   : > { %v197_v6 = vld [vmem:[%s1765_s1 + $0x8] sm:$0xff] (!%p138_p2)  ;;  %v1493_v7 = vpack.c.bf16 (!%p138_p2), %v1196_v4, %v1195_v2  ;;  %v1202_v10 = vld [vmem:[%s1765_s1 + $0x58] sm:$0xff] (!%p138_p2)  ;;  %v1207_v12 = vld [vmem:[%s1765_s1 + $0x60] sm:$0xff] (!%p138_p2) }
   0x8   : > { %v1497_v8 = vpack.c.bf16 (!%p138_p2), %v197_v6, %v196_v5  ;;  %1274 = vmatprep.subr.bf16.mxu1 (!%p138_p2), %v255_v3  ;;  %v1505_v11 = vpack.c.bf16 (!%p138_p2), %v1202_v10, %v1201_v9  ;;  %v1208_v13 = vld [vmem:[%s1765_s1 + $0x68] sm:$0xff] (!%p138_p2)  ;;  %v1183_v14 = vld [vmem:[%s1765_s1 + $0x20] sm:$0xff] (!%p138_p2) }
   0x9   : > { %1314 = vmatprep.subr.bf16.mxu0 (!%p138_p2), %v1493_v7  ;;  %1275 = vmatpush3.bf16.msra.mxu1 (!%p138_p2), %v255_v3  ;;  %v1184_v22 = vld [vmem:[%s1765_s1 + $0x28] sm:$0xff] (!%p138_p2)  ;;  %v1560_v32 = vpack.c.bf16 (!%p138_p2), %v1208_v13, %v1207_v12 }
   0xa   : > { %1315 = vmatpush3.bf16.msra.mxu0 (!%p138_p2), %v1493_v7  ;;  %1284 = vmatprep.subr.bf16.mxu1 (!%p138_p2), %v1497_v8  ;;  %v1572_v39 = vpack.c.bf16 (!%p138_p2), %v1184_v22, %v1183_v14 }
   0xb   : > { %1324 = vmatprep.subr.bf16.mxu0 (!%p138_p2), %v1505_v11 }
   0xd   : > { %s1769_s13 = smov (!%p161_p3, %s1165_s13), 1 }
   0xe   : > { %s1430_s30 = smul.u32 160, %s1769_s13  ;;  %s1228_s4 = sshll.u32 %s1769_s13, 6 }
   0xf   : > { %s1743_s7 = scalar_lea.vmem %s1767_s3, %s1228_s4 }
  0x10   : > { %s1514_s6 = scalar_lea.vmem %s1764_s0, %s1430_s30 }
  0x11   : > { %v1527_v15 = vld [vmem:[%s1514_s6] sm:$0xff]  ;;  %v1530_v16 = vld [vmem:[%s1514_s6 + $0x8] sm:$0x3]  ;;  %v1533_v17 = vld [vmem:[%s1514_s6 + $0x10] sm:$0xff] }
  0x12   : > { %v1536_v18 = vld [vmem:[%s1514_s6 + $0x18] sm:$0x3]  ;;  %v216_v19 = vrot.slane %v1527_v15, 1  ;;  %v217_v20 = vrot.slane %v1530_v16, 1  ;;  %v219_v21 = vrot.slane %v1533_v17, 1  ;;  %v1546_v24 = vld [vmem:[%s1514_s6 + $0x20] sm:$0xff]  ;;  %v192_v13 = vpack.c.bf16 %v1533_v17, %v1527_v15 }
  0x13   : > { %v220_v23 = vrot.slane %v1536_v18, 1  ;;  %v177_v25 = vld [vmem:[%s1514_s6 + $0x28] sm:$0x3]  ;;  %v1551_v27 = vld [vmem:[%s1514_s6 + $0x30] sm:$0xff]  ;;  %v1554_v28 = vld [vmem:[%s1514_s6 + $0x38] sm:$0x3] }
  0x14   : > { %v218_v26 = vsel %vm215_vm0, %v216_v19, %v217_v20  ;;  %v1557_v29 = vld [vmem:[%s1514_s6 + $0x40] sm:$0xff]  ;;  %v222_v30 = vrot.slane %v1546_v24, 1  ;;  %v223_v31 = vrot.slane %v177_v25, 1  ;;  %v181_v34 = vld [vmem:[%s1514_s6 + $0x48] sm:$0x3]  ;;  %v225_v35 = vrot.slane %v1551_v27, 1 }
  0x15   : > { %v221_v33 = vsel %vm215_vm0, %v219_v21, %v220_v23  ;;  %v226_v36 = vrot.slane %v1554_v28, 1  ;;  %v1567_v37 = vld [vmem:[%s1514_s6 + $0x50] sm:$0xff]  ;;  %v1570_v38 = vld [vmem:[%s1514_s6 + $0x60] sm:$0xff]  ;;  %v228_v42 = vrot.slane %v1557_v29, 1  ;;  %v229_v43 = vrot.slane %v181_v34, 1 }
  0x16   : > { %v248_v40 = vpack.c.bf16 %v221_v33, %v218_v26  ;;  %v224_v41 = vsel %vm215_vm0, %v222_v30, %v223_v31  ;;  %v183_v44 = vld [vmem:[%s1514_s6 + $0x58] sm:$0x3]  ;;  %v185_v45 = vld [vmem:[%s1514_s6 + $0x68] sm:$0x3]  ;;  %v416_v46 = vrot.slane %v1536_v18, 2  ;;  %v419_v48 = vrot.slane %v177_v25, 2 }
  0x17   : > { %v227_v47 = vsel %vm215_vm0, %v225_v35, %v226_v36  ;;  %v422_v49 = vrot.slane %v1554_v28, 2  ;;  %v1582_v50 = vld [vmem:[%s1514_s6 + $0x70] sm:$0xff]  ;;  %v1585_v51 = vld [vmem:[%s1514_s6 + $0x78] sm:$0x3]  ;;  %v230_v52 = vsel %vm215_vm0, %v228_v42, %v229_v43  ;;  %v425_v54 = vrot.slane %v181_v34, 2  ;;  %v1637_v25 = vld [vmem:[%s1514_s6 + $0x80] sm:$0xff] }
  0x18   : > { %1276 = vmatprep.mubr.msk.bf16.mxu1 %vm256_vm1, %v248_v40  ;;  %v1589_v53 = vpack.c.bf16 %v227_v47, %v224_v41  ;;  %v636_v55 = vpack.c.bf16 %v224_v41, %v221_v33  ;;  %v637_v56 = vpack.c.bf16 %v230_v52, %v227_v47  ;;  %v231_v57 = vrot.slane %v1567_v37, 1  ;;  %v1640_v26 = vld [vmem:[%s1514_s6 + $0x88] sm:$0x3]  ;;  %v1213_v28 = vld [vmem:[%s1765_s1 + $0x70] sm:$0xff]  ;;  %v1214_v30 = vld [vmem:[%s1765_s1 + $0x78] sm:$0xff] }
  0x19   : > { %v232_v58 = vrot.slane %v183_v44, 1  ;;  %v234_v59 = vrot.slane %v1570_v38, 1  ;;  %v235_v60 = vrot.slane %v185_v45, 1  ;;  %v237_v61 = vrot.slane %v1582_v50, 1  ;;  %v1189_v41 = vld [vmem:[%s1765_s1 + $0x30] sm:$0xff]  ;;  %v1190_v42 = vld [vmem:[%s1765_s1 + $0x38] sm:$0xff] }
  0x1a   : > { %1316 = vmatprep.mubr.msk.bf16.mxu0 %vm256_vm1, %v636_v55  ;;  %1277 = vmatmul.mubr.msk.bf16.vlgmr.msra.gmra.mrb[0].mxu1 %vm256_vm1, %v1589_v53  ;;  %v238_v62 = vrot.slane %v1585_v51, 1  ;;  %v415_v63 = vrot.slane %v1533_v17, 2  ;;  %v418_v1 = vrot.slane %v1546_v24, 2  ;;  %v421_v2 = vrot.slane %v1551_v27, 2 }
  0x1b   : > { %1285 = vmatpush3.bf16.msra.mxu1 %v1497_v8  ;;  %1317 = vmatmul.mubr.msk.bf16.vlgmr.msra.gmra.mrb[0].mxu0 %vm256_vm1, %v637_v56  ;;  %v1602_v0 = vsel %vm215_vm0, %v231_v57, %v232_v58  ;;  %v424_v3 = vrot.slane %v1557_v29, 2  ;;  %v1612_v5 = vsel %vm215_vm0, %v234_v59, %v235_v60  ;;  %v427_v12 = vrot.slane %v1567_v37, 2  ;;  %v190_v58 = vld [vmem:[%s1514_s6 + $0x90] sm:$0xff] }
  0x1c   : > { %1325 = vmatpush3.bf16.msra.mxu0 %v1505_v11  ;;  %v1609_v4 = vpack.c.bf16 %v1602_v0, %v230_v52  ;;  %v1615_v6 = vsel %vm215_vm0, %v237_v61, %v238_v62  ;;  %v417_v8 = vsel %vm411_vm2, %v415_v63, %v416_v46  ;;  %v420_v9 = vsel %vm411_vm2, %v418_v1, %v419_v48  ;;  %v191_v62 = vld [vmem:[%s1514_s6 + $0x98] sm:$0x3] }
  0x1d   : > { %1334 = vmatprep.subr.bf16.mxu0 %v1560_v32  ;;  %v1624_v10 = vpack.c.bf16 %v1615_v6, %v1612_v5  ;;  %v733_v11 = vpack.c.bf16 %v420_v9, %v417_v8  ;;  %1294 = vmatprep.subr.bf16.mxu1 %v1572_v39  ;;  %v428_v14 = vrot.slane %v183_v44, 2  ;;  %v430_v18 = vrot.slane %v1570_v38, 2 }
  0x1e   : > { %1280 = vmatprep.mubr.msk.bf16.mxu1 %vm256_vm1, %v1609_v4  ;;  %v431_v19 = vrot.slane %v185_v45, 2  ;;  %v423_v20 = vsel %vm411_vm2, %v421_v2, %v422_v49  ;;  %v426_v21 = vsel %vm411_vm2, %v424_v3, %v425_v54  ;;  %v433_v33 = vrot.slane %v1582_v50, 2  ;;  %v1220_v54 = vld [vmem:[%s1765_s1 + $0x88] sm:$0xff] }
  0x1f   : > { %1326 = vmatprep.mubr.msk.bf16.mxu0 %vm256_vm1, %v733_v11  ;;  %v429_v22 = vsel %vm411_vm2, %v427_v12, %v428_v14  ;;  %v734_v31 = vpack.c.bf16 %v426_v21, %v423_v20  ;;  %v434_v35 = vrot.slane %v1585_v51, 2  ;;  %v729_v36 = vrot.slane %v1637_v25, 2 }
  0x20   : > { %v432_v23 = vsel %vm411_vm2, %v430_v18, %v431_v19  ;;  %v730_v40 = vrot.slane %v1640_v26, 2  ;;  %v917_v43 = vpack.c.bf16 %v1214_v30, %v1213_v28  ;;  %v193_v44 = vpack.c.bf16 %v1551_v27, %v1546_v24 }
  0x21   : > { %v735_v34 = vpack.c.bf16 %v432_v23, %v429_v22  ;;  %v194_v45 = vpack.c.bf16 %v1567_v37, %v1557_v29  ;;  %v544_v46 = vpack.c.bf16 %v1190_v42, %v1189_v41  ;;  %v412_v47 = vrot.slane %v1527_v15, 2 }
  0x22   : > { %1281 = vmatmul.mubr.msk.bf16.gmra.mrb[4].mxu1 %vm256_vm1, %v1624_v10  ;;  %v413_v48 = vrot.slane %v1530_v16, 2  ;;  %v435_v49 = vsel %vm411_vm2, %v433_v33, %v434_v35  ;;  %v1672_v51 = vsel %vm411_vm2, %v729_v36, %v730_v40  ;;  %v195_v16 = vpack.c.bf16 %v1582_v50, %v1570_v38 }
  0x23   : > { %1286 = vmatprep.mubr.msk.bf16.mxu1 %vm256_vm1, %v192_v13  ;;  %v736_v52 = vpack.c.bf16 %v1672_v51, %v435_v49  ;;  %v445_v56 = vpack.c.bf16 %v423_v20, %v420_v9  ;;  %v446_v57 = vpack.c.bf16 %v429_v22, %v426_v21  ;;  %v826_v59 = vpack.c.bf16 %v190_v58, %v1637_v25  ;;  %v1225_v13 = vld [vmem:[%s1766_s2] ss:$0 sm:$0xff] }
  0x24   : > { %v414_v15 = vsel %vm411_vm2, %v412_v47, %v413_v48  ;;  %v447_v60 = vpack.c.bf16 %v435_v49, %v432_v23  ;;  %v537_v61 = vpack.c.bf16 %v1546_v24, %v1533_v17  ;;  %v909_v63 = vrot.slane %v190_v58, 1 }
  0x25   : > { %v632_v1 = vrot.slane %v1637_v25, 1  ;;  %v633_v2 = vrot.slane %v1640_v26, 1  ;;  %v910_v3 = vrot.slane %v191_v62, 1  ;;  %v539_v17 = vpack.c.bf16 %v1570_v38, %v1567_v37 }
  0x26   : > { %v994_v37 = vrot.slane %v190_v58, 2 }
  0x27   : > { %1327 = vmatmul.mubr.msk.bf16.vlgmr.msra.gmra.mrb[0].mxu0 %vm256_vm1, %v734_v31  ;;  %v634_v24 = vsel %vm215_vm0, %v632_v1, %v633_v2 }
  0x28   : > { %1335 = vmatpush3.bf16.msra.mxu0 %v1560_v32  ;;  %1330 = vmatprep.mubr.msk.bf16.mxu0 %vm256_vm1, %v735_v34  ;;  %v444_v32 = vpack.c.bf16 %v417_v8, %v414_v15  ;;  %v538_v8 = vpack.c.bf16 %v1557_v29, %v1551_v27  ;;  %v540_v27 = vpack.c.bf16 %v1637_v25, %v1582_v50 }
  0x29   : > { %1344 = vmatprep.subr.bf16.mxu0 %v917_v43  ;;  %v638_v29 = vpack.c.bf16 %v1612_v5, %v1602_v0  ;;  %v639_v50 = vpack.c.bf16 %v634_v24, %v1615_v6 }
  0x2a   : > { %1287 = vmatmul.mubr.msk.bf16.vlgmr.msra.gmra.mrb[0].mxu1 %vm256_vm1, %v193_v44 }
  0x2b   : > { %1295 = vmatpush3.bf16.msra.mxu1 %v1572_v39  ;;  %1290 = vmatprep.mubr.msk.bf16.mxu1 %vm256_vm1, %v194_v45  ;;  %v1219_v39 = vld [vmem:[%s1765_s1 + $0x80] sm:$0xff] }
  0x2c   : > { %1304 = vmatprep.subr.bf16.mxu1 %v544_v46  ;;  %v1002_v55 = vpack.c.bf16 %v1220_v54, %v1219_v39 }
  0x2f   : > { %1331 = vmatmul.mubr.msk.bf16.gmra.mrb[4].mxu0 %vm256_vm1, %v736_v52 }
  0x30   : > { %1336 = vmatprep.mubr.msk.bf16.mxu0 %vm256_vm1, %v193_v44 }
  0x32   : > { %1291 = vmatmul.mubr.msk.bf16.gmra.mrb[4].mxu1 %vm256_vm1, %v195_v16 }
  0x33   : > { %1296 = vmatprep.mubr.msk.bf16.mxu1 %vm256_vm1, %v444_v32 }
  0x37   : > { %1337 = vmatmul.mubr.msk.bf16.vlgmr.msra.gmra.mrb[0].mxu0 %vm256_vm1, %v194_v45 }
  0x38   : > { %1345 = vmatpush3.bf16.msra.mxu0 %v917_v43  ;;  %1340 = vmatprep.mubr.msk.bf16.mxu0 %vm256_vm1, %v195_v16 }
  0x39   : > { %1354 = vmatprep.subr.bf16.mxu0 %v1002_v55 }
  0x3a   : > { %1297 = vmatmul.mubr.msk.bf16.vlgmr.msra.gmra.mrb[0].mxu1 %vm256_vm1, %v445_v56 }
  0x3b   : > { %1305 = vmatpush3.bf16.msra.mxu1 %v544_v46  ;;  %1300 = vmatprep.mubr.msk.bf16.mxu1 %vm256_vm1, %v446_v57 }
  0x3c   : > { %1364 = vmatprep.subr.bf16.mxu1 %v1493_v7 }
  0x3f   : > { %1341 = vmatmul.mubr.msk.bf16.gmra.mrb[4].mxu0 %vm256_vm1, %v826_v59 }
  0x40   : > { %1346 = vmatprep.mubr.msk.bf16.mxu0 %vm256_vm1, %v1589_v53  ;;  %v911_v53 = vsel %vm215_vm0, %v909_v63, %v910_v3 }
  0x41   : > { %v913_v9 = vpack.c.bf16 %v911_v53, %v634_v24 }
  0x42   : > { %1301 = vmatmul.mubr.msk.bf16.gmra.mrb[4].mxu1 %vm256_vm1, %v447_v60 }
  0x43   : > { %1306 = vmatprep.mubr.msk.bf16.mxu1 %vm256_vm1, %v537_v61 }
  0x47   : > { %1347 = vmatmul.mubr.msk.bf16.vlgmr.msra.gmra.mrb[0].mxu0 %vm256_vm1, %v1609_v4 }
  0x48   : > { %1355 = vmatpush3.bf16.msra.mxu0 %v1002_v55  ;;  %1350 = vmatprep.mubr.msk.bf16.mxu0 %vm256_vm1, %v1624_v10 }
  0x4a   : > { %1307 = vmatmul.mubr.msk.bf16.vlgmr.msra.gmra.mrb[0].mxu1 %vm256_vm1, %v538_v8 }
  0x4b   : > { %1365 = vmatpush3.bf16.msra.mxu1 %v1493_v7  ;;  %1310 = vmatprep.mubr.msk.bf16.mxu1 %vm256_vm1, %v539_v17  ;;  %v995_v7 = vrot.slane %v191_v62, 2 }
  0x4d   : > { %v996_v38 = vsel %vm411_vm2, %v994_v37, %v995_v7 }
  0x4e   : > { %v998_v4 = vpack.c.bf16 %v996_v38, %v1672_v51 }
  0x4f   : > { %1351 = vmatmul.mubr.msk.bf16.gmra.mrb[4].mxu0 %vm256_vm1, %v913_v9 }
  0x50   : > { %1356 = vmatprep.mubr.msk.bf16.mxu0 %vm256_vm1, %v445_v56 }
  0x52   : > { %1311 = vmatmul.mubr.msk.bf16.gmra.mrb[4].mxu1 %vm256_vm1, %v540_v27 }
  0x53   : > { %1320 = vmatprep.mubr.msk.bf16.mxu1 %vm256_vm1, %v638_v29 }
  0x57   : > { %1357 = vmatmul.mubr.msk.bf16.vlgmr.msra.gmra.mrb[0].mxu0 %vm256_vm1, %v446_v57 }
  0x58   : > { %1360 = vmatprep.mubr.msk.bf16.mxu0 %vm256_vm1, %v447_v60 }
  0x5e   : > { %1321 = vmatmul.mubr.msk.bf16.vlgmr.msra.gmra.mrb[4].mxu1 %vm256_vm1, %v639_v50 }
  0x5f   : > { %1361 = vmatmul.mubr.msk.bf16.gmra.mrb[4].mxu0 %vm256_vm1, %v998_v4 }
 0x11d   : > { %v1308_v0 = vpop.f32.mrb[0].mxu1 }
 0x11e   : > { %v591_v5 = vpop.f32.mrb[1].mxu1 }
 0x11f   : > { %v1309_v10 = vpop.f32.mrb[2].mxu1 }
 0x120   : > { %v594_v11 = vpop.f32.mrb[3].mxu1 }
 0x12a   : > { %v1358_v12 = vpop.f32.mrb[0].mxu0 }
 0x12b   : > { %v1366_v14 = vadd.f32 %v1358_v12, %v1308_v0  ;;  %v1040_v18 = vpop.f32.mrb[1].mxu0 }
 0x12c   : > { %v1367_v19 = vadd.f32 %v1040_v18, %v591_v5  ;;  %v1359_v6 = vpop.f32.mrb[2].mxu0 }
 0x12d   : > { %v1088_v20 = vadd.f32 %v1366_v14, %v1225_v13  ;;  %v1368_v21 = vadd.f32 %v1359_v6, %v1309_v10  ;;  %v1043_v22 = vpop.f32.mrb[3].mxu0 }
 0x12e   : > { %v1086_v23 = vadd.f32 %v1367_v19, %v1225_v13  ;;  %v1369_v25 = vadd.f32 %v1043_v22, %v594_v11 }
 0x12f   : > { %v1096_v26 = vmax.f32 %v1088_v20, 0.0  ;;  %v1089_v28 = vadd.f32 %v1368_v21, %v1225_v13 }
 0x130   : > { %v1094_v30 = vmax.f32 %v1086_v23, 0.0  ;;  %v1087_v31 = vadd.f32 %v1369_v25, %v1225_v13 }
 0x131   : > { %1104 = vst.msk [vmem:[%s1743_s7 + $0x10] sm:$0xff] %vm256_vm1, %v1096_v26  ;;  %v1097_v33 = vmax.f32 %v1089_v28, 0.0  ;;  %v1322_v34 = vpop.f32.mrb[4].mxu1 }
 0x132   : > { %1102 = vst.msk [vmem:[%s1743_s7] sm:$0xff] %vm256_vm1, %v1094_v30  ;;  %v1095_v35 = vmax.f32 %v1087_v31, 0.0  ;;  %v1362_v36 = vpop.f32.mrb[4].mxu0  ;;  %v706_v40 = vpop.f32.mrb[5].mxu1 }
 0x133   : > { %1105 = vst.msk [vmem:[%s1743_s7 + $0x18] sm:$0xff] %vm256_vm1, %v1097_v33  ;;  %v1370_v41 = vadd.f32 %v1362_v36, %v1322_v34  ;;  %v1056_v42 = vpop.f32.mrb[5].mxu0  ;;  %v1323_v43 = vpop.f32.mrb[6].mxu1 }
 0x134   : > { %1103 = vst.msk [vmem:[%s1743_s7 + $0x8] sm:$0xff] %vm256_vm1, %v1095_v35  ;;  %v1371_v44 = vadd.f32 %v1056_v42, %v706_v40  ;;  %v1363_v45 = vpop.f32.mrb[6].mxu0  ;;  %v709_v46 = vpop.f32.mrb[7].mxu1 }
 0x135   : > { %v1092_v47 = vadd.f32 %v1370_v41, %v1225_v13  ;;  %v1372_v48 = vadd.f32 %v1363_v45, %v1323_v43  ;;  %v1059_v49 = vpop.f32.mrb[7].mxu0 }
 0x136   : > { %v1090_v51 = vadd.f32 %v1371_v44, %v1225_v13  ;;  %v1373_v52 = vadd.f32 %v1059_v49, %v709_v46 }
 0x137   : > { %v1100_v15 = vmax.f32 %v1092_v47, 0.0  ;;  %v1093_v16 = vadd.f32 %v1372_v48, %v1225_v13 }
 0x138   : > { %v1098_v32 = vmax.f32 %v1090_v51, 0.0  ;;  %v1091_v39 = vadd.f32 %v1373_v52, %v1225_v13 }
 0x139   : > { %1108 = vst.msk [vmem:[%s1743_s7 + $0x30] sm:$0xff] %vm256_vm1, %v1100_v15  ;;  %v1101_v54 = vmax.f32 %v1093_v16, 0.0 }
 0x13a   : > { %1106 = vst.msk [vmem:[%s1743_s7 + $0x20] sm:$0xff] %vm256_vm1, %v1098_v32  ;;  %v1099_v55 = vmax.f32 %v1091_v39, 0.0 }
 0x13b   : > { %1109 = vst.msk [vmem:[%s1743_s7 + $0x38] sm:$0xff] %vm256_vm1, %v1101_v54 }
 0x13c   : > { %1107 = vst.msk [vmem:[%s1743_s7 + $0x28] sm:$0xff] %vm256_vm1, %v1099_v55 }
 0x13d PF: > { %s13_s12 = sadd.s32 1, %s1445_s12  }
 0x13e   : > { %p10_p4 = scmp.ge.s32.totalorder %s13_s12, 4  }
 0x140   :  { %12 = sbr.rel (!%p10_p4) target bundleno = 1 (0x1), region = 70 }

// kernel: dda_forward.22
= control target key start
LH: loop header
LB: loop body
LE: loop exit
PB: predicated region body
PF: predicated region fallthrough
CT: control target
= control target key end

     0   :  { %s1500_s12 = smov 0   ;;  %s1781_s0 = inlined_call_operand.vmem [shape: f32[2,10,10,8], index: 0, kind: input, shape index: {}]   ;;  %s1782_s1 = inlined_call_operand.vmem [shape: f32[9,8,8], index: 1, kind: input, shape index: {}]   ;;  %s1783_s2 = inlined_call_operand.vmem [shape: f32[1,8], index: 2, kind: input, shape index: {}]   ;;  %s1784_s3 = inlined_call_operand.vmem [shape: f32[2,64,8], index: 3, kind: output, shape index: {}]  }
   0x1 LB: > { %s1196_s13 = sadd.s32 4294967295, %s1478_s12   ;;  %p1200_p0 = scmp.ge.s32.totalorder %s1478_s12, 1  ;;  %s1478_s12 = sphi %s1500_s12, %s13_s12  }
   0x2   : > { %p137_p1 = scmp.lt.s32.totalorder %s1478_s12, 3 }
   0x4   : > { %p138_p2 = pnand %p1200_p0, %p137_p1 }
   0x5   : > { %v1204_v0 = vld [vmem:[%s1782_s1 + $0x8] sm:$0xff] (!%p138_p2)  ;;  %vm287_vm0 = vcmask (!%p138_p2), 1043456   ;;  %v1223_v1 = vld [vmem:[%s1782_s1 + $0x20] sm:$0xff] (!%p138_p2)  ;;  %p161_p3 = scmp.lt.s32.totalorder (!%p138_p2), %s1196_s13, 1  ;;  %vm234_vm1 = vcmask (!%p138_p2), 1046528   ;;  %v1233_v10 = vld [vmem:[%s1782_s1 + $0x30] sm:$0xff] (!%p138_p2) }
   0x6   : > { %141 = sbr.rel (%p138_p2) target bundleno = 318 (0x13e), region = 32  ;;  %v273_v2 = vpack.c.bf16 (!%p138_p2), %v1204_v0, %v1204_v0  ;;  %v1514_v3 = vpack.c.bf16 (!%p138_p2), %v1223_v1, %v1223_v1  ;;  %v216_v4 = vld [vmem:[%s1782_s1] sm:$0xff] (!%p138_p2)  ;;  %v1228_v5 = vld [vmem:[%s1782_s1 + $0x28] sm:$0xff] (!%p138_p2)  ;;  %v1213_v11 = vld [vmem:[%s1782_s1 + $0x10] sm:$0xff] (!%p138_p2)  ;;  %vm274_vm2 = vcmask (!%p138_p2), 64512   ;;  %v1565_v25 = vpack.c.bf16 (!%p138_p2), %v1233_v10, %v1233_v10 }
   0x7   : > { %v217_v6 = vpack.c.bf16 (!%p138_p2), %v216_v4, %v216_v4  ;;  %v770_v7 = vpack.c.bf16 (!%p138_p2), %v1228_v5, %v1228_v5  ;;  %v1567_v26 = vpack.c.bf16 (!%p138_p2), %v1213_v11, %v1213_v11  ;;  %vm436_vm3 = vcmask (!%p138_p2), 1045504  }
   0x8   : > { %1453 = vmatprep.subr.msk.bf16.mxu1 (!%p138_p2), %vm287_vm0, %v273_v2  ;;  %1457 = vmatprep.subr.msk.bf16.mxu0 (!%p138_p2), %vm287_vm0, %v1514_v3  ;;  %v289_v8 = vsel (!%p138_p2), %vm287_vm0, %v273_v2, 0  ;;  %v1530_v9 = vsel (!%p138_p2), %vm287_vm0, %v1514_v3, 0 }
   0x9   : > { %1298 = vmatpush3.bf16.msra.mxu1 (!%p138_p2), %v289_v8  ;;  %1338 = vmatpush3.bf16.msra.mxu0 (!%p138_p2), %v1530_v9  ;;  %v1553_v15 = vsel (!%p138_p2), %vm287_vm0, %v217_v6, 0  ;;  %v784_v31 = vsel (!%p138_p2), %vm287_vm0, %v770_v7, 0 }
   0xa   : > { %1454 = vmatprep.subr.msk.bf16.mxu1 (!%p138_p2), %vm287_vm0, %v217_v6  ;;  %1459 = vmatprep.subr.msk.bf16.mxu0 (!%p138_p2), %vm287_vm0, %v770_v7 }
   0xd   : > { %s1786_s13 = smov (!%p161_p3, %s1196_s13), 1 }
   0xe   : > { %s1463_s22 = smul.u32 160, %s1786_s13  ;;  %s1251_s9 = sshll.u32 %s1786_s13, 6 }
   0xf   : > { %s1760_s16 = scalar_lea.vmem %s1784_s3, %s1251_s9 }
  0x10   : > { %s1539_s25 = scalar_lea.vmem %s1781_s0, %s1463_s22 }
  0x11   : > { %v172_v12 = vld [vmem:[%s1539_s25] sm:$0xff]  ;;  %v1549_v13 = vld [vmem:[%s1539_s25 + $0x8] sm:$0x3]  ;;  %v174_v14 = vld [vmem:[%s1539_s25 + $0x10] sm:$0xff] }
  0x12   : > { %v175_v16 = vld [vmem:[%s1539_s25 + $0x18] sm:$0x3]  ;;  %v1556_v17 = vmax.f32 %v172_v12, 0.0  ;;  %v193_v18 = vmax.f32 %v1549_v13, 0.0  ;;  %v1559_v19 = vmax.f32 %v174_v14, 0.0  ;;  %v176_v20 = vld [vmem:[%s1539_s25 + $0x20] sm:$0xff] }
  0x13   : > { %v195_v21 = vmax.f32 %v175_v16, 0.0  ;;  %v177_v22 = vld [vmem:[%s1539_s25 + $0x28] sm:$0x3]  ;;  %v178_v23 = vld [vmem:[%s1539_s25 + $0x30] sm:$0xff]  ;;  %v179_v24 = vld [vmem:[%s1539_s25 + $0x38] sm:$0x3] }
  0x14   : > { %v235_v27 = vrot.slane %v1556_v17, 1  ;;  %v236_v28 = vrot.slane %v193_v18, 1  ;;  %v238_v29 = vrot.slane %v1559_v19, 1  ;;  %v180_v30 = vld [vmem:[%s1539_s25 + $0x40] sm:$0xff]  ;;  %v181_v34 = vld [vmem:[%s1539_s25 + $0x48] sm:$0x3] }
  0x15   : > { %v239_v32 = vrot.slane %v195_v21, 1  ;;  %v441_v33 = vrot.slane %v195_v21, 2  ;;  %v1576_v35 = vmax.f32 %v176_v20, 0.0  ;;  %v197_v36 = vmax.f32 %v177_v22, 0.0  ;;  %v182_v45 = vld [vmem:[%s1539_s25 + $0x50] sm:$0xff]  ;;  %v184_v51 = vld [vmem:[%s1539_s25 + $0x60] sm:$0xff] }
  0x16   : > { %v237_v37 = vsel %vm234_vm1, %v235_v27, %v236_v28  ;;  %v1579_v38 = vmax.f32 %v178_v23, 0.0  ;;  %v199_v39 = vmax.f32 %v179_v24, 0.0  ;;  %v1581_v40 = vmax.f32 %v180_v30, 0.0  ;;  %v183_v50 = vld [vmem:[%s1539_s25 + $0x58] sm:$0x3]  ;;  %v186_v57 = vld [vmem:[%s1539_s25 + $0x70] sm:$0xff] }
  0x17   : > { %v240_v41 = vsel %vm234_vm1, %v238_v29, %v239_v32  ;;  %v201_v42 = vmax.f32 %v181_v34, 0.0  ;;  %v241_v43 = vrot.slane %v1576_v35, 1  ;;  %v242_v44 = vrot.slane %v197_v36, 1  ;;  %v185_v56 = vld [vmem:[%s1539_s25 + $0x68] sm:$0x3]  ;;  %v188_v32 = vld [vmem:[%s1539_s25 + $0x80] sm:$0xff] }
  0x18   : > { %v267_v46 = vpack.c.bf16 %v240_v41, %v237_v37  ;;  %v244_v47 = vrot.slane %v1579_v38, 1  ;;  %v245_v48 = vrot.slane %v199_v39, 1  ;;  %v247_v49 = vrot.slane %v1581_v40, 1  ;;  %v187_v62 = vld [vmem:[%s1539_s25 + $0x78] sm:$0x3] }
  0x19   : > { %v243_v52 = vsel %vm234_vm1, %v241_v43, %v242_v44  ;;  %v248_v53 = vrot.slane %v201_v42, 1  ;;  %v444_v54 = vrot.slane %v197_v36, 2  ;;  %v447_v55 = vrot.slane %v199_v39, 2 }
  0x1a   : > { %1299 = vmatprep.mubr.msk.bf16.mxu1 %vm274_vm2, %v267_v46  ;;  %v246_v58 = vsel %vm234_vm1, %v244_v47, %v245_v48  ;;  %v450_v59 = vrot.slane %v201_v42, 2  ;;  %v665_v60 = vpack.c.bf16 %v243_v52, %v240_v41  ;;  %v1595_v61 = vmax.f32 %v182_v45, 0.0 }
  0x1b   : > { %v249_v63 = vsel %vm234_vm1, %v247_v49, %v248_v53  ;;  %v1599_v0 = vpack.c.bf16 %v246_v58, %v243_v52  ;;  %v203_v1 = vmax.f32 %v183_v50, 0.0  ;;  %v1601_v2 = vmax.f32 %v184_v51, 0.0  ;;  %v1238_v49 = vld [vmem:[%s1782_s1 + $0x38] sm:$0xff] }
  0x1c   : > { %v666_v4 = vpack.c.bf16 %v249_v63, %v246_v58  ;;  %1339 = vmatprep.mubr.msk.bf16.mxu0 %vm274_vm2, %v665_v60  ;;  %v250_v5 = vrot.slane %v1595_v61, 1  ;;  %v205_v6 = vmax.f32 %v185_v56, 0.0  ;;  %v1605_v7 = vmax.f32 %v186_v57, 0.0  ;;  %v1218_v56 = vld [vmem:[%s1782_s1 + $0x18] sm:$0xff] }
  0x1d   : > { %1300 = vmatmul.mubr.msk.bf16.vlgmr.msra.gmra.mrb[0].mxu1 %vm274_vm2, %v1599_v0  ;;  %v251_v8 = vrot.slane %v203_v1, 1  ;;  %v207_v10 = vmax.f32 %v187_v62, 0.0  ;;  %v253_v11 = vrot.slane %v1601_v2, 1  ;;  %v440_v12 = vrot.slane %v1559_v19, 2 }
  0x1e   : > { %1308 = vmatpush3.bf16.msra.mxu1 %v1553_v15  ;;  %1340 = vmatmul.mubr.msk.bf16.vlgmr.msra.gmra.mrb[0].mxu0 %vm274_vm2, %v666_v4  ;;  %v254_v14 = vrot.slane %v205_v6, 1  ;;  %v256_v16 = vrot.slane %v1605_v7, 1  ;;  %v443_v20 = vrot.slane %v1576_v35, 2  ;;  %v446_v21 = vrot.slane %v1579_v38, 2 }
  0x1f   : > { %1348 = vmatpush3.bf16.msra.mxu0 %v784_v31  ;;  %v1617_v22 = vsel %vm234_vm1, %v250_v5, %v251_v8  ;;  %v257_v23 = vrot.slane %v207_v10, 1  ;;  %v442_v24 = vsel %vm436_vm3, %v440_v12, %v441_v33  ;;  %v449_v15 = vrot.slane %v1581_v40, 2  ;;  %1455 = vmatprep.subr.msk.bf16.mxu1 %vm287_vm0, %v1567_v26  ;;  %v1637_v33 = vld [vmem:[%s1539_s25 + $0x88] sm:$0x3]  ;;  %v190_v8 = vld [vmem:[%s1539_s25 + $0x90] sm:$0xff] }
  0x20   : > { %v1624_v27 = vpack.c.bf16 %v1617_v22, %v249_v63  ;;  %v1627_v28 = vsel %vm234_vm1, %v253_v11, %v254_v14  ;;  %v445_v29 = vsel %vm436_vm3, %v443_v20, %v444_v54  ;;  %1460 = vmatprep.subr.msk.bf16.mxu0 %vm287_vm0, %v1565_v25  ;;  %v448_v36 = vsel %vm436_vm3, %v446_v21, %v447_v55 }
  0x21   : > { %v1633_v30 = vsel %vm234_vm1, %v256_v16, %v257_v23  ;;  %v764_v31 = vpack.c.bf16 %v445_v29, %v442_v24  ;;  %v451_v37 = vsel %vm436_vm3, %v449_v15, %v450_v59  ;;  %v212_v39 = vpack.c.bf16 %v1559_v19, %v1556_v17  ;;  %v191_v23 = vld [vmem:[%s1539_s25 + $0x98] sm:$0x3] }
  0x22   : > { %1303 = vmatprep.mubr.msk.bf16.mxu1 %vm274_vm2, %v1624_v27  ;;  %v1643_v34 = vpack.c.bf16 %v1633_v30, %v1627_v28  ;;  %v452_v41 = vrot.slane %v1595_v61, 2  ;;  %v453_v42 = vrot.slane %v203_v1, 2  ;;  %v455_v43 = vrot.slane %v1601_v2, 2 }
  0x23   : > { %1349 = vmatprep.mubr.msk.bf16.mxu0 %vm274_vm2, %v764_v31  ;;  %v456_v44 = vrot.slane %v205_v6, 2  ;;  %v1652_v45 = vmax.f32 %v188_v32, 0.0  ;;  %v209_v46 = vmax.f32 %v1637_v33, 0.0  ;;  %v765_v50 = vpack.c.bf16 %v451_v37, %v448_v36 }
  0x24   : > { %v454_v47 = vsel %vm436_vm3, %v452_v41, %v453_v42  ;;  %v458_v51 = vrot.slane %v1605_v7, 2  ;;  %v459_v53 = vrot.slane %v207_v10, 2  ;;  %v867_v57 = vsel %vm287_vm0, %v1565_v25, 0 }
  0x25   : > { %1304 = vmatmul.mubr.msk.bf16.gmra.mrb[4].mxu1 %vm274_vm2, %v1643_v34  ;;  %v457_v48 = vsel %vm436_vm3, %v455_v43, %v456_v44  ;;  %v760_v54 = vrot.slane %v1652_v45, 2  ;;  %v761_v55 = vrot.slane %v209_v46, 2  ;;  %v951_v58 = vpack.c.bf16 %v1238_v49, %v1238_v49  ;;  %v1248_v43 = vld [vmem:[%s1783_s2] ss:$0 sm:$0xff] }
  0x26   : > { %1309 = vmatprep.mubr.msk.bf16.mxu1 %vm274_vm2, %v212_v39  ;;  %v766_v52 = vpack.c.bf16 %v457_v48, %v454_v47  ;;  %v213_v59 = vpack.c.bf16 %v1579_v38, %v1576_v35  ;;  %v489_v60 = vsel %vm287_vm0, %v1567_v26, 0  ;;  %v214_v62 = vpack.c.bf16 %v1595_v61, %v1581_v40 }
  0x27   : > { %v570_v63 = vpack.c.bf16 %v1218_v56, %v1218_v56  ;;  %v438_v1 = vrot.slane %v193_v18, 2  ;;  %v460_v25 = vsel %vm436_vm3, %v458_v51, %v459_v53  ;;  %v1684_v4 = vsel %vm436_vm3, %v760_v54, %v761_v55 }
  0x28   : > { %v437_v5 = vrot.slane %v1556_v17, 2  ;;  %v767_v26 = vpack.c.bf16 %v1684_v4, %v460_v25  ;;  %v215_v18 = vpack.c.bf16 %v1605_v7, %v1601_v2  ;;  %v1243_v17 = vld [vmem:[%s1782_s1 + $0x40] sm:$0xff]  ;;  %v956_v10 = vsel %vm287_vm0, %v951_v58, 0 }
  0x29   : > { %v1038_v11 = vpack.c.bf16 %v1243_v17, %v1243_v17  ;;  %v470_v12 = vpack.c.bf16 %v448_v36, %v445_v29  ;;  %v210_v14 = vmax.f32 %v190_v8, 0.0  ;;  %v471_v16 = vpack.c.bf16 %v454_v47, %v451_v37 }
  0x2a   : > { %1350 = vmatmul.mubr.msk.bf16.vlgmr.msra.gmra.mrb[0].mxu0 %vm274_vm2, %v765_v50  ;;  %v439_v13 = vsel %vm436_vm3, %v437_v5, %v438_v1  ;;  %v584_v20 = vsel %vm287_vm0, %v570_v63, 0  ;;  %v564_v15 = vpack.c.bf16 %v1576_v35, %v1559_v19  ;;  %v211_v29 = vmax.f32 %v191_v23, 0.0 }
  0x2b   : > { %1358 = vmatpush3.bf16.msra.mxu0 %v867_v57  ;;  %1353 = vmatprep.mubr.msk.bf16.mxu0 %vm274_vm2, %v766_v52  ;;  %v469_v6 = vpack.c.bf16 %v442_v24, %v439_v13  ;;  %v859_v21 = vpack.c.bf16 %v210_v14, %v1652_v45  ;;  %v472_v24 = vpack.c.bf16 %v460_v25, %v457_v48  ;;  %v661_v31 = vrot.slane %v1652_v45, 1 }
  0x2c   : > { %1461 = vmatprep.subr.msk.bf16.mxu0 %vm287_vm0, %v951_v58  ;;  %v944_v32 = vrot.slane %v210_v14, 1  ;;  %v945_v36 = vrot.slane %v211_v29, 1  ;;  %v1043_v37 = vsel %vm287_vm0, %v1038_v11, 0  ;;  %v565_v19 = vpack.c.bf16 %v1581_v40, %v1579_v38 }
  0x2d   : > { %1310 = vmatmul.mubr.msk.bf16.vlgmr.msra.gmra.mrb[0].mxu1 %vm274_vm2, %v213_v59  ;;  %v566_v35 = vpack.c.bf16 %v1601_v2, %v1595_v61  ;;  %v567_v38 = vpack.c.bf16 %v1652_v45, %v1605_v7  ;;  %v667_v40 = vpack.c.bf16 %v1627_v28, %v1617_v22  ;;  %v1031_v61 = vrot.slane %v210_v14, 2 }
  0x2e   : > { %1318 = vmatpush3.bf16.msra.mxu1 %v489_v60  ;;  %1313 = vmatprep.mubr.msk.bf16.mxu1 %vm274_vm2, %v214_v62  ;;  %v946_v33 = vsel %vm234_vm1, %v944_v32, %v945_v36 }
  0x2f   : > { %1456 = vmatprep.subr.msk.bf16.mxu1 %vm287_vm0, %v570_v63 }
  0x32   : > { %1354 = vmatmul.mubr.msk.bf16.gmra.mrb[4].mxu0 %vm274_vm2, %v767_v26 }
  0x33   : > { %1359 = vmatprep.mubr.msk.bf16.mxu0 %vm274_vm2, %v213_v59 }
  0x35   : > { %1314 = vmatmul.mubr.msk.bf16.gmra.mrb[4].mxu1 %vm274_vm2, %v215_v18 }
  0x36   : > { %1319 = vmatprep.mubr.msk.bf16.mxu1 %vm274_vm2, %v469_v6 }
  0x3a   : > { %1360 = vmatmul.mubr.msk.bf16.vlgmr.msra.gmra.mrb[0].mxu0 %vm274_vm2, %v214_v62 }
  0x3b   : > { %1368 = vmatpush3.bf16.msra.mxu0 %v956_v10  ;;  %1363 = vmatprep.mubr.msk.bf16.mxu0 %vm274_vm2, %v215_v18 }
  0x3c   : > { %1462 = vmatprep.subr.msk.bf16.mxu0 %vm287_vm0, %v1038_v11 }
  0x3d   : > { %1320 = vmatmul.mubr.msk.bf16.vlgmr.msra.gmra.mrb[0].mxu1 %vm274_vm2, %v470_v12 }
  0x3e   : > { %1328 = vmatpush3.bf16.msra.mxu1 %v584_v20  ;;  %1323 = vmatprep.mubr.msk.bf16.mxu1 %vm274_vm2, %v471_v16 }
  0x3f   : > { %1458 = vmatprep.subr.msk.bf16.mxu1 %vm287_vm0, %v1514_v3  ;;  %v662_v3 = vrot.slane %v209_v46, 1 }
  0x42   : > { %1364 = vmatmul.mubr.msk.bf16.gmra.mrb[4].mxu0 %vm274_vm2, %v859_v21 }
  0x43   : > { %1369 = vmatprep.mubr.msk.bf16.mxu0 %vm274_vm2, %v1599_v0  ;;  %v663_v0 = vsel %vm234_vm1, %v661_v31, %v662_v3 }
  0x44   : > { %v948_v39 = vpack.c.bf16 %v946_v33, %v663_v0  ;;  %v668_v7 = vpack.c.bf16 %v663_v0, %v1633_v30 }
  0x45   : > { %1324 = vmatmul.mubr.msk.bf16.gmra.mrb[4].mxu1 %vm274_vm2, %v472_v24 }
  0x46   : > { %1329 = vmatprep.mubr.msk.bf16.mxu1 %vm274_vm2, %v564_v15 }
  0x4a   : > { %1370 = vmatmul.mubr.msk.bf16.vlgmr.msra.gmra.mrb[0].mxu0 %vm274_vm2, %v1624_v27 }
  0x4b   : > { %1378 = vmatpush3.bf16.msra.mxu0 %v1043_v37  ;;  %1373 = vmatprep.mubr.msk.bf16.mxu0 %vm274_vm2, %v1643_v34 }
  0x4d   : > { %1330 = vmatmul.mubr.msk.bf16.vlgmr.msra.gmra.mrb[0].mxu1 %vm274_vm2, %v565_v19 }
  0x4e   : > { %1388 = vmatpush3.bf16.msra.mxu1 %v1530_v9  ;;  %1333 = vmatprep.mubr.msk.bf16.mxu1 %vm274_vm2, %v566_v35  ;;  %v1032_v9 = vrot.slane %v211_v29, 2 }
  0x50   : > { %v1033_v2 = vsel %vm436_vm3, %v1031_v61, %v1032_v9 }
  0x51   : > { %v1035_v27 = vpack.c.bf16 %v1033_v2, %v1684_v4 }
  0x52   : > { %1374 = vmatmul.mubr.msk.bf16.gmra.mrb[4].mxu0 %vm274_vm2, %v948_v39 }
  0x53   : > { %1379 = vmatprep.mubr.msk.bf16.mxu0 %vm274_vm2, %v470_v12 }
  0x55   : > { %1334 = vmatmul.mubr.msk.bf16.gmra.mrb[4].mxu1 %vm274_vm2, %v567_v38 }
  0x56   : > { %1343 = vmatprep.mubr.msk.bf16.mxu1 %vm274_vm2, %v667_v40 }
  0x5a   : > { %1380 = vmatmul.mubr.msk.bf16.vlgmr.msra.gmra.mrb[0].mxu0 %vm274_vm2, %v471_v16 }
  0x5b   : > { %1383 = vmatprep.mubr.msk.bf16.mxu0 %vm274_vm2, %v472_v24 }
  0x61   : > { %1344 = vmatmul.mubr.msk.bf16.vlgmr.msra.gmra.mrb[4].mxu1 %vm274_vm2, %v668_v7 }
  0x62   : > { %1384 = vmatmul.mubr.msk.bf16.gmra.mrb[4].mxu0 %vm274_vm2, %v1035_v27 }
 0x120   : > { %v1331_v22 = vpop.f32.mrb[0].mxu1 }
 0x121   : > { %v620_v28 = vpop.f32.mrb[1].mxu1 }
 0x122   : > { %v1332_v34 = vpop.f32.mrb[2].mxu1 }
 0x123   : > { %v623_v41 = vpop.f32.mrb[3].mxu1 }
 0x12d   : > { %v1381_v42 = vpop.f32.mrb[0].mxu0 }
 0x12e   : > { %v1389_v44 = vadd.f32 %v1381_v42, %v1331_v22  ;;  %v1079_v45 = vpop.f32.mrb[1].mxu0 }
 0x12f   : > { %v1390_v30 = vadd.f32 %v1079_v45, %v620_v28  ;;  %v1382_v46 = vpop.f32.mrb[2].mxu0 }
 0x130   : > { %v1127_v47 = vadd.f32 %v1389_v44, %v1248_v43  ;;  %v1391_v48 = vadd.f32 %v1382_v46, %v1332_v34  ;;  %v1082_v49 = vpop.f32.mrb[3].mxu0 }
 0x131   : > { %v1125_v50 = vadd.f32 %v1390_v30, %v1248_v43  ;;  %v1392_v51 = vadd.f32 %v1082_v49, %v623_v41 }
 0x132   : > { %1135 = vst.msk [vmem:[%s1760_s16 + $0x10] sm:$0xff] %vm274_vm2, %v1127_v47  ;;  %v1128_v52 = vadd.f32 %v1391_v48, %v1248_v43 }
 0x133   : > { %1133 = vst.msk [vmem:[%s1760_s16] sm:$0xff] %vm274_vm2, %v1125_v50  ;;  %v1126_v53 = vadd.f32 %v1392_v51, %v1248_v43 }
 0x134   : > { %1136 = vst.msk [vmem:[%s1760_s16 + $0x18] sm:$0xff] %vm274_vm2, %v1128_v52  ;;  %v1345_v54 = vpop.f32.mrb[4].mxu1 }
 0x135   : > { %1134 = vst.msk [vmem:[%s1760_s16 + $0x8] sm:$0xff] %vm274_vm2, %v1126_v53  ;;  %v1385_v55 = vpop.f32.mrb[4].mxu0  ;;  %v737_v56 = vpop.f32.mrb[5].mxu1 }
 0x136   : > { %v1393_v57 = vadd.f32 %v1385_v55, %v1345_v54  ;;  %v1095_v58 = vpop.f32.mrb[5].mxu0  ;;  %v1346_v59 = vpop.f32.mrb[6].mxu1 }
 0x137   : > { %v1394_v60 = vadd.f32 %v1095_v58, %v737_v56  ;;  %v1386_v62 = vpop.f32.mrb[6].mxu0  ;;  %v740_v63 = vpop.f32.mrb[7].mxu1 }
 0x138   : > { %v1131_v1 = vadd.f32 %v1393_v57, %v1248_v43  ;;  %v1395_v25 = vadd.f32 %v1386_v62, %v1346_v59  ;;  %v1098_v4 = vpop.f32.mrb[7].mxu0 }
 0x139   : > { %v1129_v5 = vadd.f32 %v1394_v60, %v1248_v43  ;;  %v1396_v26 = vadd.f32 %v1098_v4, %v740_v63 }
 0x13a   : > { %1139 = vst.msk [vmem:[%s1760_s16 + $0x30] sm:$0xff] %vm274_vm2, %v1131_v1  ;;  %v1132_v13 = vadd.f32 %v1395_v25, %v1248_v43 }
 0x13b   : > { %1137 = vst.msk [vmem:[%s1760_s16 + $0x20] sm:$0xff] %vm274_vm2, %v1129_v5  ;;  %v1130_v18 = vadd.f32 %v1396_v26, %v1248_v43 }
 0x13c   : > { %1140 = vst.msk [vmem:[%s1760_s16 + $0x38] sm:$0xff] %vm274_vm2, %v1132_v13 }
 0x13d   : > { %1138 = vst.msk [vmem:[%s1760_s16 + $0x28] sm:$0xff] %vm274_vm2, %v1130_v18 }
 0x13e PF: > { %s13_s12 = sadd.s32 1, %s1478_s12  }
 0x13f   : > { %p10_p4 = scmp.ge.s32.totalorder %s13_s12, 4  }
 0x141   :  { %12 = sbr.rel (!%p10_p4) target bundleno = 1 (0x1), region = 70 }

// kernel: dda_forward.15
= control target key start
LH: loop header
LB: loop body
LE: loop exit
PB: predicated region body
PF: predicated region fallthrough
CT: control target
= control target key end

     0   :  { %s6338_s14 = smov 0   ;;  %s7803_s0 = inlined_call_operand.vmem [shape: f32[2,14,14,2], index: 0, kind: input, shape index: {}]   ;;  %s7804_s1 = inlined_call_operand.vmem [shape: f32[49,2,1], index: 1, kind: input, shape index: {}]   ;;  %s7805_s2 = inlined_call_operand.<no memory space> [shape: f32[1,1], index: 2, kind: input, shape index: {}]   ;;  %s7806_s3 = inlined_call_operand.vmem [shape: f32[2,64,1], index: 3, kind: output, shape index: {}]  }
   0x1   :  { %v8_v0 = vstv %s7805_s2 }
   0x2   :  { %9 = vst [vmem:[#allocation2] sm:$0x1] %v8_v0 }
   0x3 LB: > { %s4871_s15 = sadd.s32 4294967295, %s6313_s14   ;;  %p4875_p0 = scmp.ge.s32.totalorder %s6313_s14, 1  ;;  %s6313_s14 = sphi %s6338_s14, %s15_s14  }
   0x4   : > { %p139_p1 = scmp.lt.s32.totalorder %s6313_s14, 3 }
   0x6   : > { %p140_p2 = pnand %p4875_p0, %p139_p1 }
   0x8   : > { %143 = sbr.rel (%p140_p2) target bundleno = 644 (0x284), region = 32 }
   0xf   : > { %v4879_v1 = vld [vmem:[%s7804_s1 + $0x2] sm:$0x3]  ;;  %vm277_vm0 = vcmask 1040384   ;;  %v4998_v2 = vld [vmem:[%s7804_s1 + $0x30] sm:$0x3]  ;;  %p163_p3 = scmp.lt.s32.totalorder %s4871_s15, 1 }
  0x10   : > { %v263_v3 = vpack.c.bf16 %v4879_v1, %v4879_v1  ;;  %v6352_v4 = vpack.c.bf16 %v4998_v2, %v4998_v2  ;;  %v206_v5 = vld [vmem:[%s7804_s1] sm:$0x3]  ;;  %v5003_v6 = vld [vmem:[%s7804_s1 + $0x32] sm:$0x3]  ;;  %v5008_v11 = vld [vmem:[%s7804_s1 + $0x34] sm:$0x3] }
  0x11   : > { %s7989_s15 = smov (!%p163_p3, %s4871_s15), 1  ;;  %v207_v7 = vpack.c.bf16 %v206_v5, %v206_v5  ;;  %v6362_v8 = vpack.c.bf16 %v5003_v6, %v5003_v6  ;;  %vm224_vm1 = vcmask 1046528   ;;  %vm264_vm2 = vcmask 15360   ;;  %v4888_v12 = vld [vmem:[%s7804_s1 + $0x4] sm:$0x3] }
  0x12   : > { %7871 = vst [vmem:[#allocation3_spill] sm:$0xff] %v6352_v4  ;;  %6248 = vmatprep.subr.msk.bf16.mxu1 %vm277_vm0, %v263_v3  ;;  %6272 = vmatprep.subr.msk.bf16.mxu0 %vm277_vm0, %v6352_v4  ;;  %v279_v9 = vsel %vm277_vm0, %v263_v3, 0  ;;  %v6370_v10 = vsel %vm277_vm0, %v6352_v4, 0  ;;  %s6298_s23 = smul.u32 224, %s7989_s15  ;;  %vm554_vm3 = vcmask 1044480   ;;  %v6408_v21 = vpack.c.bf16 %v5008_v11, %v5008_v11  ;;  %s5126_s16 = sshll.u32 %s7989_s15, 6 }
  0x13   : > { %7872 = vst [vmem:[#allocation4_spill] sm:$0xff] %v6370_v10  ;;  %5373 = vmatpush3.bf16.msra.mxu1 %v279_v9  ;;  %5613 = vmatpush3.bf16.msra.mxu0 %v6370_v10  ;;  %v359_v16 = vsel %vm277_vm0, %v207_v7, 0  ;;  %v6421_v27 = vpack.c.bf16 %v4888_v12, %v4888_v12  ;;  %vm682_vm4 = vcmask 1043456   ;;  %vm810_vm5 = vcmask 1042432   ;;  %s7782_s18 = scalar_lea.vmem %s7806_s3, %s5126_s16 }
  0x14   : > { %6249 = vmatprep.subr.msk.bf16.mxu1 %vm277_vm0, %v207_v7  ;;  %6274 = vmatprep.subr.msk.bf16.mxu0 %vm277_vm0, %v6362_v8  ;;  %s6383_s28 = scalar_lea.vmem %s7803_s0, %s6298_s23  ;;  %v2722_v7 = vsel %vm277_vm0, %v6362_v8, 0  ;;  %vm426_vm6 = vcmask 1045504   ;;  %vm938_vm7 = vcmask 1041408   ;;  %vm4807_vm8 = vcmask 7168  }
  0x15   : > { %v6389_v13 = vld [vmem:[%s6383_s28] sm:$0xff]  ;;  %v6392_v14 = vld [vmem:[%s6383_s28 + $0x8] sm:$0x3f]  ;;  %v6395_v15 = vld [vmem:[%s6383_s28 + $0x10] sm:$0xff] }
  0x16   : > { %v6399_v17 = vld [vmem:[%s6383_s28 + $0x18] sm:$0x3f]  ;;  %v6402_v18 = vld [vmem:[%s6383_s28 + $0x20] sm:$0xff]  ;;  %v6405_v19 = vld [vmem:[%s6383_s28 + $0x28] sm:$0x3f]  ;;  %v225_v20 = vrot.slane %v6389_v13, 1 }
  0x17   : > { %7873 = vst [vmem:[#allocation5_spill] sm:$0xff] %v6402_v18  ;;  %v6411_v22 = vld [vmem:[%s6383_s28 + $0x30] sm:$0xff]  ;;  %v6414_v23 = vld [vmem:[%s6383_s28 + $0x38] sm:$0x3f]  ;;  %v6417_v24 = vld [vmem:[%s6383_s28 + $0x40] sm:$0xff]  ;;  %v226_v25 = vrot.slane %v6392_v14, 1 }
  0x18   : > { %v228_v26 = vrot.slane %v6395_v15, 1  ;;  %v6426_v29 = vld [vmem:[%s6383_s28 + $0x48] sm:$0x3f]  ;;  %v229_v30 = vrot.slane %v6399_v17, 1  ;;  %v231_v31 = vrot.slane %v6402_v18, 1  ;;  %v232_v32 = vrot.slane %v6405_v19, 1 }
  0x19   : > { %v234_v33 = vrot.slane %v6411_v22, 1  ;;  %v227_v34 = vsel %vm224_vm1, %v225_v20, %v226_v25  ;;  %v235_v35 = vrot.slane %v6414_v23, 1  ;;  %v237_v36 = vrot.slane %v6417_v24, 1  ;;  %v6450_v46 = vld [vmem:[%s6383_s28 + $0x50] sm:$0xff]  ;;  %v6453_v47 = vld [vmem:[%s6383_s28 + $0x58] sm:$0x3f] }
  0x1a   : > { %v238_v37 = vrot.slane %v6426_v29, 1  ;;  %v6437_v38 = vsel %vm224_vm1, %v228_v26, %v229_v30  ;;  %v6440_v39 = vsel %vm224_vm1, %v231_v31, %v232_v32  ;;  %v558_v40 = vrot.slane %v6395_v15, 3  ;;  %v6456_v48 = vld [vmem:[%s6383_s28 + $0x60] sm:$0xff]  ;;  %v6464_v51 = vld [vmem:[%s6383_s28 + $0x68] sm:$0x3f]  ;;  %v6490_v2 = vld [vmem:[%s6383_s28 + $0x70] sm:$0xff] }
  0x1b   : > { %7874 = vst [vmem:[#allocation6_spill] sm:$0xff] %v6437_v38  ;;  %7875 = vst [vmem:[#allocation7_spill] sm:$0xff] %v6440_v39  ;;  %v559_v41 = vrot.slane %v6399_v17, 3  ;;  %v236_v42 = vsel %vm224_vm1, %v234_v33, %v235_v35  ;;  %v257_v44 = vpack.c.bf16 %v6437_v38, %v227_v34  ;;  %v561_v53 = vrot.slane %v6402_v18, 3  ;;  %v6503_v9 = vld [vmem:[%s6383_s28 + $0x78] sm:$0x3f] }
  0x1c   : > { %v239_v43 = vsel %vm224_vm1, %v237_v36, %v238_v37  ;;  %v6459_v49 = vpack.c.bf16 %v236_v42, %v6440_v39  ;;  %v562_v54 = vrot.slane %v6405_v19, 3  ;;  %v564_v55 = vrot.slane %v6411_v22, 3 }
  0x1d   : > { %v6461_v50 = vpack.c.bf16 %v239_v43, %v236_v42  ;;  %v6467_v52 = vsel %vm554_vm3, %v558_v40, %v559_v41  ;;  %5374 = vmatprep.mubr.msk.bf16.mxu1 %vm264_vm2, %v257_v44  ;;  %v565_v56 = vrot.slane %v6414_v23, 3  ;;  %v567_v57 = vrot.slane %v6417_v24, 3 }
  0x1e   : > { %7876 = vst [vmem:[#allocation8_spill] sm:$0xff] %v6459_v49  ;;  %7878 = vst [vmem:[#allocation10_spill] sm:$0xff] %v6467_v52  ;;  %v568_v58 = vrot.slane %v6426_v29, 3  ;;  %v570_v59 = vrot.slane %v6450_v46, 3  ;;  %v571_v60 = vrot.slane %v6453_v47, 3  ;;  %v573_v61 = vrot.slane %v6456_v48, 3  ;;  %5375 = vmatmul.mubr.msk.bf16.vlgmr.msra.gmra.mrb[0].mxu1 %vm264_vm2, %v6459_v49 }
  0x1f   : > { %7877 = vst [vmem:[#allocation9_spill] sm:$0xff] %v6461_v50  ;;  %v6482_v62 = vsel %vm554_vm3, %v561_v53, %v562_v54  ;;  %v6485_v63 = vsel %vm554_vm3, %v564_v55, %v565_v56  ;;  %v574_v0 = vrot.slane %v6464_v51, 3  ;;  %5383 = vmatpush3.bf16.msra.mxu1 %v359_v16  ;;  %v240_v1 = vrot.slane %v6450_v46, 1 }
  0x20   : > { %7879 = vst [vmem:[#allocation11_spill] sm:$0xff] %v6482_v62  ;;  %v6493_v3 = vsel %vm554_vm3, %v567_v57, %v568_v58  ;;  %v6496_v5 = vsel %vm554_vm3, %v570_v59, %v571_v60  ;;  %6250 = vmatprep.subr.msk.bf16.mxu1 %vm277_vm0, %v6421_v27  ;;  %v241_v16 = vrot.slane %v6453_v47, 1  ;;  %v202_v20 = vpack.c.bf16 %v6395_v15, %v6389_v13  ;;  %v6564_v57 = vld [vmem:[%s6383_s28 + $0x80] sm:$0xff]  ;;  %v6567_v58 = vld [vmem:[%s6383_s28 + $0x88] sm:$0x3f] }
  0x21   : > { %v6508_v11 = vsel %vm554_vm3, %v573_v61, %v574_v0  ;;  %v6512_v12 = vpack.c.bf16 %v6493_v3, %v6485_v63  ;;  %v243_v25 = vrot.slane %v6456_v48, 1  ;;  %v244_v26 = vrot.slane %v6464_v51, 1  ;;  %v5013_v0 = vld [vmem:[%s7804_s1 + $0x36] sm:$0x3] }
  0x22   : > { %v6519_v8 = vpack.c.bf16 %v6508_v11, %v6496_v5  ;;  %v246_v30 = vrot.slane %v6490_v2, 1  ;;  %v6527_v31 = vsel %vm224_vm1, %v240_v1, %v241_v16  ;;  %v247_v32 = vrot.slane %v6503_v9, 1 }
  0x23   : > { %7880 = vst [vmem:[#allocation12_spill] sm:$0xff] %v6512_v12  ;;  %5614 = vmatprep.mubr.msk.bf16.mxu0 %vm264_vm2, %v6512_v12  ;;  %7882 = vst [vmem:[#allocation14_spill] sm:$0xff] %v6527_v31  ;;  %v689_v33 = vrot.slane %v6402_v18, 4  ;;  %v690_v34 = vrot.slane %v6405_v19, 4  ;;  %v6535_v35 = vpack.c.bf16 %v6527_v31, %v239_v43  ;;  %v6538_v36 = vsel %vm224_vm1, %v243_v25, %v244_v26  ;;  %v6588_v25 = vld [vmem:[%s6383_s28 + $0x90] sm:$0xff] }
  0x24   : > { %7881 = vst [vmem:[#allocation13_spill] sm:$0xff] %v6519_v8  ;;  %5615 = vmatmul.mubr.msk.bf16.vlgmr.msra.gmra.mrb[0].mxu0 %vm264_vm2, %v6519_v8  ;;  %7884 = vst [vmem:[#allocation16_spill] sm:$0xff] %v6538_v36  ;;  %v692_v37 = vrot.slane %v6411_v22, 4  ;;  %v693_v40 = vrot.slane %v6414_v23, 4  ;;  %v6543_v41 = vsel %vm224_vm1, %v246_v30, %v247_v32  ;;  %v695_v44 = vrot.slane %v6417_v24, 4 }
  0x25   : > { %7883 = vst [vmem:[#allocation15_spill] sm:$0xff] %v6535_v35  ;;  %5623 = vmatpush3.bf16.msra.mxu0 %v2722_v7  ;;  %7885 = vst [vmem:[#allocation17_spill] sm:$0xff] %v6543_v41  ;;  %v6546_v42 = vsel %vm682_vm4, %v689_v33, %v690_v34  ;;  %v696_v43 = vrot.slane %v6426_v29, 4  ;;  %5378 = vmatprep.mubr.msk.bf16.mxu1 %vm264_vm2, %v6535_v35  ;;  %v6554_v53 = vpack.c.bf16 %v6543_v41, %v6538_v36  ;;  %v6591_v26 = vld [vmem:[%s6383_s28 + $0x98] sm:$0x3f] }
  0x26   : > { %v6557_v54 = vsel %vm682_vm4, %v692_v37, %v693_v40  ;;  %6275 = vmatprep.subr.msk.bf16.mxu0 %vm277_vm0, %v6408_v21  ;;  %v698_v55 = vrot.slane %v6450_v46, 4  ;;  %v699_v56 = vrot.slane %v6453_v47, 4  ;;  %v701_v60 = vrot.slane %v6456_v48, 4  ;;  %v6601_v37 = vld [vmem:[%s6383_s28 + $0xa0] sm:$0xff]  ;;  %v6604_v40 = vld [vmem:[%s6383_s28 + $0xa8] sm:$0x3f] }
  0x27   : > { %7886 = vst [vmem:[#allocation18_spill] sm:$0xff] %v6554_v53  ;;  %v6570_v59 = vsel %vm682_vm4, %v695_v44, %v696_v43  ;;  %v702_v61 = vrot.slane %v6464_v51, 4  ;;  %5379 = vmatmul.mubr.msk.bf16.gmra.mrb[4].mxu1 %vm264_vm2, %v6554_v53  ;;  %v704_v16 = vrot.slane %v6490_v2, 4  ;;  %v705_v32 = vrot.slane %v6503_v9, 4 }
  0x28   : > { %v6581_v1 = vpack.c.bf16 %v6570_v59, %v6557_v54  ;;  %v6584_v7 = vsel %vm682_vm4, %v698_v55, %v699_v56  ;;  %5384 = vmatprep.mubr.msk.bf16.mxu1 %vm264_vm2, %v202_v20  ;;  %v1460_v33 = vrot.slane %v6564_v57, 4  ;;  %v1461_v34 = vrot.slane %v6567_v58, 4 }
  0x29   : > { %v6594_v30 = vsel %vm682_vm4, %v701_v60, %v702_v61  ;;  %v2809_v44 = vsel %vm277_vm0, %v6408_v21, 0  ;;  %v6612_v43 = vpack.c.bf16 %v6411_v22, %v6402_v18  ;;  %v2891_v20 = vpack.c.bf16 %v5013_v0, %v5013_v0  ;;  %v4893_v21 = vld [vmem:[%s7804_s1 + $0x6] sm:$0x3] }
  0x2a   : > { %7887 = vst [vmem:[#allocation19_spill] sm:$0xff] %v6581_v1  ;;  %7888 = vst [vmem:[#allocation20_spill] sm:$0xff] %v6594_v30  ;;  %5624 = vmatprep.mubr.msk.bf16.mxu0 %vm264_vm2, %v6581_v1  ;;  %v6615_v55 = vsel %vm682_vm4, %v704_v16, %v705_v32  ;;  %v6618_v56 = vsel %vm682_vm4, %v1460_v33, %v1461_v34  ;;  %v2103_v60 = vrot.slane %v6588_v25, 4  ;;  %v2104_v61 = vrot.slane %v6591_v26, 4  ;;  %v5018_v33 = vld [vmem:[%s7804_s1 + $0x38] sm:$0x3] }
  0x2b   : > { %7889 = vst [vmem:[#allocation21_spill] sm:$0xff] %v6612_v43  ;;  %7890 = vst [vmem:[#allocation22_spill] sm:$0xff] %v6615_v55  ;;  %v6627_v6 = vpack.c.bf16 %v6594_v30, %v6584_v7  ;;  %v2710_v0 = vrot.slane %v6601_v37, 4  ;;  %v2711_v16 = vrot.slane %v6604_v40, 4  ;;  %v817_v32 = vrot.slane %v6402_v18, 5 }
  0x2c   : > { %v479_v34 = vsel %vm277_vm0, %v6421_v27, 0  ;;  %v818_v45 = vrot.slane %v6405_v19, 5  ;;  %v820_v28 = vrot.slane %v6411_v22, 5  ;;  %v821_v10 = vrot.slane %v6414_v23, 5 }
  0x2d   : > { %7891 = vst [vmem:[#allocation23_spill] sm:$0xff] %v6627_v6  ;;  %v6642_v4 = vpack.c.bf16 %v6618_v56, %v6615_v55  ;;  %v6646_v49 = vpack.c.bf16 %v6450_v46, %v6417_v24  ;;  %v823_v1 = vrot.slane %v6417_v24, 5  ;;  %v824_v8 = vrot.slane %v6426_v29, 5 }
  0x2e   : > { %v6651_v27 = vsel %vm682_vm4, %v2103_v60, %v2104_v61  ;;  %v6654_v12 = vsel %vm810_vm5, %v817_v32, %v818_v45  ;;  %v6656_v50 = vpack.c.bf16 %v4893_v21, %v4893_v21  ;;  %v6658_v38 = vpack.c.bf16 %v5018_v33, %v5018_v33 }
  0x2f   : > { %7892 = vst [vmem:[#allocation24_spill] sm:$0xff] %v6642_v4  ;;  %7893 = vst [vmem:[#allocation25_spill] sm:$0xff] %v6654_v12  ;;  %5385 = vmatmul.mubr.msk.bf16.vlgmr.msra.gmra.mrb[0].mxu1 %vm264_vm2, %v6612_v43  ;;  %v6665_v39 = vsel %vm682_vm4, %v2710_v0, %v2711_v16  ;;  %v6668_v53 = vsel %vm810_vm5, %v820_v28, %v821_v10  ;;  %v826_v60 = vrot.slane %v6450_v46, 5  ;;  %v427_v45 = vrot.slane %v6389_v13, 2 }
  0x30   : > { %5625 = vmatmul.mubr.msk.bf16.vlgmr.msra.gmra.mrb[0].mxu0 %vm264_vm2, %v6627_v6  ;;  %7894 = vst [vmem:[#allocation26_spill] sm:$0xff] %v6665_v39  ;;  %7895 = vst [vmem:[#allocation27_spill] sm:$0xff] %v6668_v53  ;;  %5393 = vmatpush3.bf16.msra.mxu1 %v479_v34  ;;  %v827_v61 = vrot.slane %v6453_v47, 5  ;;  %v829_v21 = vrot.slane %v6456_v48, 5  ;;  %v428_v32 = vrot.slane %v6392_v14, 2  ;;  %v430_v33 = vrot.slane %v6395_v15, 2 }
  0x31   : > { %5633 = vmatpush3.bf16.msra.mxu0 %v2809_v44  ;;  %5628 = vmatprep.mubr.msk.bf16.mxu0 %vm264_vm2, %v6642_v4  ;;  %v6681_v10 = vsel %vm810_vm5, %v823_v1, %v824_v8  ;;  %v830_v28 = vrot.slane %v6464_v51, 5  ;;  %v431_v44 = vrot.slane %v6399_v17, 2  ;;  %v433_v0 = vrot.slane %v6402_v18, 2 }
  0x32   : > { %5388 = vmatprep.mubr.msk.bf16.mxu1 %vm264_vm2, %v6646_v49  ;;  %7896 = vst [vmem:[#allocation28_spill] sm:$0xff] %v6681_v10  ;;  %6276 = vmatprep.subr.msk.bf16.mxu0 %vm277_vm0, %v2891_v20  ;;  %v429_v16 = vsel %vm426_vm6, %v427_v45, %v428_v32  ;;  %v434_v34 = vrot.slane %v6405_v19, 2  ;;  %v436_v43 = vrot.slane %v6411_v22, 2  ;;  %v437_v8 = vrot.slane %v6414_v23, 2 }
  0x33   : > { %6251 = vmatprep.subr.msk.bf16.mxu1 %vm277_vm0, %v6656_v50  ;;  %v6695_v1 = vpack.c.bf16 %v6665_v39, %v6651_v27  ;;  %v6699_v4 = vpack.c.bf16 %v6490_v2, %v6456_v48  ;;  %v6702_v6 = vsel %vm426_vm6, %v430_v33, %v431_v44  ;;  %v832_v45 = vrot.slane %v6490_v2, 5 }
  0x34   : > { %7899 = vst [vmem:[#allocation31_spill] sm:$0xff] %v6702_v6  ;;  %v6707_v32 = vpack.c.bf16 %v6681_v10, %v6668_v53  ;;  %v459_v35 = vpack.c.bf16 %v6702_v6, %v429_v16  ;;  %v833_v12 = vrot.slane %v6503_v9, 5  ;;  %v1559_v39 = vrot.slane %v6564_v57, 5 }
  0x35   : > { %7897 = vst [vmem:[#allocation29_spill] sm:$0xff] %v6695_v1  ;;  %7898 = vst [vmem:[#allocation30_spill] sm:$0xff] %v6699_v4  ;;  %v6713_v55 = vsel %vm810_vm5, %v826_v60, %v827_v61  ;;  %v6716_v30 = vsel %vm810_vm5, %v829_v21, %v830_v28  ;;  %v2896_v33 = vsel %vm277_vm0, %v2891_v20, 0  ;;  %v1560_v44 = vrot.slane %v6567_v58, 5 }
  0x36   : > { %7900 = vst [vmem:[#allocation32_spill] sm:$0xff] %v6707_v32  ;;  %7901 = vst [vmem:[#allocation33_spill] sm:$0xff] %v6713_v55  ;;  %v6721_v10 = vsel %vm426_vm6, %v433_v0, %v434_v34  ;;  %v438_v16 = vsel %vm426_vm6, %v436_v43, %v437_v8  ;;  %v2190_v53 = vrot.slane %v6588_v25, 5  ;;  %v439_v6 = vrot.slane %v6417_v24, 2 }
  0x37   : > { %7902 = vst [vmem:[#allocation34_spill] sm:$0xff] %v6716_v30  ;;  %5389 = vmatmul.mubr.msk.bf16.gmra.mrb[4].mxu1 %vm264_vm2, %v6699_v4  ;;  %v6731_v60 = vsel %vm810_vm5, %v832_v45, %v833_v12  ;;  %v2191_v20 = vrot.slane %v6591_v26, 5  ;;  %v440_v61 = vrot.slane %v6426_v29, 2  ;;  %v442_v21 = vrot.slane %v6450_v46, 2 }
  0x38   : > { %5629 = vmatmul.mubr.msk.bf16.gmra.mrb[4].mxu0 %vm264_vm2, %v6695_v1  ;;  %5394 = vmatprep.mubr.msk.bf16.mxu1 %vm264_vm2, %v459_v35  ;;  %v6740_v43 = vsel %vm810_vm5, %v1559_v39, %v1560_v44  ;;  %v2797_v28 = vrot.slane %v6601_v37, 5  ;;  %v2798_v0 = vrot.slane %v6604_v40, 5  ;;  %v443_v12 = vrot.slane %v6453_v47, 2  ;;  %v4898_v35 = vld [vmem:[%s7804_s1 + $0x8] sm:$0x3] }
  0x39   : > { %5634 = vmatprep.mubr.msk.bf16.mxu0 %vm264_vm2, %v6707_v32  ;;  %v441_v34 = vsel %vm426_vm6, %v439_v6, %v440_v61  ;;  %v445_v8 = vrot.slane %v6456_v48, 2  ;;  %v446_v45 = vrot.slane %v6464_v51, 2  ;;  %v448_v1 = vrot.slane %v6490_v2, 2 }
  0x3a   : > { %v6753_v39 = vsel %vm426_vm6, %v442_v21, %v443_v12  ;;  %v6755_v44 = vpack.c.bf16 %v441_v34, %v438_v16  ;;  %v449_v32 = vrot.slane %v6503_v9, 2  ;;  %v945_v4 = vrot.slane %v6402_v18, 6 }
  0x3b   : > { %v6761_v6 = vpack.c.bf16 %v6716_v30, %v6713_v55  ;;  %v6764_v61 = vpack.c.bf16 %v438_v16, %v6721_v10  ;;  %v946_v41 = vrot.slane %v6405_v19, 6  ;;  %v948_v36 = vrot.slane %v6411_v22, 6 }
  0x3c   : > { %7903 = vst [vmem:[#allocation35_spill] sm:$0xff] %v6755_v44  ;;  %v949_v21 = vrot.slane %v6414_v23, 6  ;;  %v951_v12 = vrot.slane %v6417_v24, 6  ;;  %v952_v44 = vrot.slane %v6426_v29, 6  ;;  %v721_v31 = vpack.c.bf16 %v4898_v35, %v4898_v35 }
  0x3d   : > { %7904 = vst [vmem:[#allocation36_spill] sm:$0xff] %v6761_v6  ;;  %7905 = vst [vmem:[#allocation37_spill] sm:$0xff] %v6764_v61  ;;  %v607_v18 = vsel %vm277_vm0, %v6656_v50, 0  ;;  %v6775_v30 = vpack.c.bf16 %v6740_v43, %v6731_v60  ;;  %v6778_v16 = vpack.c.bf16 %v6753_v39, %v441_v34  ;;  %v6781_v19 = vsel %vm938_vm7, %v945_v4, %v946_v41  ;;  %v5023_v34 = vld [vmem:[%s7804_s1 + $0x3a] sm:$0x3] }
  0x3e   : > { %v6784_v23 = vsel %vm810_vm5, %v2190_v53, %v2191_v20  ;;  %v6787_v55 = vsel %vm810_vm5, %v2797_v28, %v2798_v0  ;;  %v6790_v29 = vsel %vm426_vm6, %v445_v8, %v446_v45  ;;  %v6793_v50 = vsel %vm426_vm6, %v448_v1, %v449_v32 }
  0x3f   : > { %7906 = vst [vmem:[#allocation38_spill] sm:$0xff] %v6775_v30  ;;  %7907 = vst [vmem:[#allocation39_spill] sm:$0xff] %v6787_v55  ;;  %5395 = vmatmul.mubr.msk.bf16.vlgmr.msra.gmra.mrb[0].mxu1 %vm264_vm2, %v6764_v61  ;;  %v6800_v4 = vsel %vm938_vm7, %v948_v36, %v949_v21  ;;  %v6803_v41 = vsel %vm938_vm7, %v951_v12, %v952_v44  ;;  %v954_v53 = vrot.slane %v6450_v46, 6  ;;  %v955_v20 = vrot.slane %v6453_v47, 6 }
  0x40   : > { %5635 = vmatmul.mubr.msk.bf16.vlgmr.msra.gmra.mrb[0].mxu0 %vm264_vm2, %v6761_v6  ;;  %7908 = vst [vmem:[#allocation40_spill] sm:$0xff] %v6800_v4  ;;  %7909 = vst [vmem:[#allocation41_spill] sm:$0xff] %v6803_v41  ;;  %5403 = vmatpush3.bf16.msra.mxu1 %v607_v18  ;;  %v957_v1 = vrot.slane %v6456_v48, 6  ;;  %v958_v32 = vrot.slane %v6464_v51, 6  ;;  %v555_v28 = vrot.slane %v6389_v13, 3  ;;  %v556_v0 = vrot.slane %v6392_v14, 3 }
  0x41   : > { %5643 = vmatpush3.bf16.msra.mxu0 %v2896_v33  ;;  %5638 = vmatprep.mubr.msk.bf16.mxu0 %vm264_vm2, %v6775_v30  ;;  %v6821_v18 = vpack.c.bf16 %v6787_v55, %v6784_v23  ;;  %v6825_v51 = vpack.c.bf16 %v6793_v50, %v6790_v29  ;;  %v6829_v36 = vpack.c.bf16 %v6803_v41, %v6800_v4  ;;  %v960_v35 = vrot.slane %v6490_v2, 6 }
  0x42   : > { %5398 = vmatprep.mubr.msk.bf16.mxu1 %vm264_vm2, %v6778_v16  ;;  %6277 = vmatprep.subr.msk.bf16.mxu0 %vm277_vm0, %v6658_v38  ;;  %v557_v47 = vsel %vm554_vm3, %v555_v28, %v556_v0  ;;  %v6832_v33 = vsel %vm938_vm7, %v954_v53, %v955_v20  ;;  %v6838_v8 = vsel %vm938_vm7, %v957_v1, %v958_v32  ;;  %v961_v44 = vrot.slane %v6503_v9, 6 }
  0x43   : > { %6252 = vmatprep.subr.msk.bf16.mxu1 %vm277_vm0, %v721_v31  ;;  %7910 = vst [vmem:[#allocation42_spill] sm:$0xff] %v6821_v18  ;;  %7911 = vst [vmem:[#allocation43_spill] sm:$0xff] %v6825_v51  ;;  %v587_v45 = vpack.c.bf16 %v6467_v52, %v557_v47  ;;  %v1658_v21 = vrot.slane %v6564_v57, 6  ;;  %v1659_v12 = vrot.slane %v6567_v58, 6  ;;  %v6847_v53 = vpack.c.bf16 %v6485_v63, %v6482_v62 }
  0x44   : > { %7912 = vst [vmem:[#allocation44_spill] sm:$0xff] %v6829_v36  ;;  %7913 = vst [vmem:[#allocation45_spill] sm:$0xff] %v6832_v33  ;;  %v6849_v20 = vpack.c.bf16 %v5023_v34, %v5023_v34  ;;  %v6853_v1 = vpack.c.bf16 %v6496_v5, %v6493_v3  ;;  %v6861_v32 = vpack.c.bf16 %v6838_v8, %v6832_v33  ;;  %v2979_v63 = vsel %vm277_vm0, %v6658_v38, 0 }
  0x45   : > { %7914 = vst [vmem:[#allocation46_spill] sm:$0xff] %v6838_v8  ;;  %7915 = vst [vmem:[#allocation47_spill] sm:$0xff] %v6847_v53  ;;  %v735_v28 = vsel %vm277_vm0, %v721_v31, 0  ;;  %v6870_v3 = vsel %vm938_vm7, %v960_v35, %v961_v44  ;;  %v2277_v5 = vrot.slane %v6588_v25, 6  ;;  %v2278_v0 = vrot.slane %v6591_v26, 6 }
  0x46   : > { %v811_v47 = vrot.slane %v6389_v13, 5  ;;  %v6876_v34 = vsel %vm938_vm7, %v1658_v21, %v1659_v12  ;;  %v2884_v38 = vrot.slane %v6601_v37, 6  ;;  %v2885_v31 = vrot.slane %v6604_v40, 6  ;;  %v4903_v21 = vld [vmem:[%s7804_s1 + $0xa] sm:$0x3] }
  0x47   : > { %5399 = vmatmul.mubr.msk.bf16.gmra.mrb[4].mxu1 %vm264_vm2, %v6825_v51  ;;  %v812_v35 = vrot.slane %v6392_v14, 5  ;;  %v814_v44 = vrot.slane %v6395_v15, 5  ;;  %v815_v61 = vrot.slane %v6399_v17, 5  ;;  %v684_v30 = vrot.slane %v6392_v14, 4  ;;  %v7921_v51 = vld [vmem:[#allocation17_spill] sm:$0xff] }
  0x48   : > { %5639 = vmatmul.mubr.msk.bf16.gmra.mrb[4].mxu0 %vm264_vm2, %v6821_v18  ;;  %5404 = vmatprep.mubr.msk.bf16.mxu1 %vm264_vm2, %v587_v45  ;;  %v576_v18 = vrot.slane %v6490_v2, 3  ;;  %v577_v45 = vrot.slane %v6503_v9, 3  ;;  %v1163_v12 = vrot.slane %v6564_v57, 1  ;;  %v1164_v6 = vrot.slane %v6567_v58, 1 }
  0x49   : > { %5644 = vmatprep.mubr.msk.bf16.mxu0 %vm264_vm2, %v6829_v36  ;;  %v683_v36 = vrot.slane %v6389_v13, 4  ;;  %v686_v9 = vrot.slane %v6395_v15, 4  ;;  %v687_v52 = vrot.slane %v6399_v17, 4  ;;  %v6895_v62 = vsel %vm810_vm5, %v811_v47, %v812_v35 }
  0x4a   : > { %v6898_v55 = vsel %vm810_vm5, %v814_v44, %v815_v61  ;;  %v6902_v8 = vpack.c.bf16 %v6876_v34, %v6870_v3  ;;  %v6907_v33 = vsel %vm224_vm1, %v1163_v12, %v1164_v6  ;;  %v2449_v41 = vrot.slane %v6601_v37, 1 }
  0x4b   : > { %v6911_v4 = vsel %vm938_vm7, %v2277_v5, %v2278_v0  ;;  %v6914_v47 = vsel %vm938_vm7, %v2884_v38, %v2885_v31  ;;  %v849_v61 = vpack.c.bf16 %v4903_v21, %v4903_v21  ;;  %v2450_v35 = vrot.slane %v6604_v40, 1 }
  0x4c   : > { %v6922_v6 = vsel %vm554_vm3, %v576_v18, %v577_v45  ;;  %v939_v44 = vrot.slane %v6389_v13, 6  ;;  %v685_v5 = vsel %vm682_vm4, %v683_v36, %v684_v30  ;;  %v6927_v0 = vsel %vm682_vm4, %v686_v9, %v687_v52  ;;  %v7919_v45 = vld [vmem:[#allocation14_spill] sm:$0xff] }
  0x4d   : > { %v6930_v38 = vsel %vm224_vm1, %v2449_v41, %v2450_v35  ;;  %v940_v31 = vrot.slane %v6392_v14, 6  ;;  %v6937_v18 = vpack.c.bf16 %v6914_v47, %v6911_v4  ;;  %v942_v13 = vrot.slane %v6395_v15, 6 }
  0x4e   : > { %v943_v52 = vrot.slane %v6399_v17, 6  ;;  %v6945_v30 = vpack.c.bf16 %v6922_v6, %v6508_v11  ;;  %v1262_v41 = vrot.slane %v6564_v57, 2  ;;  %v1263_v36 = vrot.slane %v6567_v58, 2 }
  0x4f   : > { %5405 = vmatmul.mubr.msk.bf16.vlgmr.msra.gmra.mrb[0].mxu1 %vm264_vm2, %v6847_v53  ;;  %7916 = vst [vmem:[#allocation48_spill] sm:$0xff] %v6937_v18  ;;  %v6951_v14 = vsel %vm938_vm7, %v939_v44, %v940_v31  ;;  %v1929_v11 = vrot.slane %v6588_v25, 2  ;;  %v2536_v12 = vrot.slane %v6601_v37, 2  ;;  %v2537_v9 = vrot.slane %v6604_v40, 2 }
  0x50   : > { %5645 = vmatmul.mubr.msk.bf16.vlgmr.msra.gmra.mrb[0].mxu0 %vm264_vm2, %v6861_v32  ;;  %5413 = vmatpush3.bf16.msra.mxu1 %v735_v28  ;;  %v6957_v17 = vsel %vm938_vm7, %v942_v13, %v943_v52  ;;  %v1930_v28 = vrot.slane %v6591_v26, 2  ;;  %v1264_v21 = vsel %vm426_vm6, %v1262_v41, %v1263_v36  ;;  %v6981_v31 = vpack.c.bf16 %v6417_v24, %v6411_v22 }
  0x51   : > { %5653 = vmatpush3.bf16.msra.mxu0 %v2979_v63  ;;  %5648 = vmatprep.mubr.msk.bf16.mxu0 %vm264_vm2, %v6902_v8  ;;  %v715_v63 = vpack.c.bf16 %v6927_v0, %v685_v5  ;;  %v6973_v5 = vsel %vm426_vm6, %v2536_v12, %v2537_v9  ;;  %v1361_v13 = vrot.slane %v6564_v57, 3  ;;  %v1362_v52 = vrot.slane %v6567_v58, 3  ;;  %v5028_v58 = vld [vmem:[%s7804_s1 + $0x3c] sm:$0x3]  ;;  %v4908_v12 = vld [vmem:[%s7804_s1 + $0xc] sm:$0x3] }
  0x52   : > { %5408 = vmatprep.mubr.msk.bf16.mxu1 %vm264_vm2, %v6853_v1  ;;  %6278 = vmatprep.subr.msk.bf16.mxu0 %vm277_vm0, %v6849_v20  ;;  %v6967_v35 = vsel %vm426_vm6, %v1929_v11, %v1930_v28  ;;  %v2016_v41 = vrot.slane %v6588_v25, 3  ;;  %v2017_v36 = vrot.slane %v6591_v26, 3  ;;  %v2623_v11 = vrot.slane %v6601_v37, 3 }
  0x53   : > { %6253 = vmatprep.subr.msk.bf16.mxu1 %vm277_vm0, %v849_v61  ;;  %v6970_v44 = vpack.c.bf16 %v6967_v35, %v1264_v21  ;;  %v2624_v28 = vrot.slane %v6604_v40, 3  ;;  %v1363_v22 = vsel %vm554_vm3, %v1361_v13, %v1362_v52  ;;  %v6995_v24 = vpack.c.bf16 %v6456_v48, %v6450_v46 }
  0x54   : > { %v7008_v40 = vsel %vm554_vm3, %v2016_v41, %v2017_v36  ;;  %v7015_v46 = vpack.c.bf16 %v6564_v57, %v6490_v2  ;;  %v3068_v13 = vsel %vm277_vm0, %v6849_v20, 0  ;;  %v863_v52 = vsel %vm277_vm0, %v849_v61, 0  ;;  %v7036_v36 = vld [vmem:[%s6383_s28 + $0xb0] sm:$0xff]  ;;  %v7922_v61 = vld [vmem:[#allocation30_spill] sm:$0xff] }
  0x55   : > { %v7011_v9 = vsel %vm554_vm3, %v2623_v11, %v2624_v28  ;;  %v7018_v48 = vpack.c.bf16 %v7008_v40, %v1363_v22  ;;  %v7029_v41 = vpack.c.bf16 %v6588_v25, %v6564_v57  ;;  %v7033_v2 = vpack.c.bf16 %v6584_v7, %v6570_v59  ;;  %v7051_v57 = vld [vmem:[%s6383_s28 + $0xb8] sm:$0x3f]  ;;  %v7923_v59 = vld [vmem:[#allocation31_spill] sm:$0xff] }
  0x56   : > { %v3150_v11 = vpack.c.bf16 %v5028_v58, %v5028_v58  ;;  %v977_v28 = vpack.c.bf16 %v4908_v12, %v4908_v12  ;;  %v7044_v20 = vpack.c.bf16 %v6907_v33, %v7921_v51  ;;  %v3404_v58 = vrot.slane %v7036_v36, 5 }
  0x57   : > { %5409 = vmatmul.mubr.msk.bf16.gmra.mrb[4].mxu1 %vm264_vm2, %v6945_v30  ;;  %7918 = vst [vmem:[#allocation50_spill] sm:$0xff] %v7029_v41  ;;  %v3405_v51 = vrot.slane %v7051_v57, 5  ;;  %v1842_v12 = vrot.slane %v6588_v25, 1  ;;  %v3491_v7 = vrot.slane %v7036_v36, 6 }
  0x58   : > { %5649 = vmatmul.mubr.msk.bf16.gmra.mrb[4].mxu0 %vm264_vm2, %v6937_v18  ;;  %5414 = vmatprep.mubr.msk.bf16.mxu1 %vm264_vm2, %v715_v63  ;;  %v6999_v63 = vpack.c.bf16 %v6557_v54, %v6546_v42  ;;  %v7022_v54 = vpack.c.bf16 %v6651_v27, %v6618_v56  ;;  %v7920_v56 = vld [vmem:[#allocation16_spill] sm:$0xff] }
  0x59   : > { %5654 = vmatprep.mubr.msk.bf16.mxu0 %vm264_vm2, %v6646_v49  ;;  %v7040_v27 = vpack.c.bf16 %v7920_v56, %v7919_v45  ;;  %v7058_v45 = vpack.c.bf16 %v6784_v23, %v6740_v43  ;;  %v7068_v56 = vpack.c.bf16 %v6790_v29, %v6753_v39  ;;  %v1843_v43 = vrot.slane %v6591_v26, 1  ;;  %v7925_v29 = vld [vmem:[#allocation20_spill] sm:$0xff] }
  0x5a   : > { %7917 = vst [vmem:[#allocation49_spill] sm:$0xff] %v6999_v63  ;;  %v7077_v23 = vsel %vm810_vm5, %v3404_v58, %v3405_v51  ;;  %v7086_v39 = vpack.c.bf16 %v7036_v36, %v6601_v37  ;;  %v7094_v26 = vpack.c.bf16 %v1363_v22, %v6922_v6  ;;  %v7928_v22 = vld [vmem:[#allocation15_spill] sm:$0xff] }
  0x5b   : > { %v1844_v51 = vsel %vm224_vm1, %v1842_v12, %v1843_v43  ;;  %v4913_v12 = vld [vmem:[%s7804_s1 + $0xe] sm:$0x3]  ;;  %v3056_v43 = vrot.slane %v7036_v36, 1 }
  0x5c   : > { %7924 = vst [vmem:[#allocation14_spill] sm:$0xff] %v7086_v39  ;;  %v7113_v6 = vpack.c.bf16 %v6930_v38, %v1844_v51  ;;  %v7136_v58 = vpack.c.bf16 %v1844_v51, %v6907_v33  ;;  %v7936_v51 = vld [vmem:[#allocation34_spill] sm:$0xff] }
  0x5f   : > { %5415 = vmatmul.mubr.msk.bf16.vlgmr.msra.gmra.mrb[0].mxu1 %vm264_vm2, %v6999_v63  ;;  %v3492_v63 = vrot.slane %v7051_v57, 6 }
  0x60   : > { %5655 = vmatmul.mubr.msk.bf16.vlgmr.msra.gmra.mrb[0].mxu0 %vm264_vm2, %v7922_v61  ;;  %5423 = vmatpush3.bf16.msra.mxu1 %v863_v52  ;;  %v7081_v52 = vpack.c.bf16 %v6911_v4, %v6876_v34  ;;  %v7103_v34 = vpack.c.bf16 %v6601_v37, %v6588_v25  ;;  %v7929_v25 = vpack.c.bf16 %v6898_v55, %v6895_v62  ;;  %v7930_v37 = vld [vmem:[#allocation27_spill] sm:$0xff]  ;;  %v3155_v62 = vsel %vm277_vm0, %v3150_v11, 0 }
  0x61   : > { %5663 = vmatpush3.bf16.msra.mxu0 %v3068_v13  ;;  %5658 = vmatprep.mubr.msk.bf16.mxu0 %vm264_vm2, %v7029_v41  ;;  %v7071_v13 = vpack.c.bf16 %v1264_v21, %v6793_v50  ;;  %v7926_v50 = vld [vmem:[#allocation22_spill] sm:$0xff]  ;;  %v7099_v4 = vsel %vm938_vm7, %v3491_v7, %v3492_v63 }
  0x62   : > { %5418 = vmatprep.mubr.msk.bf16.mxu1 %vm264_vm2, %v7033_v2  ;;  %6279 = vmatprep.subr.msk.bf16.mxu0 %vm277_vm0, %v3150_v11  ;;  %v7090_v21 = vpack.c.bf16 %v7926_v50, %v7925_v29  ;;  %v7927_v29 = vld [vmem:[#allocation25_spill] sm:$0xff]  ;;  %v5033_v7 = vld [vmem:[%s7804_s1 + $0x3e] sm:$0x3]  ;;  %v3057_v50 = vrot.slane %v7051_v57, 1 }
  0x63   : > { %6254 = vmatprep.subr.msk.bf16.mxu1 %vm277_vm0, %v977_v28  ;;  %v7123_v63 = vpack.c.bf16 %v7930_v37, %v7927_v29  ;;  %v7932_v37 = vld [vmem:[#allocation28_spill] sm:$0xff]  ;;  %v3237_v53 = vpack.c.bf16 %v5033_v7, %v5033_v7  ;;  %v7934_v41 = vld [vmem:[#allocation18_spill] sm:$0xff] }
  0x64   : > { %v7147_v11 = vsel %vm224_vm1, %v3056_v43, %v3057_v50  ;;  %v7167_v50 = vpack.c.bf16 %v6731_v60, %v7936_v51  ;;  %v5038_v60 = vld [vmem:[%s7804_s1 + $0x40] sm:$0x3]  ;;  %v3143_v43 = vrot.slane %v7036_v36, 2  ;;  %v7940_v51 = vld [vmem:[#allocation45_spill] sm:$0xff] }
  0x65   : > { %7931 = vst [vmem:[#allocation16_spill] sm:$0xff] %v7123_v63 }
  0x67   : > { %5419 = vmatmul.mubr.msk.bf16.gmra.mrb[4].mxu1 %vm264_vm2, %v7090_v21 }
  0x68   : > { %5659 = vmatmul.mubr.msk.bf16.gmra.mrb[4].mxu0 %vm264_vm2, %v7086_v39  ;;  %5424 = vmatprep.mubr.msk.bf16.mxu1 %vm264_vm2, %v7929_v25  ;;  %v991_v25 = vsel %vm277_vm0, %v977_v28, 0  ;;  %v7933_v39 = vld [vmem:[#allocation33_spill] sm:$0xff]  ;;  %v7153_v28 = vpack.c.bf16 %v6973_v5, %v6967_v35  ;;  %v7937_v35 = vpack.c.bf16 %v6957_v17, %v6951_v14  ;;  %v3242_v14 = vsel %vm277_vm0, %v3237_v53, 0 }
  0x69   : > { %5664 = vmatprep.mubr.msk.bf16.mxu0 %vm264_vm2, %v7928_v22  ;;  %v7140_v18 = vpack.c.bf16 %v7933_v39, %v7932_v37  ;;  %v1072_v22 = vpack.c.bf16 %v4913_v12, %v4913_v12  ;;  %v7163_v39 = vpack.c.bf16 %v7147_v11, %v6930_v38  ;;  %v7938_v38 = vld [vmem:[#allocation40_spill] sm:$0xff]  ;;  %v7939_v37 = vld [vmem:[#allocation41_spill] sm:$0xff] }
  0x6a   : > { %v7181_v7 = vpack.c.bf16 %v7938_v38, %v6781_v19  ;;  %v4918_v12 = vld [vmem:[%s7804_s1 + $0x10] sm:$0x3]  ;;  %v3324_v38 = vpack.c.bf16 %v5038_v60, %v5038_v60  ;;  %v7942_v60 = vld [vmem:[#allocation46_spill] sm:$0xff] }
  0x6b   : > { %7935 = vst [vmem:[#allocation17_spill] sm:$0xff] %v7163_v39  ;;  %v1173_v33 = vpack.c.bf16 %v4918_v12, %v4918_v12  ;;  %v7220_v12 = vpack.c.bf16 %v6870_v3, %v7942_v60  ;;  %v4923_v3 = vld [vmem:[%s7804_s1 + $0x12] sm:$0x3] }
  0x6f   : > { %5425 = vmatmul.mubr.msk.bf16.vlgmr.msra.gmra.mrb[0].mxu1 %vm264_vm2, %v7123_v63 }
  0x70   : > { %5665 = vmatmul.mubr.msk.bf16.vlgmr.msra.gmra.mrb[0].mxu0 %vm264_vm2, %v7934_v41  ;;  %5433 = vmatpush3.bf16.msra.mxu1 %v991_v25  ;;  %v1086_v25 = vsel %vm277_vm0, %v1072_v22, 0 }
  0x71   : > { %5673 = vmatpush3.bf16.msra.mxu0 %v3155_v62  ;;  %5668 = vmatprep.mubr.msk.bf16.mxu0 %vm264_vm2, %v7136_v58  ;;  %v3144_v62 = vrot.slane %v7051_v57, 2 }
  0x72   : > { %5428 = vmatprep.mubr.msk.bf16.mxu1 %vm264_vm2, %v7140_v18  ;;  %6280 = vmatprep.subr.msk.bf16.mxu0 %vm277_vm0, %v3237_v53  ;;  %v7206_v53 = vpack.c.bf16 %v7011_v9, %v7008_v40  ;;  %v7943_v40 = vld [vmem:[#allocation5_spill] sm:$0xff] }
  0x73   : > { %6255 = vmatprep.subr.msk.bf16.mxu1 %vm277_vm0, %v1072_v22  ;;  %v7202_v63 = vsel %vm426_vm6, %v3143_v43, %v3144_v62  ;;  %v7944_v43 = vpack.c.bf16 %v7943_v40, %v6395_v15  ;;  %v3230_v62 = vrot.slane %v7036_v36, 3  ;;  %v1272_v15 = vpack.c.bf16 %v4923_v3, %v4923_v3  ;;  %v7946_v40 = vld [vmem:[#allocation6_spill] sm:$0xff] }
  0x74   : > { %v7216_v22 = vpack.c.bf16 %v7202_v63, %v6973_v5  ;;  %v5043_v5 = vld [vmem:[%s7804_s1 + $0x42] sm:$0x3]  ;;  %v3317_v3 = vrot.slane %v7036_v36, 4 }
  0x77   : > { %5429 = vmatmul.mubr.msk.bf16.gmra.mrb[4].mxu1 %vm264_vm2, %v7167_v50 }
  0x78   : > { %5669 = vmatmul.mubr.msk.bf16.gmra.mrb[4].mxu0 %vm264_vm2, %v7163_v39  ;;  %5434 = vmatprep.mubr.msk.bf16.mxu1 %vm264_vm2, %v7937_v35  ;;  %v7195_v35 = vpack.c.bf16 %v7940_v51, %v7939_v37  ;;  %v7941_v39 = vld [vmem:[#allocation43_spill] sm:$0xff]  ;;  %v1187_v37 = vsel %vm277_vm0, %v1173_v33, 0  ;;  %v3411_v51 = vpack.c.bf16 %v5043_v5, %v5043_v5 }
  0x79   : > { %5674 = vmatprep.mubr.msk.bf16.mxu0 %vm264_vm2, %v6778_v16  ;;  %v5048_v5 = vld [vmem:[%s7804_s1 + $0x44] sm:$0x3] }
  0x7f   : > { %5435 = vmatmul.mubr.msk.bf16.vlgmr.msra.gmra.mrb[0].mxu1 %vm264_vm2, %v7181_v7 }
  0x80   : > { %5675 = vmatmul.mubr.msk.bf16.vlgmr.msra.gmra.mrb[0].mxu0 %vm264_vm2, %v7941_v39  ;;  %5443 = vmatpush3.bf16.msra.mxu1 %v1086_v25  ;;  %v3329_v25 = vsel %vm277_vm0, %v3324_v38, 0 }
  0x81   : > { %5683 = vmatpush3.bf16.msra.mxu0 %v3242_v14  ;;  %5678 = vmatprep.mubr.msk.bf16.mxu0 %vm264_vm2, %v6970_v44  ;;  %v3231_v14 = vrot.slane %v7051_v57, 3 }
  0x82   : > { %5438 = vmatprep.mubr.msk.bf16.mxu1 %vm264_vm2, %v7195_v35  ;;  %6281 = vmatprep.subr.msk.bf16.mxu0 %vm277_vm0, %v3324_v38  ;;  %v7945_v38 = vld [vmem:[#allocation7_spill] sm:$0xff] }
  0x83   : > { %6256 = vmatprep.subr.msk.bf16.mxu1 %vm277_vm0, %v1173_v33  ;;  %v7247_v60 = vsel %vm554_vm3, %v3230_v62, %v3231_v14  ;;  %v3318_v62 = vrot.slane %v7051_v57, 4  ;;  %v3416_v14 = vsel %vm277_vm0, %v3411_v51, 0  ;;  %v7949_v57 = vld [vmem:[#allocation26_spill] sm:$0xff] }
  0x84   : > { %v7257_v33 = vpack.c.bf16 %v7247_v60, %v7011_v9  ;;  %v4928_v9 = vld [vmem:[%s7804_s1 + $0x14] sm:$0x3] }
  0x87   : > { %5439 = vmatmul.mubr.msk.bf16.gmra.mrb[4].mxu1 %vm264_vm2, %v7220_v12 }
  0x88   : > { %5679 = vmatmul.mubr.msk.bf16.gmra.mrb[4].mxu0 %vm264_vm2, %v7216_v22  ;;  %5444 = vmatprep.mubr.msk.bf16.mxu1 %vm264_vm2, %v7944_v43  ;;  %v7947_v43 = vpack.c.bf16 %v7945_v38, %v7946_v40  ;;  %v1371_v38 = vpack.c.bf16 %v4928_v9, %v4928_v9  ;;  %v7948_v40 = vld [vmem:[#allocation9_spill] sm:$0xff] }
  0x89   : > { %5684 = vmatprep.mubr.msk.bf16.mxu0 %vm264_vm2, %v6853_v1  ;;  %v4933_v9 = vld [vmem:[%s7804_s1 + $0x16] sm:$0x3] }
  0x8f   : > { %5445 = vmatmul.mubr.msk.bf16.vlgmr.msra.gmra.mrb[0].mxu1 %vm264_vm2, %v6981_v31 }
  0x90   : > { %5685 = vmatmul.mubr.msk.bf16.vlgmr.msra.gmra.mrb[0].mxu0 %vm264_vm2, %v6945_v30  ;;  %5453 = vmatpush3.bf16.msra.mxu1 %v1187_v37  ;;  %v3498_v37 = vpack.c.bf16 %v5048_v5, %v5048_v5  ;;  %v5053_v5 = vld [vmem:[%s7804_s1 + $0x46] sm:$0x3] }
  0x91   : > { %5693 = vmatpush3.bf16.msra.mxu0 %v3329_v25  ;;  %5688 = vmatprep.mubr.msk.bf16.mxu0 %vm264_vm2, %v7018_v48  ;;  %v1286_v25 = vsel %vm277_vm0, %v1272_v15, 0 }
  0x92   : > { %5448 = vmatprep.mubr.msk.bf16.mxu1 %vm264_vm2, %v6995_v24  ;;  %6282 = vmatprep.subr.msk.bf16.mxu0 %vm277_vm0, %v3411_v51 }
  0x93   : > { %6257 = vmatprep.subr.msk.bf16.mxu1 %vm277_vm0, %v1272_v15  ;;  %v7950_v15 = vpack.c.bf16 %v6721_v10, %v7923_v59  ;;  %v7951_v10 = vld [vmem:[#allocation35_spill] sm:$0xff] }
  0x94   : > { %v7952_v59 = vld [vmem:[#allocation39_spill] sm:$0xff] }
  0x97   : > { %5449 = vmatmul.mubr.msk.bf16.gmra.mrb[4].mxu1 %vm264_vm2, %v7015_v46 }
  0x98   : > { %5689 = vmatmul.mubr.msk.bf16.gmra.mrb[4].mxu0 %vm264_vm2, %v7257_v33  ;;  %5454 = vmatprep.mubr.msk.bf16.mxu1 %vm264_vm2, %v7947_v43  ;;  %v7284_v43 = vsel %vm682_vm4, %v3317_v3, %v3318_v62  ;;  %v3503_v3 = vsel %vm277_vm0, %v3498_v37, 0  ;;  %v1385_v62 = vsel %vm277_vm0, %v1371_v38, 0 }
  0x99   : > { %5694 = vmatprep.mubr.msk.bf16.mxu0 %vm264_vm2, %v7033_v2  ;;  %v7294_v51 = vpack.c.bf16 %v7284_v43, %v7949_v57  ;;  %v7955_v57 = vld [vmem:[#allocation10_spill] sm:$0xff] }
  0x9f   : > { %5455 = vmatmul.mubr.msk.bf16.vlgmr.msra.gmra.mrb[0].mxu1 %vm264_vm2, %v7948_v40 }
  0xa0   : > { %5695 = vmatmul.mubr.msk.bf16.vlgmr.msra.gmra.mrb[0].mxu0 %vm264_vm2, %v7090_v21  ;;  %5463 = vmatpush3.bf16.msra.mxu1 %v1286_v25  ;;  %v1470_v25 = vpack.c.bf16 %v4933_v9, %v4933_v9  ;;  %v4938_v9 = vld [vmem:[%s7804_s1 + $0x18] sm:$0x3] }
  0xa1   : > { %5703 = vmatpush3.bf16.msra.mxu0 %v3416_v14  ;;  %5698 = vmatprep.mubr.msk.bf16.mxu0 %vm264_vm2, %v7022_v54  ;;  %v3581_v14 = vpack.c.bf16 %v5053_v5, %v5053_v5  ;;  %v5058_v5 = vld [vmem:[%s7804_s1 + $0x48] sm:$0x3] }
  0xa2   : > { %5458 = vmatprep.mubr.msk.bf16.mxu1 %vm264_vm2, %v7040_v27  ;;  %6283 = vmatprep.subr.msk.bf16.mxu0 %vm277_vm0, %v3498_v37  ;;  %v7326_v37 = vpack.c.bf16 %v7077_v23, %v7952_v59  ;;  %v3670_v59 = vpack.c.bf16 %v5058_v5, %v5058_v5 }
  0xa3   : > { %6258 = vmatprep.subr.msk.bf16.mxu1 %vm277_vm0, %v1371_v38  ;;  %v7954_v38 = vld [vmem:[#allocation11_spill] sm:$0xff] }
  0xa4   : > { %7953 = vst [vmem:[#allocation30_spill] sm:$0xff] %v7326_v37  ;;  %v3675_v5 = vsel %vm277_vm0, %v3670_v59, 0 }
  0xa7   : > { %5459 = vmatmul.mubr.msk.bf16.gmra.mrb[4].mxu1 %vm264_vm2, %v7044_v20 }
  0xa8   : > { %5699 = vmatmul.mubr.msk.bf16.gmra.mrb[4].mxu0 %vm264_vm2, %v7294_v51  ;;  %5464 = vmatprep.mubr.msk.bf16.mxu1 %vm264_vm2, %v7950_v15  ;;  %v7956_v15 = vpack.c.bf16 %v7954_v38, %v7955_v57  ;;  %v7957_v38 = vld [vmem:[#allocation12_spill] sm:$0xff]  ;;  %v7958_v57 = vld [vmem:[#allocation13_spill] sm:$0xff] }
  0xa9   : > { %5704 = vmatprep.mubr.msk.bf16.mxu0 %vm264_vm2, %v7140_v18 }
  0xaf   : > { %5465 = vmatmul.mubr.msk.bf16.vlgmr.msra.gmra.mrb[0].mxu1 %vm264_vm2, %v7951_v10  ;;  %v7966_v10 = vld [vmem:[#allocation36_spill] sm:$0xff] }
  0xb0   : > { %5705 = vmatmul.mubr.msk.bf16.vlgmr.msra.gmra.mrb[0].mxu0 %vm264_vm2, %v7167_v50  ;;  %5473 = vmatpush3.bf16.msra.mxu1 %v1385_v62  ;;  %v1484_v62 = vsel %vm277_vm0, %v1470_v25, 0 }
  0xb1   : > { %5713 = vmatpush3.bf16.msra.mxu0 %v3503_v3  ;;  %5708 = vmatprep.mubr.msk.bf16.mxu0 %vm264_vm2, %v7058_v45  ;;  %v3586_v3 = vsel %vm277_vm0, %v3581_v14, 0 }
  0xb2   : > { %5468 = vmatprep.mubr.msk.bf16.mxu1 %vm264_vm2, %v7068_v56  ;;  %6284 = vmatprep.subr.msk.bf16.mxu0 %vm277_vm0, %v3581_v14  ;;  %v7358_v14 = vpack.c.bf16 %v7099_v4, %v6914_v47  ;;  %v4943_v47 = vld [vmem:[%s7804_s1 + $0x1a] sm:$0x3] }
  0xb3   : > { %6259 = vmatprep.subr.msk.bf16.mxu1 %vm277_vm0, %v1470_v25  ;;  %v7960_v25 = vpack.c.bf16 %v6546_v42, %v6927_v0  ;;  %v7961_v42 = vld [vmem:[#allocation19_spill] sm:$0xff] }
  0xb4   : > { %7959 = vst [vmem:[#allocation31_spill] sm:$0xff] %v7358_v14  ;;  %v7383_v0 = vld [vmem:[%s6383_s28 + $0xc0] sm:$0xff] }
  0xb7   : > { %5469 = vmatmul.mubr.msk.bf16.gmra.mrb[4].mxu1 %vm264_vm2, %v7071_v13 }
  0xb8   : > { %5709 = vmatmul.mubr.msk.bf16.gmra.mrb[4].mxu0 %vm264_vm2, %v7326_v37  ;;  %5474 = vmatprep.mubr.msk.bf16.mxu1 %vm264_vm2, %v7956_v15  ;;  %v1569_v37 = vpack.c.bf16 %v4938_v9, %v4938_v9  ;;  %v5063_v15 = vld [vmem:[%s7804_s1 + $0x4a] sm:$0x3] }
  0xb9   : > { %5714 = vmatprep.mubr.msk.bf16.mxu0 %vm264_vm2, %v7195_v35 }
  0xba   : > { %v1583_v9 = vsel %vm277_vm0, %v1569_v37, 0 }
  0xbf   : > { %5475 = vmatmul.mubr.msk.bf16.vlgmr.msra.gmra.mrb[0].mxu1 %vm264_vm2, %v7957_v38  ;;  %v7962_v38 = vld [vmem:[#allocation23_spill] sm:$0xff] }
  0xc0   : > { %5715 = vmatmul.mubr.msk.bf16.vlgmr.msra.gmra.mrb[0].mxu0 %vm264_vm2, %v7220_v12  ;;  %5483 = vmatpush3.bf16.msra.mxu1 %v1484_v62  ;;  %v1668_v62 = vpack.c.bf16 %v4943_v47, %v4943_v47  ;;  %v5068_v47 = vld [vmem:[%s7804_s1 + $0x4c] sm:$0x3] }
  0xc1   : > { %5723 = vmatpush3.bf16.msra.mxu0 %v3586_v3  ;;  %5718 = vmatprep.mubr.msk.bf16.mxu0 %vm264_vm2, %v7081_v52  ;;  %v3757_v3 = vpack.c.bf16 %v5063_v15, %v5063_v15  ;;  %v7403_v15 = vld [vmem:[%s6383_s28 + $0xc8] sm:$0x3f] }
  0xc2   : > { %5478 = vmatprep.mubr.msk.bf16.mxu1 %vm264_vm2, %v7958_v57  ;;  %6285 = vmatprep.subr.msk.bf16.mxu0 %vm277_vm0, %v3670_v59  ;;  %v7963_v59 = vld [vmem:[#allocation24_spill] sm:$0xff] }
  0xc3   : > { %6260 = vmatprep.subr.msk.bf16.mxu1 %vm277_vm0, %v1569_v37  ;;  %v3578_v37 = vpack.c.bf16 %v7383_v0, %v7036_v36  ;;  %v4948_v36 = vld [vmem:[%s7804_s1 + $0x1c] sm:$0x3] }
  0xc7   : > { %5479 = vmatmul.mubr.msk.bf16.gmra.mrb[4].mxu1 %vm264_vm2, %v7094_v26 }
  0xc8   : > { %5719 = vmatmul.mubr.msk.bf16.gmra.mrb[4].mxu0 %vm264_vm2, %v7358_v14  ;;  %5484 = vmatprep.mubr.msk.bf16.mxu1 %vm264_vm2, %v7960_v25  ;;  %v7964_v25 = vpack.c.bf16 %v7927_v29, %v6898_v55  ;;  %v1682_v55 = vsel %vm277_vm0, %v1668_v62, 0  ;;  %v3844_v29 = vpack.c.bf16 %v5068_v47, %v5068_v47  ;;  %v7968_v47 = vpack.c.bf16 %v6781_v19, %v6957_v17  ;;  %v7969_v17 = vld [vmem:[#allocation44_spill] sm:$0xff] }
  0xc9   : > { %5724 = vmatprep.mubr.msk.bf16.mxu0 %vm264_vm2, %v6995_v24 }
  0xcf   : > { %5485 = vmatmul.mubr.msk.bf16.vlgmr.msra.gmra.mrb[0].mxu1 %vm264_vm2, %v7961_v42  ;;  %v3762_v42 = vsel %vm277_vm0, %v3757_v3, 0 }
  0xd0   : > { %5725 = vmatmul.mubr.msk.bf16.vlgmr.msra.gmra.mrb[0].mxu0 %vm264_vm2, %v7015_v46  ;;  %5493 = vmatpush3.bf16.msra.mxu1 %v1583_v9  ;;  %v3664_v9 = vrot.slane %v7403_v15, 1 }
  0xd1   : > { %5733 = vmatpush3.bf16.msra.mxu0 %v3675_v5  ;;  %5728 = vmatprep.mubr.msk.bf16.mxu0 %vm264_vm2, %v7103_v34  ;;  %v3663_v5 = vrot.slane %v7383_v0, 1 }
  0xd2   : > { %5488 = vmatprep.mubr.msk.bf16.mxu1 %vm264_vm2, %v7962_v38  ;;  %6286 = vmatprep.subr.msk.bf16.mxu0 %vm277_vm0, %v3757_v3 }
  0xd3   : > { %6261 = vmatprep.subr.msk.bf16.mxu1 %vm277_vm0, %v1668_v62  ;;  %v7420_v14 = vsel %vm224_vm1, %v3663_v5, %v3664_v9  ;;  %v7967_v62 = vld [vmem:[#allocation38_spill] sm:$0xff]  ;;  %v3750_v5 = vrot.slane %v7383_v0, 2  ;;  %v3751_v9 = vrot.slane %v7403_v15, 2 }
  0xd4   : > { %v3667_v3 = vpack.c.bf16 %v7420_v14, %v7147_v11  ;;  %v4953_v11 = vld [vmem:[%s7804_s1 + $0x1e] sm:$0x3] }
  0xd5   : > { %v1849_v19 = vpack.c.bf16 %v4953_v11, %v4953_v11  ;;  %v3838_v11 = vrot.slane %v7403_v15, 3 }
  0xd7   : > { %5489 = vmatmul.mubr.msk.bf16.gmra.mrb[4].mxu1 %vm264_vm2, %v7963_v59 }
  0xd8   : > { %5729 = vmatmul.mubr.msk.bf16.gmra.mrb[4].mxu0 %vm264_vm2, %v3578_v37  ;;  %5494 = vmatprep.mubr.msk.bf16.mxu1 %vm264_vm2, %v7964_v25  ;;  %v1760_v37 = vpack.c.bf16 %v4948_v36, %v4948_v36  ;;  %v7965_v25 = vld [vmem:[#allocation32_spill] sm:$0xff] }
  0xd9   : > { %5734 = vmatprep.mubr.msk.bf16.mxu0 %vm264_vm2, %v7040_v27  ;;  %v5073_v36 = vld [vmem:[%s7804_s1 + $0x4e] sm:$0x3] }
  0xdf   : > { %5495 = vmatmul.mubr.msk.bf16.vlgmr.msra.gmra.mrb[0].mxu1 %vm264_vm2, %v7965_v25  ;;  %v3931_v25 = vpack.c.bf16 %v5073_v36, %v5073_v36  ;;  %v4958_v36 = vld [vmem:[%s7804_s1 + $0x20] sm:$0x3] }
  0xe0   : > { %5735 = vmatmul.mubr.msk.bf16.vlgmr.msra.gmra.mrb[0].mxu0 %vm264_vm2, %v7044_v20  ;;  %5503 = vmatpush3.bf16.msra.mxu1 %v1682_v55  ;;  %v1765_v55 = vsel %vm277_vm0, %v1760_v37, 0 }
  0xe1   : > { %5743 = vmatpush3.bf16.msra.mxu0 %v3762_v42  ;;  %5738 = vmatprep.mubr.msk.bf16.mxu0 %vm264_vm2, %v7113_v6  ;;  %v3849_v42 = vsel %vm277_vm0, %v3844_v29, 0 }
  0xe2   : > { %5498 = vmatprep.mubr.msk.bf16.mxu1 %vm264_vm2, %v7966_v10  ;;  %6287 = vmatprep.subr.msk.bf16.mxu0 %vm277_vm0, %v3844_v29 }
  0xe3   : > { %6262 = vmatprep.subr.msk.bf16.mxu1 %vm277_vm0, %v1760_v37  ;;  %v7970_v37 = vld [vmem:[#allocation21_spill] sm:$0xff] }
  0xe7   : > { %5499 = vmatmul.mubr.msk.bf16.gmra.mrb[4].mxu1 %vm264_vm2, %v7967_v62 }
  0xe8   : > { %5739 = vmatmul.mubr.msk.bf16.gmra.mrb[4].mxu0 %vm264_vm2, %v3667_v3  ;;  %5504 = vmatprep.mubr.msk.bf16.mxu1 %vm264_vm2, %v7968_v47  ;;  %v7454_v3 = vsel %vm426_vm6, %v3750_v5, %v3751_v9  ;;  %v5078_v47 = vld [vmem:[%s7804_s1 + $0x50] sm:$0x3]  ;;  %v3936_v5 = vsel %vm277_vm0, %v3931_v25, 0  ;;  %v1854_v9 = vsel %vm277_vm0, %v1849_v19, 0 }
  0xe9   : > { %5744 = vmatprep.mubr.msk.bf16.mxu0 %vm264_vm2, %v7068_v56  ;;  %v3754_v29 = vpack.c.bf16 %v7454_v3, %v7202_v63  ;;  %v3837_v63 = vrot.slane %v7383_v0, 3 }
  0xef   : > { %5505 = vmatmul.mubr.msk.bf16.vlgmr.msra.gmra.mrb[0].mxu1 %vm264_vm2, %v7969_v17  ;;  %v5083_v17 = vld [vmem:[%s7804_s1 + $0x52] sm:$0x3] }
  0xf0   : > { %5745 = vmatmul.mubr.msk.bf16.vlgmr.msra.gmra.mrb[0].mxu0 %vm264_vm2, %v7071_v13  ;;  %5513 = vmatpush3.bf16.msra.mxu1 %v1765_v55  ;;  %v7486_v55 = vsel %vm554_vm3, %v3837_v63, %v3838_v11  ;;  %v7973_v11 = vld [vmem:[#allocation15_spill] sm:$0xff] }
  0xf1   : > { %5753 = vmatpush3.bf16.msra.mxu0 %v3849_v42  ;;  %5748 = vmatprep.mubr.msk.bf16.mxu0 %vm264_vm2, %v7153_v28  ;;  %v1936_v42 = vpack.c.bf16 %v4958_v36, %v4958_v36 }
  0xf2   : > { %5508 = vmatprep.mubr.msk.bf16.mxu1 %vm264_vm2, %v6861_v32  ;;  %6288 = vmatprep.subr.msk.bf16.mxu0 %vm277_vm0, %v3931_v25  ;;  %v3841_v25 = vpack.c.bf16 %v7486_v55, %v7247_v60  ;;  %v3924_v60 = vrot.slane %v7383_v0, 4 }
  0xf3   : > { %6263 = vmatprep.subr.msk.bf16.mxu1 %vm277_vm0, %v1849_v19  ;;  %v7972_v19 = vld [vmem:[#allocation8_spill] sm:$0xff]  ;;  %v1941_v36 = vsel %vm277_vm0, %v1936_v42, 0 }
  0xf7   : > { %5509 = vmatmul.mubr.msk.bf16.gmra.mrb[4].mxu1 %vm264_vm2, %v6902_v8 }
  0xf8   : > { %5749 = vmatmul.mubr.msk.bf16.gmra.mrb[4].mxu0 %vm264_vm2, %v3754_v29  ;;  %5514 = vmatprep.mubr.msk.bf16.mxu1 %vm264_vm2, %v7970_v37  ;;  %v4963_v29 = vld [vmem:[%s7804_s1 + $0x22] sm:$0x3]  ;;  %v3925_v37 = vrot.slane %v7403_v15, 4 }
  0xf9   : > { %5754 = vmatprep.mubr.msk.bf16.mxu0 %vm264_vm2, %v7958_v57  ;;  %v4018_v57 = vpack.c.bf16 %v5078_v47, %v5078_v47  ;;  %v2023_v63 = vpack.c.bf16 %v4963_v29, %v4963_v29 }
  0xfb   : > { %v4023_v47 = vsel %vm277_vm0, %v4018_v57, 0  ;;  %v2028_v29 = vsel %vm277_vm0, %v2023_v63, 0 }
  0xff   : > { %5515 = vmatmul.mubr.msk.bf16.vlgmr.msra.gmra.mrb[0].mxu1 %vm264_vm2, %v6646_v49  ;;  %v7971_v49 = vld [vmem:[#allocation50_spill] sm:$0xff] }
 0x100   : > { %5755 = vmatmul.mubr.msk.bf16.vlgmr.msra.gmra.mrb[0].mxu0 %vm264_vm2, %v7094_v26  ;;  %5523 = vmatpush3.bf16.msra.mxu1 %v1854_v9  ;;  %v7974_v9 = vld [vmem:[#allocation29_spill] sm:$0xff] }
 0x101   : > { %5763 = vmatpush3.bf16.msra.mxu0 %v3936_v5  ;;  %5758 = vmatprep.mubr.msk.bf16.mxu0 %vm264_vm2, %v7206_v53  ;;  %v7518_v5 = vsel %vm682_vm4, %v3924_v60, %v3925_v37 }
 0x102   : > { %5518 = vmatprep.mubr.msk.bf16.mxu1 %vm264_vm2, %v7922_v61  ;;  %6289 = vmatprep.subr.msk.bf16.mxu0 %vm277_vm0, %v4018_v57  ;;  %v7975_v57 = vld [vmem:[#allocation37_spill] sm:$0xff] }
 0x103   : > { %6264 = vmatprep.subr.msk.bf16.mxu1 %vm277_vm0, %v1936_v42  ;;  %v5088_v42 = vld [vmem:[%s7804_s1 + $0x54] sm:$0x3] }
 0x107   : > { %5519 = vmatmul.mubr.msk.bf16.gmra.mrb[4].mxu1 %vm264_vm2, %v7971_v49 }
 0x108   : > { %5759 = vmatmul.mubr.msk.bf16.gmra.mrb[4].mxu0 %vm264_vm2, %v3841_v25  ;;  %5524 = vmatprep.mubr.msk.bf16.mxu1 %vm264_vm2, %v7972_v19  ;;  %v4968_v25 = vld [vmem:[%s7804_s1 + $0x24] sm:$0x3]  ;;  %v4012_v19 = vrot.slane %v7403_v15, 5 }
 0x109   : > { %5764 = vmatprep.mubr.msk.bf16.mxu0 %vm264_vm2, %v7962_v38  ;;  %v4105_v38 = vpack.c.bf16 %v5083_v17, %v5083_v17  ;;  %v2110_v60 = vpack.c.bf16 %v4968_v25, %v4968_v25  ;;  %v4978_v25 = vld [vmem:[%s7804_s1 + $0x28] sm:$0x3] }
 0x10b   : > { %v4110_v17 = vsel %vm277_vm0, %v4105_v38, 0 }
 0x10f   : > { %5525 = vmatmul.mubr.msk.bf16.vlgmr.msra.gmra.mrb[0].mxu1 %vm264_vm2, %v7973_v11 }
 0x110   : > { %5765 = vmatmul.mubr.msk.bf16.vlgmr.msra.gmra.mrb[0].mxu0 %vm264_vm2, %v7963_v59  ;;  %5533 = vmatpush3.bf16.msra.mxu1 %v1941_v36  ;;  %v3928_v59 = vpack.c.bf16 %v7518_v5, %v7284_v43  ;;  %v4011_v43 = vrot.slane %v7383_v0, 5  ;;  %v5093_v36 = vld [vmem:[%s7804_s1 + $0x56] sm:$0x3] }
 0x111   : > { %5773 = vmatpush3.bf16.msra.mxu0 %v4023_v47  ;;  %5768 = vmatprep.mubr.msk.bf16.mxu0 %vm264_vm2, %v7974_v9  ;;  %v7976_v47 = vld [vmem:[#allocation42_spill] sm:$0xff]  ;;  %v2115_v9 = vsel %vm277_vm0, %v2110_v60, 0 }
 0x112   : > { %5528 = vmatprep.mubr.msk.bf16.mxu1 %vm264_vm2, %v7934_v41  ;;  %6290 = vmatprep.subr.msk.bf16.mxu0 %vm277_vm0, %v4105_v38  ;;  %v7550_v37 = vsel %vm810_vm5, %v4011_v43, %v4012_v19  ;;  %v4973_v38 = vld [vmem:[%s7804_s1 + $0x26] sm:$0x3] }
 0x113   : > { %6265 = vmatprep.subr.msk.bf16.mxu1 %vm277_vm0, %v2023_v63  ;;  %v4099_v63 = vrot.slane %v7403_v15, 6  ;;  %v5098_v15 = vld [vmem:[%s7804_s1 + $0x58] sm:$0x3] }
 0x114   : > { %v4364_v19 = vpack.c.bf16 %v5098_v15, %v5098_v15 }
 0x117   : > { %5529 = vmatmul.mubr.msk.bf16.gmra.mrb[4].mxu1 %vm264_vm2, %v7136_v58 }
 0x118   : > { %5769 = vmatmul.mubr.msk.bf16.gmra.mrb[4].mxu0 %vm264_vm2, %v3928_v59  ;;  %5534 = vmatprep.mubr.msk.bf16.mxu1 %vm264_vm2, %v7975_v57  ;;  %v2197_v59 = vpack.c.bf16 %v4973_v38, %v4973_v38 }
 0x119   : > { %5774 = vmatprep.mubr.msk.bf16.mxu0 %vm264_vm2, %v7966_v10  ;;  %v4188_v10 = vpack.c.bf16 %v5088_v42, %v5088_v42  ;;  %v7978_v42 = vld [vmem:[#allocation48_spill] sm:$0xff] }
 0x11a   : > { %v2202_v43 = vsel %vm277_vm0, %v2197_v59, 0 }
 0x11b   : > { %v4193_v11 = vsel %vm277_vm0, %v4188_v10, 0 }
 0x11f   : > { %5535 = vmatmul.mubr.msk.bf16.vlgmr.msra.gmra.mrb[0].mxu1 %vm264_vm2, %v6778_v16  ;;  %v7977_v16 = vld [vmem:[#allocation47_spill] sm:$0xff] }
 0x120   : > { %5775 = vmatmul.mubr.msk.bf16.vlgmr.msra.gmra.mrb[0].mxu0 %vm264_vm2, %v7967_v62  ;;  %5543 = vmatpush3.bf16.msra.mxu1 %v2028_v29  ;;  %v4015_v62 = vpack.c.bf16 %v7550_v37, %v7077_v23  ;;  %v4098_v23 = vrot.slane %v7383_v0, 6  ;;  %v7980_v29 = vld [vmem:[#allocation14_spill] sm:$0xff] }
 0x121   : > { %5783 = vmatpush3.bf16.msra.mxu0 %v4110_v17  ;;  %5778 = vmatprep.mubr.msk.bf16.mxu0 %vm264_vm2, %v7976_v47  ;;  %v2284_v17 = vpack.c.bf16 %v4978_v25, %v4978_v25 }
 0x122   : > { %5538 = vmatprep.mubr.msk.bf16.mxu1 %vm264_vm2, %v7941_v39  ;;  %6291 = vmatprep.subr.msk.bf16.mxu0 %vm277_vm0, %v4188_v10  ;;  %v7582_v57 = vsel %vm938_vm7, %v4098_v23, %v4099_v63  ;;  %v7630_v10 = vld [vmem:[%s6383_s28 + $0xd8] sm:$0x3f] }
 0x123   : > { %6266 = vmatprep.subr.msk.bf16.mxu1 %vm277_vm0, %v2110_v60  ;;  %v5103_v60 = vld [vmem:[%s7804_s1 + $0x5a] sm:$0x3]  ;;  %v7982_v63 = vld [vmem:[#allocation17_spill] sm:$0xff] }
 0x127   : > { %5539 = vmatmul.mubr.msk.bf16.gmra.mrb[4].mxu1 %vm264_vm2, %v6970_v44 }
 0x128   : > { %5779 = vmatmul.mubr.msk.bf16.gmra.mrb[4].mxu0 %vm264_vm2, %v4015_v62  ;;  %5544 = vmatprep.mubr.msk.bf16.mxu1 %vm264_vm2, %v7977_v16  ;;  %v4271_v62 = vrot.slane %v7630_v10, 1  ;;  %v4369_v16 = vsel %vm277_vm0, %v4364_v19, 0 }
 0x129   : > { %5784 = vmatprep.mubr.msk.bf16.mxu0 %vm264_vm2, %v6861_v32  ;;  %v4277_v32 = vpack.c.bf16 %v5093_v36, %v5093_v36  ;;  %v4451_v36 = vpack.c.bf16 %v5103_v60, %v5103_v60 }
 0x12f   : > { %5545 = vmatmul.mubr.msk.bf16.vlgmr.msra.gmra.mrb[0].mxu1 %vm264_vm2, %v6853_v1  ;;  %v7979_v1 = vld [vmem:[#allocation49_spill] sm:$0xff] }
 0x130   : > { %5785 = vmatmul.mubr.msk.bf16.vlgmr.msra.gmra.mrb[0].mxu0 %vm264_vm2, %v6902_v8  ;;  %5553 = vmatpush3.bf16.msra.mxu1 %v2115_v9  ;;  %v4102_v8 = vpack.c.bf16 %v7582_v57, %v7099_v4  ;;  %v4282_v4 = vsel %vm277_vm0, %v4277_v32, 0  ;;  %v4358_v9 = vrot.slane %v7630_v10, 2 }
 0x131   : > { %5793 = vmatpush3.bf16.msra.mxu0 %v4193_v11  ;;  %5788 = vmatprep.mubr.msk.bf16.mxu0 %vm264_vm2, %v7978_v42 }
 0x132   : > { %5548 = vmatprep.mubr.msk.bf16.mxu1 %vm264_vm2, %v6945_v30  ;;  %6292 = vmatprep.subr.msk.bf16.mxu0 %vm277_vm0, %v4277_v32  ;;  %v4456_v32 = vsel %vm277_vm0, %v4451_v36, 0 }
 0x133   : > { %6267 = vmatprep.subr.msk.bf16.mxu1 %vm277_vm0, %v2197_v59 }
 0x137   : > { %5549 = vmatmul.mubr.msk.bf16.gmra.mrb[4].mxu1 %vm264_vm2, %v7018_v48 }
 0x138   : > { %5789 = vmatmul.mubr.msk.bf16.gmra.mrb[4].mxu0 %vm264_vm2, %v4102_v8  ;;  %5554 = vmatprep.mubr.msk.bf16.mxu1 %vm264_vm2, %v7979_v1 }
 0x139   : > { %5794 = vmatprep.mubr.msk.bf16.mxu0 %vm264_vm2, %v7922_v61  ;;  %v7612_v61 = vld [vmem:[%s6383_s28 + $0xd0] sm:$0xff] }
 0x13a   : > { %v4270_v47 = vrot.slane %v7612_v61, 1 }
 0x13c   : > { %v4272_v23 = vsel %vm224_vm1, %v4270_v47, %v4271_v62 }
 0x13d   : > { %v4274_v11 = vpack.c.bf16 %v4272_v23, %v7420_v14  ;;  %v4357_v14 = vrot.slane %v7612_v61, 2 }
 0x13f   : > { %5555 = vmatmul.mubr.msk.bf16.vlgmr.msra.gmra.mrb[0].mxu1 %vm264_vm2, %v7033_v2  ;;  %v7981_v2 = vld [vmem:[#allocation16_spill] sm:$0xff] }
 0x140   : > { %5795 = vmatmul.mubr.msk.bf16.vlgmr.msra.gmra.mrb[0].mxu0 %vm264_vm2, %v7971_v49  ;;  %5563 = vmatpush3.bf16.msra.mxu1 %v2202_v43  ;;  %v4185_v49 = vpack.c.bf16 %v7612_v61, %v7383_v0  ;;  %v4983_v0 = vld [vmem:[%s7804_s1 + $0x2a] sm:$0x3] }
 0x141   : > { %5803 = vmatpush3.bf16.msra.mxu0 %v4282_v4  ;;  %5798 = vmatprep.mubr.msk.bf16.mxu0 %vm264_vm2, %v7980_v29  ;;  %v2367_v38 = vpack.c.bf16 %v4983_v0, %v4983_v0 }
 0x142   : > { %5558 = vmatprep.mubr.msk.bf16.mxu1 %vm264_vm2, %v7090_v21  ;;  %6293 = vmatprep.subr.msk.bf16.mxu0 %vm277_vm0, %v4364_v19 }
 0x143   : > { %6268 = vmatprep.subr.msk.bf16.mxu1 %vm277_vm0, %v2284_v17  ;;  %v2372_v59 = vsel %vm277_vm0, %v2367_v38, 0 }
 0x147   : > { %5559 = vmatmul.mubr.msk.bf16.gmra.mrb[4].mxu1 %vm264_vm2, %v7022_v54 }
 0x148   : > { %5799 = vmatmul.mubr.msk.bf16.gmra.mrb[4].mxu0 %vm264_vm2, %v4185_v49  ;;  %5564 = vmatprep.mubr.msk.bf16.mxu1 %vm264_vm2, %v7981_v2  ;;  %v5123_v49 = vld [vmem:[#allocation2] ss:$0 sm:$0xff] }
 0x149   : > { %5804 = vmatprep.mubr.msk.bf16.mxu0 %vm264_vm2, %v7934_v41  ;;  %v2289_v41 = vsel %vm277_vm0, %v2284_v17, 0 }
 0x14f   : > { %5565 = vmatmul.mubr.msk.bf16.vlgmr.msra.gmra.mrb[0].mxu1 %vm264_vm2, %v7140_v18  ;;  %v5108_v18 = vld [vmem:[%s7804_s1 + $0x5c] sm:$0x3] }
 0x150   : > { %5805 = vmatmul.mubr.msk.bf16.vlgmr.msra.gmra.mrb[0].mxu0 %vm264_vm2, %v7136_v58  ;;  %5573 = vmatpush3.bf16.msra.mxu1 %v2289_v41  ;;  %v4988_v58 = vld [vmem:[%s7804_s1 + $0x2c] sm:$0x3] }
 0x151   : > { %5813 = vmatpush3.bf16.msra.mxu0 %v4369_v16  ;;  %5808 = vmatprep.mubr.msk.bf16.mxu0 %vm264_vm2, %v7982_v63  ;;  %v2456_v42 = vpack.c.bf16 %v4988_v58, %v4988_v58 }
 0x152   : > { %5568 = vmatprep.mubr.msk.bf16.mxu1 %vm264_vm2, %v7167_v50  ;;  %6294 = vmatprep.subr.msk.bf16.mxu0 %vm277_vm0, %v4451_v36 }
 0x153   : > { %6269 = vmatprep.subr.msk.bf16.mxu1 %vm277_vm0, %v2367_v38  ;;  %v2461_v15 = vsel %vm277_vm0, %v2456_v42, 0 }
 0x157   : > { %5569 = vmatmul.mubr.msk.bf16.gmra.mrb[4].mxu1 %vm264_vm2, %v7058_v45 }
 0x158   : > { %5809 = vmatmul.mubr.msk.bf16.gmra.mrb[4].mxu0 %vm264_vm2, %v4274_v11  ;;  %5574 = vmatprep.mubr.msk.bf16.mxu1 %vm264_vm2, %v7181_v7  ;;  %v4359_v7 = vsel %vm426_vm6, %v4357_v14, %v4358_v9 }
 0x159   : > { %5814 = vmatprep.mubr.msk.bf16.mxu0 %vm264_vm2, %v7941_v39  ;;  %v4538_v39 = vpack.c.bf16 %v5108_v18, %v5108_v18  ;;  %v4361_v8 = vpack.c.bf16 %v4359_v7, %v7454_v3  ;;  %v4445_v3 = vrot.slane %v7630_v10, 3 }
 0x15b   : > { %v4543_v1 = vsel %vm277_vm0, %v4538_v39, 0 }
 0x15f   : > { %5575 = vmatmul.mubr.msk.bf16.vlgmr.msra.gmra.mrb[0].mxu1 %vm264_vm2, %v7195_v35  ;;  %v4993_v35 = vld [vmem:[%s7804_s1 + $0x2e] sm:$0x3] }
 0x160   : > { %5815 = vmatmul.mubr.msk.bf16.vlgmr.msra.gmra.mrb[0].mxu0 %vm264_vm2, %v6970_v44  ;;  %5583 = vmatpush3.bf16.msra.mxu1 %v2372_v59  ;;  %v5113_v44 = vld [vmem:[%s7804_s1 + $0x5e] sm:$0x3]  ;;  %v2543_v25 = vpack.c.bf16 %v4993_v35, %v4993_v35 }
 0x161   : > { %5823 = vmatpush3.bf16.msra.mxu0 %v4456_v32  ;;  %5818 = vmatprep.mubr.msk.bf16.mxu0 %vm264_vm2, %v7216_v22  ;;  %v4444_v22 = vrot.slane %v7612_v61, 3 }
 0x162   : > { %5578 = vmatprep.mubr.msk.bf16.mxu1 %vm264_vm2, %v7220_v12  ;;  %6295 = vmatprep.subr.msk.bf16.mxu0 %vm277_vm0, %v4538_v39 }
 0x163   : > { %6270 = vmatprep.subr.msk.bf16.mxu1 %vm277_vm0, %v2456_v42 }
 0x167   : > { %5579 = vmatmul.mubr.msk.bf16.gmra.mrb[4].mxu1 %vm264_vm2, %v7081_v52 }
 0x168   : > { %5819 = vmatmul.mubr.msk.bf16.gmra.mrb[4].mxu0 %vm264_vm2, %v4361_v8  ;;  %5584 = vmatprep.mubr.msk.bf16.mxu1 %vm264_vm2, %v6981_v31  ;;  %v4446_v31 = vsel %vm554_vm3, %v4444_v22, %v4445_v3 }
 0x169   : > { %5824 = vmatprep.mubr.msk.bf16.mxu0 %vm264_vm2, %v6945_v30  ;;  %v4625_v30 = vpack.c.bf16 %v5113_v44, %v5113_v44  ;;  %v4448_v4 = vpack.c.bf16 %v4446_v31, %v7486_v55  ;;  %v2548_v55 = vsel %vm277_vm0, %v2543_v25, 0 }
 0x16f   : > { %5585 = vmatmul.mubr.msk.bf16.vlgmr.msra.gmra.mrb[0].mxu1 %vm264_vm2, %v6995_v24  ;;  %v5118_v24 = vld [vmem:[%s7804_s1 + $0x60] sm:$0x3] }
 0x170   : > { %5825 = vmatmul.mubr.msk.bf16.vlgmr.msra.gmra.mrb[0].mxu0 %vm264_vm2, %v7018_v48  ;;  %5593 = vmatpush3.bf16.msra.mxu1 %v2461_v15  ;;  %v4532_v48 = vrot.slane %v7630_v10, 4  ;;  %v4712_v43 = vpack.c.bf16 %v5118_v24, %v5118_v24 }
 0x171   : > { %5833 = vmatpush3.bf16.msra.mxu0 %v4543_v1  ;;  %5828 = vmatprep.mubr.msk.bf16.mxu0 %vm264_vm2, %v7257_v33  ;;  %v4630_v33 = vsel %vm277_vm0, %v4625_v30, 0 }
 0x172   : > { %5588 = vmatprep.mubr.msk.bf16.mxu1 %vm264_vm2, %v7015_v46  ;;  %6296 = vmatprep.subr.msk.bf16.mxu0 %vm277_vm0, %v4625_v30  ;;  %v4531_v46 = vrot.slane %v7612_v61, 4 }
 0x173   : > { %6271 = vmatprep.subr.msk.bf16.mxu1 %vm277_vm0, %v2543_v25 }
 0x177   : > { %5589 = vmatmul.mubr.msk.bf16.gmra.mrb[4].mxu1 %vm264_vm2, %v7103_v34  ;;  %v7983_v34 = vld [vmem:[#allocation3_spill] sm:$0xff] }
 0x178   : > { %5829 = vmatmul.mubr.msk.bf16.gmra.mrb[4].mxu0 %vm264_vm2, %v4448_v4  ;;  %5594 = vmatprep.mubr.msk.bf16.mxu1 %vm264_vm2, %v7948_v40  ;;  %v4619_v40 = vrot.slane %v7630_v10, 5 }
 0x179   : > { %5834 = vmatprep.mubr.msk.bf16.mxu0 %vm264_vm2, %v7090_v21  ;;  %v4533_v21 = vsel %vm682_vm4, %v4531_v46, %v4532_v48 }
 0x17f   : > { %5595 = vmatmul.mubr.msk.bf16.vlgmr.msra.gmra.mrb[0].mxu1 %vm264_vm2, %v7040_v27  ;;  %v7984_v27 = vld [vmem:[#allocation35_spill] sm:$0xff] }
 0x180   : > { %5835 = vmatmul.mubr.msk.bf16.vlgmr.msra.gmra.mrb[0].mxu0 %vm264_vm2, %v7022_v54  ;;  %5603 = vmatpush3.bf16.msra.mxu1 %v2548_v55  ;;  %v4535_v54 = vpack.c.bf16 %v4533_v21, %v7518_v5  ;;  %v7986_v5 = vld [vmem:[#allocation30_spill] sm:$0xff] }
 0x181   : > { %5843 = vmatpush3.bf16.msra.mxu0 %v4630_v33  ;;  %5838 = vmatprep.mubr.msk.bf16.mxu0 %vm264_vm2, %v7294_v51  ;;  %v4717_v51 = vsel %vm277_vm0, %v4712_v43, 0 }
 0x182   : > { %5598 = vmatprep.mubr.msk.bf16.mxu1 %vm264_vm2, %v7044_v20  ;;  %6297 = vmatprep.subr.msk.bf16.mxu0 %vm277_vm0, %v4712_v43  ;;  %v4618_v20 = vrot.slane %v7612_v61, 5 }
 0x183   : > { %6273 = vmatprep.subr.msk.bf16.mxu1 %vm277_vm0, %v7983_v34 }
 0x187   : > { %5599 = vmatmul.mubr.msk.bf16.gmra.mrb[4].mxu1 %vm264_vm2, %v7113_v6  ;;  %v7985_v6 = vld [vmem:[#allocation4_spill] sm:$0xff] }
 0x188   : > { %5839 = vmatmul.mubr.msk.bf16.gmra.mrb[4].mxu0 %vm264_vm2, %v4535_v54  ;;  %5604 = vmatprep.mubr.msk.bf16.mxu1 %vm264_vm2, %v7984_v27 }
 0x189   : > { %5844 = vmatprep.mubr.msk.bf16.mxu0 %vm264_vm2, %v7167_v50  ;;  %v4620_v50 = vsel %vm810_vm5, %v4618_v20, %v4619_v40 }
 0x18a   : > { %v4622_v19 = vpack.c.bf16 %v4620_v50, %v7550_v37 }
 0x18f   : > { %5605 = vmatmul.mubr.msk.bf16.vlgmr.msra.gmra.mrb[0].mxu1 %vm264_vm2, %v7068_v56  ;;  %v4706_v56 = vrot.slane %v7630_v10, 6 }
 0x190   : > { %5845 = vmatmul.mubr.msk.bf16.vlgmr.msra.gmra.mrb[0].mxu0 %vm264_vm2, %v7058_v45  ;;  %5863 = vmatpush3.bf16.msra.mxu1 %v7985_v6  ;;  %v4705_v45 = vrot.slane %v7612_v61, 6 }
 0x191   : > { %5853 = vmatpush3.bf16.msra.mxu0 %v4717_v51  ;;  %5848 = vmatprep.mubr.msk.bf16.mxu0 %vm264_vm2, %v7986_v5 }
 0x192   : > { %5608 = vmatprep.mubr.msk.bf16.mxu1 %vm264_vm2, %v7071_v13  ;;  %v7987_v13 = vld [vmem:[#allocation31_spill] sm:$0xff]  ;;  %v4707_v37 = vsel %vm938_vm7, %v4705_v45, %v4706_v56 }
 0x197   : > { %5609 = vmatmul.mubr.msk.bf16.gmra.mrb[4].mxu1 %vm264_vm2, %v7153_v28  ;;  %v4709_v28 = vpack.c.bf16 %v4707_v37, %v7582_v57 }
 0x198   : > { %5849 = vmatmul.mubr.msk.bf16.gmra.mrb[4].mxu0 %vm264_vm2, %v4622_v19  ;;  %5618 = vmatprep.mubr.msk.bf16.mxu1 %vm264_vm2, %v7094_v26 }
 0x199   : > { %5854 = vmatprep.mubr.msk.bf16.mxu0 %vm264_vm2, %v7220_v12 }
 0x1a0   : > { %5855 = vmatmul.mubr.msk.bf16.vlgmr.msra.gmra.mrb[0].mxu0 %vm264_vm2, %v7081_v52 }
 0x1a1   : > { %5858 = vmatprep.mubr.msk.bf16.mxu0 %vm264_vm2, %v7987_v13 }
 0x1a3   : > { %5619 = vmatmul.mubr.msk.bf16.vlgmr.msra.gmra.mrb[4].mxu1 %vm264_vm2, %v7206_v53 }
 0x1a8   : > { %5859 = vmatmul.mubr.msk.bf16.gmra.mrb[4].mxu0 %vm264_vm2, %v4709_v28 }
 0x262   : > { %v5606_v26 = vpop.f32.mrb[0].mxu1 }
 0x263   : > { %v2584_v12 = vpop.f32.mrb[1].mxu1 }
 0x264   : > { %v5607_v17 = vpop.f32.mrb[2].mxu1 }
 0x265   : > { %v2587_v61 = vpop.f32.mrb[3].mxu1 }
 0x273   : > { %v5856_v29 = vpop.f32.mrb[0].mxu0 }
 0x274   : > { %v5864_v52 = vadd.f32 %v5856_v29, %v5606_v26  ;;  %v4753_v2 = vpop.f32.mrb[1].mxu0 }
 0x275   : > { %v5865_v53 = vadd.f32 %v4753_v2, %v2584_v12  ;;  %v5857_v57 = vpop.f32.mrb[2].mxu0 }
 0x276   : > { %v4801_v10 = vadd.f32 %v5864_v52, %v5123_v49  ;;  %v5866_v60 = vadd.f32 %v5857_v57, %v5607_v17  ;;  %v4756_v0 = vpop.f32.mrb[3].mxu0  ;;  %v5620_v16 = vpop.f32.mrb[4].mxu1 }
 0x277   : > { %v4799_v47 = vadd.f32 %v5865_v53, %v5123_v49  ;;  %v5867_v62 = vadd.f32 %v4756_v0, %v2587_v61  ;;  %v2687_v36 = vpop.f32.mrb[5].mxu1 }
 0x278   : > { %4810 = vst.msk [vmem:[%s7782_s18 + $0x10] sm:$0xff] %vm4807_vm8, %v4801_v10  ;;  %v4802_v41 = vadd.f32 %v5866_v60, %v5123_v49  ;;  %v5621_v23 = vpop.f32.mrb[6].mxu1 }
 0x279   : > { %4808 = vst.msk [vmem:[%s7782_s18] sm:$0xff] %vm4807_vm8, %v4799_v47  ;;  %v4800_v38 = vadd.f32 %v5867_v62, %v5123_v49  ;;  %v2690_v63 = vpop.f32.mrb[7].mxu1 }
 0x27a   : > { %4811 = vst.msk [vmem:[%s7782_s18 + $0x18] sm:$0xff] %vm4807_vm8, %v4802_v41 }
 0x27b   : > { %4809 = vst.msk [vmem:[%s7782_s18 + $0x8] sm:$0xff] %vm4807_vm8, %v4800_v38  ;;  %v5860_v11 = vpop.f32.mrb[4].mxu0 }
 0x27c   : > { %v5868_v18 = vadd.f32 %v5860_v11, %v5620_v16  ;;  %v4769_v58 = vpop.f32.mrb[5].mxu0 }
 0x27d   : > { %v5869_v14 = vadd.f32 %v4769_v58, %v2687_v36  ;;  %v5861_v9 = vpop.f32.mrb[6].mxu0 }
 0x27e   : > { %v4805_v32 = vadd.f32 %v5868_v18, %v5123_v49  ;;  %v5870_v59 = vadd.f32 %v5861_v9, %v5621_v23  ;;  %v4772_v39 = vpop.f32.mrb[7].mxu0 }
 0x27f   : > { %v4803_v42 = vadd.f32 %v5869_v14, %v5123_v49  ;;  %v5871_v7 = vadd.f32 %v4772_v39, %v2690_v63 }
 0x280   : > { %4814 = vst.msk [vmem:[%s7782_s18 + $0x30] sm:$0xff] %vm4807_vm8, %v4805_v32  ;;  %v4806_v8 = vadd.f32 %v5870_v59, %v5123_v49 }
 0x281   : > { %4812 = vst.msk [vmem:[%s7782_s18 + $0x20] sm:$0xff] %vm4807_vm8, %v4803_v42  ;;  %v4804_v44 = vadd.f32 %v5871_v7, %v5123_v49 }
 0x282   : > { %4815 = vst.msk [vmem:[%s7782_s18 + $0x38] sm:$0xff] %vm4807_vm8, %v4806_v8 }
 0x283   : > { %4813 = vst.msk [vmem:[%s7782_s18 + $0x28] sm:$0xff] %vm4807_vm8, %v4804_v44 }
 0x284 PF: > { %s15_s14 = sadd.s32 1, %s6313_s14  }
 0x285   : > { %p12_p4 = scmp.ge.s32.totalorder %s15_s14, 4  }
 0x287   :  { %14 = sbr.rel (!%p12_p4) target bundleno = 3 (0x3), region = 110 }

// kernel: dda_forward.20
= control target key start
LH: loop header
LB: loop body
LE: loop exit
PB: predicated region body
PF: predicated region fallthrough
CT: control target
= control target key end

     0   :  { %vm19_vm0 = vcmask 130048   ;;  %v351_v3 = vmov 0.0   ;;  %vm85_vm1 = vcmask 392192   ;;  %s563_s1 = inlined_call_operand.vmem [shape: f32[48,16], index: 1, kind: input, shape index: {}]   ;;  %s564_s0 = inlined_call_operand.vmem [shape: f32[128,48], index: 0, kind: input, shape index: {}]   ;;  %s565_s2 = inlined_call_operand.vmem [shape: f32[1,16], index: 2, kind: input, shape index: {}]   ;;  %s566_s3 = inlined_call_operand.vmem [shape: f32[128,16], index: 3, kind: output, shape index: {}]  }
   0x1   :  { %v76_v0 = vld [vmem:[%s563_s1] sm:$0xff]  ;;  %v77_v1 = vld [vmem:[%s563_s1 + $0x8] sm:$0xff]  ;;  %v78_v2 = vld [vmem:[%s563_s1 + $0x10] sm:$0xff]  ;;  %22 = vst.msk [vmem:[#allocation2 + $0x10] sm:$0xff] %vm19_vm0, %v351_v3 }
   0x2   :  { %20 = vst.msk [vmem:[#allocation2] sm:$0xff] %vm19_vm0, %v351_v3  ;;  %21 = vst.msk [vmem:[#allocation2 + $0x8] sm:$0xff] %vm19_vm0, %v351_v3  ;;  %v82_v4 = vpack.c.bf16 %v77_v1, %v76_v0  ;;  %v79_v5 = vld [vmem:[%s563_s1 + $0x18] sm:$0xff]  ;;  %v80_v6 = vld [vmem:[%s563_s1 + $0x20] sm:$0xff] }
   0x3   :  { %23 = vst.msk [vmem:[#allocation2 + $0x18] sm:$0xff] %vm19_vm0, %v351_v3  ;;  %24 = vst.msk [vmem:[#allocation2 + $0x20] sm:$0xff] %vm19_vm0, %v351_v3  ;;  %v81_v7 = vld [vmem:[%s563_s1 + $0x28] sm:$0xff]  ;;  %v83_v8 = vpack.c.bf16 %v79_v5, %v78_v2  ;;  %v36_v9 = vld [vmem:[%s564_s0] sm:$0xff] }
   0x4   :  { %25 = vst.msk [vmem:[#allocation2 + $0x28] sm:$0xff] %vm19_vm0, %v351_v3  ;;  %26 = vst.msk [vmem:[#allocation2 + $0x30] sm:$0xff] %vm19_vm0, %v351_v3  ;;  %v37_v10 = vld [vmem:[%s564_s0 + $0x8] sm:$0xff]  ;;  %v44_v11 = vld [vmem:[%s564_s0 + $0x40] sm:$0xff]  ;;  %322 = vmatprep.subr.bf16.mxu0 %v82_v4  ;;  %344 = vmatprep.subr.bf16.mxu1 %v82_v4  ;;  %v84_v15 = vpack.c.bf16 %v81_v7, %v80_v6 }
   0x5   :  { %27 = vst.msk [vmem:[#allocation2 + $0x38] sm:$0xff] %vm19_vm0, %v351_v3  ;;  %28 = vst.msk [vmem:[#allocation2 + $0x40] sm:$0xff] %vm19_vm0, %v351_v3  ;;  %v68_v12 = vpack.c.bf16 %v37_v10, %v36_v9  ;;  %v45_v13 = vld [vmem:[%s564_s0 + $0x48] sm:$0xff]  ;;  %323 = vmatpush3.bf16.msra.mxu0 %v82_v4  ;;  %347 = vmatpush3.bf16.msra.mxu1 %v82_v4  ;;  %v38_v16 = vld [vmem:[%s564_s0 + $0x10] sm:$0xff] }
   0x6   :  { %29 = vst.msk [vmem:[#allocation2 + $0x48] sm:$0xff] %vm19_vm0, %v351_v3  ;;  %30 = vst.msk [vmem:[#allocation2 + $0x50] sm:$0xff] %vm19_vm0, %v351_v3  ;;  %v72_v14 = vpack.c.bf16 %v45_v13, %v44_v11  ;;  %324 = vmatprep.subr.bf16.mxu0 %v83_v8  ;;  %345 = vmatprep.subr.bf16.mxu1 %v83_v8  ;;  %v39_v17 = vld [vmem:[%s564_s0 + $0x18] sm:$0xff]  ;;  %v46_v18 = vld [vmem:[%s564_s0 + $0x50] sm:$0xff] }
   0x7   :  { %31 = vst.msk [vmem:[#allocation2 + $0x58] sm:$0xff] %vm19_vm0, %v351_v3  ;;  %32 = vst.msk [vmem:[#allocation2 + $0x60] sm:$0xff] %vm19_vm0, %v351_v3  ;;  %328 = vmatprep.mubr.msk.bf16.mxu0 %vm85_vm1, %v68_v12  ;;  %v47_v19 = vld [vmem:[%s564_s0 + $0x58] sm:$0xff]  ;;  %v40_v20 = vld [vmem:[%s564_s0 + $0x20] sm:$0xff]  ;;  %v69_v24 = vpack.c.bf16 %v39_v17, %v38_v16 }
   0x8   :  { %33 = vst.msk [vmem:[#allocation2 + $0x68] sm:$0xff] %vm19_vm0, %v351_v3  ;;  %34 = vst.msk [vmem:[#allocation2 + $0x70] sm:$0xff] %vm19_vm0, %v351_v3  ;;  %336 = vmatprep.mubr.msk.bf16.mxu1 %vm85_vm1, %v72_v14  ;;  %v41_v21 = vld [vmem:[%s564_s0 + $0x28] sm:$0xff]  ;;  %v48_v22 = vld [vmem:[%s564_s0 + $0x60] sm:$0xff]  ;;  %v73_v25 = vpack.c.bf16 %v47_v19, %v46_v18 }
   0x9   :  { %35 = vst.msk [vmem:[#allocation2 + $0x78] sm:$0xff] %vm19_vm0, %v351_v3  ;;  %325 = vmatpush3.bf16.msra.mxu0 %v83_v8  ;;  %348 = vmatpush3.bf16.msra.mxu1 %v83_v8  ;;  %v49_v23 = vld [vmem:[%s564_s0 + $0x68] sm:$0xff]  ;;  %v70_v26 = vpack.c.bf16 %v41_v21, %v40_v20  ;;  %v42_v28 = vld [vmem:[%s564_s0 + $0x30] sm:$0xff]  ;;  %v43_v29 = vld [vmem:[%s564_s0 + $0x38] sm:$0xff] }
   0xa   :  { %326 = vmatprep.subr.bf16.mxu0 %v84_v15  ;;  %346 = vmatprep.subr.bf16.mxu1 %v84_v15  ;;  %v74_v27 = vpack.c.bf16 %v49_v23, %v48_v22  ;;  %v50_v30 = vld [vmem:[%s564_s0 + $0x70] sm:$0xff]  ;;  %v51_v31 = vld [vmem:[%s564_s0 + $0x78] sm:$0xff]  ;;  %v71_v32 = vpack.c.bf16 %v43_v29, %v42_v28  ;;  %v52_v36 = vld [vmem:[#allocation2] sm:$0xff] }
   0xb   :  { %v75_v33 = vpack.c.bf16 %v51_v31, %v50_v30  ;;  %v54_v34 = vld [vmem:[#allocation2 + $0x10] sm:$0xff]  ;;  %v55_v40 = vld [vmem:[#allocation2 + $0x18] sm:$0xff]  ;;  %v53_v46 = vld [vmem:[#allocation2 + $0x8] sm:$0xff] }
   0xc   :  { %v60_v37 = vld [vmem:[#allocation2 + $0x40] sm:$0xff]  ;;  %v58_v58 = vld [vmem:[#allocation2 + $0x30] sm:$0xff]  ;;  %v59_v1 = vld [vmem:[#allocation2 + $0x38] sm:$0xff] }
   0xd   :  { %327 = vmatpush3.bf16.msra.mxu0 %v84_v15  ;;  %349 = vmatpush3.bf16.msra.mxu1 %v84_v15  ;;  %v62_v35 = vld [vmem:[#allocation2 + $0x50] sm:$0xff]  ;;  %v61_v47 = vld [vmem:[#allocation2 + $0x48] sm:$0xff]  ;;  %v56_v60 = vld [vmem:[#allocation2 + $0x20] sm:$0xff] }
   0xe   :  { %v63_v41 = vld [vmem:[#allocation2 + $0x58] sm:$0xff]  ;;  %v64_v61 = vld [vmem:[#allocation2 + $0x60] sm:$0xff]  ;;  %v57_v7 = vld [vmem:[#allocation2 + $0x28] sm:$0xff] }
   0xf   :  { %v66_v59 = vld [vmem:[#allocation2 + $0x70] sm:$0xff]  ;;  %v473_v62 = vld [vmem:[%s565_s2] ss:$0 sm:$0xff]  ;;  %v65_v8 = vld [vmem:[#allocation2 + $0x68] sm:$0xff] }
  0x10   :  { %329 = vmatmul.mubr.msk.bf16.vlgmr.msra.gmra.mrb[0].mxu0 %vm85_vm1, %v69_v24  ;;  %337 = vmatmul.mubr.msk.bf16.vlgmr.msra.gmra.mrb[0].mxu1 %vm85_vm1, %v73_v25  ;;  %v67_v2 = vld [vmem:[#allocation2 + $0x78] sm:$0xff] }
  0x11   :  { %332 = vmatprep.mubr.msk.bf16.mxu0 %vm85_vm1, %v70_v26  ;;  %340 = vmatprep.mubr.msk.bf16.mxu1 %vm85_vm1, %v74_v27 }
  0x18   :  { %333 = vmatmul.mubr.msk.bf16.gmra.mrb[4].mxu0 %vm85_vm1, %v71_v32  ;;  %341 = vmatmul.mubr.msk.bf16.gmra.mrb[4].mxu1 %vm85_vm1, %v75_v33 }
  0xe3   :  { %v330_v38 = vpop.f32.mrb[0].mxu0  ;;  %v338_v39 = vpop.f32.mrb[0].mxu1 }
  0xe4   :  { %v209_v42 = vadd.f32 %v330_v38, %v54_v34  ;;  %v217_v43 = vadd.f32 %v338_v39, %v62_v35  ;;  %v144_v44 = vpop.f32.mrb[1].mxu0  ;;  %v176_v45 = vpop.f32.mrb[1].mxu1 }
  0xe5   :  { %v207_v48 = vadd.f32 %v144_v44, %v52_v36  ;;  %v215_v49 = vadd.f32 %v176_v45, %v60_v37  ;;  %v331_v50 = vpop.f32.mrb[2].mxu0  ;;  %v339_v51 = vpop.f32.mrb[2].mxu1 }
  0xe6   :  { %226 = vst.msk [vmem:[#allocation2 + $0x10] sm:$0xff] %vm19_vm0, %v209_v42  ;;  %234 = vst.msk [vmem:[#allocation2 + $0x50] sm:$0xff] %vm19_vm0, %v217_v43  ;;  %v210_v52 = vadd.f32 %v331_v50, %v55_v40  ;;  %v218_v53 = vadd.f32 %v339_v51, %v63_v41  ;;  %v147_v54 = vpop.f32.mrb[3].mxu0  ;;  %v179_v55 = vpop.f32.mrb[3].mxu1 }
  0xe7   :  { %224 = vst.msk [vmem:[#allocation2] sm:$0xff] %vm19_vm0, %v207_v48  ;;  %232 = vst.msk [vmem:[#allocation2 + $0x40] sm:$0xff] %vm19_vm0, %v215_v49  ;;  %v208_v56 = vadd.f32 %v147_v54, %v53_v46  ;;  %v216_v57 = vadd.f32 %v179_v55, %v61_v47 }
  0xe8   :  { %227 = vst.msk [vmem:[#allocation2 + $0x18] sm:$0xff] %vm19_vm0, %v210_v52  ;;  %235 = vst.msk [vmem:[#allocation2 + $0x58] sm:$0xff] %vm19_vm0, %v218_v53 }
  0xe9   :  { %225 = vst.msk [vmem:[#allocation2 + $0x8] sm:$0xff] %vm19_vm0, %v208_v56  ;;  %233 = vst.msk [vmem:[#allocation2 + $0x48] sm:$0xff] %vm19_vm0, %v216_v57 }
  0xeb   :  { %v334_v63 = vpop.f32.mrb[4].mxu0  ;;  %v342_v0 = vpop.f32.mrb[4].mxu1 }
  0xec   :  { %v213_v3 = vadd.f32 %v334_v63, %v58_v58  ;;  %v221_v4 = vadd.f32 %v342_v0, %v66_v59  ;;  %v160_v5 = vpop.f32.mrb[5].mxu0  ;;  %v192_v6 = vpop.f32.mrb[5].mxu1 }
  0xed   :  { %v245_v9 = vld [vmem:[#allocation2 + $0x10] sm:$0xff]  ;;  %v211_v11 = vadd.f32 %v160_v5, %v56_v60  ;;  %v219_v12 = vadd.f32 %v192_v6, %v64_v61  ;;  %v335_v13 = vpop.f32.mrb[6].mxu0  ;;  %v343_v14 = vpop.f32.mrb[6].mxu1 }
  0xee   :  { %v253_v10 = vld [vmem:[#allocation2 + $0x50] sm:$0xff]  ;;  %v268_v15 = vadd.f32 %v473_v62, %v245_v9  ;;  %v243_v17 = vld [vmem:[#allocation2] sm:$0xff]  ;;  %230 = vst.msk [vmem:[#allocation2 + $0x30] sm:$0xff] %vm19_vm0, %v213_v3  ;;  %238 = vst.msk [vmem:[#allocation2 + $0x70] sm:$0xff] %vm19_vm0, %v221_v4  ;;  %v214_v19 = vadd.f32 %v335_v13, %v59_v1  ;;  %v222_v20 = vadd.f32 %v343_v14, %v67_v2  ;;  %v163_v21 = vpop.f32.mrb[7].mxu0  ;;  %v195_v22 = vpop.f32.mrb[7].mxu1 }
  0xef   :  { %v276_v16 = vadd.f32 %v473_v62, %v253_v10  ;;  %v251_v18 = vld [vmem:[#allocation2 + $0x40] sm:$0xff]  ;;  %v266_v23 = vadd.f32 %v473_v62, %v243_v17  ;;  %v246_v25 = vld [vmem:[#allocation2 + $0x18] sm:$0xff]  ;;  %228 = vst.msk [vmem:[#allocation2 + $0x20] sm:$0xff] %vm19_vm0, %v211_v11  ;;  %236 = vst.msk [vmem:[#allocation2 + $0x60] sm:$0xff] %vm19_vm0, %v219_v12  ;;  %v212_v27 = vadd.f32 %v163_v21, %v57_v7 }
  0xf0   :  { %v274_v24 = vadd.f32 %v473_v62, %v251_v18  ;;  %v254_v26 = vld [vmem:[#allocation2 + $0x58] sm:$0xff]  ;;  %v220_v28 = vadd.f32 %v195_v22, %v65_v8  ;;  %284 = vst.msk [vmem:[%s566_s3 + $0x10] sm:$0xff] %vm19_vm0, %v268_v15  ;;  %v269_v29 = vadd.f32 %v473_v62, %v246_v25  ;;  %v244_v31 = vld [vmem:[#allocation2 + $0x8] sm:$0xff]  ;;  %231 = vst.msk [vmem:[#allocation2 + $0x38] sm:$0xff] %vm19_vm0, %v214_v19 }
  0xf1   :  { %292 = vst.msk [vmem:[%s566_s3 + $0x50] sm:$0xff] %vm19_vm0, %v276_v16  ;;  %v277_v30 = vadd.f32 %v473_v62, %v254_v26  ;;  %v252_v32 = vld [vmem:[#allocation2 + $0x48] sm:$0xff]  ;;  %239 = vst.msk [vmem:[#allocation2 + $0x78] sm:$0xff] %vm19_vm0, %v222_v20  ;;  %v267_v33 = vadd.f32 %v473_v62, %v244_v31 }
  0xf2   :  { %282 = vst.msk [vmem:[%s566_s3] sm:$0xff] %vm19_vm0, %v266_v23  ;;  %290 = vst.msk [vmem:[%s566_s3 + $0x40] sm:$0xff] %vm19_vm0, %v274_v24  ;;  %v275_v34 = vadd.f32 %v473_v62, %v252_v32 }
  0xf3   :  { %229 = vst.msk [vmem:[#allocation2 + $0x28] sm:$0xff] %vm19_vm0, %v212_v27  ;;  %237 = vst.msk [vmem:[#allocation2 + $0x68] sm:$0xff] %vm19_vm0, %v220_v28 }
  0xf4   :  { %285 = vst.msk [vmem:[%s566_s3 + $0x18] sm:$0xff] %vm19_vm0, %v269_v29  ;;  %293 = vst.msk [vmem:[%s566_s3 + $0x58] sm:$0xff] %vm19_vm0, %v277_v30 }
  0xf5   :  { %283 = vst.msk [vmem:[%s566_s3 + $0x8] sm:$0xff] %vm19_vm0, %v267_v33  ;;  %291 = vst.msk [vmem:[%s566_s3 + $0x48] sm:$0xff] %vm19_vm0, %v275_v34  ;;  %v249_v35 = vld [vmem:[#allocation2 + $0x30] sm:$0xff] }
  0xf6   :  { %v257_v36 = vld [vmem:[#allocation2 + $0x70] sm:$0xff]  ;;  %v272_v37 = vadd.f32 %v473_v62, %v249_v35  ;;  %v247_v39 = vld [vmem:[#allocation2 + $0x20] sm:$0xff] }
  0xf7   :  { %v280_v38 = vadd.f32 %v473_v62, %v257_v36  ;;  %v255_v40 = vld [vmem:[#allocation2 + $0x60] sm:$0xff]  ;;  %v270_v41 = vadd.f32 %v473_v62, %v247_v39  ;;  %v250_v43 = vld [vmem:[#allocation2 + $0x38] sm:$0xff] }
  0xf8   :  { %v278_v42 = vadd.f32 %v473_v62, %v255_v40  ;;  %v258_v44 = vld [vmem:[#allocation2 + $0x78] sm:$0xff]  ;;  %288 = vst.msk [vmem:[%s566_s3 + $0x30] sm:$0xff] %vm19_vm0, %v272_v37  ;;  %v273_v45 = vadd.f32 %v473_v62, %v250_v43 }
  0xf9   :  { %296 = vst.msk [vmem:[%s566_s3 + $0x70] sm:$0xff] %vm19_vm0, %v280_v38  ;;  %v281_v46 = vadd.f32 %v473_v62, %v258_v44  ;;  %286 = vst.msk [vmem:[%s566_s3 + $0x20] sm:$0xff] %vm19_vm0, %v270_v41 }
  0xfa   :  { %v248_v47 = vld [vmem:[#allocation2 + $0x28] sm:$0xff]  ;;  %294 = vst.msk [vmem:[%s566_s3 + $0x60] sm:$0xff] %vm19_vm0, %v278_v42  ;;  %289 = vst.msk [vmem:[%s566_s3 + $0x38] sm:$0xff] %vm19_vm0, %v273_v45 }
  0xfb   :  { %v256_v48 = vld [vmem:[#allocation2 + $0x68] sm:$0xff]  ;;  %v271_v49 = vadd.f32 %v473_v62, %v248_v47  ;;  %297 = vst.msk [vmem:[%s566_s3 + $0x78] sm:$0xff] %vm19_vm0, %v281_v46 }
  0xfc   :  { %v279_v50 = vadd.f32 %v473_v62, %v256_v48 }
  0xfd   :  { %287 = vst.msk [vmem:[%s566_s3 + $0x28] sm:$0xff] %vm19_vm0, %v271_v49 }
  0xfe   :  { %295 = vst.msk [vmem:[%s566_s3 + $0x68] sm:$0xff] %vm19_vm0, %v279_v50 }

// kernel: dda_forward.23
= control target key start
LH: loop header
LB: loop body
LE: loop exit
PB: predicated region body
PF: predicated region fallthrough
CT: control target
= control target key end

     0   :  { %vm123_vm0 = vcmask 1043456   ;;  %vm98_vm1 = vcmask 64512   ;;  %vm23_vm2 = vcmask 130048   ;;  %v431_v15 = vmov 0.0   ;;  %s651_s0 = inlined_call_operand.vmem [shape: f32[128,8], index: 0, kind: input, shape index: {}]   ;;  %s652_s1 = inlined_call_operand.vmem [shape: f32[8,16], index: 1, kind: input, shape index: {}]   ;;  %s653_s2 = inlined_call_operand.vmem [shape: f32[1,16], index: 2, kind: input, shape index: {}]   ;;  %s654_s3 = inlined_call_operand.vmem [shape: f32[128,16], index: 3, kind: input, shape index: {}]   ;;  %s655_s4 = inlined_call_operand.hbm [shape: f32[128,16], index: 4, kind: output, shape index: {}]  }
   0x1   :  { %v96_v0 = vld [vmem:[%s652_s1] sm:$0xff]  ;;  %v41_v2 = vld [vmem:[%s651_s0 + $0x8] sm:$0xff]  ;;  %v42_v8 = vld [vmem:[%s651_s0 + $0x10] sm:$0xff]  ;;  %26 = vst.msk [vmem:[#allocation2 + $0x10] sm:$0xff] %vm23_vm2, %v431_v15 }
   0x2   :  { %v40_v1 = vld [vmem:[%s651_s0] sm:$0xff]  ;;  %v97_v3 = vpack.c.bf16 %v96_v0, %v96_v0  ;;  %v57_v5 = vmax.f32 %v41_v2, 0.0  ;;  %v49_v7 = vld [vmem:[%s651_s0 + $0x48] sm:$0xff]  ;;  %v43_v11 = vld [vmem:[%s651_s0 + $0x18] sm:$0xff]  ;;  %v58_v12 = vmax.f32 %v42_v8, 0.0  ;;  %24 = vst.msk [vmem:[#allocation2] sm:$0xff] %vm23_vm2, %v431_v15 }
   0x3   :  { %v56_v4 = vmax.f32 %v40_v1, 0.0  ;;  %v48_v6 = vld [vmem:[%s651_s0 + $0x40] sm:$0xff]  ;;  %v65_v10 = vmax.f32 %v49_v7, 0.0  ;;  %v50_v13 = vld [vmem:[%s651_s0 + $0x50] sm:$0xff]  ;;  %v51_v14 = vld [vmem:[%s651_s0 + $0x58] sm:$0xff]  ;;  %25 = vst.msk [vmem:[#allocation2 + $0x8] sm:$0xff] %vm23_vm2, %v431_v15 }
   0x4   :  { %v64_v9 = vmax.f32 %v48_v6, 0.0  ;;  %27 = vst.msk [vmem:[#allocation2 + $0x18] sm:$0xff] %vm23_vm2, %v431_v15  ;;  %28 = vst.msk [vmem:[#allocation2 + $0x20] sm:$0xff] %vm23_vm2, %v431_v15  ;;  %401 = vmatprep.subr.msk.bf16.mxu0 %vm123_vm0, %v97_v3  ;;  %402 = vmatprep.subr.msk.bf16.mxu1 %vm123_vm0, %v97_v3  ;;  %v125_v16 = vsel %vm123_vm0, %v97_v3, 0  ;;  %v59_v18 = vmax.f32 %v43_v11, 0.0  ;;  %v66_v19 = vmax.f32 %v50_v13, 0.0 }
   0x5   :  { %29 = vst.msk [vmem:[#allocation2 + $0x28] sm:$0xff] %vm23_vm2, %v431_v15  ;;  %30 = vst.msk [vmem:[#allocation2 + $0x30] sm:$0xff] %vm23_vm2, %v431_v15  ;;  %v88_v17 = vpack.c.bf16 %v57_v5, %v56_v4  ;;  %v44_v20 = vld [vmem:[%s651_s0 + $0x20] sm:$0xff]  ;;  %v45_v21 = vld [vmem:[%s651_s0 + $0x28] sm:$0xff]  ;;  %382 = vmatpush3.bf16.msra.mxu0 %v125_v16  ;;  %400 = vmatpush3.bf16.msra.mxu1 %v125_v16  ;;  %v67_v24 = vmax.f32 %v51_v14, 0.0 }
   0x6   :  { %31 = vst.msk [vmem:[#allocation2 + $0x38] sm:$0xff] %vm23_vm2, %v431_v15  ;;  %32 = vst.msk [vmem:[#allocation2 + $0x40] sm:$0xff] %vm23_vm2, %v431_v15  ;;  %v52_v22 = vld [vmem:[%s651_s0 + $0x60] sm:$0xff]  ;;  %v92_v23 = vpack.c.bf16 %v65_v10, %v64_v9  ;;  %v60_v25 = vmax.f32 %v44_v20, 0.0  ;;  %v61_v26 = vmax.f32 %v45_v21, 0.0  ;;  %v53_v27 = vld [vmem:[%s651_s0 + $0x68] sm:$0xff]  ;;  %v89_v30 = vpack.c.bf16 %v59_v18, %v58_v12 }
   0x7   :  { %33 = vst.msk [vmem:[#allocation2 + $0x48] sm:$0xff] %vm23_vm2, %v431_v15  ;;  %34 = vst.msk [vmem:[#allocation2 + $0x50] sm:$0xff] %vm23_vm2, %v431_v15  ;;  %v46_v28 = vld [vmem:[%s651_s0 + $0x30] sm:$0xff]  ;;  %v47_v29 = vld [vmem:[%s651_s0 + $0x38] sm:$0xff]  ;;  %383 = vmatprep.mubr.msk.bf16.mxu0 %vm98_vm1, %v88_v17  ;;  %v68_v31 = vmax.f32 %v52_v22, 0.0  ;;  %v69_v32 = vmax.f32 %v53_v27, 0.0  ;;  %v93_v35 = vpack.c.bf16 %v67_v24, %v66_v19 }
   0x8   :  { %35 = vst.msk [vmem:[#allocation2 + $0x58] sm:$0xff] %vm23_vm2, %v431_v15  ;;  %36 = vst.msk [vmem:[#allocation2 + $0x60] sm:$0xff] %vm23_vm2, %v431_v15  ;;  %v54_v33 = vld [vmem:[%s651_s0 + $0x70] sm:$0xff]  ;;  %v55_v34 = vld [vmem:[%s651_s0 + $0x78] sm:$0xff]  ;;  %391 = vmatprep.mubr.msk.bf16.mxu1 %vm98_vm1, %v92_v23  ;;  %v90_v36 = vpack.c.bf16 %v61_v26, %v60_v25 }
   0x9   :  { %37 = vst.msk [vmem:[#allocation2 + $0x68] sm:$0xff] %vm23_vm2, %v431_v15  ;;  %38 = vst.msk [vmem:[#allocation2 + $0x70] sm:$0xff] %vm23_vm2, %v431_v15 }
   0xa   :  { %39 = vst.msk [vmem:[#allocation2 + $0x78] sm:$0xff] %vm23_vm2, %v431_v15 }
   0xb   :  { %9 = vsyncpa [#allocation4], 0  ;;  %384 = vmatmul.mubr.msk.bf16.vlgmr.msra.gmra.mrb[0].mxu0 %vm98_vm1, %v89_v30  ;;  %v94_v37 = vpack.c.bf16 %v69_v32, %v68_v31  ;;  %v62_v38 = vmax.f32 %v46_v28, 0.0  ;;  %v63_v39 = vmax.f32 %v47_v29, 0.0  ;;  %392 = vmatmul.mubr.msk.bf16.vlgmr.msra.gmra.mrb[0].mxu1 %vm98_vm1, %v93_v35  ;;  %v70_v40 = vmax.f32 %v54_v33, 0.0  ;;  %v74_v44 = vld [vmem:[#allocation2 + $0x10] sm:$0xff] }
   0xc   :  { %387 = vmatprep.mubr.msk.bf16.mxu0 %vm98_vm1, %v90_v36  ;;  %v71_v41 = vmax.f32 %v55_v34, 0.0  ;;  %v72_v46 = vld [vmem:[#allocation2] sm:$0xff]  ;;  %v75_v49 = vld [vmem:[#allocation2 + $0x18] sm:$0xff]  ;;  %v73_v54 = vld [vmem:[#allocation2 + $0x8] sm:$0xff]  ;;  %s432_s1 = smov [#allocation3]  }
   0xd   :  { %395 = vmatprep.mubr.msk.bf16.mxu1 %vm98_vm1, %v94_v37  ;;  %v91_v42 = vpack.c.bf16 %v63_v39, %v62_v38  ;;  %v80_v48 = vld [vmem:[#allocation2 + $0x40] sm:$0xff]  ;;  %v78_v4 = vld [vmem:[#allocation2 + $0x30] sm:$0xff]  ;;  %v79_v11 = vld [vmem:[#allocation2 + $0x38] sm:$0xff]  ;;  %s352_s24 = sshll.u32 %s432_s1, 4  ;;  %s353_s24 = int_to_ptr.vmem [resolvable:$true] %s352_s24 }
   0xe   :  { %v95_v43 = vpack.c.bf16 %v71_v41, %v70_v40  ;;  %v82_v45 = vld [vmem:[#allocation2 + $0x50] sm:$0xff]  ;;  %v81_v59 = vld [vmem:[#allocation2 + $0x48] sm:$0xff]  ;;  %v548_v6 = vld [vmem:[%s653_s2] ss:$0 sm:$0xff]  ;;  %p412_p1 = scmp.lt.s32.totalorder %s353_s24, %s353_s24 }
   0xf   :  { %v83_v53 = vld [vmem:[#allocation2 + $0x58] sm:$0xff]  ;;  %v76_v7 = vld [vmem:[#allocation2 + $0x20] sm:$0xff]  ;;  %v301_v9 = vld [vmem:[%s654_s3 + $0x10] sm:$0xff] }
  0x10   :  { %v86_v5 = vld [vmem:[#allocation2 + $0x70] sm:$0xff]  ;;  %v84_v8 = vld [vmem:[#allocation2 + $0x60] sm:$0xff]  ;;  %v77_v17 = vld [vmem:[#allocation2 + $0x28] sm:$0xff] }
  0x11   :  { %v87_v12 = vld [vmem:[#allocation2 + $0x78] sm:$0xff]  ;;  %v309_v13 = vld [vmem:[%s654_s3 + $0x50] sm:$0xff]  ;;  %v85_v18 = vld [vmem:[#allocation2 + $0x68] sm:$0xff] }
  0x12   :  { %v299_v20 = vld [vmem:[%s654_s3] sm:$0xff]  ;;  %v302_v29 = vld [vmem:[%s654_s3 + $0x18] sm:$0xff] }
  0x13   :  { %388 = vmatmul.mubr.msk.bf16.gmra.mrb[4].mxu0 %vm98_vm1, %v91_v42  ;;  %396 = vmatmul.mubr.msk.bf16.gmra.mrb[4].mxu1 %vm98_vm1, %v95_v43  ;;  %v307_v21 = vld [vmem:[%s654_s3 + $0x40] sm:$0xff]  ;;  %v310_v38 = vld [vmem:[%s654_s3 + $0x58] sm:$0xff] }
  0xde   :  { %v385_v47 = vpop.f32.mrb[0].mxu0  ;;  %v393_v51 = vpop.f32.mrb[0].mxu1 }
  0xdf   :  { %v226_v50 = vadd.f32 %v385_v47, %v74_v44  ;;  %v161_v52 = vpop.f32.mrb[1].mxu0  ;;  %v234_v55 = vadd.f32 %v393_v51, %v82_v45  ;;  %v193_v57 = vpop.f32.mrb[1].mxu1  ;;  %v300_v47 = vld [vmem:[%s654_s3 + $0x8] sm:$0xff] }
  0xe0   :  { %v224_v56 = vadd.f32 %v161_v52, %v72_v46  ;;  %v386_v58 = vpop.f32.mrb[2].mxu0  ;;  %v232_v60 = vadd.f32 %v193_v57, %v80_v48  ;;  %v394_v62 = vpop.f32.mrb[2].mxu1 }
  0xe1   :  { %243 = vst.msk [vmem:[#allocation2 + $0x10] sm:$0xff] %vm23_vm2, %v226_v50  ;;  %v227_v61 = vadd.f32 %v386_v58, %v75_v49  ;;  %v164_v63 = vpop.f32.mrb[3].mxu0  ;;  %251 = vst.msk [vmem:[#allocation2 + $0x50] sm:$0xff] %vm23_vm2, %v234_v55  ;;  %v235_v0 = vadd.f32 %v394_v62, %v83_v53  ;;  %v196_v2 = vpop.f32.mrb[3].mxu1  ;;  %v313_v62 = vld [vmem:[%s654_s3 + $0x70] sm:$0xff] }
  0xe2   :  { %241 = vst.msk [vmem:[#allocation2] sm:$0xff] %vm23_vm2, %v224_v56  ;;  %v225_v1 = vadd.f32 %v164_v63, %v73_v54  ;;  %249 = vst.msk [vmem:[#allocation2 + $0x40] sm:$0xff] %vm23_vm2, %v232_v60  ;;  %v233_v3 = vadd.f32 %v196_v2, %v81_v59  ;;  %v308_v54 = vld [vmem:[%s654_s3 + $0x48] sm:$0xff] }
  0xe3   :  { %244 = vst.msk [vmem:[#allocation2 + $0x18] sm:$0xff] %vm23_vm2, %v227_v61  ;;  %252 = vst.msk [vmem:[#allocation2 + $0x58] sm:$0xff] %vm23_vm2, %v235_v0  ;;  %v305_v61 = vld [vmem:[%s654_s3 + $0x30] sm:$0xff]  ;;  %v303_v0 = vld [vmem:[%s654_s3 + $0x20] sm:$0xff] }
  0xe4   :  { %242 = vst.msk [vmem:[#allocation2 + $0x8] sm:$0xff] %vm23_vm2, %v225_v1  ;;  %250 = vst.msk [vmem:[#allocation2 + $0x48] sm:$0xff] %vm23_vm2, %v233_v3  ;;  %v311_v1 = vld [vmem:[%s654_s3 + $0x60] sm:$0xff] }
  0xe6   :  { %v389_v10 = vpop.f32.mrb[4].mxu0  ;;  %v397_v15 = vpop.f32.mrb[4].mxu1 }
  0xe7   :  { %v230_v14 = vadd.f32 %v389_v10, %v78_v4  ;;  %v177_v16 = vpop.f32.mrb[5].mxu0  ;;  %v238_v22 = vadd.f32 %v397_v15, %v86_v5  ;;  %v209_v24 = vpop.f32.mrb[5].mxu1  ;;  %v306_v5 = vld [vmem:[%s654_s3 + $0x38] sm:$0xff] }
  0xe8   :  { %v262_v19 = vld [vmem:[#allocation2 + $0x10] sm:$0xff]  ;;  %v228_v23 = vadd.f32 %v177_v16, %v76_v7  ;;  %v390_v25 = vpop.f32.mrb[6].mxu0  ;;  %v236_v30 = vadd.f32 %v209_v24, %v84_v8  ;;  %v398_v32 = vpop.f32.mrb[6].mxu1 }
  0xe9   :  { %v285_v26 = vadd.f32 %v548_v6, %v262_v19  ;;  %v270_v27 = vld [vmem:[#allocation2 + $0x50] sm:$0xff]  ;;  %v260_v28 = vld [vmem:[#allocation2] sm:$0xff]  ;;  %247 = vst.msk [vmem:[#allocation2 + $0x30] sm:$0xff] %vm23_vm2, %v230_v14  ;;  %v231_v31 = vadd.f32 %v390_v25, %v79_v11  ;;  %v180_v33 = vpop.f32.mrb[7].mxu0  ;;  %255 = vst.msk [vmem:[#allocation2 + $0x70] sm:$0xff] %vm23_vm2, %v238_v22  ;;  %v239_v39 = vadd.f32 %v398_v32, %v87_v12  ;;  %v212_v41 = vpop.f32.mrb[7].mxu1 }
  0xea   :  { %v293_v34 = vadd.f32 %v548_v6, %v270_v27  ;;  %v283_v35 = vadd.f32 %v548_v6, %v260_v28  ;;  %v268_v36 = vld [vmem:[#allocation2 + $0x40] sm:$0xff]  ;;  %v263_v37 = vld [vmem:[#allocation2 + $0x18] sm:$0xff]  ;;  %245 = vst.msk [vmem:[#allocation2 + $0x20] sm:$0xff] %vm23_vm2, %v228_v23  ;;  %v229_v40 = vadd.f32 %v180_v33, %v77_v17  ;;  %253 = vst.msk [vmem:[#allocation2 + $0x60] sm:$0xff] %vm23_vm2, %v236_v30 }
  0xeb   :  { %v317_v42 = vadd.f32 %v301_v9, %v285_v26  ;;  %v291_v43 = vadd.f32 %v548_v6, %v268_v36  ;;  %v286_v44 = vadd.f32 %v548_v6, %v263_v37  ;;  %v271_v45 = vld [vmem:[#allocation2 + $0x58] sm:$0xff]  ;;  %v261_v46 = vld [vmem:[#allocation2 + $0x8] sm:$0xff]  ;;  %248 = vst.msk [vmem:[#allocation2 + $0x38] sm:$0xff] %vm23_vm2, %v231_v31  ;;  %v237_v48 = vadd.f32 %v212_v41, %v85_v18 }
  0xec   :  { %v325_v49 = vadd.f32 %v309_v13, %v293_v34  ;;  %v315_v50 = vadd.f32 %v299_v20, %v283_v35  ;;  %v294_v51 = vadd.f32 %v548_v6, %v271_v45  ;;  %v284_v52 = vadd.f32 %v548_v6, %v261_v46  ;;  %v269_v53 = vld [vmem:[#allocation2 + $0x48] sm:$0xff]  ;;  %256 = vst.msk [vmem:[#allocation2 + $0x78] sm:$0xff] %vm23_vm2, %v239_v39  ;;  %v314_v11 = vld [vmem:[%s654_s3 + $0x78] sm:$0xff] }
  0xed   :  { %246 = vst.msk [vmem:[#allocation2 + $0x28] sm:$0xff] %vm23_vm2, %v229_v40  ;;  %333 = vst.msk [vmem:[#allocation3 + $0x10] sm:$0xff] %vm23_vm2, %v317_v42  ;;  %v323_v55 = vadd.f32 %v307_v21, %v291_v43  ;;  %v318_v56 = vadd.f32 %v302_v29, %v286_v44  ;;  %v292_v57 = vadd.f32 %v548_v6, %v269_v53  ;;  %v304_v17 = vld [vmem:[%s654_s3 + $0x28] sm:$0xff] }
  0xee   :  { %254 = vst.msk [vmem:[#allocation2 + $0x68] sm:$0xff] %vm23_vm2, %v237_v48  ;;  %341 = vst.msk [vmem:[#allocation3 + $0x50] sm:$0xff] %vm23_vm2, %v325_v49  ;;  %v326_v58 = vadd.f32 %v310_v38, %v294_v51  ;;  %v316_v59 = vadd.f32 %v300_v47, %v284_v52  ;;  %v312_v23 = vld [vmem:[%s654_s3 + $0x68] sm:$0xff]  ;;  %s407_s3 = scalar_lea.vmem %s353_s24, 2048 }
  0xef   :  { %331 = vst.msk [vmem:[#allocation3] sm:$0xff] %vm23_vm2, %v315_v50  ;;  %339 = vst.msk [vmem:[#allocation3 + $0x40] sm:$0xff] %vm23_vm2, %v323_v55  ;;  %v324_v60 = vadd.f32 %v308_v54, %v292_v57  ;;  %p408_p0 = scmp.ne.s32.totalorder %s353_s24, %s407_s3  ;;  %p413_p2 = scmp.lt.s32.totalorder %s407_s3, %s407_s3 }
  0xf0   :  { %334 = vst.msk [vmem:[#allocation3 + $0x18] sm:$0xff] %vm23_vm2, %v318_v56  ;;  %342 = vst.msk [vmem:[#allocation3 + $0x58] sm:$0xff] %vm23_vm2, %v326_v58  ;;  %v266_v63 = vld [vmem:[#allocation2 + $0x30] sm:$0xff] }
  0xf1   :  { %332 = vst.msk [vmem:[#allocation3 + $0x8] sm:$0xff] %vm23_vm2, %v316_v59  ;;  %340 = vst.msk [vmem:[#allocation3 + $0x48] sm:$0xff] %vm23_vm2, %v324_v60  ;;  %v289_v2 = vadd.f32 %v548_v6, %v266_v63  ;;  %v274_v3 = vld [vmem:[#allocation2 + $0x70] sm:$0xff]  ;;  %v264_v4 = vld [vmem:[#allocation2 + $0x20] sm:$0xff]  ;;  %p414_p3 = por %p413_p2, %p412_p1 }
  0xf2   :  { %v297_v7 = vadd.f32 %v548_v6, %v274_v3  ;;  %v287_v8 = vadd.f32 %v548_v6, %v264_v4  ;;  %v272_v9 = vld [vmem:[#allocation2 + $0x60] sm:$0xff]  ;;  %v267_v10 = vld [vmem:[#allocation2 + $0x38] sm:$0xff] }
  0xf3   :  { %v321_v12 = vadd.f32 %v305_v61, %v289_v2  ;;  %v295_v13 = vadd.f32 %v548_v6, %v272_v9  ;;  %v290_v14 = vadd.f32 %v548_v6, %v267_v10  ;;  %v275_v15 = vld [vmem:[#allocation2 + $0x78] sm:$0xff]  ;;  %p415_p4 = pnand %p414_p3, %p408_p0 }
  0xf4   :  { %v265_v16 = vld [vmem:[#allocation2 + $0x28] sm:$0xff]  ;;  %v329_v18 = vadd.f32 %v313_v62, %v297_v7  ;;  %v319_v19 = vadd.f32 %v303_v0, %v287_v8  ;;  %v298_v20 = vadd.f32 %v548_v6, %v275_v15 }
  0xf5   :  { %v288_v21 = vadd.f32 %v548_v6, %v265_v16  ;;  %v273_v22 = vld [vmem:[#allocation2 + $0x68] sm:$0xff]  ;;  %337 = vst.msk [vmem:[#allocation3 + $0x30] sm:$0xff] %vm23_vm2, %v321_v12  ;;  %v327_v24 = vadd.f32 %v311_v1, %v295_v13  ;;  %v322_v25 = vadd.f32 %v306_v5, %v290_v14 }
  0xf6   :  { %v296_v26 = vadd.f32 %v548_v6, %v273_v22  ;;  %345 = vst.msk [vmem:[#allocation3 + $0x70] sm:$0xff] %vm23_vm2, %v329_v18  ;;  %335 = vst.msk [vmem:[#allocation3 + $0x20] sm:$0xff] %vm23_vm2, %v319_v19  ;;  %v330_v27 = vadd.f32 %v314_v11, %v298_v20 }
  0xf7   :  { %v320_v28 = vadd.f32 %v304_v17, %v288_v21  ;;  %343 = vst.msk [vmem:[#allocation3 + $0x60] sm:$0xff] %vm23_vm2, %v327_v24  ;;  %338 = vst.msk [vmem:[#allocation3 + $0x38] sm:$0xff] %vm23_vm2, %v322_v25 }
  0xf8   :  { %v328_v29 = vadd.f32 %v312_v23, %v296_v26  ;;  %346 = vst.msk [vmem:[#allocation3 + $0x78] sm:$0xff] %vm23_vm2, %v330_v27 }
  0xf9   :  { %336 = vst.msk [vmem:[#allocation3 + $0x28] sm:$0xff] %vm23_vm2, %v320_v28 }
  0xfa   :  { %344 = vst.msk [vmem:[#allocation3 + $0x68] sm:$0xff] %vm23_vm2, %v328_v29 }
  0xfb   :  { %418 = shalt.err (!%p415_p4)
}
  0xfc   :  { %s419_s28 = scalar_lea.hbm %s655_s4, 2048 }
  0xfd   :  { %p420_p5 = scmp.ne.s32.totalorder %s655_s4, %s419_s28  ;;  %p423_p6 = scmp.lt.u32.totalorder %s419_s28, %s655_s4 }
  0xff   :  { %p425_p7 = pnand %p423_p6, %p420_p5 }
 0x101   :  { %428 = shalt.err (!%p425_p7)
}
 0x102   :  { %s433_s7 = smov 128   ;;  %s434_s8 = smov 8  }
 0x103   :  { %358 = dma.vmem_to_hbm [thread:$0]  %s353_s24, 2048, %s655_s4, [#allocation4], %s433_s7, %s433_s7, %s434_s8  }
 0x104   :  { %429 = dma.done.wait [#allocation4], 2048  }
 0x105   :  { %430 = vsyncadd [#allocation4], 4294965248 }
 0x106   :  { %362 = vsyncpa [#allocation4], 1 }

</bundles_post_ra>
